<compile_context>
chip_gen: v6e
topology: v6e:2x2x1
jax: 0.10.0
libtpu: 0.0.40
codegen_flags: <defaults>
</compile_context>

<pallas_src>
import jax
import jax.numpy as jnp
from jax.experimental import pallas as pl
from jax.experimental.pallas import tpu as pltpu


# ------------------------------ fused kernel --------------------------------

def _fused_kernel(x_ref,
                  enc_wih_ref, enc_whh_ref, enc_b_ref,
                  dec_whh_ref, prd_whh_ref,
                  zproj_w_ref, zproj_b_ref,
                  fcr_w_ref, fcr_b_ref, fcp_w_ref, fcp_b_ref,
                  rec_ref, pred_ref,
                  enc_proj_ref):
    T, Bp, Ip = x_ref.shape
    Hp = enc_whh_ref.shape[0]

    def cell(gates_pre, h_prev, c_prev, whh_ref):
        # gates_pre already contains x_t @ W_ih + (b_ih + b_hh); only the
        # h_prev @ W_hh matmul sits on the serial chain.  bf16 operands feed
        # the MXU natively; accumulation and gate math stay f32.
        gates = gates_pre + jnp.dot(h_prev.astype(jnp.bfloat16), whh_ref[...],
                                    preferred_element_type=jnp.float32)
        # gate layout is [i | f | o | g], each 128-lane aligned:
        # one sigmoid over the contiguous i/f/o slab, one tanh over g.
        sg = jax.nn.sigmoid(gates[:, :3 * Hp])
        g_g = jnp.tanh(gates[:, 3 * Hp:])
        i_g = sg[:, 0 * Hp:1 * Hp]
        f_g = sg[:, 1 * Hp:2 * Hp]
        o_g = sg[:, 2 * Hp:3 * Hp]
        c_new = f_g * c_prev + i_g * g_g
        h_new = o_g * jnp.tanh(c_new)
        return h_new, c_new

    # ---- encoder: input projection hoisted out of the recurrence -----------
    # Stage the (T*Bp, 4*Hp) projection in VMEM scratch and re-read one
    # timestep at a time (keeps only ~4 vregs of it live in the loop).
    x2d = x_ref[...].reshape(T * Bp, Ip).astype(jnp.bfloat16)
    enc_proj_ref[...] = (jnp.dot(x2d, enc_wih_ref[...],
                                 preferred_element_type=jnp.float32)
                         + enc_b_ref[...])

    zeros = jnp.zeros((Bp, Hp), jnp.float32)
    h_e, c_e = zeros, zeros
    for t in range(T):                       # static T -> fully unrolled
        gates_pre = enc_proj_ref[t * Bp:(t + 1) * Bp, :]
        h_e, c_e = cell(gates_pre, h_e, c_e, enc_whh_ref)

    z = h_e                                  # == h_n[-1]; stays vreg resident

    # ---- decoder + predictor: constant input z => one fused projection -----
    zproj = (jnp.dot(z.astype(jnp.bfloat16), zproj_w_ref[...],
                     preferred_element_type=jnp.float32)
             + zproj_b_ref[...])             # (Bp, 8*Hp)
    zproj_d = zproj[:, :4 * Hp]
    zproj_p = zproj[:, 4 * Hp:]

    h_d, c_d = zeros, zeros
    h_p, c_p = zeros, zeros
    for t in range(T):                       # two independent chains interleave
        h_d, c_d = cell(zproj_d, h_d, c_d, dec_whh_ref)
        h_p, c_p = cell(zproj_p, h_p, c_p, prd_whh_ref)
        # per-step fc + lane-dense store: hides the fc matmul inside the
        # serial-chain MXU bubbles and avoids holding T hidden states live.
        rec_ref[t * Bp:(t + 1) * Bp, :] = (
            jnp.dot(h_d.astype(jnp.bfloat16), fcr_w_ref[...],
                    preferred_element_type=jnp.float32) + fcr_b_ref[...])
        pred_ref[t * Bp:(t + 1) * Bp, :] = (
            jnp.dot(h_p.astype(jnp.bfloat16), fcp_w_ref[...],
                    preferred_element_type=jnp.float32) + fcp_b_ref[...])


# ----------------------- parameters (torch-like init) -----------------------

_LANE = 128
_SUBLANE = 8
# PyTorch LSTM gate order is [i, f, g, o]; kernel uses [i, f, o, g] so that a
# single sigmoid covers the first 3 gate slots and a single tanh the last one.
_GATE_ORDER = (0, 1, 3, 2)


def _round_up(n, m):
    return ((n + m - 1) // m) * m


def _torch_lstm_init(key, input_size, hidden_size):
    # matches torch.nn.LSTM default init: U(-1/sqrt(H), 1/sqrt(H))
    k = 1.0 / float(hidden_size) ** 0.5
    ks = jax.random.split(key, 4)
    w_ih = jax.random.uniform(ks[0], (4 * hidden_size, input_size), jnp.float32, -k, k)
    w_hh = jax.random.uniform(ks[1], (4 * hidden_size, hidden_size), jnp.float32, -k, k)
    b_ih = jax.random.uniform(ks[2], (4 * hidden_size,), jnp.float32, -k, k)
    b_hh = jax.random.uniform(ks[3], (4 * hidden_size,), jnp.float32, -k, k)
    return w_ih, w_hh, b_ih, b_hh


def _torch_linear_init(key, in_features, out_features):
    k = 1.0 / float(in_features) ** 0.5
    k1, k2 = jax.random.split(key)
    w = jax.random.uniform(k1, (out_features, in_features), jnp.float32, -k, k)
    b = jax.random.uniform(k2, (out_features,), jnp.float32, -k, k)
    return w, b


def _pack_lstm(w_ih, w_hh, b_ih, b_hh, in_pad, hid_pad):
    """PyTorch-layout LSTM weights -> lane-padded kernel layout.

    Returns:
      wih_p: (in_pad, 4*hid_pad) bf16, gate slots ordered [i, f, o, g]
      whh_p: (hid_pad, 4*hid_pad) bf16
      b_p:   (1, 4*hid_pad) f32 = b_ih + b_hh (zero in padded lanes)
    Zero padding keeps padded hidden lanes at exactly 0 through the recurrence.
    """
    four_h, in_sz = w_ih.shape
    hid = four_h // 4
    gp = 4 * hid_pad
    wih_p = jnp.zeros((in_pad, gp), jnp.float32)
    whh_p = jnp.zeros((hid_pad, gp), jnp.float32)
    b_p = jnp.zeros((1, gp), jnp.float32)
    b = b_ih + b_hh
    for slot, g in enumerate(_GATE_ORDER):
        wih_p = wih_p.at[:in_sz, slot * hid_pad:slot * hid_pad + hid].set(
            w_ih[g * hid:(g + 1) * hid, :].T)
        whh_p = whh_p.at[:hid, slot * hid_pad:slot * hid_pad + hid].set(
            w_hh[g * hid:(g + 1) * hid, :].T)
        b_p = b_p.at[0, slot * hid_pad:slot * hid_pad + hid].set(
            b[g * hid:(g + 1) * hid])
    return wih_p.astype(jnp.bfloat16), whh_p.astype(jnp.bfloat16), b_p


def _pack_linear(w, b, in_pad, out_pad):
    out_f, in_f = w.shape
    w_p = jnp.zeros((in_pad, out_pad), jnp.float32).at[:in_f, :out_f].set(w.T)
    b_p = jnp.zeros((1, out_pad), jnp.float32).at[0, :out_f].set(b)
    return w_p.astype(jnp.bfloat16), b_p


def init_model(key, input_size, hidden_size, output_size):
    ip = _round_up(input_size, _LANE)
    hp = _round_up(hidden_size, _LANE)
    op = _round_up(output_size, _LANE)
    keys = jax.random.split(key, 5)

    enc_wih, enc_whh, enc_b = _pack_lstm(
        *_torch_lstm_init(keys[0], input_size, hidden_size), ip, hp)
    dec_wih, dec_whh, dec_b = _pack_lstm(
        *_torch_lstm_init(keys[1], hidden_size, hidden_size), hp, hp)
    fcr_w, fcr_b = _pack_linear(
        *_torch_linear_init(keys[2], hidden_size, output_size), hp, op)
    prd_wih, prd_whh, prd_b = _pack_lstm(
        *_torch_lstm_init(keys[3], hidden_size, hidden_size), hp, hp)
    fcp_w, fcp_b = _pack_linear(
        *_torch_linear_init(keys[4], hidden_size, output_size), hp, op)

    # Fuse the two latent (constant-input) projections into one matmul:
    # z @ [dec_wih | prd_wih] -> slice decoder/predictor halves in-kernel.
    zproj_w = jnp.concatenate([dec_wih, prd_wih], axis=1)   # (hp, 8*hp) bf16
    zproj_b = jnp.concatenate([dec_b, prd_b], axis=1)       # (1, 8*hp) f32

    return {
        "enc_wih": enc_wih, "enc_whh": enc_whh, "enc_b": enc_b,
        "dec_whh": dec_whh, "prd_whh": prd_whh,
        "zproj_w": zproj_w, "zproj_b": zproj_b,
        "fcr_w": fcr_w, "fcr_b": fcr_b,
        "fcp_w": fcp_w, "fcp_b": fcp_b,
    }


# ------------------------------- forward pass --------------------------------

def lstmae_predictor_forward(params, x, output_size):
    """x: (B, T, input_size) -> (reconstructed (B,T,O), prediction (B,T,O))."""
    B, T, in_sz = x.shape
    Bp = _round_up(B, _SUBLANE)
    Ip = params["enc_wih"].shape[0]
    Hp = params["enc_whh"].shape[0]
    Op = params["fcr_w"].shape[1]

    # batch-first -> time-major; zero-pad batch to 8 sublanes, input to 128 lanes
    x_tm = jnp.transpose(x, (1, 0, 2))                               # (T, B, I)
    x_pad = jnp.zeros((T, Bp, Ip), jnp.float32).at[:, :B, :in_sz].set(x_tm)

    rec_p, pred_p = pl.pallas_call(
        _fused_kernel,
        out_shape=(jax.ShapeDtypeStruct((T * Bp, Op), jnp.float32),
                   jax.ShapeDtypeStruct((T * Bp, Op), jnp.float32)),
        scratch_shapes=[pltpu.VMEM((T * Bp, 4 * Hp), jnp.float32)],
        compiler_params=pltpu.CompilerParams(
            vmem_limit_bytes=32 * 1024 * 1024),
    )(x_pad,
      params["enc_wih"], params["enc_whh"], params["enc_b"],
      params["dec_whh"], params["prd_whh"],
      params["zproj_w"], params["zproj_b"],
      params["fcr_w"], params["fcr_b"], params["fcp_w"], params["fcp_b"])

    # Padded batch rows / output lanes are dropped here (they carry bias-driven
    # junk state by design).
    reconstructed = rec_p.reshape(T, Bp, Op)[:, :B, :output_size].transpose(1, 0, 2)
    prediction = pred_p.reshape(T, Bp, Op)[:, :B, :output_size].transpose(1, 0, 2)
    return reconstructed, prediction


# ----------------------------------- main ------------------------------------

if __name__ == "__main__":
    input_size = 4
    hidden_size = 32
    output_size = 4
    B, T = 2, 8

    key = jax.random.PRNGKey(0)
    pkey, xkey = jax.random.split(key)
    params = init_model(pkey, input_size, hidden_size, output_size)
    x = jax.random.normal(xkey, (B, T, input_size), dtype=jnp.float32)

    fwd = jax.jit(lstmae_predictor_forward, static_argnames="output_size")
    reconstructed, prediction = fwd(params, x, output_size=output_size)
    jax.block_until_ready((reconstructed, prediction))

    assert reconstructed.shape == (B, T, output_size)
    assert prediction.shape == (B, T, output_size)
    assert bool(jnp.all(jnp.isfinite(reconstructed)))
    assert bool(jnp.all(jnp.isfinite(prediction)))
    print("KERNEL_OK")
</pallas_src>

<mosaic_0001>
module attributes {stable_mosaic.version = 11 : i64} {
  func.func @_fused_kernel(%arg0: memref<8x8x128xf32, #tpu.memory_space<vmem>>, %arg1: memref<128x512xbf16, #tpu.memory_space<vmem>>, %arg2: memref<128x512xbf16, #tpu.memory_space<vmem>>, %arg3: memref<1x512xf32, #tpu.memory_space<vmem>>, %arg4: memref<128x512xbf16, #tpu.memory_space<vmem>>, %arg5: memref<128x512xbf16, #tpu.memory_space<vmem>>, %arg6: memref<128x1024xbf16, #tpu.memory_space<vmem>>, %arg7: memref<1x1024xf32, #tpu.memory_space<vmem>>, %arg8: memref<128x128xbf16, #tpu.memory_space<vmem>>, %arg9: memref<1x128xf32, #tpu.memory_space<vmem>>, %arg10: memref<128x128xbf16, #tpu.memory_space<vmem>>, %arg11: memref<1x128xf32, #tpu.memory_space<vmem>>, %arg12: memref<64x128xf32, #tpu.memory_space<vmem>>, %arg13: memref<64x128xf32, #tpu.memory_space<vmem>>, %arg14: memref<64x512xf32, #tpu.memory_space<vmem>>) attributes {dimension_semantics = [], scalar_prefetch = 0 : i64, scratch_operands = 1 : i64, tpu.core_type = #tpu.core_type<tc>} {
    %c0 = arith.constant 0 : index
    %c0_0 = arith.constant 0 : index
    %c0_1 = arith.constant 0 : index
    %0 = vector.load %arg0[%c0, %c0_0, %c0_1] : memref<8x8x128xf32, #tpu.memory_space<vmem>>, vector<8x8x128xf32>
    %1 = vector.shape_cast %0 : vector<8x8x128xf32> to vector<64x128xf32>
    %2 = arith.truncf %1 : vector<64x128xf32> to vector<64x128xbf16>
    %c0_2 = arith.constant 0 : index
    %c0_3 = arith.constant 0 : index
    %3 = vector.load %arg1[%c0_2, %c0_3] : memref<128x512xbf16, #tpu.memory_space<vmem>>, vector<128x512xbf16>
    %cst = arith.constant dense<0.000000e+00> : vector<64x512xf32>
    %4 = tpu.matmul %2, %3, %cst {dimension_numbers = #tpu.dot_dimension_numbers<[1], [0], [0], [1], [0, 0, 1, 1], [], []>} : vector<64x128xbf16>, vector<128x512xbf16>, vector<64x512xf32> -> vector<64x512xf32>
    %c0_4 = arith.constant 0 : index
    %c0_5 = arith.constant 0 : index
    %5 = vector.load %arg3[%c0_4, %c0_5] : memref<1x512xf32, #tpu.memory_space<vmem>>, vector<1x512xf32>
    %6 = vector.broadcast %5 : vector<1x512xf32> to vector<64x512xf32>
    %7 = arith.addf %4, %6 : vector<64x512xf32>
    %c0_6 = arith.constant 0 : index
    %c0_7 = arith.constant 0 : index
    %8 = vector.load %arg14[%c0_6, %c0_7] : memref<64x512xf32, #tpu.memory_space<vmem>>, vector<64x512xf32>
    tpu.vector_store %arg14[%c0_6, %c0_7], %7 {strides = array<i32>} : memref<64x512xf32, #tpu.memory_space<vmem>>, vector<64x512xf32>,
    %cst_8 = arith.constant 0.000000e+00 : f32
    %9 = vector.broadcast %cst_8 : f32 to vector<8x128xf32>
    %c0_9 = arith.constant 0 : index
    %c0_10 = arith.constant 0 : index
    %10 = vector.load %arg14[%c0_9, %c0_10] : memref<64x512xf32, #tpu.memory_space<vmem>>, vector<8x512xf32>
    %11 = arith.truncf %9 : vector<8x128xf32> to vector<8x128xbf16>
    %c0_11 = arith.constant 0 : index
    %c0_12 = arith.constant 0 : index
    %12 = vector.load %arg2[%c0_11, %c0_12] : memref<128x512xbf16, #tpu.memory_space<vmem>>, vector<128x512xbf16>
    %cst_13 = arith.constant dense<0.000000e+00> : vector<8x512xf32>
    %13 = tpu.matmul %11, %12, %cst_13 {dimension_numbers = #tpu.dot_dimension_numbers<[1], [0], [0], [1], [0, 0, 1, 1], [], []>} : vector<8x128xbf16>, vector<128x512xbf16>, vector<8x512xf32> -> vector<8x512xf32>
    %14 = arith.addf %10, %13 : vector<8x512xf32>
    %15 = vector.extract_strided_slice %14 {offsets = [0, 0], sizes = [8, 384], strides = [1, 1]} : vector<8x512xf32> to vector<8x384xf32>
    %16 = arith.negf %15 : vector<8x384xf32>
    %17 = math.exp %16 : vector<8x384xf32>
    %cst_14 = arith.constant 1.000000e+00 : f32
    %18 = vector.broadcast %cst_14 : f32 to vector<8x384xf32>
    %19 = arith.addf %18, %17 : vector<8x384xf32>
    %20 = arith.divf %18, %19 : vector<8x384xf32>
    %21 = vector.extract_strided_slice %14 {offsets = [0, 384], sizes = [8, 128], strides = [1, 1]} : vector<8x512xf32> to vector<8x128xf32>
    %22 = math.tanh %21 : vector<8x128xf32>
    %23 = vector.extract_strided_slice %20 {offsets = [0, 0], sizes = [8, 128], strides = [1, 1]} : vector<8x384xf32> to vector<8x128xf32>
    %24 = vector.extract_strided_slice %20 {offsets = [0, 128], sizes = [8, 128], strides = [1, 1]} : vector<8x384xf32> to vector<8x128xf32>
    %25 = vector.extract_strided_slice %20 {offsets = [0, 256], sizes = [8, 128], strides = [1, 1]} : vector<8x384xf32> to vector<8x128xf32>
    %26 = arith.mulf %24, %9 : vector<8x128xf32>
    %27 = arith.mulf %23, %22 : vector<8x128xf32>
    %28 = arith.addf %26, %27 : vector<8x128xf32>
    %29 = math.tanh %28 : vector<8x128xf32>
    %30 = arith.mulf %25, %29 : vector<8x128xf32>
    %c8 = arith.constant 8 : index
    %c0_15 = arith.constant 0 : index
    %31 = vector.load %arg14[%c8, %c0_15] : memref<64x512xf32, #tpu.memory_space<vmem>>, vector<8x512xf32>
    %32 = arith.truncf %30 : vector<8x128xf32> to vector<8x128xbf16>
    %c0_16 = arith.constant 0 : index
    %c0_17 = arith.constant 0 : index
    %33 = vector.load %arg2[%c0_16, %c0_17] : memref<128x512xbf16, #tpu.memory_space<vmem>>, vector<128x512xbf16>
    %cst_18 = arith.constant dense<0.000000e+00> : vector<8x512xf32>
    %34 = tpu.matmul %32, %33, %cst_18 {dimension_numbers = #tpu.dot_dimension_numbers<[1], [0], [0], [1], [0, 0, 1, 1], [], []>} : vector<8x128xbf16>, vector<128x512xbf16>, vector<8x512xf32> -> vector<8x512xf32>
    %35 = arith.addf %31, %34 : vector<8x512xf32>
    %36 = vector.extract_strided_slice %35 {offsets = [0, 0], sizes = [8, 384], strides = [1, 1]} : vector<8x512xf32> to vector<8x384xf32>
    %37 = arith.negf %36 : vector<8x384xf32>
    %38 = math.exp %37 : vector<8x384xf32>
    %cst_19 = arith.constant 1.000000e+00 : f32
    %39 = vector.broadcast %cst_19 : f32 to vector<8x384xf32>
    %40 = arith.addf %39, %38 : vector<8x384xf32>
    %41 = arith.divf %39, %40 : vector<8x384xf32>
    %42 = vector.extract_strided_slice %35 {offsets = [0, 384], sizes = [8, 128], strides = [1, 1]} : vector<8x512xf32> to vector<8x128xf32>
    %43 = math.tanh %42 : vector<8x128xf32>
    %44 = vector.extract_strided_slice %41 {offsets = [0, 0], sizes = [8, 128], strides = [1, 1]} : vector<8x384xf32> to vector<8x128xf32>
    %45 = vector.extract_strided_slice %41 {offsets = [0, 128], sizes = [8, 128], strides = [1, 1]} : vector<8x384xf32> to vector<8x128xf32>
    %46 = vector.extract_strided_slice %41 {offsets = [0, 256], sizes = [8, 128], strides = [1, 1]} : vector<8x384xf32> to vector<8x128xf32>
    %47 = arith.mulf %45, %28 : vector<8x128xf32>
    %48 = arith.mulf %44, %43 : vector<8x128xf32>
    %49 = arith.addf %47, %48 : vector<8x128xf32>
    %50 = math.tanh %49 : vector<8x128xf32>
    %51 = arith.mulf %46, %50 : vector<8x128xf32>
    %c16 = arith.constant 16 : index
    %c0_20 = arith.constant 0 : index
    %52 = vector.load %arg14[%c16, %c0_20] : memref<64x512xf32, #tpu.memory_space<vmem>>, vector<8x512xf32>
    %53 = arith.truncf %51 : vector<8x128xf32> to vector<8x128xbf16>
    %c0_21 = arith.constant 0 : index
    %c0_22 = arith.constant 0 : index
    %54 = vector.load %arg2[%c0_21, %c0_22] : memref<128x512xbf16, #tpu.memory_space<vmem>>, vector<128x512xbf16>
    %cst_23 = arith.constant dense<0.000000e+00> : vector<8x512xf32>
    %55 = tpu.matmul %53, %54, %cst_23 {dimension_numbers = #tpu.dot_dimension_numbers<[1], [0], [0], [1], [0, 0, 1, 1], [], []>} : vector<8x128xbf16>, vector<128x512xbf16>, vector<8x512xf32> -> vector<8x512xf32>
    %56 = arith.addf %52, %55 : vector<8x512xf32>
    %57 = vector.extract_strided_slice %56 {offsets = [0, 0], sizes = [8, 384], strides = [1, 1]} : vector<8x512xf32> to vector<8x384xf32>
    %58 = arith.negf %57 : vector<8x384xf32>
    %59 = math.exp %58 : vector<8x384xf32>
    %cst_24 = arith.constant 1.000000e+00 : f32
    %60 = vector.broadcast %cst_24 : f32 to vector<8x384xf32>
    %61 = arith.addf %60, %59 : vector<8x384xf32>
    %62 = arith.divf %60, %61 : vector<8x384xf32>
    %63 = vector.extract_strided_slice %56 {offsets = [0, 384], sizes = [8, 128], strides = [1, 1]} : vector<8x512xf32> to vector<8x128xf32>
    %64 = math.tanh %63 : vector<8x128xf32>
    %65 = vector.extract_strided_slice %62 {offsets = [0, 0], sizes = [8, 128], strides = [1, 1]} : vector<8x384xf32> to vector<8x128xf32>
    %66 = vector.extract_strided_slice %62 {offsets = [0, 128], sizes = [8, 128], strides = [1, 1]} : vector<8x384xf32> to vector<8x128xf32>
    %67 = vector.extract_strided_slice %62 {offsets = [0, 256], sizes = [8, 128], strides = [1, 1]} : vector<8x384xf32> to vector<8x128xf32>
    %68 = arith.mulf %66, %49 : vector<8x128xf32>
    %69 = arith.mulf %65, %64 : vector<8x128xf32>
    %70 = arith.addf %68, %69 : vector<8x128xf32>
    %71 = math.tanh %70 : vector<8x128xf32>
    %72 = arith.mulf %67, %71 : vector<8x128xf32>
    %c24 = arith.constant 24 : index
    %c0_25 = arith.constant 0 : index
    %73 = vector.load %arg14[%c24, %c0_25] : memref<64x512xf32, #tpu.memory_space<vmem>>, vector<8x512xf32>
    %74 = arith.truncf %72 : vector<8x128xf32> to vector<8x128xbf16>
    %c0_26 = arith.constant 0 : index
    %c0_27 = arith.constant 0 : index
    %75 = vector.load %arg2[%c0_26, %c0_27] : memref<128x512xbf16, #tpu.memory_space<vmem>>, vector<128x512xbf16>
    %cst_28 = arith.constant dense<0.000000e+00> : vector<8x512xf32>
    %76 = tpu.matmul %74, %75, %cst_28 {dimension_numbers = #tpu.dot_dimension_numbers<[1], [0], [0], [1], [0, 0, 1, 1], [], []>} : vector<8x128xbf16>, vector<128x512xbf16>, vector<8x512xf32> -> vector<8x512xf32>
    %77 = arith.addf %73, %76 : vector<8x512xf32>
    %78 = vector.extract_strided_slice %77 {offsets = [0, 0], sizes = [8, 384], strides = [1, 1]} : vector<8x512xf32> to vector<8x384xf32>
    %79 = arith.negf %78 : vector<8x384xf32>
    %80 = math.exp %79 : vector<8x384xf32>
    %cst_29 = arith.constant 1.000000e+00 : f32
    %81 = vector.broadcast %cst_29 : f32 to vector<8x384xf32>
    %82 = arith.addf %81, %80 : vector<8x384xf32>
    %83 = arith.divf %81, %82 : vector<8x384xf32>
    %84 = vector.extract_strided_slice %77 {offsets = [0, 384], sizes = [8, 128], strides = [1, 1]} : vector<8x512xf32> to vector<8x128xf32>
    %85 = math.tanh %84 : vector<8x128xf32>
    %86 = vector.extract_strided_slice %83 {offsets = [0, 0], sizes = [8, 128], strides = [1, 1]} : vector<8x384xf32> to vector<8x128xf32>
    %87 = vector.extract_strided_slice %83 {offsets = [0, 128], sizes = [8, 128], strides = [1, 1]} : vector<8x384xf32> to vector<8x128xf32>
    %88 = vector.extract_strided_slice %83 {offsets = [0, 256], sizes = [8, 128], strides = [1, 1]} : vector<8x384xf32> to vector<8x128xf32>
    %89 = arith.mulf %87, %70 : vector<8x128xf32>
    %90 = arith.mulf %86, %85 : vector<8x128xf32>
    %91 = arith.addf %89, %90 : vector<8x128xf32>
    %92 = math.tanh %91 : vector<8x128xf32>
    %93 = arith.mulf %88, %92 : vector<8x128xf32>
    %c32 = arith.constant 32 : index
    %c0_30 = arith.constant 0 : index
    %94 = vector.load %arg14[%c32, %c0_30] : memref<64x512xf32, #tpu.memory_space<vmem>>, vector<8x512xf32>
    %95 = arith.truncf %93 : vector<8x128xf32> to vector<8x128xbf16>
    %c0_31 = arith.constant 0 : index
    %c0_32 = arith.constant 0 : index
    %96 = vector.load %arg2[%c0_31, %c0_32] : memref<128x512xbf16, #tpu.memory_space<vmem>>, vector<128x512xbf16>
    %cst_33 = arith.constant dense<0.000000e+00> : vector<8x512xf32>
    %97 = tpu.matmul %95, %96, %cst_33 {dimension_numbers = #tpu.dot_dimension_numbers<[1], [0], [0], [1], [0, 0, 1, 1], [], []>} : vector<8x128xbf16>, vector<128x512xbf16>, vector<8x512xf32> -> vector<8x512xf32>
    %98 = arith.addf %94, %97 : vector<8x512xf32>
    %99 = vector.extract_strided_slice %98 {offsets = [0, 0], sizes = [8, 384], strides = [1, 1]} : vector<8x512xf32> to vector<8x384xf32>
    %100 = arith.negf %99 : vector<8x384xf32>
    %101 = math.exp %100 : vector<8x384xf32>
    %cst_34 = arith.constant 1.000000e+00 : f32
    %102 = vector.broadcast %cst_34 : f32 to vector<8x384xf32>
    %103 = arith.addf %102, %101 : vector<8x384xf32>
    %104 = arith.divf %102, %103 : vector<8x384xf32>
    %105 = vector.extract_strided_slice %98 {offsets = [0, 384], sizes = [8, 128], strides = [1, 1]} : vector<8x512xf32> to vector<8x128xf32>
    %106 = math.tanh %105 : vector<8x128xf32>
    %107 = vector.extract_strided_slice %104 {offsets = [0, 0], sizes = [8, 128], strides = [1, 1]} : vector<8x384xf32> to vector<8x128xf32>
    %108 = vector.extract_strided_slice %104 {offsets = [0, 128], sizes = [8, 128], strides = [1, 1]} : vector<8x384xf32> to vector<8x128xf32>
    %109 = vector.extract_strided_slice %104 {offsets = [0, 256], sizes = [8, 128], strides = [1, 1]} : vector<8x384xf32> to vector<8x128xf32>
    %110 = arith.mulf %108, %91 : vector<8x128xf32>
    %111 = arith.mulf %107, %106 : vector<8x128xf32>
    %112 = arith.addf %110, %111 : vector<8x128xf32>
    %113 = math.tanh %112 : vector<8x128xf32>
    %114 = arith.mulf %109, %113 : vector<8x128xf32>
    %c40 = arith.constant 40 : index
    %c0_35 = arith.constant 0 : index
    %115 = vector.load %arg14[%c40, %c0_35] : memref<64x512xf32, #tpu.memory_space<vmem>>, vector<8x512xf32>
    %116 = arith.truncf %114 : vector<8x128xf32> to vector<8x128xbf16>
    %c0_36 = arith.constant 0 : index
    %c0_37 = arith.constant 0 : index
    %117 = vector.load %arg2[%c0_36, %c0_37] : memref<128x512xbf16, #tpu.memory_space<vmem>>, vector<128x512xbf16>
    %cst_38 = arith.constant dense<0.000000e+00> : vector<8x512xf32>
    %118 = tpu.matmul %116, %117, %cst_38 {dimension_numbers = #tpu.dot_dimension_numbers<[1], [0], [0], [1], [0, 0, 1, 1], [], []>} : vector<8x128xbf16>, vector<128x512xbf16>, vector<8x512xf32> -> vector<8x512xf32>
    %119 = arith.addf %115, %118 : vector<8x512xf32>
    %120 = vector.extract_strided_slice %119 {offsets = [0, 0], sizes = [8, 384], strides = [1, 1]} : vector<8x512xf32> to vector<8x384xf32>
    %121 = arith.negf %120 : vector<8x384xf32>
    %122 = math.exp %121 : vector<8x384xf32>
    %cst_39 = arith.constant 1.000000e+00 : f32
    %123 = vector.broadcast %cst_39 : f32 to vector<8x384xf32>
    %124 = arith.addf %123, %122 : vector<8x384xf32>
    %125 = arith.divf %123, %124 : vector<8x384xf32>
    %126 = vector.extract_strided_slice %119 {offsets = [0, 384], sizes = [8, 128], strides = [1, 1]} : vector<8x512xf32> to vector<8x128xf32>
    %127 = math.tanh %126 : vector<8x128xf32>
    %128 = vector.extract_strided_slice %125 {offsets = [0, 0], sizes = [8, 128], strides = [1, 1]} : vector<8x384xf32> to vector<8x128xf32>
    %129 = vector.extract_strided_slice %125 {offsets = [0, 128], sizes = [8, 128], strides = [1, 1]} : vector<8x384xf32> to vector<8x128xf32>
    %130 = vector.extract_strided_slice %125 {offsets = [0, 256], sizes = [8, 128], strides = [1, 1]} : vector<8x384xf32> to vector<8x128xf32>
    %131 = arith.mulf %129, %112 : vector<8x128xf32>
    %132 = arith.mulf %128, %127 : vector<8x128xf32>
    %133 = arith.addf %131, %132 : vector<8x128xf32>
    %134 = math.tanh %133 : vector<8x128xf32>
    %135 = arith.mulf %130, %134 : vector<8x128xf32>
    %c48 = arith.constant 48 : index
    %c0_40 = arith.constant 0 : index
    %136 = vector.load %arg14[%c48, %c0_40] : memref<64x512xf32, #tpu.memory_space<vmem>>, vector<8x512xf32>
    %137 = arith.truncf %135 : vector<8x128xf32> to vector<8x128xbf16>
    %c0_41 = arith.constant 0 : index
    %c0_42 = arith.constant 0 : index
    %138 = vector.load %arg2[%c0_41, %c0_42] : memref<128x512xbf16, #tpu.memory_space<vmem>>, vector<128x512xbf16>
    %cst_43 = arith.constant dense<0.000000e+00> : vector<8x512xf32>
    %139 = tpu.matmul %137, %138, %cst_43 {dimension_numbers = #tpu.dot_dimension_numbers<[1], [0], [0], [1], [0, 0, 1, 1], [], []>} : vector<8x128xbf16>, vector<128x512xbf16>, vector<8x512xf32> -> vector<8x512xf32>
    %140 = arith.addf %136, %139 : vector<8x512xf32>
    %141 = vector.extract_strided_slice %140 {offsets = [0, 0], sizes = [8, 384], strides = [1, 1]} : vector<8x512xf32> to vector<8x384xf32>
    %142 = arith.negf %141 : vector<8x384xf32>
    %143 = math.exp %142 : vector<8x384xf32>
    %cst_44 = arith.constant 1.000000e+00 : f32
    %144 = vector.broadcast %cst_44 : f32 to vector<8x384xf32>
    %145 = arith.addf %144, %143 : vector<8x384xf32>
    %146 = arith.divf %144, %145 : vector<8x384xf32>
    %147 = vector.extract_strided_slice %140 {offsets = [0, 384], sizes = [8, 128], strides = [1, 1]} : vector<8x512xf32> to vector<8x128xf32>
    %148 = math.tanh %147 : vector<8x128xf32>
    %149 = vector.extract_strided_slice %146 {offsets = [0, 0], sizes = [8, 128], strides = [1, 1]} : vector<8x384xf32> to vector<8x128xf32>
    %150 = vector.extract_strided_slice %146 {offsets = [0, 128], sizes = [8, 128], strides = [1, 1]} : vector<8x384xf32> to vector<8x128xf32>
    %151 = vector.extract_strided_slice %146 {offsets = [0, 256], sizes = [8, 128], strides = [1, 1]} : vector<8x384xf32> to vector<8x128xf32>
    %152 = arith.mulf %150, %133 : vector<8x128xf32>
    %153 = arith.mulf %149, %148 : vector<8x128xf32>
    %154 = arith.addf %152, %153 : vector<8x128xf32>
    %155 = math.tanh %154 : vector<8x128xf32>
    %156 = arith.mulf %151, %155 : vector<8x128xf32>
    %c56 = arith.constant 56 : index
    %c0_45 = arith.constant 0 : index
    %157 = vector.load %arg14[%c56, %c0_45] : memref<64x512xf32, #tpu.memory_space<vmem>>, vector<8x512xf32>
    %158 = arith.truncf %156 : vector<8x128xf32> to vector<8x128xbf16>
    %c0_46 = arith.constant 0 : index
    %c0_47 = arith.constant 0 : index
    %159 = vector.load %arg2[%c0_46, %c0_47] : memref<128x512xbf16, #tpu.memory_space<vmem>>, vector<128x512xbf16>
    %cst_48 = arith.constant dense<0.000000e+00> : vector<8x512xf32>
    %160 = tpu.matmul %158, %159, %cst_48 {dimension_numbers = #tpu.dot_dimension_numbers<[1], [0], [0], [1], [0, 0, 1, 1], [], []>} : vector<8x128xbf16>, vector<128x512xbf16>, vector<8x512xf32> -> vector<8x512xf32>
    %161 = arith.addf %157, %160 : vector<8x512xf32>
    %162 = vector.extract_strided_slice %161 {offsets = [0, 0], sizes = [8, 384], strides = [1, 1]} : vector<8x512xf32> to vector<8x384xf32>
    %163 = arith.negf %162 : vector<8x384xf32>
    %164 = math.exp %163 : vector<8x384xf32>
    %cst_49 = arith.constant 1.000000e+00 : f32
    %165 = vector.broadcast %cst_49 : f32 to vector<8x384xf32>
    %166 = arith.addf %165, %164 : vector<8x384xf32>
    %167 = arith.divf %165, %166 : vector<8x384xf32>
    %168 = vector.extract_strided_slice %161 {offsets = [0, 384], sizes = [8, 128], strides = [1, 1]} : vector<8x512xf32> to vector<8x128xf32>
    %169 = math.tanh %168 : vector<8x128xf32>
    %170 = vector.extract_strided_slice %167 {offsets = [0, 0], sizes = [8, 128], strides = [1, 1]} : vector<8x384xf32> to vector<8x128xf32>
    %171 = vector.extract_strided_slice %167 {offsets = [0, 128], sizes = [8, 128], strides = [1, 1]} : vector<8x384xf32> to vector<8x128xf32>
    %172 = vector.extract_strided_slice %167 {offsets = [0, 256], sizes = [8, 128], strides = [1, 1]} : vector<8x384xf32> to vector<8x128xf32>
    %173 = arith.mulf %171, %154 : vector<8x128xf32>
    %174 = arith.mulf %170, %169 : vector<8x128xf32>
    %175 = arith.addf %173, %174 : vector<8x128xf32>
    %176 = math.tanh %175 : vector<8x128xf32>
    %177 = arith.mulf %172, %176 : vector<8x128xf32>
    %178 = arith.truncf %177 : vector<8x128xf32> to vector<8x128xbf16>
    %c0_50 = arith.constant 0 : index
    %c0_51 = arith.constant 0 : index
    %179 = vector.load %arg6[%c0_50, %c0_51] : memref<128x1024xbf16, #tpu.memory_space<vmem>>, vector<128x1024xbf16>
    %cst_52 = arith.constant dense<0.000000e+00> : vector<8x1024xf32>
    %180 = tpu.matmul %178, %179, %cst_52 {dimension_numbers = #tpu.dot_dimension_numbers<[1], [0], [0], [1], [0, 0, 1, 1], [], []>} : vector<8x128xbf16>, vector<128x1024xbf16>, vector<8x1024xf32> -> vector<8x1024xf32>
    %c0_53 = arith.constant 0 : index
    %c0_54 = arith.constant 0 : index
    %181 = vector.load %arg7[%c0_53, %c0_54] : memref<1x1024xf32, #tpu.memory_space<vmem>>, vector<1x1024xf32>
    %182 = vector.broadcast %181 : vector<1x1024xf32> to vector<8x1024xf32>
    %183 = arith.addf %180, %182 : vector<8x1024xf32>
    %184 = vector.extract_strided_slice %183 {offsets = [0, 0], sizes = [8, 512], strides = [1, 1]} : vector<8x1024xf32> to vector<8x512xf32>
    %185 = vector.extract_strided_slice %183 {offsets = [0, 512], sizes = [8, 512], strides = [1, 1]} : vector<8x1024xf32> to vector<8x512xf32>
    %186 = arith.truncf %9 : vector<8x128xf32> to vector<8x128xbf16>
    %c0_55 = arith.constant 0 : index
    %c0_56 = arith.constant 0 : index
    %187 = vector.load %arg4[%c0_55, %c0_56] : memref<128x512xbf16, #tpu.memory_space<vmem>>, vector<128x512xbf16>
    %cst_57 = arith.constant dense<0.000000e+00> : vector<8x512xf32>
    %188 = tpu.matmul %186, %187, %cst_57 {dimension_numbers = #tpu.dot_dimension_numbers<[1], [0], [0], [1], [0, 0, 1, 1], [], []>} : vector<8x128xbf16>, vector<128x512xbf16>, vector<8x512xf32> -> vector<8x512xf32>
    %189 = arith.addf %184, %188 : vector<8x512xf32>
    %190 = vector.extract_strided_slice %189 {offsets = [0, 0], sizes = [8, 384], strides = [1, 1]} : vector<8x512xf32> to vector<8x384xf32>
    %191 = arith.negf %190 : vector<8x384xf32>
    %192 = math.exp %191 : vector<8x384xf32>
    %cst_58 = arith.constant 1.000000e+00 : f32
    %193 = vector.broadcast %cst_58 : f32 to vector<8x384xf32>
    %194 = arith.addf %193, %192 : vector<8x384xf32>
    %195 = arith.divf %193, %194 : vector<8x384xf32>
    %196 = vector.extract_strided_slice %189 {offsets = [0, 384], sizes = [8, 128], strides = [1, 1]} : vector<8x512xf32> to vector<8x128xf32>
    %197 = math.tanh %196 : vector<8x128xf32>
    %198 = vector.extract_strided_slice %195 {offsets = [0, 0], sizes = [8, 128], strides = [1, 1]} : vector<8x384xf32> to vector<8x128xf32>
    %199 = vector.extract_strided_slice %195 {offsets = [0, 128], sizes = [8, 128], strides = [1, 1]} : vector<8x384xf32> to vector<8x128xf32>
    %200 = vector.extract_strided_slice %195 {offsets = [0, 256], sizes = [8, 128], strides = [1, 1]} : vector<8x384xf32> to vector<8x128xf32>
    %201 = arith.mulf %199, %9 : vector<8x128xf32>
    %202 = arith.mulf %198, %197 : vector<8x128xf32>
    %203 = arith.addf %201, %202 : vector<8x128xf32>
    %204 = math.tanh %203 : vector<8x128xf32>
    %205 = arith.mulf %200, %204 : vector<8x128xf32>
    %206 = arith.truncf %9 : vector<8x128xf32> to vector<8x128xbf16>
    %c0_59 = arith.constant 0 : index
    %c0_60 = arith.constant 0 : index
    %207 = vector.load %arg5[%c0_59, %c0_60] : memref<128x512xbf16, #tpu.memory_space<vmem>>, vector<128x512xbf16>
    %cst_61 = arith.constant dense<0.000000e+00> : vector<8x512xf32>
    %208 = tpu.matmul %206, %207, %cst_61 {dimension_numbers = #tpu.dot_dimension_numbers<[1], [0], [0], [1], [0, 0, 1, 1], [], []>} : vector<8x128xbf16>, vector<128x512xbf16>, vector<8x512xf32> -> vector<8x512xf32>
    %209 = arith.addf %185, %208 : vector<8x512xf32>
    %210 = vector.extract_strided_slice %209 {offsets = [0, 0], sizes = [8, 384], strides = [1, 1]} : vector<8x512xf32> to vector<8x384xf32>
    %211 = arith.negf %210 : vector<8x384xf32>
    %212 = math.exp %211 : vector<8x384xf32>
    %cst_62 = arith.constant 1.000000e+00 : f32
    %213 = vector.broadcast %cst_62 : f32 to vector<8x384xf32>
    %214 = arith.addf %213, %212 : vector<8x384xf32>
    %215 = arith.divf %213, %214 : vector<8x384xf32>
    %216 = vector.extract_strided_slice %209 {offsets = [0, 384], sizes = [8, 128], strides = [1, 1]} : vector<8x512xf32> to vector<8x128xf32>
    %217 = math.tanh %216 : vector<8x128xf32>
    %218 = vector.extract_strided_slice %215 {offsets = [0, 0], sizes = [8, 128], strides = [1, 1]} : vector<8x384xf32> to vector<8x128xf32>
    %219 = vector.extract_strided_slice %215 {offsets = [0, 128], sizes = [8, 128], strides = [1, 1]} : vector<8x384xf32> to vector<8x128xf32>
    %220 = vector.extract_strided_slice %215 {offsets = [0, 256], sizes = [8, 128], strides = [1, 1]} : vector<8x384xf32> to vector<8x128xf32>
    %221 = arith.mulf %219, %9 : vector<8x128xf32>
    %222 = arith.mulf %218, %217 : vector<8x128xf32>
    %223 = arith.addf %221, %222 : vector<8x128xf32>
    %224 = math.tanh %223 : vector<8x128xf32>
    %225 = arith.mulf %220, %224 : vector<8x128xf32>
    %226 = arith.truncf %205 : vector<8x128xf32> to vector<8x128xbf16>
    %c0_63 = arith.constant 0 : index
    %c0_64 = arith.constant 0 : index
    %227 = vector.load %arg8[%c0_63, %c0_64] : memref<128x128xbf16, #tpu.memory_space<vmem>>, vector<128x128xbf16>
    %cst_65 = arith.constant dense<0.000000e+00> : vector<8x128xf32>
    %228 = tpu.matmul %226, %227, %cst_65 {dimension_numbers = #tpu.dot_dimension_numbers<[1], [0], [0], [1], [0, 0, 1, 1], [], []>} : vector<8x128xbf16>, vector<128x128xbf16>, vector<8x128xf32> -> vector<8x128xf32>
    %c0_66 = arith.constant 0 : index
    %c0_67 = arith.constant 0 : index
    %229 = vector.load %arg9[%c0_66, %c0_67] : memref<1x128xf32, #tpu.memory_space<vmem>>, vector<1x128xf32>
    %230 = vector.broadcast %229 : vector<1x128xf32> to vector<8x128xf32>
    %231 = arith.addf %228, %230 : vector<8x128xf32>
    %c0_68 = arith.constant 0 : index
    %c0_69 = arith.constant 0 : index
    %232 = vector.load %arg12[%c0_68, %c0_69] : memref<64x128xf32, #tpu.memory_space<vmem>>, vector<8x128xf32>
    tpu.vector_store %arg12[%c0_68, %c0_69], %231 {strides = array<i32>} : memref<64x128xf32, #tpu.memory_space<vmem>>, vector<8x128xf32>,
    %233 = arith.truncf %225 : vector<8x128xf32> to vector<8x128xbf16>
    %c0_70 = arith.constant 0 : index
    %c0_71 = arith.constant 0 : index
    %234 = vector.load %arg10[%c0_70, %c0_71] : memref<128x128xbf16, #tpu.memory_space<vmem>>, vector<128x128xbf16>
    %cst_72 = arith.constant dense<0.000000e+00> : vector<8x128xf32>
    %235 = tpu.matmul %233, %234, %cst_72 {dimension_numbers = #tpu.dot_dimension_numbers<[1], [0], [0], [1], [0, 0, 1, 1], [], []>} : vector<8x128xbf16>, vector<128x128xbf16>, vector<8x128xf32> -> vector<8x128xf32>
    %c0_73 = arith.constant 0 : index
    %c0_74 = arith.constant 0 : index
    %236 = vector.load %arg11[%c0_73, %c0_74] : memref<1x128xf32, #tpu.memory_space<vmem>>, vector<1x128xf32>
    %237 = vector.broadcast %236 : vector<1x128xf32> to vector<8x128xf32>
    %238 = arith.addf %235, %237 : vector<8x128xf32>
    %c0_75 = arith.constant 0 : index
    %c0_76 = arith.constant 0 : index
    %239 = vector.load %arg13[%c0_75, %c0_76] : memref<64x128xf32, #tpu.memory_space<vmem>>, vector<8x128xf32>
    tpu.vector_store %arg13[%c0_75, %c0_76], %238 {strides = array<i32>} : memref<64x128xf32, #tpu.memory_space<vmem>>, vector<8x128xf32>,
    %240 = arith.truncf %205 : vector<8x128xf32> to vector<8x128xbf16>
    %c0_77 = arith.constant 0 : index
    %c0_78 = arith.constant 0 : index
    %241 = vector.load %arg4[%c0_77, %c0_78] : memref<128x512xbf16, #tpu.memory_space<vmem>>, vector<128x512xbf16>
    %cst_79 = arith.constant dense<0.000000e+00> : vector<8x512xf32>
    %242 = tpu.matmul %240, %241, %cst_79 {dimension_numbers = #tpu.dot_dimension_numbers<[1], [0], [0], [1], [0, 0, 1, 1], [], []>} : vector<8x128xbf16>, vector<128x512xbf16>, vector<8x512xf32> -> vector<8x512xf32>
    %243 = arith.addf %184, %242 : vector<8x512xf32>
    %244 = vector.extract_strided_slice %243 {offsets = [0, 0], sizes = [8, 384], strides = [1, 1]} : vector<8x512xf32> to vector<8x384xf32>
    %245 = arith.negf %244 : vector<8x384xf32>
    %246 = math.exp %245 : vector<8x384xf32>
    %cst_80 = arith.constant 1.000000e+00 : f32
    %247 = vector.broadcast %cst_80 : f32 to vector<8x384xf32>
    %248 = arith.addf %247, %246 : vector<8x384xf32>
    %249 = arith.divf %247, %248 : vector<8x384xf32>
    %250 = vector.extract_strided_slice %243 {offsets = [0, 384], sizes = [8, 128], strides = [1, 1]} : vector<8x512xf32> to vector<8x128xf32>
    %251 = math.tanh %250 : vector<8x128xf32>
    %252 = vector.extract_strided_slice %249 {offsets = [0, 0], sizes = [8, 128], strides = [1, 1]} : vector<8x384xf32> to vector<8x128xf32>
    %253 = vector.extract_strided_slice %249 {offsets = [0, 128], sizes = [8, 128], strides = [1, 1]} : vector<8x384xf32> to vector<8x128xf32>
    %254 = vector.extract_strided_slice %249 {offsets = [0, 256], sizes = [8, 128], strides = [1, 1]} : vector<8x384xf32> to vector<8x128xf32>
    %255 = arith.mulf %253, %203 : vector<8x128xf32>
    %256 = arith.mulf %252, %251 : vector<8x128xf32>
    %257 = arith.addf %255, %256 : vector<8x128xf32>
    %258 = math.tanh %257 : vector<8x128xf32>
    %259 = arith.mulf %254, %258 : vector<8x128xf32>
    %260 = arith.truncf %225 : vector<8x128xf32> to vector<8x128xbf16>
    %c0_81 = arith.constant 0 : index
    %c0_82 = arith.constant 0 : index
    %261 = vector.load %arg5[%c0_81, %c0_82] : memref<128x512xbf16, #tpu.memory_space<vmem>>, vector<128x512xbf16>
    %cst_83 = arith.constant dense<0.000000e+00> : vector<8x512xf32>
    %262 = tpu.matmul %260, %261, %cst_83 {dimension_numbers = #tpu.dot_dimension_numbers<[1], [0], [0], [1], [0, 0, 1, 1], [], []>} : vector<8x128xbf16>, vector<128x512xbf16>, vector<8x512xf32> -> vector<8x512xf32>
    %263 = arith.addf %185, %262 : vector<8x512xf32>
    %264 = vector.extract_strided_slice %263 {offsets = [0, 0], sizes = [8, 384], strides = [1, 1]} : vector<8x512xf32> to vector<8x384xf32>
    %265 = arith.negf %264 : vector<8x384xf32>
    %266 = math.exp %265 : vector<8x384xf32>
    %cst_84 = arith.constant 1.000000e+00 : f32
    %267 = vector.broadcast %cst_84 : f32 to vector<8x384xf32>
    %268 = arith.addf %267, %266 : vector<8x384xf32>
    %269 = arith.divf %267, %268 : vector<8x384xf32>
    %270 = vector.extract_strided_slice %263 {offsets = [0, 384], sizes = [8, 128], strides = [1, 1]} : vector<8x512xf32> to vector<8x128xf32>
    %271 = math.tanh %270 : vector<8x128xf32>
    %272 = vector.extract_strided_slice %269 {offsets = [0, 0], sizes = [8, 128], strides = [1, 1]} : vector<8x384xf32> to vector<8x128xf32>
    %273 = vector.extract_strided_slice %269 {offsets = [0, 128], sizes = [8, 128], strides = [1, 1]} : vector<8x384xf32> to vector<8x128xf32>
    %274 = vector.extract_strided_slice %269 {offsets = [0, 256], sizes = [8, 128], strides = [1, 1]} : vector<8x384xf32> to vector<8x128xf32>
    %275 = arith.mulf %273, %223 : vector<8x128xf32>
    %276 = arith.mulf %272, %271 : vector<8x128xf32>
    %277 = arith.addf %275, %276 : vector<8x128xf32>
    %278 = math.tanh %277 : vector<8x128xf32>
    %279 = arith.mulf %274, %278 : vector<8x128xf32>
    %280 = arith.truncf %259 : vector<8x128xf32> to vector<8x128xbf16>
    %c0_85 = arith.constant 0 : index
    %c0_86 = arith.constant 0 : index
    %281 = vector.load %arg8[%c0_85, %c0_86] : memref<128x128xbf16, #tpu.memory_space<vmem>>, vector<128x128xbf16>
    %cst_87 = arith.constant dense<0.000000e+00> : vector<8x128xf32>
    %282 = tpu.matmul %280, %281, %cst_87 {dimension_numbers = #tpu.dot_dimension_numbers<[1], [0], [0], [1], [0, 0, 1, 1], [], []>} : vector<8x128xbf16>, vector<128x128xbf16>, vector<8x128xf32> -> vector<8x128xf32>
    %c0_88 = arith.constant 0 : index
    %c0_89 = arith.constant 0 : index
    %283 = vector.load %arg9[%c0_88, %c0_89] : memref<1x128xf32, #tpu.memory_space<vmem>>, vector<1x128xf32>
    %284 = vector.broadcast %283 : vector<1x128xf32> to vector<8x128xf32>
    %285 = arith.addf %282, %284 : vector<8x128xf32>
    %c8_90 = arith.constant 8 : index
    %c0_91 = arith.constant 0 : index
    %286 = vector.load %arg12[%c8_90, %c0_91] : memref<64x128xf32, #tpu.memory_space<vmem>>, vector<8x128xf32>
    tpu.vector_store %arg12[%c8_90, %c0_91], %285 {strides = array<i32>} : memref<64x128xf32, #tpu.memory_space<vmem>>, vector<8x128xf32>,
    %287 = arith.truncf %279 : vector<8x128xf32> to vector<8x128xbf16>
    %c0_92 = arith.constant 0 : index
    %c0_93 = arith.constant 0 : index
    %288 = vector.load %arg10[%c0_92, %c0_93] : memref<128x128xbf16, #tpu.memory_space<vmem>>, vector<128x128xbf16>
    %cst_94 = arith.constant dense<0.000000e+00> : vector<8x128xf32>
    %289 = tpu.matmul %287, %288, %cst_94 {dimension_numbers = #tpu.dot_dimension_numbers<[1], [0], [0], [1], [0, 0, 1, 1], [], []>} : vector<8x128xbf16>, vector<128x128xbf16>, vector<8x128xf32> -> vector<8x128xf32>
    %c0_95 = arith.constant 0 : index
    %c0_96 = arith.constant 0 : index
    %290 = vector.load %arg11[%c0_95, %c0_96] : memref<1x128xf32, #tpu.memory_space<vmem>>, vector<1x128xf32>
    %291 = vector.broadcast %290 : vector<1x128xf32> to vector<8x128xf32>
    %292 = arith.addf %289, %291 : vector<8x128xf32>
    %c8_97 = arith.constant 8 : index
    %c0_98 = arith.constant 0 : index
    %293 = vector.load %arg13[%c8_97, %c0_98] : memref<64x128xf32, #tpu.memory_space<vmem>>, vector<8x128xf32>
    tpu.vector_store %arg13[%c8_97, %c0_98], %292 {strides = array<i32>} : memref<64x128xf32, #tpu.memory_space<vmem>>, vector<8x128xf32>,
    %294 = arith.truncf %259 : vector<8x128xf32> to vector<8x128xbf16>
    %c0_99 = arith.constant 0 : index
    %c0_100 = arith.constant 0 : index
    %295 = vector.load %arg4[%c0_99, %c0_100] : memref<128x512xbf16, #tpu.memory_space<vmem>>, vector<128x512xbf16>
    %cst_101 = arith.constant dense<0.000000e+00> : vector<8x512xf32>
    %296 = tpu.matmul %294, %295, %cst_101 {dimension_numbers = #tpu.dot_dimension_numbers<[1], [0], [0], [1], [0, 0, 1, 1], [], []>} : vector<8x128xbf16>, vector<128x512xbf16>, vector<8x512xf32> -> vector<8x512xf32>
    %297 = arith.addf %184, %296 : vector<8x512xf32>
    %298 = vector.extract_strided_slice %297 {offsets = [0, 0], sizes = [8, 384], strides = [1, 1]} : vector<8x512xf32> to vector<8x384xf32>
    %299 = arith.negf %298 : vector<8x384xf32>
    %300 = math.exp %299 : vector<8x384xf32>
    %cst_102 = arith.constant 1.000000e+00 : f32
    %301 = vector.broadcast %cst_102 : f32 to vector<8x384xf32>
    %302 = arith.addf %301, %300 : vector<8x384xf32>
    %303 = arith.divf %301, %302 : vector<8x384xf32>
    %304 = vector.extract_strided_slice %297 {offsets = [0, 384], sizes = [8, 128], strides = [1, 1]} : vector<8x512xf32> to vector<8x128xf32>
    %305 = math.tanh %304 : vector<8x128xf32>
    %306 = vector.extract_strided_slice %303 {offsets = [0, 0], sizes = [8, 128], strides = [1, 1]} : vector<8x384xf32> to vector<8x128xf32>
    %307 = vector.extract_strided_slice %303 {offsets = [0, 128], sizes = [8, 128], strides = [1, 1]} : vector<8x384xf32> to vector<8x128xf32>
    %308 = vector.extract_strided_slice %303 {offsets = [0, 256], sizes = [8, 128], strides = [1, 1]} : vector<8x384xf32> to vector<8x128xf32>
    %309 = arith.mulf %307, %257 : vector<8x128xf32>
    %310 = arith.mulf %306, %305 : vector<8x128xf32>
    %311 = arith.addf %309, %310 : vector<8x128xf32>
    %312 = math.tanh %311 : vector<8x128xf32>
    %313 = arith.mulf %308, %312 : vector<8x128xf32>
    %314 = arith.truncf %279 : vector<8x128xf32> to vector<8x128xbf16>
    %c0_103 = arith.constant 0 : index
    %c0_104 = arith.constant 0 : index
    %315 = vector.load %arg5[%c0_103, %c0_104] : memref<128x512xbf16, #tpu.memory_space<vmem>>, vector<128x512xbf16>
    %cst_105 = arith.constant dense<0.000000e+00> : vector<8x512xf32>
    %316 = tpu.matmul %314, %315, %cst_105 {dimension_numbers = #tpu.dot_dimension_numbers<[1], [0], [0], [1], [0, 0, 1, 1], [], []>} : vector<8x128xbf16>, vector<128x512xbf16>, vector<8x512xf32> -> vector<8x512xf32>
    %317 = arith.addf %185, %316 : vector<8x512xf32>
    %318 = vector.extract_strided_slice %317 {offsets = [0, 0], sizes = [8, 384], strides = [1, 1]} : vector<8x512xf32> to vector<8x384xf32>
    %319 = arith.negf %318 : vector<8x384xf32>
    %320 = math.exp %319 : vector<8x384xf32>
    %cst_106 = arith.constant 1.000000e+00 : f32
    %321 = vector.broadcast %cst_106 : f32 to vector<8x384xf32>
    %322 = arith.addf %321, %320 : vector<8x384xf32>
    %323 = arith.divf %321, %322 : vector<8x384xf32>
    %324 = vector.extract_strided_slice %317 {offsets = [0, 384], sizes = [8, 128], strides = [1, 1]} : vector<8x512xf32> to vector<8x128xf32>
    %325 = math.tanh %324 : vector<8x128xf32>
    %326 = vector.extract_strided_slice %323 {offsets = [0, 0], sizes = [8, 128], strides = [1, 1]} : vector<8x384xf32> to vector<8x128xf32>
    %327 = vector.extract_strided_slice %323 {offsets = [0, 128], sizes = [8, 128], strides = [1, 1]} : vector<8x384xf32> to vector<8x128xf32>
    %328 = vector.extract_strided_slice %323 {offsets = [0, 256], sizes = [8, 128], strides = [1, 1]} : vector<8x384xf32> to vector<8x128xf32>
    %329 = arith.mulf %327, %277 : vector<8x128xf32>
    %330 = arith.mulf %326, %325 : vector<8x128xf32>
    %331 = arith.addf %329, %330 : vector<8x128xf32>
    %332 = math.tanh %331 : vector<8x128xf32>
    %333 = arith.mulf %328, %332 : vector<8x128xf32>
    %334 = arith.truncf %313 : vector<8x128xf32> to vector<8x128xbf16>
    %c0_107 = arith.constant 0 : index
    %c0_108 = arith.constant 0 : index
    %335 = vector.load %arg8[%c0_107, %c0_108] : memref<128x128xbf16, #tpu.memory_space<vmem>>, vector<128x128xbf16>
    %cst_109 = arith.constant dense<0.000000e+00> : vector<8x128xf32>
    %336 = tpu.matmul %334, %335, %cst_109 {dimension_numbers = #tpu.dot_dimension_numbers<[1], [0], [0], [1], [0, 0, 1, 1], [], []>} : vector<8x128xbf16>, vector<128x128xbf16>, vector<8x128xf32> -> vector<8x128xf32>
    %c0_110 = arith.constant 0 : index
    %c0_111 = arith.constant 0 : index
    %337 = vector.load %arg9[%c0_110, %c0_111] : memref<1x128xf32, #tpu.memory_space<vmem>>, vector<1x128xf32>
    %338 = vector.broadcast %337 : vector<1x128xf32> to vector<8x128xf32>
    %339 = arith.addf %336, %338 : vector<8x128xf32>
    %c16_112 = arith.constant 16 : index
    %c0_113 = arith.constant 0 : index
    %340 = vector.load %arg12[%c16_112, %c0_113] : memref<64x128xf32, #tpu.memory_space<vmem>>, vector<8x128xf32>
    tpu.vector_store %arg12[%c16_112, %c0_113], %339 {strides = array<i32>} : memref<64x128xf32, #tpu.memory_space<vmem>>, vector<8x128xf32>,
    %341 = arith.truncf %333 : vector<8x128xf32> to vector<8x128xbf16>
    %c0_114 = arith.constant 0 : index
    %c0_115 = arith.constant 0 : index
    %342 = vector.load %arg10[%c0_114, %c0_115] : memref<128x128xbf16, #tpu.memory_space<vmem>>, vector<128x128xbf16>
    %cst_116 = arith.constant dense<0.000000e+00> : vector<8x128xf32>
    %343 = tpu.matmul %341, %342, %cst_116 {dimension_numbers = #tpu.dot_dimension_numbers<[1], [0], [0], [1], [0, 0, 1, 1], [], []>} : vector<8x128xbf16>, vector<128x128xbf16>, vector<8x128xf32> -> vector<8x128xf32>
    %c0_117 = arith.constant 0 : index
    %c0_118 = arith.constant 0 : index
    %344 = vector.load %arg11[%c0_117, %c0_118] : memref<1x128xf32, #tpu.memory_space<vmem>>, vector<1x128xf32>
    %345 = vector.broadcast %344 : vector<1x128xf32> to vector<8x128xf32>
    %346 = arith.addf %343, %345 : vector<8x128xf32>
    %c16_119 = arith.constant 16 : index
    %c0_120 = arith.constant 0 : index
    %347 = vector.load %arg13[%c16_119, %c0_120] : memref<64x128xf32, #tpu.memory_space<vmem>>, vector<8x128xf32>
    tpu.vector_store %arg13[%c16_119, %c0_120], %346 {strides = array<i32>} : memref<64x128xf32, #tpu.memory_space<vmem>>, vector<8x128xf32>,
    %348 = arith.truncf %313 : vector<8x128xf32> to vector<8x128xbf16>
    %c0_121 = arith.constant 0 : index
    %c0_122 = arith.constant 0 : index
    %349 = vector.load %arg4[%c0_121, %c0_122] : memref<128x512xbf16, #tpu.memory_space<vmem>>, vector<128x512xbf16>
    %cst_123 = arith.constant dense<0.000000e+00> : vector<8x512xf32>
    %350 = tpu.matmul %348, %349, %cst_123 {dimension_numbers = #tpu.dot_dimension_numbers<[1], [0], [0], [1], [0, 0, 1, 1], [], []>} : vector<8x128xbf16>, vector<128x512xbf16>, vector<8x512xf32> -> vector<8x512xf32>
    %351 = arith.addf %184, %350 : vector<8x512xf32>
    %352 = vector.extract_strided_slice %351 {offsets = [0, 0], sizes = [8, 384], strides = [1, 1]} : vector<8x512xf32> to vector<8x384xf32>
    %353 = arith.negf %352 : vector<8x384xf32>
    %354 = math.exp %353 : vector<8x384xf32>
    %cst_124 = arith.constant 1.000000e+00 : f32
    %355 = vector.broadcast %cst_124 : f32 to vector<8x384xf32>
    %356 = arith.addf %355, %354 : vector<8x384xf32>
    %357 = arith.divf %355, %356 : vector<8x384xf32>
    %358 = vector.extract_strided_slice %351 {offsets = [0, 384], sizes = [8, 128], strides = [1, 1]} : vector<8x512xf32> to vector<8x128xf32>
    %359 = math.tanh %358 : vector<8x128xf32>
    %360 = vector.extract_strided_slice %357 {offsets = [0, 0], sizes = [8, 128], strides = [1, 1]} : vector<8x384xf32> to vector<8x128xf32>
    %361 = vector.extract_strided_slice %357 {offsets = [0, 128], sizes = [8, 128], strides = [1, 1]} : vector<8x384xf32> to vector<8x128xf32>
    %362 = vector.extract_strided_slice %357 {offsets = [0, 256], sizes = [8, 128], strides = [1, 1]} : vector<8x384xf32> to vector<8x128xf32>
    %363 = arith.mulf %361, %311 : vector<8x128xf32>
    %364 = arith.mulf %360, %359 : vector<8x128xf32>
    %365 = arith.addf %363, %364 : vector<8x128xf32>
    %366 = math.tanh %365 : vector<8x128xf32>
    %367 = arith.mulf %362, %366 : vector<8x128xf32>
    %368 = arith.truncf %333 : vector<8x128xf32> to vector<8x128xbf16>
    %c0_125 = arith.constant 0 : index
    %c0_126 = arith.constant 0 : index
    %369 = vector.load %arg5[%c0_125, %c0_126] : memref<128x512xbf16, #tpu.memory_space<vmem>>, vector<128x512xbf16>
    %cst_127 = arith.constant dense<0.000000e+00> : vector<8x512xf32>
    %370 = tpu.matmul %368, %369, %cst_127 {dimension_numbers = #tpu.dot_dimension_numbers<[1], [0], [0], [1], [0, 0, 1, 1], [], []>} : vector<8x128xbf16>, vector<128x512xbf16>, vector<8x512xf32> -> vector<8x512xf32>
    %371 = arith.addf %185, %370 : vector<8x512xf32>
    %372 = vector.extract_strided_slice %371 {offsets = [0, 0], sizes = [8, 384], strides = [1, 1]} : vector<8x512xf32> to vector<8x384xf32>
    %373 = arith.negf %372 : vector<8x384xf32>
    %374 = math.exp %373 : vector<8x384xf32>
    %cst_128 = arith.constant 1.000000e+00 : f32
    %375 = vector.broadcast %cst_128 : f32 to vector<8x384xf32>
    %376 = arith.addf %375, %374 : vector<8x384xf32>
    %377 = arith.divf %375, %376 : vector<8x384xf32>
    %378 = vector.extract_strided_slice %371 {offsets = [0, 384], sizes = [8, 128], strides = [1, 1]} : vector<8x512xf32> to vector<8x128xf32>
    %379 = math.tanh %378 : vector<8x128xf32>
    %380 = vector.extract_strided_slice %377 {offsets = [0, 0], sizes = [8, 128], strides = [1, 1]} : vector<8x384xf32> to vector<8x128xf32>
    %381 = vector.extract_strided_slice %377 {offsets = [0, 128], sizes = [8, 128], strides = [1, 1]} : vector<8x384xf32> to vector<8x128xf32>
    %382 = vector.extract_strided_slice %377 {offsets = [0, 256], sizes = [8, 128], strides = [1, 1]} : vector<8x384xf32> to vector<8x128xf32>
    %383 = arith.mulf %381, %331 : vector<8x128xf32>
    %384 = arith.mulf %380, %379 : vector<8x128xf32>
    %385 = arith.addf %383, %384 : vector<8x128xf32>
    %386 = math.tanh %385 : vector<8x128xf32>
    %387 = arith.mulf %382, %386 : vector<8x128xf32>
    %388 = arith.truncf %367 : vector<8x128xf32> to vector<8x128xbf16>
    %c0_129 = arith.constant 0 : index
    %c0_130 = arith.constant 0 : index
    %389 = vector.load %arg8[%c0_129, %c0_130] : memref<128x128xbf16, #tpu.memory_space<vmem>>, vector<128x128xbf16>
    %cst_131 = arith.constant dense<0.000000e+00> : vector<8x128xf32>
    %390 = tpu.matmul %388, %389, %cst_131 {dimension_numbers = #tpu.dot_dimension_numbers<[1], [0], [0], [1], [0, 0, 1, 1], [], []>} : vector<8x128xbf16>, vector<128x128xbf16>, vector<8x128xf32> -> vector<8x128xf32>
    %c0_132 = arith.constant 0 : index
    %c0_133 = arith.constant 0 : index
    %391 = vector.load %arg9[%c0_132, %c0_133] : memref<1x128xf32, #tpu.memory_space<vmem>>, vector<1x128xf32>
    %392 = vector.broadcast %391 : vector<1x128xf32> to vector<8x128xf32>
    %393 = arith.addf %390, %392 : vector<8x128xf32>
    %c24_134 = arith.constant 24 : index
    %c0_135 = arith.constant 0 : index
    %394 = vector.load %arg12[%c24_134, %c0_135] : memref<64x128xf32, #tpu.memory_space<vmem>>, vector<8x128xf32>
    tpu.vector_store %arg12[%c24_134, %c0_135], %393 {strides = array<i32>} : memref<64x128xf32, #tpu.memory_space<vmem>>, vector<8x128xf32>,
    %395 = arith.truncf %387 : vector<8x128xf32> to vector<8x128xbf16>
    %c0_136 = arith.constant 0 : index
    %c0_137 = arith.constant 0 : index
    %396 = vector.load %arg10[%c0_136, %c0_137] : memref<128x128xbf16, #tpu.memory_space<vmem>>, vector<128x128xbf16>
    %cst_138 = arith.constant dense<0.000000e+00> : vector<8x128xf32>
    %397 = tpu.matmul %395, %396, %cst_138 {dimension_numbers = #tpu.dot_dimension_numbers<[1], [0], [0], [1], [0, 0, 1, 1], [], []>} : vector<8x128xbf16>, vector<128x128xbf16>, vector<8x128xf32> -> vector<8x128xf32>
    %c0_139 = arith.constant 0 : index
    %c0_140 = arith.constant 0 : index
    %398 = vector.load %arg11[%c0_139, %c0_140] : memref<1x128xf32, #tpu.memory_space<vmem>>, vector<1x128xf32>
    %399 = vector.broadcast %398 : vector<1x128xf32> to vector<8x128xf32>
    %400 = arith.addf %397, %399 : vector<8x128xf32>
    %c24_141 = arith.constant 24 : index
    %c0_142 = arith.constant 0 : index
    %401 = vector.load %arg13[%c24_141, %c0_142] : memref<64x128xf32, #tpu.memory_space<vmem>>, vector<8x128xf32>
    tpu.vector_store %arg13[%c24_141, %c0_142], %400 {strides = array<i32>} : memref<64x128xf32, #tpu.memory_space<vmem>>, vector<8x128xf32>,
    %402 = arith.truncf %367 : vector<8x128xf32> to vector<8x128xbf16>
    %c0_143 = arith.constant 0 : index
    %c0_144 = arith.constant 0 : index
    %403 = vector.load %arg4[%c0_143, %c0_144] : memref<128x512xbf16, #tpu.memory_space<vmem>>, vector<128x512xbf16>
    %cst_145 = arith.constant dense<0.000000e+00> : vector<8x512xf32>
    %404 = tpu.matmul %402, %403, %cst_145 {dimension_numbers = #tpu.dot_dimension_numbers<[1], [0], [0], [1], [0, 0, 1, 1], [], []>} : vector<8x128xbf16>, vector<128x512xbf16>, vector<8x512xf32> -> vector<8x512xf32>
    %405 = arith.addf %184, %404 : vector<8x512xf32>
    %406 = vector.extract_strided_slice %405 {offsets = [0, 0], sizes = [8, 384], strides = [1, 1]} : vector<8x512xf32> to vector<8x384xf32>
    %407 = arith.negf %406 : vector<8x384xf32>
    %408 = math.exp %407 : vector<8x384xf32>
    %cst_146 = arith.constant 1.000000e+00 : f32
    %409 = vector.broadcast %cst_146 : f32 to vector<8x384xf32>
    %410 = arith.addf %409, %408 : vector<8x384xf32>
    %411 = arith.divf %409, %410 : vector<8x384xf32>
    %412 = vector.extract_strided_slice %405 {offsets = [0, 384], sizes = [8, 128], strides = [1, 1]} : vector<8x512xf32> to vector<8x128xf32>
    %413 = math.tanh %412 : vector<8x128xf32>
    %414 = vector.extract_strided_slice %411 {offsets = [0, 0], sizes = [8, 128], strides = [1, 1]} : vector<8x384xf32> to vector<8x128xf32>
    %415 = vector.extract_strided_slice %411 {offsets = [0, 128], sizes = [8, 128], strides = [1, 1]} : vector<8x384xf32> to vector<8x128xf32>
    %416 = vector.extract_strided_slice %411 {offsets = [0, 256], sizes = [8, 128], strides = [1, 1]} : vector<8x384xf32> to vector<8x128xf32>
    %417 = arith.mulf %415, %365 : vector<8x128xf32>
    %418 = arith.mulf %414, %413 : vector<8x128xf32>
    %419 = arith.addf %417, %418 : vector<8x128xf32>
    %420 = math.tanh %419 : vector<8x128xf32>
    %421 = arith.mulf %416, %420 : vector<8x128xf32>
    %422 = arith.truncf %387 : vector<8x128xf32> to vector<8x128xbf16>
    %c0_147 = arith.constant 0 : index
    %c0_148 = arith.constant 0 : index
    %423 = vector.load %arg5[%c0_147, %c0_148] : memref<128x512xbf16, #tpu.memory_space<vmem>>, vector<128x512xbf16>
    %cst_149 = arith.constant dense<0.000000e+00> : vector<8x512xf32>
    %424 = tpu.matmul %422, %423, %cst_149 {dimension_numbers = #tpu.dot_dimension_numbers<[1], [0], [0], [1], [0, 0, 1, 1], [], []>} : vector<8x128xbf16>, vector<128x512xbf16>, vector<8x512xf32> -> vector<8x512xf32>
    %425 = arith.addf %185, %424 : vector<8x512xf32>
    %426 = vector.extract_strided_slice %425 {offsets = [0, 0], sizes = [8, 384], strides = [1, 1]} : vector<8x512xf32> to vector<8x384xf32>
    %427 = arith.negf %426 : vector<8x384xf32>
    %428 = math.exp %427 : vector<8x384xf32>
    %cst_150 = arith.constant 1.000000e+00 : f32
    %429 = vector.broadcast %cst_150 : f32 to vector<8x384xf32>
    %430 = arith.addf %429, %428 : vector<8x384xf32>
    %431 = arith.divf %429, %430 : vector<8x384xf32>
    %432 = vector.extract_strided_slice %425 {offsets = [0, 384], sizes = [8, 128], strides = [1, 1]} : vector<8x512xf32> to vector<8x128xf32>
    %433 = math.tanh %432 : vector<8x128xf32>
    %434 = vector.extract_strided_slice %431 {offsets = [0, 0], sizes = [8, 128], strides = [1, 1]} : vector<8x384xf32> to vector<8x128xf32>
    %435 = vector.extract_strided_slice %431 {offsets = [0, 128], sizes = [8, 128], strides = [1, 1]} : vector<8x384xf32> to vector<8x128xf32>
    %436 = vector.extract_strided_slice %431 {offsets = [0, 256], sizes = [8, 128], strides = [1, 1]} : vector<8x384xf32> to vector<8x128xf32>
    %437 = arith.mulf %435, %385 : vector<8x128xf32>
    %438 = arith.mulf %434, %433 : vector<8x128xf32>
    %439 = arith.addf %437, %438 : vector<8x128xf32>
    %440 = math.tanh %439 : vector<8x128xf32>
    %441 = arith.mulf %436, %440 : vector<8x128xf32>
    %442 = arith.truncf %421 : vector<8x128xf32> to vector<8x128xbf16>
    %c0_151 = arith.constant 0 : index
    %c0_152 = arith.constant 0 : index
    %443 = vector.load %arg8[%c0_151, %c0_152] : memref<128x128xbf16, #tpu.memory_space<vmem>>, vector<128x128xbf16>
    %cst_153 = arith.constant dense<0.000000e+00> : vector<8x128xf32>
    %444 = tpu.matmul %442, %443, %cst_153 {dimension_numbers = #tpu.dot_dimension_numbers<[1], [0], [0], [1], [0, 0, 1, 1], [], []>} : vector<8x128xbf16>, vector<128x128xbf16>, vector<8x128xf32> -> vector<8x128xf32>
    %c0_154 = arith.constant 0 : index
    %c0_155 = arith.constant 0 : index
    %445 = vector.load %arg9[%c0_154, %c0_155] : memref<1x128xf32, #tpu.memory_space<vmem>>, vector<1x128xf32>
    %446 = vector.broadcast %445 : vector<1x128xf32> to vector<8x128xf32>
    %447 = arith.addf %444, %446 : vector<8x128xf32>
    %c32_156 = arith.constant 32 : index
    %c0_157 = arith.constant 0 : index
    %448 = vector.load %arg12[%c32_156, %c0_157] : memref<64x128xf32, #tpu.memory_space<vmem>>, vector<8x128xf32>
    tpu.vector_store %arg12[%c32_156, %c0_157], %447 {strides = array<i32>} : memref<64x128xf32, #tpu.memory_space<vmem>>, vector<8x128xf32>,
    %449 = arith.truncf %441 : vector<8x128xf32> to vector<8x128xbf16>
    %c0_158 = arith.constant 0 : index
    %c0_159 = arith.constant 0 : index
    %450 = vector.load %arg10[%c0_158, %c0_159] : memref<128x128xbf16, #tpu.memory_space<vmem>>, vector<128x128xbf16>
    %cst_160 = arith.constant dense<0.000000e+00> : vector<8x128xf32>
    %451 = tpu.matmul %449, %450, %cst_160 {dimension_numbers = #tpu.dot_dimension_numbers<[1], [0], [0], [1], [0, 0, 1, 1], [], []>} : vector<8x128xbf16>, vector<128x128xbf16>, vector<8x128xf32> -> vector<8x128xf32>
    %c0_161 = arith.constant 0 : index
    %c0_162 = arith.constant 0 : index
    %452 = vector.load %arg11[%c0_161, %c0_162] : memref<1x128xf32, #tpu.memory_space<vmem>>, vector<1x128xf32>
    %453 = vector.broadcast %452 : vector<1x128xf32> to vector<8x128xf32>
    %454 = arith.addf %451, %453 : vector<8x128xf32>
    %c32_163 = arith.constant 32 : index
    %c0_164 = arith.constant 0 : index
    %455 = vector.load %arg13[%c32_163, %c0_164] : memref<64x128xf32, #tpu.memory_space<vmem>>, vector<8x128xf32>
    tpu.vector_store %arg13[%c32_163, %c0_164], %454 {strides = array<i32>} : memref<64x128xf32, #tpu.memory_space<vmem>>, vector<8x128xf32>,
    %456 = arith.truncf %421 : vector<8x128xf32> to vector<8x128xbf16>
    %c0_165 = arith.constant 0 : index
    %c0_166 = arith.constant 0 : index
    %457 = vector.load %arg4[%c0_165, %c0_166] : memref<128x512xbf16, #tpu.memory_space<vmem>>, vector<128x512xbf16>
    %cst_167 = arith.constant dense<0.000000e+00> : vector<8x512xf32>
    %458 = tpu.matmul %456, %457, %cst_167 {dimension_numbers = #tpu.dot_dimension_numbers<[1], [0], [0], [1], [0, 0, 1, 1], [], []>} : vector<8x128xbf16>, vector<128x512xbf16>, vector<8x512xf32> -> vector<8x512xf32>
    %459 = arith.addf %184, %458 : vector<8x512xf32>
    %460 = vector.extract_strided_slice %459 {offsets = [0, 0], sizes = [8, 384], strides = [1, 1]} : vector<8x512xf32> to vector<8x384xf32>
    %461 = arith.negf %460 : vector<8x384xf32>
    %462 = math.exp %461 : vector<8x384xf32>
    %cst_168 = arith.constant 1.000000e+00 : f32
    %463 = vector.broadcast %cst_168 : f32 to vector<8x384xf32>
    %464 = arith.addf %463, %462 : vector<8x384xf32>
    %465 = arith.divf %463, %464 : vector<8x384xf32>
    %466 = vector.extract_strided_slice %459 {offsets = [0, 384], sizes = [8, 128], strides = [1, 1]} : vector<8x512xf32> to vector<8x128xf32>
    %467 = math.tanh %466 : vector<8x128xf32>
    %468 = vector.extract_strided_slice %465 {offsets = [0, 0], sizes = [8, 128], strides = [1, 1]} : vector<8x384xf32> to vector<8x128xf32>
    %469 = vector.extract_strided_slice %465 {offsets = [0, 128], sizes = [8, 128], strides = [1, 1]} : vector<8x384xf32> to vector<8x128xf32>
    %470 = vector.extract_strided_slice %465 {offsets = [0, 256], sizes = [8, 128], strides = [1, 1]} : vector<8x384xf32> to vector<8x128xf32>
    %471 = arith.mulf %469, %419 : vector<8x128xf32>
    %472 = arith.mulf %468, %467 : vector<8x128xf32>
    %473 = arith.addf %471, %472 : vector<8x128xf32>
    %474 = math.tanh %473 : vector<8x128xf32>
    %475 = arith.mulf %470, %474 : vector<8x128xf32>
    %476 = arith.truncf %441 : vector<8x128xf32> to vector<8x128xbf16>
    %c0_169 = arith.constant 0 : index
    %c0_170 = arith.constant 0 : index
    %477 = vector.load %arg5[%c0_169, %c0_170] : memref<128x512xbf16, #tpu.memory_space<vmem>>, vector<128x512xbf16>
    %cst_171 = arith.constant dense<0.000000e+00> : vector<8x512xf32>
    %478 = tpu.matmul %476, %477, %cst_171 {dimension_numbers = #tpu.dot_dimension_numbers<[1], [0], [0], [1], [0, 0, 1, 1], [], []>} : vector<8x128xbf16>, vector<128x512xbf16>, vector<8x512xf32> -> vector<8x512xf32>
    %479 = arith.addf %185, %478 : vector<8x512xf32>
    %480 = vector.extract_strided_slice %479 {offsets = [0, 0], sizes = [8, 384], strides = [1, 1]} : vector<8x512xf32> to vector<8x384xf32>
    %481 = arith.negf %480 : vector<8x384xf32>
    %482 = math.exp %481 : vector<8x384xf32>
    %cst_172 = arith.constant 1.000000e+00 : f32
    %483 = vector.broadcast %cst_172 : f32 to vector<8x384xf32>
    %484 = arith.addf %483, %482 : vector<8x384xf32>
    %485 = arith.divf %483, %484 : vector<8x384xf32>
    %486 = vector.extract_strided_slice %479 {offsets = [0, 384], sizes = [8, 128], strides = [1, 1]} : vector<8x512xf32> to vector<8x128xf32>
    %487 = math.tanh %486 : vector<8x128xf32>
    %488 = vector.extract_strided_slice %485 {offsets = [0, 0], sizes = [8, 128], strides = [1, 1]} : vector<8x384xf32> to vector<8x128xf32>
    %489 = vector.extract_strided_slice %485 {offsets = [0, 128], sizes = [8, 128], strides = [1, 1]} : vector<8x384xf32> to vector<8x128xf32>
    %490 = vector.extract_strided_slice %485 {offsets = [0, 256], sizes = [8, 128], strides = [1, 1]} : vector<8x384xf32> to vector<8x128xf32>
    %491 = arith.mulf %489, %439 : vector<8x128xf32>
    %492 = arith.mulf %488, %487 : vector<8x128xf32>
    %493 = arith.addf %491, %492 : vector<8x128xf32>
    %494 = math.tanh %493 : vector<8x128xf32>
    %495 = arith.mulf %490, %494 : vector<8x128xf32>
    %496 = arith.truncf %475 : vector<8x128xf32> to vector<8x128xbf16>
    %c0_173 = arith.constant 0 : index
    %c0_174 = arith.constant 0 : index
    %497 = vector.load %arg8[%c0_173, %c0_174] : memref<128x128xbf16, #tpu.memory_space<vmem>>, vector<128x128xbf16>
    %cst_175 = arith.constant dense<0.000000e+00> : vector<8x128xf32>
    %498 = tpu.matmul %496, %497, %cst_175 {dimension_numbers = #tpu.dot_dimension_numbers<[1], [0], [0], [1], [0, 0, 1, 1], [], []>} : vector<8x128xbf16>, vector<128x128xbf16>, vector<8x128xf32> -> vector<8x128xf32>
    %c0_176 = arith.constant 0 : index
    %c0_177 = arith.constant 0 : index
    %499 = vector.load %arg9[%c0_176, %c0_177] : memref<1x128xf32, #tpu.memory_space<vmem>>, vector<1x128xf32>
    %500 = vector.broadcast %499 : vector<1x128xf32> to vector<8x128xf32>
    %501 = arith.addf %498, %500 : vector<8x128xf32>
    %c40_178 = arith.constant 40 : index
    %c0_179 = arith.constant 0 : index
    %502 = vector.load %arg12[%c40_178, %c0_179] : memref<64x128xf32, #tpu.memory_space<vmem>>, vector<8x128xf32>
    tpu.vector_store %arg12[%c40_178, %c0_179], %501 {strides = array<i32>} : memref<64x128xf32, #tpu.memory_space<vmem>>, vector<8x128xf32>,
    %503 = arith.truncf %495 : vector<8x128xf32> to vector<8x128xbf16>
    %c0_180 = arith.constant 0 : index
    %c0_181 = arith.constant 0 : index
    %504 = vector.load %arg10[%c0_180, %c0_181] : memref<128x128xbf16, #tpu.memory_space<vmem>>, vector<128x128xbf16>
    %cst_182 = arith.constant dense<0.000000e+00> : vector<8x128xf32>
    %505 = tpu.matmul %503, %504, %cst_182 {dimension_numbers = #tpu.dot_dimension_numbers<[1], [0], [0], [1], [0, 0, 1, 1], [], []>} : vector<8x128xbf16>, vector<128x128xbf16>, vector<8x128xf32> -> vector<8x128xf32>
    %c0_183 = arith.constant 0 : index
    %c0_184 = arith.constant 0 : index
    %506 = vector.load %arg11[%c0_183, %c0_184] : memref<1x128xf32, #tpu.memory_space<vmem>>, vector<1x128xf32>
    %507 = vector.broadcast %506 : vector<1x128xf32> to vector<8x128xf32>
    %508 = arith.addf %505, %507 : vector<8x128xf32>
    %c40_185 = arith.constant 40 : index
    %c0_186 = arith.constant 0 : index
    %509 = vector.load %arg13[%c40_185, %c0_186] : memref<64x128xf32, #tpu.memory_space<vmem>>, vector<8x128xf32>
    tpu.vector_store %arg13[%c40_185, %c0_186], %508 {strides = array<i32>} : memref<64x128xf32, #tpu.memory_space<vmem>>, vector<8x128xf32>,
    %510 = arith.truncf %475 : vector<8x128xf32> to vector<8x128xbf16>
    %c0_187 = arith.constant 0 : index
    %c0_188 = arith.constant 0 : index
    %511 = vector.load %arg4[%c0_187, %c0_188] : memref<128x512xbf16, #tpu.memory_space<vmem>>, vector<128x512xbf16>
    %cst_189 = arith.constant dense<0.000000e+00> : vector<8x512xf32>
    %512 = tpu.matmul %510, %511, %cst_189 {dimension_numbers = #tpu.dot_dimension_numbers<[1], [0], [0], [1], [0, 0, 1, 1], [], []>} : vector<8x128xbf16>, vector<128x512xbf16>, vector<8x512xf32> -> vector<8x512xf32>
    %513 = arith.addf %184, %512 : vector<8x512xf32>
    %514 = vector.extract_strided_slice %513 {offsets = [0, 0], sizes = [8, 384], strides = [1, 1]} : vector<8x512xf32> to vector<8x384xf32>
    %515 = arith.negf %514 : vector<8x384xf32>
    %516 = math.exp %515 : vector<8x384xf32>
    %cst_190 = arith.constant 1.000000e+00 : f32
    %517 = vector.broadcast %cst_190 : f32 to vector<8x384xf32>
    %518 = arith.addf %517, %516 : vector<8x384xf32>
    %519 = arith.divf %517, %518 : vector<8x384xf32>
    %520 = vector.extract_strided_slice %513 {offsets = [0, 384], sizes = [8, 128], strides = [1, 1]} : vector<8x512xf32> to vector<8x128xf32>
    %521 = math.tanh %520 : vector<8x128xf32>
    %522 = vector.extract_strided_slice %519 {offsets = [0, 0], sizes = [8, 128], strides = [1, 1]} : vector<8x384xf32> to vector<8x128xf32>
    %523 = vector.extract_strided_slice %519 {offsets = [0, 128], sizes = [8, 128], strides = [1, 1]} : vector<8x384xf32> to vector<8x128xf32>
    %524 = vector.extract_strided_slice %519 {offsets = [0, 256], sizes = [8, 128], strides = [1, 1]} : vector<8x384xf32> to vector<8x128xf32>
    %525 = arith.mulf %523, %473 : vector<8x128xf32>
    %526 = arith.mulf %522, %521 : vector<8x128xf32>
    %527 = arith.addf %525, %526 : vector<8x128xf32>
    %528 = math.tanh %527 : vector<8x128xf32>
    %529 = arith.mulf %524, %528 : vector<8x128xf32>
    %530 = arith.truncf %495 : vector<8x128xf32> to vector<8x128xbf16>
    %c0_191 = arith.constant 0 : index
    %c0_192 = arith.constant 0 : index
    %531 = vector.load %arg5[%c0_191, %c0_192] : memref<128x512xbf16, #tpu.memory_space<vmem>>, vector<128x512xbf16>
    %cst_193 = arith.constant dense<0.000000e+00> : vector<8x512xf32>
    %532 = tpu.matmul %530, %531, %cst_193 {dimension_numbers = #tpu.dot_dimension_numbers<[1], [0], [0], [1], [0, 0, 1, 1], [], []>} : vector<8x128xbf16>, vector<128x512xbf16>, vector<8x512xf32> -> vector<8x512xf32>
    %533 = arith.addf %185, %532 : vector<8x512xf32>
    %534 = vector.extract_strided_slice %533 {offsets = [0, 0], sizes = [8, 384], strides = [1, 1]} : vector<8x512xf32> to vector<8x384xf32>
    %535 = arith.negf %534 : vector<8x384xf32>
    %536 = math.exp %535 : vector<8x384xf32>
    %cst_194 = arith.constant 1.000000e+00 : f32
    %537 = vector.broadcast %cst_194 : f32 to vector<8x384xf32>
    %538 = arith.addf %537, %536 : vector<8x384xf32>
    %539 = arith.divf %537, %538 : vector<8x384xf32>
    %540 = vector.extract_strided_slice %533 {offsets = [0, 384], sizes = [8, 128], strides = [1, 1]} : vector<8x512xf32> to vector<8x128xf32>
    %541 = math.tanh %540 : vector<8x128xf32>
    %542 = vector.extract_strided_slice %539 {offsets = [0, 0], sizes = [8, 128], strides = [1, 1]} : vector<8x384xf32> to vector<8x128xf32>
    %543 = vector.extract_strided_slice %539 {offsets = [0, 128], sizes = [8, 128], strides = [1, 1]} : vector<8x384xf32> to vector<8x128xf32>
    %544 = vector.extract_strided_slice %539 {offsets = [0, 256], sizes = [8, 128], strides = [1, 1]} : vector<8x384xf32> to vector<8x128xf32>
    %545 = arith.mulf %543, %493 : vector<8x128xf32>
    %546 = arith.mulf %542, %541 : vector<8x128xf32>
    %547 = arith.addf %545, %546 : vector<8x128xf32>
    %548 = math.tanh %547 : vector<8x128xf32>
    %549 = arith.mulf %544, %548 : vector<8x128xf32>
    %550 = arith.truncf %529 : vector<8x128xf32> to vector<8x128xbf16>
    %c0_195 = arith.constant 0 : index
    %c0_196 = arith.constant 0 : index
    %551 = vector.load %arg8[%c0_195, %c0_196] : memref<128x128xbf16, #tpu.memory_space<vmem>>, vector<128x128xbf16>
    %cst_197 = arith.constant dense<0.000000e+00> : vector<8x128xf32>
    %552 = tpu.matmul %550, %551, %cst_197 {dimension_numbers = #tpu.dot_dimension_numbers<[1], [0], [0], [1], [0, 0, 1, 1], [], []>} : vector<8x128xbf16>, vector<128x128xbf16>, vector<8x128xf32> -> vector<8x128xf32>
    %c0_198 = arith.constant 0 : index
    %c0_199 = arith.constant 0 : index
    %553 = vector.load %arg9[%c0_198, %c0_199] : memref<1x128xf32, #tpu.memory_space<vmem>>, vector<1x128xf32>
    %554 = vector.broadcast %553 : vector<1x128xf32> to vector<8x128xf32>
    %555 = arith.addf %552, %554 : vector<8x128xf32>
    %c48_200 = arith.constant 48 : index
    %c0_201 = arith.constant 0 : index
    %556 = vector.load %arg12[%c48_200, %c0_201] : memref<64x128xf32, #tpu.memory_space<vmem>>, vector<8x128xf32>
    tpu.vector_store %arg12[%c48_200, %c0_201], %555 {strides = array<i32>} : memref<64x128xf32, #tpu.memory_space<vmem>>, vector<8x128xf32>,
    %557 = arith.truncf %549 : vector<8x128xf32> to vector<8x128xbf16>
    %c0_202 = arith.constant 0 : index
    %c0_203 = arith.constant 0 : index
    %558 = vector.load %arg10[%c0_202, %c0_203] : memref<128x128xbf16, #tpu.memory_space<vmem>>, vector<128x128xbf16>
    %cst_204 = arith.constant dense<0.000000e+00> : vector<8x128xf32>
    %559 = tpu.matmul %557, %558, %cst_204 {dimension_numbers = #tpu.dot_dimension_numbers<[1], [0], [0], [1], [0, 0, 1, 1], [], []>} : vector<8x128xbf16>, vector<128x128xbf16>, vector<8x128xf32> -> vector<8x128xf32>
    %c0_205 = arith.constant 0 : index
    %c0_206 = arith.constant 0 : index
    %560 = vector.load %arg11[%c0_205, %c0_206] : memref<1x128xf32, #tpu.memory_space<vmem>>, vector<1x128xf32>
    %561 = vector.broadcast %560 : vector<1x128xf32> to vector<8x128xf32>
    %562 = arith.addf %559, %561 : vector<8x128xf32>
    %c48_207 = arith.constant 48 : index
    %c0_208 = arith.constant 0 : index
    %563 = vector.load %arg13[%c48_207, %c0_208] : memref<64x128xf32, #tpu.memory_space<vmem>>, vector<8x128xf32>
    tpu.vector_store %arg13[%c48_207, %c0_208], %562 {strides = array<i32>} : memref<64x128xf32, #tpu.memory_space<vmem>>, vector<8x128xf32>,
    %564 = arith.truncf %529 : vector<8x128xf32> to vector<8x128xbf16>
    %c0_209 = arith.constant 0 : index
    %c0_210 = arith.constant 0 : index
    %565 = vector.load %arg4[%c0_209, %c0_210] : memref<128x512xbf16, #tpu.memory_space<vmem>>, vector<128x512xbf16>
    %cst_211 = arith.constant dense<0.000000e+00> : vector<8x512xf32>
    %566 = tpu.matmul %564, %565, %cst_211 {dimension_numbers = #tpu.dot_dimension_numbers<[1], [0], [0], [1], [0, 0, 1, 1], [], []>} : vector<8x128xbf16>, vector<128x512xbf16>, vector<8x512xf32> -> vector<8x512xf32>
    %567 = arith.addf %184, %566 : vector<8x512xf32>
    %568 = vector.extract_strided_slice %567 {offsets = [0, 0], sizes = [8, 384], strides = [1, 1]} : vector<8x512xf32> to vector<8x384xf32>
    %569 = arith.negf %568 : vector<8x384xf32>
    %570 = math.exp %569 : vector<8x384xf32>
    %cst_212 = arith.constant 1.000000e+00 : f32
    %571 = vector.broadcast %cst_212 : f32 to vector<8x384xf32>
    %572 = arith.addf %571, %570 : vector<8x384xf32>
    %573 = arith.divf %571, %572 : vector<8x384xf32>
    %574 = vector.extract_strided_slice %567 {offsets = [0, 384], sizes = [8, 128], strides = [1, 1]} : vector<8x512xf32> to vector<8x128xf32>
    %575 = math.tanh %574 : vector<8x128xf32>
    %576 = vector.extract_strided_slice %573 {offsets = [0, 0], sizes = [8, 128], strides = [1, 1]} : vector<8x384xf32> to vector<8x128xf32>
    %577 = vector.extract_strided_slice %573 {offsets = [0, 128], sizes = [8, 128], strides = [1, 1]} : vector<8x384xf32> to vector<8x128xf32>
    %578 = vector.extract_strided_slice %573 {offsets = [0, 256], sizes = [8, 128], strides = [1, 1]} : vector<8x384xf32> to vector<8x128xf32>
    %579 = arith.mulf %577, %527 : vector<8x128xf32>
    %580 = arith.mulf %576, %575 : vector<8x128xf32>
    %581 = arith.addf %579, %580 : vector<8x128xf32>
    %582 = math.tanh %581 : vector<8x128xf32>
    %583 = arith.mulf %578, %582 : vector<8x128xf32>
    %584 = arith.truncf %549 : vector<8x128xf32> to vector<8x128xbf16>
    %c0_213 = arith.constant 0 : index
    %c0_214 = arith.constant 0 : index
    %585 = vector.load %arg5[%c0_213, %c0_214] : memref<128x512xbf16, #tpu.memory_space<vmem>>, vector<128x512xbf16>
    %cst_215 = arith.constant dense<0.000000e+00> : vector<8x512xf32>
    %586 = tpu.matmul %584, %585, %cst_215 {dimension_numbers = #tpu.dot_dimension_numbers<[1], [0], [0], [1], [0, 0, 1, 1], [], []>} : vector<8x128xbf16>, vector<128x512xbf16>, vector<8x512xf32> -> vector<8x512xf32>
    %587 = arith.addf %185, %586 : vector<8x512xf32>
    %588 = vector.extract_strided_slice %587 {offsets = [0, 0], sizes = [8, 384], strides = [1, 1]} : vector<8x512xf32> to vector<8x384xf32>
    %589 = arith.negf %588 : vector<8x384xf32>
    %590 = math.exp %589 : vector<8x384xf32>
    %cst_216 = arith.constant 1.000000e+00 : f32
    %591 = vector.broadcast %cst_216 : f32 to vector<8x384xf32>
    %592 = arith.addf %591, %590 : vector<8x384xf32>
    %593 = arith.divf %591, %592 : vector<8x384xf32>
    %594 = vector.extract_strided_slice %587 {offsets = [0, 384], sizes = [8, 128], strides = [1, 1]} : vector<8x512xf32> to vector<8x128xf32>
    %595 = math.tanh %594 : vector<8x128xf32>
    %596 = vector.extract_strided_slice %593 {offsets = [0, 0], sizes = [8, 128], strides = [1, 1]} : vector<8x384xf32> to vector<8x128xf32>
    %597 = vector.extract_strided_slice %593 {offsets = [0, 128], sizes = [8, 128], strides = [1, 1]} : vector<8x384xf32> to vector<8x128xf32>
    %598 = vector.extract_strided_slice %593 {offsets = [0, 256], sizes = [8, 128], strides = [1, 1]} : vector<8x384xf32> to vector<8x128xf32>
    %599 = arith.mulf %597, %547 : vector<8x128xf32>
    %600 = arith.mulf %596, %595 : vector<8x128xf32>
    %601 = arith.addf %599, %600 : vector<8x128xf32>
    %602 = math.tanh %601 : vector<8x128xf32>
    %603 = arith.mulf %598, %602 : vector<8x128xf32>
    %604 = arith.truncf %583 : vector<8x128xf32> to vector<8x128xbf16>
    %c0_217 = arith.constant 0 : index
    %c0_218 = arith.constant 0 : index
    %605 = vector.load %arg8[%c0_217, %c0_218] : memref<128x128xbf16, #tpu.memory_space<vmem>>, vector<128x128xbf16>
    %cst_219 = arith.constant dense<0.000000e+00> : vector<8x128xf32>
    %606 = tpu.matmul %604, %605, %cst_219 {dimension_numbers = #tpu.dot_dimension_numbers<[1], [0], [0], [1], [0, 0, 1, 1], [], []>} : vector<8x128xbf16>, vector<128x128xbf16>, vector<8x128xf32> -> vector<8x128xf32>
    %c0_220 = arith.constant 0 : index
    %c0_221 = arith.constant 0 : index
    %607 = vector.load %arg9[%c0_220, %c0_221] : memref<1x128xf32, #tpu.memory_space<vmem>>, vector<1x128xf32>
    %608 = vector.broadcast %607 : vector<1x128xf32> to vector<8x128xf32>
    %609 = arith.addf %606, %608 : vector<8x128xf32>
    %c56_222 = arith.constant 56 : index
    %c0_223 = arith.constant 0 : index
    %610 = vector.load %arg12[%c56_222, %c0_223] : memref<64x128xf32, #tpu.memory_space<vmem>>, vector<8x128xf32>
    tpu.vector_store %arg12[%c56_222, %c0_223], %609 {strides = array<i32>} : memref<64x128xf32, #tpu.memory_space<vmem>>, vector<8x128xf32>,
    %611 = arith.truncf %603 : vector<8x128xf32> to vector<8x128xbf16>
    %c0_224 = arith.constant 0 : index
    %c0_225 = arith.constant 0 : index
    %612 = vector.load %arg10[%c0_224, %c0_225] : memref<128x128xbf16, #tpu.memory_space<vmem>>, vector<128x128xbf16>
    %cst_226 = arith.constant dense<0.000000e+00> : vector<8x128xf32>
    %613 = tpu.matmul %611, %612, %cst_226 {dimension_numbers = #tpu.dot_dimension_numbers<[1], [0], [0], [1], [0, 0, 1, 1], [], []>} : vector<8x128xbf16>, vector<128x128xbf16>, vector<8x128xf32> -> vector<8x128xf32>
    %c0_227 = arith.constant 0 : index
    %c0_228 = arith.constant 0 : index
    %614 = vector.load %arg11[%c0_227, %c0_228] : memref<1x128xf32, #tpu.memory_space<vmem>>, vector<1x128xf32>
    %615 = vector.broadcast %614 : vector<1x128xf32> to vector<8x128xf32>
    %616 = arith.addf %613, %615 : vector<8x128xf32>
    %c56_229 = arith.constant 56 : index
    %c0_230 = arith.constant 0 : index
    %617 = vector.load %arg13[%c56_229, %c0_230] : memref<64x128xf32, #tpu.memory_space<vmem>>, vector<8x128xf32>
    tpu.vector_store %arg13[%c56_229, %c0_230], %616 {strides = array<i32>} : memref<64x128xf32, #tpu.memory_space<vmem>>, vector<8x128xf32>,
    return
  }
}

</mosaic_0001>

<bundles_post_ra>
// kernel: lstmae_predictor_forward.1
= control target key start
LH: loop header
LB: loop body
LE: loop exit
PB: predicated region body
PF: predicated region fallthrough
CT: control target
= control target key end

     0   :  { %19 = vsyncpa [#allocation4], 0  ;;  %s13810_s0 = inlined_call_operand.vmem [shape: f32[8,8,128], index: 0, kind: input, shape index: {}]   ;;  %s13811_s1 = inlined_call_operand.hbm [shape: bf16[128,512], index: 1, kind: input, shape index: {}]   ;;  %s13812_s2 = inlined_call_operand.hbm [shape: bf16[128,512], index: 2, kind: input, shape index: {}]   ;;  %s13813_s3 = inlined_call_operand.vmem [shape: f32[1,512], index: 3, kind: input, shape index: {}]   ;;  %s13814_s4 = inlined_call_operand.hbm [shape: bf16[128,512], index: 4, kind: input, shape index: {}]   ;;  %s13815_s5 = inlined_call_operand.hbm [shape: bf16[128,512], index: 5, kind: input, shape index: {}]   ;;  %s13816_s6 = inlined_call_operand.hbm [shape: bf16[128,1024], index: 6, kind: input, shape index: {}]   ;;  %s13817_s7 = inlined_call_operand.vmem [shape: f32[1,1024], index: 7, kind: input, shape index: {}]   ;;  %s13818_s8 = inlined_call_operand.vmem [shape: bf16[128,128], index: 8, kind: input, shape index: {}]   ;;  %s13819_s9 = inlined_call_operand.vmem [shape: f32[1,128], index: 9, kind: input, shape index: {}]   ;;  %s13820_s10 = inlined_call_operand.hbm [shape: bf16[128,128], index: 10, kind: input, shape index: {}]   ;;  %s13821_s11 = inlined_call_operand.vmem [shape: f32[1,128], index: 11, kind: input, shape index: {}]   ;;  %s13822_s12 = inlined_call_operand.vmem [shape: f32[64,128], index: 12, kind: output, shape index: {0}]   ;;  %s13823_s13 = inlined_call_operand.vmem [shape: f32[64,128], index: 13, kind: output, shape index: {1}]  }
   0x1   :  { %20 = vsyncpa [#allocation6], 0 }
   0x2   :  { %21 = vsyncpa [#allocation9], 0 }
   0x3   :  { %22 = vsyncpa [#allocation12], 0  ;;  %s11371_s25 = smov [#allocation5]   ;;  %s11372_s27 = smov [#allocation8]  }
   0x4   :  { %s42_s26 = sshll.u32 %s11371_s25, 4  ;;  %s68_s28 = sshll.u32 %s11372_s27, 4  ;;  %s43_s26 = int_to_ptr.vmem [resolvable:$true] %s42_s26  ;;  %s69_s28 = int_to_ptr.vmem [resolvable:$true] %s68_s28 }
   0x5   :  { %s11251_s29 = scalar_lea.vmem %s43_s26, 4096  ;;  %p11256_p1 = scmp.lt.s32.totalorder %s43_s26, %s43_s26 }
   0x6   :  { %p11252_p0 = scmp.ne.s32.totalorder %s43_s26, %s11251_s29  ;;  %p11257_p2 = scmp.lt.s32.totalorder %s11251_s29, %s11251_s29 }
   0x8   :  { %p11258_p3 = por %p11257_p2, %p11256_p1 }
   0xa   :  { %p11259_p4 = pnand %p11258_p3, %p11252_p0 }
   0xc   :  { %11262 = shalt.err (!%p11259_p4)
}
   0xd   :  { %s11373_s30 = smov 256   ;;  %s11374_s14 = smov 16  }
   0xe   :  { %48 = dma.hbm_to_vmem [thread:$0]  %s13812_s2, 4096, %s43_s26, [#allocation6], %s11373_s30, %s11373_s30, %s11374_s14  }
   0xf   :  { %s11271_s17 = scalar_lea.vmem %s69_s28, 4096  ;;  %p11276_p6 = scmp.lt.s32.totalorder %s69_s28, %s69_s28 }
  0x10   :  { %p11272_p5 = scmp.ne.s32.totalorder %s69_s28, %s11271_s17  ;;  %p11277_p7 = scmp.lt.s32.totalorder %s11271_s17, %s11271_s17 }
  0x12   :  { %p11278_p8 = por %p11277_p7, %p11276_p6 }
  0x14   :  { %p11279_p9 = pnand %p11278_p8, %p11272_p5 }
  0x16   :  { %11282 = shalt.err (!%p11279_p9)
}
  0x17   :  { %74 = dma.hbm_to_vmem [thread:$0]  %s13815_s5, 4096, %s69_s28, [#allocation9], %s11373_s30, %s11373_s30, %s11374_s14  }
  0x18   :  { %s11375_s20 = smov [#allocation3]   ;;  %s11376_s22 = smov [#allocation7]  }
  0x19   :  { %s30_s21 = sshll.u32 %s11375_s20, 4  ;;  %s56_s23 = sshll.u32 %s11376_s22, 4  ;;  %s31_s21 = int_to_ptr.vmem [resolvable:$true] %s30_s21  ;;  %s57_s23 = int_to_ptr.vmem [resolvable:$true] %s56_s23 }
  0x1a   :  { %s11291_s2 = scalar_lea.vmem %s31_s21, 4096  ;;  %p11296_p11 = scmp.lt.s32.totalorder %s31_s21, %s31_s21 }
  0x1b   :  { %p11292_p10 = scmp.ne.s32.totalorder %s31_s21, %s11291_s2  ;;  %p11297_p12 = scmp.lt.s32.totalorder %s11291_s2, %s11291_s2 }
  0x1d   :  { %p11298_p13 = por %p11297_p12, %p11296_p11 }
  0x1f   :  { %p11299_p0 = pnand %p11298_p13, %p11292_p10 }
  0x21   :  { %11302 = shalt.err (!%p11299_p0)
}
  0x22   :  { %36 = dma.hbm_to_vmem [thread:$0]  %s13811_s1, 4096, %s31_s21, [#allocation4], %s11373_s30, %s11373_s30, %s11374_s14  }
  0x23   :  { %s11311_s5 = scalar_lea.vmem %s57_s23, 4096  ;;  %p11316_p2 = scmp.lt.s32.totalorder %s57_s23, %s57_s23 }
  0x24   :  { %p11312_p1 = scmp.ne.s32.totalorder %s57_s23, %s11311_s5  ;;  %p11317_p3 = scmp.lt.s32.totalorder %s11311_s5, %s11311_s5 }
  0x26   :  { %p11318_p4 = por %p11317_p3, %p11316_p2 }
  0x28   :  { %p11319_p5 = pnand %p11318_p4, %p11312_p1 }
  0x2a   :  { %11322 = shalt.err (!%p11319_p5)
}
  0x2b   :  { %62 = dma.hbm_to_vmem [thread:$0]  %s13814_s4, 4096, %s57_s23, [#allocation6], %s11373_s30, %s11373_s30, %s11374_s14  }
  0x2c   :  { %s11377_s28 = smov [#allocation10]  }
  0x2d   :  { %s80_s29 = sshll.u32 %s11377_s28, 4  ;;  %s81_s29 = int_to_ptr.vmem [resolvable:$true] %s80_s29 }
  0x2e   :  { %s11331_s15 = scalar_lea.vmem %s81_s29, 8192  ;;  %p11336_p7 = scmp.lt.s32.totalorder %s81_s29, %s81_s29 }
  0x2f   :  { %p11332_p6 = scmp.ne.s32.totalorder %s81_s29, %s11331_s15  ;;  %p11337_p8 = scmp.lt.s32.totalorder %s11331_s15, %s11331_s15 }
  0x31   :  { %p11338_p9 = por %p11337_p8, %p11336_p7 }
  0x33   :  { %p11339_p10 = pnand %p11338_p9, %p11332_p6 }
  0x35   :  { %11342 = shalt.err (!%p11339_p10)
}
  0x36   :  { %s11378_s1 = smov 512   ;;  %s11379_s16 = smov 32  }
  0x37   :  { %86 = dma.hbm_to_vmem [thread:$0]  %s13816_s6, 8192, %s81_s29, [#allocation9], %s11378_s1, %s11378_s1, %s11379_s16  }
  0x38   :  { %s11380_s19 = smov [#allocation11]  }
  0x39   :  { %s98_s20 = sshll.u32 %s11380_s19, 4  ;;  %s99_s20 = int_to_ptr.vmem [resolvable:$true] %s98_s20 }
  0x3a   :  { %s11351_s4 = scalar_lea.vmem %s99_s20, 1024  ;;  %p11356_p12 = scmp.lt.s32.totalorder %s99_s20, %s99_s20 }
  0x3b   :  { %p11352_p11 = scmp.ne.s32.totalorder %s99_s20, %s11351_s4  ;;  %p11357_p13 = scmp.lt.s32.totalorder %s11351_s4, %s11351_s4 }
  0x3d   :  { %p11358_p0 = por %p11357_p13, %p11356_p12 }
  0x3f   :  { %p11359_p1 = pnand %p11358_p0, %p11352_p11 }
  0x41   :  { %11362 = shalt.err (!%p11359_p1)
}
  0x42   :  { %s11381_s30 = smov 64   ;;  %s11382_s14 = smov 4  }
  0x43   :  { %104 = dma.hbm_to_vmem [thread:$0]  %s13820_s10, 1024, %s99_s20, [#allocation12], %s11381_s30, %s11381_s30, %s11382_s14  }
  0x44   :  { %11363 = dma.done.wait [#allocation4], 4096  }
  0x45   :  { %11364 = vsyncadd [#allocation4], 4294963200 }
  0x46   :  { %11365 = dma.done.wait [#allocation6], 8192  }
  0x47   :  { %11366 = vsyncadd [#allocation6], 4294959104 }
  0x48   :  { %11367 = dma.done.wait [#allocation9], 12288  }
  0x49   :  { %11368 = vsyncadd [#allocation9], 4294955008 }
  0x4a   :  { %11369 = dma.done.wait [#allocation12], 1024  }
  0x4b   :  { %11370 = vsyncadd [#allocation12], 4294966272  ;;  %v13828_v0 = vmov 0   ;;  %v10219_v1 = vld [vmem:[#allocation3 + $0xe4] ss:$16 sps:$4 sm:$0xff]   ;;  %v127_v34 = vld [vmem:[%s13810_s0 + $0x8] sm:$0xff] }
  0x4c   :  { %384 = vmatprep.mubr.bf16.mxu0 %v13828_v0  ;;  %457 = vmatprep.mubr.bf16.mxu1 %v13828_v0  ;;  %v10221_v2 = vld [vmem:[#allocation3 + $0xec] ss:$16 sps:$4 sm:$0xff]   ;;  %v10223_v3 = vld [vmem:[#allocation3 + $0xe0] ss:$16 sps:$4 sm:$0xff]   ;;  %v10224_v4 = vld [vmem:[#allocation3 + $0xe8] ss:$16 sps:$4 sm:$0xff]  }
  0x4d   :  { %352 = vmatprep.subr.bf16.mxu0 %v10219_v1  ;;  %425 = vmatprep.subr.bf16.mxu1 %v10221_v2  ;;  %v10225_v5 = vld [vmem:[#allocation3 + $0xc4] ss:$16 sps:$4 sm:$0xff]   ;;  %v10227_v6 = vld [vmem:[#allocation3 + $0xcc] ss:$16 sps:$4 sm:$0xff]   ;;  %v10229_v7 = vld [vmem:[#allocation3 + $0xc0] ss:$16 sps:$4 sm:$0xff]  }
  0x4e   :  { %353 = vmatpush1.bf16.msra.mxu0 %v10223_v3  ;;  %426 = vmatpush1.bf16.msra.mxu1 %v10224_v4  ;;  %v10230_v8 = vld [vmem:[#allocation3 + $0xc8] ss:$16 sps:$4 sm:$0xff]   ;;  %v10231_v9 = vld [vmem:[#allocation3 + $0xa4] ss:$16 sps:$4 sm:$0xff]   ;;  %v10233_v10 = vld [vmem:[#allocation3 + $0xac] ss:$16 sps:$4 sm:$0xff]  }
  0x4f   :  { %354 = vmatprep.subr.bf16.mxu0 %v10225_v5  ;;  %427 = vmatprep.subr.bf16.mxu1 %v10227_v6  ;;  %v10235_v11 = vld [vmem:[#allocation3 + $0xa0] ss:$16 sps:$4 sm:$0xff]   ;;  %v10236_v12 = vld [vmem:[#allocation3 + $0xa8] ss:$16 sps:$4 sm:$0xff]   ;;  %v10237_v13 = vld [vmem:[#allocation3 + $0x84] ss:$16 sps:$4 sm:$0xff]  }
  0x50   :  { %v10239_v14 = vld [vmem:[#allocation3 + $0x8c] ss:$16 sps:$4 sm:$0xff]   ;;  %v10241_v15 = vld [vmem:[#allocation3 + $0x80] ss:$16 sps:$4 sm:$0xff]   ;;  %v10242_v16 = vld [vmem:[#allocation3 + $0x88] ss:$16 sps:$4 sm:$0xff]  }
  0x51   :  { %v10243_v17 = vld [vmem:[#allocation3 + $0x64] ss:$16 sps:$4 sm:$0xff]   ;;  %v10245_v18 = vld [vmem:[#allocation3 + $0x6c] ss:$16 sps:$4 sm:$0xff]   ;;  %v10247_v19 = vld [vmem:[#allocation3 + $0x60] ss:$16 sps:$4 sm:$0xff]  }
  0x52   :  { %355 = vmatpush1.bf16.msra.mxu0 %v10229_v7  ;;  %428 = vmatpush1.bf16.msra.mxu1 %v10230_v8  ;;  %v10248_v20 = vld [vmem:[#allocation3 + $0x68] ss:$16 sps:$4 sm:$0xff]   ;;  %v10249_v21 = vld [vmem:[#allocation3 + $0x44] ss:$16 sps:$4 sm:$0xff]   ;;  %v10251_v22 = vld [vmem:[#allocation3 + $0x4c] ss:$16 sps:$4 sm:$0xff]  }
  0x53   :  { %356 = vmatprep.subr.bf16.mxu0 %v10231_v9  ;;  %429 = vmatprep.subr.bf16.mxu1 %v10233_v10  ;;  %v10253_v23 = vld [vmem:[#allocation3 + $0x40] ss:$16 sps:$4 sm:$0xff]   ;;  %v10254_v24 = vld [vmem:[#allocation3 + $0x48] ss:$16 sps:$4 sm:$0xff]   ;;  %v10255_v25 = vld [vmem:[#allocation3 + $0x24] ss:$16 sps:$4 sm:$0xff]  }
  0x54   :  { %v10257_v26 = vld [vmem:[#allocation3 + $0x2c] ss:$16 sps:$4 sm:$0xff]   ;;  %v10259_v27 = vld [vmem:[#allocation3 + $0x20] ss:$16 sps:$4 sm:$0xff]   ;;  %v10260_v28 = vld [vmem:[#allocation3 + $0x28] ss:$16 sps:$4 sm:$0xff]  }
  0x55   :  { %v10261_v29 = vld [vmem:[#allocation3 + $0x4] ss:$16 sps:$4 sm:$0xff]   ;;  %v10263_v30 = vld [vmem:[#allocation3 + $0xc] ss:$16 sps:$4 sm:$0xff]   ;;  %v10265_v31 = vld [vmem:[#allocation3] ss:$16 sps:$4 sm:$0xff]  }
  0x56   :  { %357 = vmatpush1.bf16.msra.mxu0 %v10235_v11  ;;  %430 = vmatpush1.bf16.msra.mxu1 %v10236_v12  ;;  %v10266_v32 = vld [vmem:[#allocation3 + $0x8] ss:$16 sps:$4 sm:$0xff]   ;;  %v126_v33 = vld [vmem:[%s13810_s0] sm:$0xff]  ;;  %v11496_v36 = vld [vmem:[#allocation5 + $0xec] ss:$16 sps:$4 sm:$0xff]   ;;  %vm11385_vm0 = vmmov 0  }
  0x57   :  { %358 = vmatprep.subr.bf16.mxu0 %v10237_v13  ;;  %431 = vmatprep.subr.bf16.mxu1 %v10239_v14  ;;  %v11494_v35 = vld [vmem:[#allocation5 + $0xe4] ss:$16 sps:$4 sm:$0xff]   ;;  %v134_v37 = vpack.c.bf16 %v127_v34, %v126_v33  ;;  %v11498_v38 = vld [vmem:[#allocation5 + $0xe0] ss:$16 sps:$4 sm:$0xff]   ;;  %v11500_v39 = vld [vmem:[#allocation5 + $0xe8] ss:$16 sps:$4 sm:$0xff]   ;;  %v172_v14 = vlaneseq }
  0x58   :  { %v11504_v40 = vld [vmem:[#allocation5 + $0xc4] ss:$16 sps:$4 sm:$0xff]   ;;  %v11506_v41 = vld [vmem:[#allocation5 + $0xcc] ss:$16 sps:$4 sm:$0xff]   ;;  %v11508_v42 = vld [vmem:[#allocation5 + $0xc0] ss:$16 sps:$4 sm:$0xff]  }
  0x59   :  { %v11510_v43 = vld [vmem:[#allocation5 + $0xc8] ss:$16 sps:$4 sm:$0xff]   ;;  %v128_v44 = vld [vmem:[%s13810_s0 + $0x10] sm:$0xff]  ;;  %v11524_v47 = vld [vmem:[#allocation5 + $0xac] ss:$16 sps:$4 sm:$0xff]  }
  0x5a   :  { %359 = vmatpush1.bf16.msra.mxu0 %v10241_v15  ;;  %432 = vmatpush1.bf16.msra.mxu1 %v10242_v16  ;;  %v129_v45 = vld [vmem:[%s13810_s0 + $0x18] sm:$0xff]  ;;  %v11520_v46 = vld [vmem:[#allocation5 + $0xa4] ss:$16 sps:$4 sm:$0xff]   ;;  %v11528_v49 = vld [vmem:[#allocation5 + $0xa0] ss:$16 sps:$4 sm:$0xff]   ;;  %v11614_v15 = vshrl.u32 %v172_v14, 7 }
  0x5b   :  { %360 = vmatprep.subr.bf16.mxu0 %v10243_v17  ;;  %433 = vmatprep.subr.bf16.mxu1 %v10245_v18  ;;  %v135_v48 = vpack.c.bf16 %v129_v45, %v128_v44  ;;  %v11530_v50 = vld [vmem:[#allocation5 + $0xa8] ss:$16 sps:$4 sm:$0xff]   ;;  %v11534_v51 = vld [vmem:[#allocation5 + $0x84] ss:$16 sps:$4 sm:$0xff]   ;;  %v11538_v52 = vld [vmem:[#allocation5 + $0x8c] ss:$16 sps:$4 sm:$0xff]  }
  0x5c   :  { %v11540_v53 = vld [vmem:[#allocation5 + $0x80] ss:$16 sps:$4 sm:$0xff]   ;;  %v11542_v54 = vld [vmem:[#allocation5 + $0x88] ss:$16 sps:$4 sm:$0xff]   ;;  %v11554_v57 = vld [vmem:[#allocation5 + $0x64] ss:$16 sps:$4 sm:$0xff]  }
  0x5d   :  { %v130_v55 = vld [vmem:[%s13810_s0 + $0x20] sm:$0xff]  ;;  %v131_v56 = vld [vmem:[%s13810_s0 + $0x28] sm:$0xff]  ;;  %v132_v3 = vld [vmem:[%s13810_s0 + $0x30] sm:$0xff]  ;;  %13954 = vst [vmem:[#allocation17_spill] sm:$0xff] %v11614_v15  ;;  %v13825_v16 = vsub.s32 2, %v11614_v15  ;;  %v13827_v17 = vsub.s32 0, %v11614_v15 }
  0x5e   :  { %361 = vmatpush1.bf16.msra.mxu0 %v10247_v19  ;;  %434 = vmatpush1.bf16.msra.mxu1 %v10248_v20  ;;  %v11556_v58 = vld [vmem:[#allocation5 + $0x6c] ss:$16 sps:$4 sm:$0xff]   ;;  %v11560_v59 = vld [vmem:[#allocation5 + $0x60] ss:$16 sps:$4 sm:$0xff]   ;;  %v11562_v60 = vld [vmem:[#allocation5 + $0x68] ss:$16 sps:$4 sm:$0xff]   ;;  %v136_v61 = vpack.c.bf16 %v131_v56, %v130_v55 }
  0x5f   :  { %362 = vmatprep.subr.bf16.mxu0 %v10249_v21  ;;  %435 = vmatprep.subr.bf16.mxu1 %v10251_v22  ;;  %v11564_v62 = vld [vmem:[#allocation5 + $0x44] ss:$16 sps:$4 sm:$0xff]   ;;  %v11566_v63 = vld [vmem:[#allocation5 + $0x4c] ss:$16 sps:$4 sm:$0xff]   ;;  %v10301_v1 = vld [vmem:[#allocation5 + $0x40] ss:$16 sps:$4 sm:$0xff]  }
  0x60   :  { %v10302_v2 = vld [vmem:[#allocation5 + $0x48] ss:$16 sps:$4 sm:$0xff]   ;;  %v10303_v5 = vld [vmem:[#allocation5 + $0x24] ss:$16 sps:$4 sm:$0xff]   ;;  %v10305_v6 = vld [vmem:[#allocation5 + $0x2c] ss:$16 sps:$4 sm:$0xff]  }
  0x61   :  { %v133_v4 = vld [vmem:[%s13810_s0 + $0x38] sm:$0xff]  ;;  %v10307_v7 = vld [vmem:[#allocation5 + $0x20] ss:$16 sps:$4 sm:$0xff]   ;;  %v10309_v10 = vld [vmem:[#allocation5 + $0x4] ss:$16 sps:$4 sm:$0xff]  }
  0x62   :  { %363 = vmatpush1.bf16.msra.mxu0 %v10253_v23  ;;  %436 = vmatpush1.bf16.msra.mxu1 %v10254_v24  ;;  %v10308_v8 = vld [vmem:[#allocation5 + $0x28] ss:$16 sps:$4 sm:$0xff]   ;;  %v137_v9 = vpack.c.bf16 %v133_v4, %v132_v3  ;;  %v10311_v11 = vld [vmem:[#allocation5 + $0xc] ss:$16 sps:$4 sm:$0xff]   ;;  %v10313_v12 = vld [vmem:[#allocation5] ss:$16 sps:$4 sm:$0xff]  }
  0x63   :  { %364 = vmatprep.subr.bf16.mxu0 %v10255_v25  ;;  %437 = vmatprep.subr.bf16.mxu1 %v10257_v26  ;;  %v10314_v13 = vld [vmem:[#allocation5 + $0x8] ss:$16 sps:$4 sm:$0xff]   ;;  %v170_v18 = vld [vmem:[%s13813_s3] sm:$0xf] }
  0x64   :  { %v11625_v21 = vrot.slane %v170_v18, %v13825_v16  ;;  %v175_v24 = vrot.slane %v170_v18, %v13827_v17  ;;  %v11804_v16 = vld [vmem:[#allocation5] ss:$16 sps:$4 sm:$0xff]   ;;  %v11810_v17 = vld [vmem:[#allocation5 + $0xe4] ss:$16 sps:$4 sm:$0xff]  }
  0x66   :  { %365 = vmatpush1.bf16.msra.mxu0 %v10259_v27  ;;  %438 = vmatpush1.bf16.msra.mxu1 %v10260_v28  ;;  %v13826_v27 = vsub.s32 1, %v11614_v15  ;;  %v13824_v28 = vsub.s32 3, %v11614_v15 }
  0x67   :  { %366 = vmatprep.subr.bf16.mxu0 %v10261_v29  ;;  %439 = vmatprep.subr.bf16.mxu1 %v10263_v30 }
  0x6a   :  { %367 = vmatpush1.bf16.msra.mxu0 %v10265_v31  ;;  %440 = vmatpush1.bf16.msra.mxu1 %v10266_v32 }
  0x6b   :  { %726 = vmatprep.subr.bf16.mxu0 %v11494_v35  ;;  %767 = vmatprep.subr.bf16.mxu1 %v11496_v36 }
  0x6d   :  { %385 = vmatmul.mubr.bf16.vlgmr.msra.gmra.mxu0 %v134_v37  ;;  %458 = vmatmul.mubr.bf16.vlgmr.msra.gmra.mxu1 %v134_v37 }
  0x6e   :  { %727 = vmatpush1.bf16.msra.mxu0 %v11498_v38  ;;  %768 = vmatpush1.bf16.msra.mxu1 %v11500_v39 }
  0x6f   :  { %728 = vmatprep.subr.bf16.mxu0 %v11504_v40  ;;  %769 = vmatprep.subr.bf16.mxu1 %v11506_v41 }
  0x70   :  { %394 = vmatprep.mubr.bf16.mxu0 %v13828_v0  ;;  %467 = vmatprep.mubr.bf16.mxu1 %v13828_v0 }
  0x72   :  { %729 = vmatpush1.bf16.msra.mxu0 %v11508_v42  ;;  %770 = vmatpush1.bf16.msra.mxu1 %v11510_v43 }
  0x73   :  { %730 = vmatprep.subr.bf16.mxu0 %v11520_v46  ;;  %771 = vmatprep.subr.bf16.mxu1 %v11524_v47 }
  0x75   :  { %395 = vmatmul.mubr.bf16.gmra.mxu0 %v135_v48  ;;  %468 = vmatmul.mubr.bf16.gmra.mxu1 %v135_v48 }
  0x76   :  { %731 = vmatpush1.bf16.msra.mxu0 %v11528_v49  ;;  %772 = vmatpush1.bf16.msra.mxu1 %v11530_v50 }
  0x77   :  { %732 = vmatprep.subr.bf16.mxu0 %v11534_v51  ;;  %773 = vmatprep.subr.bf16.mxu1 %v11538_v52 }
  0x78   :  { %404 = vmatprep.mubr.bf16.mxu0 %v13828_v0  ;;  %477 = vmatprep.mubr.bf16.mxu1 %v13828_v0 }
  0x7a   :  { %733 = vmatpush1.bf16.msra.mxu0 %v11540_v53  ;;  %774 = vmatpush1.bf16.msra.mxu1 %v11542_v54 }
  0x7b   :  { %734 = vmatprep.subr.bf16.mxu0 %v11554_v57  ;;  %775 = vmatprep.subr.bf16.mxu1 %v11556_v58 }
  0x7d   :  { %405 = vmatmul.mubr.bf16.gmra.mxu0 %v136_v61  ;;  %478 = vmatmul.mubr.bf16.gmra.mxu1 %v136_v61 }
  0x7e   :  { %735 = vmatpush1.bf16.msra.mxu0 %v11560_v59  ;;  %776 = vmatpush1.bf16.msra.mxu1 %v11562_v60 }
  0x7f   :  { %736 = vmatprep.subr.bf16.mxu0 %v11564_v62  ;;  %777 = vmatprep.subr.bf16.mxu1 %v11566_v63 }
  0x80   :  { %414 = vmatprep.mubr.bf16.mxu0 %v13828_v0  ;;  %487 = vmatprep.mubr.bf16.mxu1 %v13828_v0 }
  0x82   :  { %737 = vmatpush1.bf16.msra.mxu0 %v10301_v1  ;;  %778 = vmatpush1.bf16.msra.mxu1 %v10302_v2 }
  0x83   :  { %738 = vmatprep.subr.bf16.mxu0 %v10303_v5  ;;  %779 = vmatprep.subr.bf16.mxu1 %v10305_v6 }
  0x85   :  { %415 = vmatmul.mubr.bf16.gmra.mxu0 %v137_v9  ;;  %488 = vmatmul.mubr.bf16.gmra.mxu1 %v137_v9 }
  0x86   :  { %739 = vmatpush1.bf16.msra.mxu0 %v10307_v7  ;;  %780 = vmatpush1.bf16.msra.mxu1 %v10308_v8 }
  0x87   :  { %740 = vmatprep.subr.bf16.mxu0 %v10309_v10  ;;  %781 = vmatprep.subr.bf16.mxu1 %v10311_v11 }
  0x88   :  { %758 = vmatprep.mubr.bf16.mxu0 %v13828_v0  ;;  %799 = vmatprep.mubr.bf16.mxu1 %v13828_v0 }
  0x8a   :  { %741 = vmatpush1.bf16.msra.mxu0 %v10313_v12  ;;  %782 = vmatpush1.bf16.msra.mxu1 %v10314_v13 }
  0x8b   :  { %841 = vmatprep.subr.bf16.mxu0 %v11494_v35  ;;  %882 = vmatprep.subr.bf16.mxu1 %v11496_v36 }
  0x8d   :  { %759 = vmatmul.mubr.bf16.vlgmr.msra.gmra.mxu0 %v13828_v0  ;;  %800 = vmatmul.mubr.bf16.vlgmr.msra.gmra.mxu1 %v13828_v0 }
  0x8e   :  { %842 = vmatpush1.bf16.msra.mxu0 %v11498_v38  ;;  %883 = vmatpush1.bf16.msra.mxu1 %v11500_v39 }
  0x8f   :  { %843 = vmatprep.subr.bf16.mxu0 %v11504_v40  ;;  %884 = vmatprep.subr.bf16.mxu1 %v11506_v41 }
  0x90   :  { %873 = vmatprep.mubr.bf16.mxu0 %v13828_v0  ;;  %914 = vmatprep.mubr.bf16.mxu1 %v13828_v0 }
  0x92   :  { %844 = vmatpush1.bf16.msra.mxu0 %v11508_v42  ;;  %885 = vmatpush1.bf16.msra.mxu1 %v11510_v43 }
  0x93   :  { %845 = vmatprep.subr.bf16.mxu0 %v11520_v46  ;;  %886 = vmatprep.subr.bf16.mxu1 %v11524_v47 }
  0x96   :  { %846 = vmatpush1.bf16.msra.mxu0 %v11528_v49  ;;  %887 = vmatpush1.bf16.msra.mxu1 %v11530_v50 }
  0x97   :  { %847 = vmatprep.subr.bf16.mxu0 %v11534_v51  ;;  %888 = vmatprep.subr.bf16.mxu1 %v11538_v52 }
  0x9a   :  { %848 = vmatpush1.bf16.msra.mxu0 %v11540_v53  ;;  %889 = vmatpush1.bf16.msra.mxu1 %v11542_v54 }
  0x9b   :  { %849 = vmatprep.subr.bf16.mxu0 %v11554_v57  ;;  %890 = vmatprep.subr.bf16.mxu1 %v11556_v58 }
  0x9e   :  { %850 = vmatpush1.bf16.msra.mxu0 %v11560_v59  ;;  %891 = vmatpush1.bf16.msra.mxu1 %v11562_v60 }
  0x9f   :  { %851 = vmatprep.subr.bf16.mxu0 %v11564_v62  ;;  %892 = vmatprep.subr.bf16.mxu1 %v11566_v63 }
  0xa2   :  { %852 = vmatpush1.bf16.msra.mxu0 %v10301_v1  ;;  %893 = vmatpush1.bf16.msra.mxu1 %v10302_v2 }
  0xa3   :  { %853 = vmatprep.subr.bf16.mxu0 %v10303_v5  ;;  %894 = vmatprep.subr.bf16.mxu1 %v10305_v6 }
  0xa6   :  { %854 = vmatpush1.bf16.msra.mxu0 %v10307_v7  ;;  %895 = vmatpush1.bf16.msra.mxu1 %v10308_v8 }
  0xa7   :  { %855 = vmatprep.subr.bf16.mxu0 %v10309_v10  ;;  %896 = vmatprep.subr.bf16.mxu1 %v10311_v11 }
  0xaa   :  { %856 = vmatpush1.bf16.msra.mxu0 %v10313_v12  ;;  %897 = vmatpush1.bf16.msra.mxu1 %v10314_v13 }
  0xab   :  { %956 = vmatprep.subr.bf16.mxu0 %v11494_v35  ;;  %997 = vmatprep.subr.bf16.mxu1 %v11496_v36  ;;  %v11644_v35 = vrot.slane %v170_v18, %v13826_v27  ;;  %v11648_v36 = vrot.slane %v170_v18, %v13824_v28  ;;  %v11801_v28 = vld [vmem:[#allocation5 + $0xc] ss:$16 sps:$4 sm:$0xff]   ;;  %v11807_v27 = vld [vmem:[#allocation5 + $0x8] ss:$16 sps:$4 sm:$0xff]  }
 0x12d   :  { %v386_v19 = vpop.f32.mrf.mxu0  ;;  %v11621_v20 = vpop.f32.mrf.mxu1 }
 0x12e   :  { %v387_v14 = vadd.f32 %v386_v19, %v175_v24 }
 0x12f   :  { %v388_v22 = vpop.f32.mrf.mxu0  ;;  %v11627_v23 = vpop.f32.mrf.mxu1 }
 0x131   :  { %v390_v25 = vpop.f32.mrf.mxu0  ;;  %v463_v26 = vpop.f32.mrf.mxu1 }
 0x132   :  { %v11633_v29 = vadd.f32 %v390_v25, %v175_v24  ;;  %v11636_v30 = vadd.f32 %v463_v26, %v11625_v21  ;;  %v389_v26 = vadd.f32 %v388_v22, %v11644_v35 }
 0x133   :  { %v11638_v31 = vpop.f32.mrf.mxu0  ;;  %v11640_v32 = vpop.f32.mrf.mxu1 }
 0x135   :  { %v396_v33 = vpop.f32.mrf.mxu0  ;;  %v469_v34 = vpop.f32.mrf.mxu1 }
 0x136   :  { %v11650_v37 = vadd.f32 %v396_v33, %v175_v24  ;;  %v11653_v38 = vadd.f32 %v469_v34, %v11625_v21 }
 0x137   :  { %v398_v39 = vpop.f32.mrf.mxu0  ;;  %v471_v40 = vpop.f32.mrf.mxu1 }
 0x138   :  { %v11656_v41 = vadd.f32 %v398_v39, %v11644_v35  ;;  %v11659_v42 = vadd.f32 %v471_v40, %v11648_v36 }
 0x139   :  { %v400_v43 = vpop.f32.mrf.mxu0  ;;  %v473_v44 = vpop.f32.mrf.mxu1 }
 0x13a   :  { %v11661_v45 = vadd.f32 %v400_v43, %v175_v24  ;;  %v11664_v46 = vadd.f32 %v473_v44, %v11625_v21 }
 0x13b   :  { %v11666_v47 = vpop.f32.mrf.mxu0  ;;  %v11668_v48 = vpop.f32.mrf.mxu1 }
 0x13d   :  { %v406_v49 = vpop.f32.mrf.mxu0  ;;  %v479_v50 = vpop.f32.mrf.mxu1 }
 0x13e   :  { %v11670_v51 = vadd.f32 %v406_v49, %v175_v24  ;;  %v11673_v52 = vadd.f32 %v479_v50, %v11625_v21 }
 0x13f   :  { %v408_v53 = vpop.f32.mrf.mxu0  ;;  %v481_v54 = vpop.f32.mrf.mxu1 }
 0x140   :  { %13955 = vst [vmem:[#allocation18_spill] sm:$0xff] %v11670_v51  ;;  %13956 = vst [vmem:[#allocation19_spill] sm:$0xff] %v11673_v52  ;;  %v11676_v55 = vadd.f32 %v408_v53, %v11644_v35  ;;  %v11679_v56 = vadd.f32 %v481_v54, %v11648_v36  ;;  %v466_v52 = vadd.f32 %v11640_v32, %v11648_v36 }
 0x141   :  { %v410_v57 = vpop.f32.mrf.mxu0  ;;  %v483_v58 = vpop.f32.mrf.mxu1 }
 0x142   :  { %13957 = vst [vmem:[#allocation20_spill] sm:$0xff] %v11676_v55  ;;  %13958 = vst [vmem:[#allocation21_spill] sm:$0xff] %v11679_v56  ;;  %v11681_v59 = vadd.f32 %v410_v57, %v175_v24  ;;  %v11684_v60 = vadd.f32 %v483_v58, %v11625_v21  ;;  %v460_v57 = vadd.f32 %v11621_v20, %v11625_v21 }
 0x143   :  { %v11686_v61 = vpop.f32.mrf.mxu0  ;;  %v11688_v62 = vpop.f32.mrf.mxu1 }
 0x144   :  { %13959 = vst [vmem:[#allocation22_spill] sm:$0xff] %v11681_v59  ;;  %13960 = vst [vmem:[#allocation23_spill] sm:$0xff] %v11684_v60 }
 0x145   :  { %13961 = vst [vmem:[#allocation24_spill] sm:$0xff] %v11686_v61  ;;  %13962 = vst [vmem:[#allocation25_spill] sm:$0xff] %v11688_v62  ;;  %v416_v63 = vpop.f32.mrf.mxu0  ;;  %v489_v1 = vpop.f32.mrf.mxu1 }
 0x146   :  { %v11690_v2 = vadd.f32 %v416_v63, %v175_v24  ;;  %v11693_v3 = vadd.f32 %v489_v1, %v11625_v21 }
 0x147   :  { %v418_v4 = vpop.f32.mrf.mxu0  ;;  %v491_v5 = vpop.f32.mrf.mxu1 }
 0x148   :  { %13963 = vst [vmem:[#allocation26_spill] sm:$0xff] %v11690_v2  ;;  %13964 = vst [vmem:[#allocation27_spill] sm:$0xff] %v11693_v3  ;;  %v11696_v6 = vadd.f32 %v418_v4, %v11644_v35  ;;  %v11699_v7 = vadd.f32 %v491_v5, %v11648_v36 }
 0x149   :  { %v420_v8 = vpop.f32.mrf.mxu0  ;;  %v493_v9 = vpop.f32.mrf.mxu1 }
 0x14a   :  { %13965 = vst [vmem:[#allocation28_spill] sm:$0xff] %v11696_v6  ;;  %13966 = vst [vmem:[#allocation29_spill] sm:$0xff] %v11699_v7  ;;  %v11701_v10 = vadd.f32 %v420_v8, %v175_v24  ;;  %v11704_v11 = vadd.f32 %v493_v9, %v11625_v21  ;;  %v462_v24 = vadd.f32 %v11627_v23, %v11648_v36 }
 0x14b   :  { %v11706_v12 = vpop.f32.mrf.mxu0  ;;  %v11708_v13 = vpop.f32.mrf.mxu1 }
 0x14c   :  { %13967 = vst [vmem:[#allocation30_spill] sm:$0xff] %v11701_v10  ;;  %13968 = vst [vmem:[#allocation31_spill] sm:$0xff] %v11704_v11  ;;  %v393_v11 = vadd.f32 %v11638_v31, %v11644_v35 }
 0x14d   :  { %13969 = vst [vmem:[#allocation32_spill] sm:$0xff] %v11706_v12  ;;  %13970 = vst [vmem:[#allocation33_spill] sm:$0xff] %v11708_v13  ;;  %v760_v18 = vpop.f32.mrf.mxu0  ;;  %v801_v25 = vpop.f32.mrf.mxu1 }
 0x14e   :  { %v808_v33 = vadd.f32 %v760_v18, %v387_v14  ;;  %v810_v19 = vadd.f32 %v801_v25, %v460_v57  ;;  %v11741_v57 = vld [vmem:[#allocation5 + $0xac] ss:$16 sps:$4 sm:$0xff]  }
 0x14f   :  { %v762_v34 = vpop.f32.mrf.mxu0  ;;  %v803_v39 = vpop.f32.mrf.mxu1 }
 0x150   :  { %v8948_v40 = vmul.f32 -1.442695, %v808_v33  ;;  %v809_v43 = vadd.f32 %v762_v34, %v389_v26  ;;  %v8950_v22 = vmul.f32 -1.442695, %v810_v19  ;;  %v811_v63 = vadd.f32 %v803_v39, %v462_v24  ;;  %v11744_v19 = vld [vmem:[#allocation5 + $0xa0] ss:$16 sps:$4 sm:$0xff]  }
 0x151   :  { %v764_v44 = vpop.f32.mrf.mxu0  ;;  %v805_v49 = vpop.f32.mrf.mxu1  ;;  %v11747_v24 = vld [vmem:[#allocation5 + $0xa8] ss:$16 sps:$4 sm:$0xff]  }
 0x152   :  { %10827 = vpow2.f32 %v8948_v40  ;;  %v8949_v50 = vmul.f32 -1.442695, %v809_v43  ;;  %v11718_v40 = vld [vmem:[#allocation5 + $0xe0] ss:$16 sps:$4 sm:$0xff]   ;;  %v11721_v43 = vld [vmem:[#allocation5 + $0xe8] ss:$16 sps:$4 sm:$0xff]  }
 0x153   :  { %v765_v53 = vpop.f32.mrf.mxu0  ;;  %v806_v54 = vpop.f32.mrf.mxu1  ;;  %v11724_v44 = vld [vmem:[#allocation5 + $0xc4] ss:$16 sps:$4 sm:$0xff]   ;;  %v11727_v49 = vld [vmem:[#allocation5 + $0xcc] ss:$16 sps:$4 sm:$0xff]  }
 0x154   :  { %10829 = vpow2.f32 %v8949_v50  ;;  %v11732_v50 = vld [vmem:[#allocation5 + $0xc0] ss:$16 sps:$4 sm:$0xff]   ;;  %v11735_v53 = vld [vmem:[#allocation5 + $0xc8] ss:$16 sps:$4 sm:$0xff]   ;;  %v11738_v54 = vld [vmem:[#allocation5 + $0xa4] ss:$16 sps:$4 sm:$0xff]  }
 0x155   :  { %10831 = vpow2.f32 %v8950_v22  ;;  %v11750_v22 = vld [vmem:[#allocation5 + $0x84] ss:$16 sps:$4 sm:$0xff]  }
 0x15f   :  { %v10828_v58 = vpop.eup %10827 }
 0x160   :  { %v821_v1 = vadd.f32 1.0, %v10828_v58  ;;  %v11753_v58 = vld [vmem:[#allocation5 + $0x8c] ss:$16 sps:$4 sm:$0xff]  }
 0x161   :  { %v10830_v4 = vpop.eup %10829 }
 0x162   :  { %10833 = vrcp.f32 %v821_v1  ;;  %v822_v5 = vadd.f32 1.0, %v10830_v4  ;;  %v10832_v8 = vpop.eup %10831  ;;  %v11759_v1 = vld [vmem:[#allocation5 + $0x88] ss:$16 sps:$4 sm:$0xff]   ;;  %v11762_v4 = vld [vmem:[#allocation5 + $0x64] ss:$16 sps:$4 sm:$0xff]  }
 0x163   :  { %10835 = vtanh.f32 %v811_v63  ;;  %v823_v26 = vadd.f32 1.0, %v10832_v8  ;;  %v11756_v63 = vld [vmem:[#allocation5 + $0x80] ss:$16 sps:$4 sm:$0xff]  }
 0x164   :  { %10837 = vrcp.f32 %v822_v5  ;;  %v11765_v5 = vld [vmem:[#allocation5 + $0x6c] ss:$16 sps:$4 sm:$0xff]   ;;  %v11768_v8 = vld [vmem:[#allocation5 + $0x60] ss:$16 sps:$4 sm:$0xff]  }
 0x165   :  { %10839 = vrcp.f32 %v823_v26  ;;  %v11780_v26 = vld [vmem:[#allocation5 + $0x40] ss:$16 sps:$4 sm:$0xff]  }
 0x16f   :  { %v10834_v9 = vpop.eup %10833 }
 0x170   :  { %v10836_v14 = vpop.eup %10835 }
 0x171   :  { %v10838_v18 = vpop.eup %10837  ;;  %v832_v21 = vmul.f32 %v10836_v14, %v10834_v9  ;;  %v11771_v9 = vld [vmem:[#allocation5 + $0x68] ss:$16 sps:$4 sm:$0xff]   ;;  %v11774_v14 = vld [vmem:[#allocation5 + $0x44] ss:$16 sps:$4 sm:$0xff]  }
 0x172   :  { %v831_v20 = vmul.f32 0.0, %v10838_v18  ;;  %v10840_v23 = vpop.eup %10839  ;;  %v11777_v18 = vld [vmem:[#allocation5 + $0x4c] ss:$16 sps:$4 sm:$0xff]  }
 0x174   :  { %v11715_v25 = vadd.f32 %v832_v21, %v831_v20  ;;  %v11783_v20 = vld [vmem:[#allocation5 + $0x48] ss:$16 sps:$4 sm:$0xff]   ;;  %v11786_v21 = vld [vmem:[#allocation5 + $0x24] ss:$16 sps:$4 sm:$0xff]  }
 0x176   :  { %10841 = vtanh.f32 %v11715_v25 }
 0x183   :  { %v10842_v33 = vpop.eup %10841 }
 0x184   :  { %v835_v34 = vmul.f32 %v10842_v33, %v10840_v23  ;;  %v11789_v23 = vld [vmem:[#allocation5 + $0x2c] ss:$16 sps:$4 sm:$0xff]   ;;  %v11792_v33 = vld [vmem:[#allocation5 + $0x20] ss:$16 sps:$4 sm:$0xff]  }
 0x186   :  { %v840_v39 = vpack.c.bf16 %v835_v34, %v835_v34  ;;  %v11795_v34 = vld [vmem:[#allocation5 + $0x28] ss:$16 sps:$4 sm:$0xff]  }
 0x188   :  { %874 = vmatmul.mubr.bf16.vlgmr.msra.gmra.mxu0 %v840_v39  ;;  %915 = vmatmul.mubr.bf16.vlgmr.msra.gmra.mxu1 %v840_v39  ;;  %v11798_v39 = vld [vmem:[#allocation5 + $0x4] ss:$16 sps:$4 sm:$0xff]  }
 0x189   :  { %957 = vmatpush1.bf16.msra.mxu0 %v11718_v40  ;;  %998 = vmatpush1.bf16.msra.mxu1 %v11721_v43 }
 0x18a   :  { %958 = vmatprep.subr.bf16.mxu0 %v11724_v44  ;;  %999 = vmatprep.subr.bf16.mxu1 %v11727_v49 }
 0x18b   :  { %988 = vmatprep.mubr.bf16.mxu0 %v13828_v0  ;;  %1029 = vmatprep.mubr.bf16.mxu1 %v13828_v0  ;;  %v11813_v0 = vld [vmem:[#allocation5 + $0xec] ss:$16 sps:$4 sm:$0xff]  }
 0x18d   :  { %959 = vmatpush1.bf16.msra.mxu0 %v11732_v50  ;;  %1000 = vmatpush1.bf16.msra.mxu1 %v11735_v53 }
 0x18e   :  { %960 = vmatprep.subr.bf16.mxu0 %v11738_v54  ;;  %1001 = vmatprep.subr.bf16.mxu1 %v11741_v57 }
 0x191   :  { %961 = vmatpush1.bf16.msra.mxu0 %v11744_v19  ;;  %1002 = vmatpush1.bf16.msra.mxu1 %v11747_v24 }
 0x192   :  { %962 = vmatprep.subr.bf16.mxu0 %v11750_v22  ;;  %1003 = vmatprep.subr.bf16.mxu1 %v11753_v58 }
 0x195   :  { %963 = vmatpush1.bf16.msra.mxu0 %v11756_v63  ;;  %1004 = vmatpush1.bf16.msra.mxu1 %v11759_v1 }
 0x196   :  { %964 = vmatprep.subr.bf16.mxu0 %v11762_v4  ;;  %1005 = vmatprep.subr.bf16.mxu1 %v11765_v5 }
 0x199   :  { %965 = vmatpush1.bf16.msra.mxu0 %v11768_v8  ;;  %1006 = vmatpush1.bf16.msra.mxu1 %v11771_v9 }
 0x19a   :  { %966 = vmatprep.subr.bf16.mxu0 %v11774_v14  ;;  %1007 = vmatprep.subr.bf16.mxu1 %v11777_v18 }
 0x19d   :  { %967 = vmatpush1.bf16.msra.mxu0 %v11780_v26  ;;  %1008 = vmatpush1.bf16.msra.mxu1 %v11783_v20 }
 0x19e   :  { %968 = vmatprep.subr.bf16.mxu0 %v11786_v21  ;;  %1009 = vmatprep.subr.bf16.mxu1 %v11789_v23 }
 0x1a1   :  { %969 = vmatpush1.bf16.msra.mxu0 %v11792_v33  ;;  %1010 = vmatpush1.bf16.msra.mxu1 %v11795_v34 }
 0x1a2   :  { %970 = vmatprep.subr.bf16.mxu0 %v11798_v39  ;;  %1011 = vmatprep.subr.bf16.mxu1 %v11801_v28 }
 0x1a5   :  { %971 = vmatpush1.bf16.msra.mxu0 %v11804_v16  ;;  %1012 = vmatpush1.bf16.msra.mxu1 %v11807_v27 }
 0x1a6   :  { %1071 = vmatprep.subr.bf16.mxu0 %v11810_v17  ;;  %1112 = vmatprep.subr.bf16.mxu1 %v11813_v0 }
 0x248   :  { %v875_v15 = vpop.f32.mrf.mxu0  ;;  %v916_v13 = vpop.f32.mrf.mxu1 }
 0x249   :  { %v923_v10 = vadd.f32 %v875_v15, %v11633_v29  ;;  %v925_v56 = vadd.f32 %v916_v13, %v11636_v30 }
 0x24a   :  { %v877_v12 = vpop.f32.mrf.mxu0  ;;  %v918_v7 = vpop.f32.mrf.mxu1 }
 0x24b   :  { %v8951_v3 = vmul.f32 -1.442695, %v923_v10  ;;  %v924_v6 = vadd.f32 %v877_v12, %v393_v11  ;;  %v8953_v55 = vmul.f32 -1.442695, %v925_v56  ;;  %v926_v31 = vadd.f32 %v918_v7, %v466_v52 }
 0x24c   :  { %v879_v2 = vpop.f32.mrf.mxu0  ;;  %v920_v62 = vpop.f32.mrf.mxu1  ;;  %v13971_v56 = vmov 0  }
 0x24d   :  { %10843 = vpow2.f32 %v8951_v3  ;;  %v8952_v60 = vmul.f32 -1.442695, %v924_v6 }
 0x24e   :  { %v880_v59 = vpop.f32.mrf.mxu0  ;;  %v921_v61 = vpop.f32.mrf.mxu1 }
 0x24f   :  { %10845 = vpow2.f32 %v8952_v60 }
 0x250   :  { %10847 = vpow2.f32 %v8953_v55 }
 0x251   :  { %10849 = vtanh.f32 %v926_v31 }
 0x25a   :  { %v10844_v51 = vpop.eup %10843 }
 0x25b   :  { %v936_v15 = vadd.f32 1.0, %v10844_v51 }
 0x25c   :  { %v10846_v29 = vpop.eup %10845 }
 0x25d   :  { %10851 = vrcp.f32 %v936_v15  ;;  %v937_v2 = vadd.f32 1.0, %v10846_v29  ;;  %v10848_v62 = vpop.eup %10847 }
 0x25e   :  { %v10850_v3 = vpop.eup %10849  ;;  %v938_v6 = vadd.f32 1.0, %v10848_v62 }
 0x25f   :  { %10853 = vrcp.f32 %v937_v2 }
 0x260   :  { %10855 = vrcp.f32 %v938_v6 }
 0x26a   :  { %v10852_v59 = vpop.eup %10851 }
 0x26b   :  { %v947_v61 = vmul.f32 %v10852_v59, %v10850_v3 }
 0x26c   :  { %v10854_v60 = vpop.eup %10853 }
 0x26d   :  { %v946_v30 = vmul.f32 %v10854_v60, %v11715_v25  ;;  %v10856_v32 = vpop.eup %10855 }
 0x26f   :  { %v11823_v10 = vadd.f32 %v947_v61, %v946_v30 }
 0x271   :  { %10857 = vtanh.f32 %v11823_v10 }
 0x27e   :  { %v10858_v51 = vpop.eup %10857 }
 0x27f   :  { %v950_v52 = vmul.f32 %v10858_v51, %v10856_v32 }
 0x281   :  { %v955_v55 = vpack.c.bf16 %v950_v52, %v950_v52 }
 0x283   :  { %989 = vmatmul.mubr.bf16.vlgmr.msra.gmra.mxu0 %v955_v55  ;;  %1030 = vmatmul.mubr.bf16.vlgmr.msra.gmra.mxu1 %v955_v55 }
 0x284   :  { %1072 = vmatpush1.bf16.msra.mxu0 %v11718_v40  ;;  %1113 = vmatpush1.bf16.msra.mxu1 %v11721_v43 }
 0x285   :  { %1073 = vmatprep.subr.bf16.mxu0 %v11724_v44  ;;  %1114 = vmatprep.subr.bf16.mxu1 %v11727_v49 }
 0x286   :  { %1103 = vmatprep.mubr.bf16.mxu0 %v13971_v56  ;;  %1144 = vmatprep.mubr.bf16.mxu1 %v13971_v56 }
 0x288   :  { %1074 = vmatpush1.bf16.msra.mxu0 %v11732_v50  ;;  %1115 = vmatpush1.bf16.msra.mxu1 %v11735_v53 }
 0x289   :  { %1075 = vmatprep.subr.bf16.mxu0 %v11738_v54  ;;  %1116 = vmatprep.subr.bf16.mxu1 %v11741_v57 }
 0x28c   :  { %1076 = vmatpush1.bf16.msra.mxu0 %v11744_v19  ;;  %1117 = vmatpush1.bf16.msra.mxu1 %v11747_v24 }
 0x28d   :  { %1077 = vmatprep.subr.bf16.mxu0 %v11750_v22  ;;  %1118 = vmatprep.subr.bf16.mxu1 %v11753_v58 }
 0x290   :  { %1078 = vmatpush1.bf16.msra.mxu0 %v11756_v63  ;;  %1119 = vmatpush1.bf16.msra.mxu1 %v11759_v1 }
 0x291   :  { %1079 = vmatprep.subr.bf16.mxu0 %v11762_v4  ;;  %1120 = vmatprep.subr.bf16.mxu1 %v11765_v5 }
 0x294   :  { %1080 = vmatpush1.bf16.msra.mxu0 %v11768_v8  ;;  %1121 = vmatpush1.bf16.msra.mxu1 %v11771_v9 }
 0x295   :  { %1081 = vmatprep.subr.bf16.mxu0 %v11774_v14  ;;  %1122 = vmatprep.subr.bf16.mxu1 %v11777_v18 }
 0x298   :  { %1082 = vmatpush1.bf16.msra.mxu0 %v11780_v26  ;;  %1123 = vmatpush1.bf16.msra.mxu1 %v11783_v20 }
 0x299   :  { %1083 = vmatprep.subr.bf16.mxu0 %v11786_v21  ;;  %1124 = vmatprep.subr.bf16.mxu1 %v11789_v23 }
 0x29c   :  { %1084 = vmatpush1.bf16.msra.mxu0 %v11792_v33  ;;  %1125 = vmatpush1.bf16.msra.mxu1 %v11795_v34 }
 0x29d   :  { %1085 = vmatprep.subr.bf16.mxu0 %v11798_v39  ;;  %1126 = vmatprep.subr.bf16.mxu1 %v11801_v28 }
 0x2a0   :  { %1086 = vmatpush1.bf16.msra.mxu0 %v11804_v16  ;;  %1127 = vmatpush1.bf16.msra.mxu1 %v11807_v27 }
 0x2a1   :  { %1186 = vmatprep.subr.bf16.mxu0 %v11810_v17  ;;  %1227 = vmatprep.subr.bf16.mxu1 %v11813_v0 }
 0x343   :  { %v990_v7 = vpop.f32.mrf.mxu0  ;;  %v1031_v11 = vpop.f32.mrf.mxu1 }
 0x344   :  { %v1038_v12 = vadd.f32 %v990_v7, %v11650_v37  ;;  %v1040_v61 = vadd.f32 %v1031_v11, %v11653_v38 }
 0x345   :  { %v992_v13 = vpop.f32.mrf.mxu0  ;;  %v1033_v25 = vpop.f32.mrf.mxu1 }
 0x346   :  { %v8954_v31 = vmul.f32 -1.442695, %v1038_v12  ;;  %v1039_v15 = vadd.f32 %v992_v13, %v11656_v41  ;;  %v8956_v60 = vmul.f32 -1.442695, %v1040_v61  ;;  %v1041_v6 = vadd.f32 %v1033_v25, %v11659_v42 }
 0x347   :  { %v994_v29 = vpop.f32.mrf.mxu0  ;;  %v1035_v2 = vpop.f32.mrf.mxu1 }
 0x348   :  { %10859 = vpow2.f32 %v8954_v31  ;;  %v8955_v62 = vmul.f32 -1.442695, %v1039_v15  ;;  %v403_v2 = vadd.f32 %v11666_v47, %v11644_v35 }
 0x349   :  { %v995_v3 = vpop.f32.mrf.mxu0  ;;  %v1036_v59 = vpop.f32.mrf.mxu1 }
 0x34a   :  { %10861 = vpow2.f32 %v8955_v62 }
 0x34b   :  { %10863 = vpow2.f32 %v8956_v60 }
 0x34c   :  { %10865 = vtanh.f32 %v1041_v6 }
 0x355   :  { %v10860_v30 = vpop.eup %10859 }
 0x356   :  { %v1051_v32 = vadd.f32 1.0, %v10860_v30 }
 0x357   :  { %v10862_v37 = vpop.eup %10861 }
 0x358   :  { %10867 = vrcp.f32 %v1051_v32  ;;  %v1052_v51 = vadd.f32 1.0, %v10862_v37  ;;  %v10864_v41 = vpop.eup %10863 }
 0x359   :  { %v10866_v52 = vpop.eup %10865  ;;  %v1053_v13 = vadd.f32 1.0, %v10864_v41 }
 0x35a   :  { %10869 = vrcp.f32 %v1052_v51 }
 0x35b   :  { %10871 = vrcp.f32 %v1053_v13 }
 0x365   :  { %v10868_v55 = vpop.eup %10867 }
 0x366   :  { %v1062_v7 = vmul.f32 %v10868_v55, %v10866_v52  ;;  %v476_v52 = vadd.f32 %v11668_v48, %v11648_v36 }
 0x367   :  { %v10870_v12 = vpop.eup %10869 }
 0x368   :  { %v1061_v31 = vmul.f32 %v10870_v12, %v11823_v10  ;;  %v10872_v42 = vpop.eup %10871 }
 0x36a   :  { %v11865_v38 = vadd.f32 %v1062_v7, %v1061_v31 }
 0x36c   :  { %10873 = vtanh.f32 %v11865_v38 }
 0x379   :  { %v10874_v11 = vpop.eup %10873 }
 0x37a   :  { %v1065_v25 = vmul.f32 %v10874_v11, %v10872_v42 }
 0x37c   :  { %v1070_v15 = vpack.c.bf16 %v1065_v25, %v1065_v25 }
 0x37e   :  { %1104 = vmatmul.mubr.bf16.vlgmr.msra.gmra.mxu0 %v1070_v15  ;;  %1145 = vmatmul.mubr.bf16.vlgmr.msra.gmra.mxu1 %v1070_v15 }
 0x37f   :  { %1187 = vmatpush1.bf16.msra.mxu0 %v11718_v40  ;;  %1228 = vmatpush1.bf16.msra.mxu1 %v11721_v43 }
 0x380   :  { %1188 = vmatprep.subr.bf16.mxu0 %v11724_v44  ;;  %1229 = vmatprep.subr.bf16.mxu1 %v11727_v49 }
 0x381   :  { %1218 = vmatprep.mubr.bf16.mxu0 %v13971_v56  ;;  %1259 = vmatprep.mubr.bf16.mxu1 %v13971_v56 }
 0x383   :  { %1189 = vmatpush1.bf16.msra.mxu0 %v11732_v50  ;;  %1230 = vmatpush1.bf16.msra.mxu1 %v11735_v53 }
 0x384   :  { %1190 = vmatprep.subr.bf16.mxu0 %v11738_v54  ;;  %1231 = vmatprep.subr.bf16.mxu1 %v11741_v57 }
 0x387   :  { %1191 = vmatpush1.bf16.msra.mxu0 %v11744_v19  ;;  %1232 = vmatpush1.bf16.msra.mxu1 %v11747_v24 }
 0x388   :  { %1192 = vmatprep.subr.bf16.mxu0 %v11750_v22  ;;  %1233 = vmatprep.subr.bf16.mxu1 %v11753_v58 }
 0x38b   :  { %1193 = vmatpush1.bf16.msra.mxu0 %v11756_v63  ;;  %1234 = vmatpush1.bf16.msra.mxu1 %v11759_v1 }
 0x38c   :  { %1194 = vmatprep.subr.bf16.mxu0 %v11762_v4  ;;  %1235 = vmatprep.subr.bf16.mxu1 %v11765_v5 }
 0x38f   :  { %1195 = vmatpush1.bf16.msra.mxu0 %v11768_v8  ;;  %1236 = vmatpush1.bf16.msra.mxu1 %v11771_v9 }
 0x390   :  { %1196 = vmatprep.subr.bf16.mxu0 %v11774_v14  ;;  %1237 = vmatprep.subr.bf16.mxu1 %v11777_v18 }
 0x393   :  { %1197 = vmatpush1.bf16.msra.mxu0 %v11780_v26  ;;  %1238 = vmatpush1.bf16.msra.mxu1 %v11783_v20 }
 0x394   :  { %1198 = vmatprep.subr.bf16.mxu0 %v11786_v21  ;;  %1239 = vmatprep.subr.bf16.mxu1 %v11789_v23 }
 0x397   :  { %1199 = vmatpush1.bf16.msra.mxu0 %v11792_v33  ;;  %1240 = vmatpush1.bf16.msra.mxu1 %v11795_v34 }
 0x398   :  { %1200 = vmatprep.subr.bf16.mxu0 %v11798_v39  ;;  %1241 = vmatprep.subr.bf16.mxu1 %v11801_v28 }
 0x39b   :  { %1201 = vmatpush1.bf16.msra.mxu0 %v11804_v16  ;;  %1242 = vmatpush1.bf16.msra.mxu1 %v11807_v27 }
 0x39c   :  { %1301 = vmatprep.subr.bf16.mxu0 %v11810_v17  ;;  %1342 = vmatprep.subr.bf16.mxu1 %v11813_v0 }
 0x43e   :  { %v1105_v10 = vpop.f32.mrf.mxu0  ;;  %v1146_v29 = vpop.f32.mrf.mxu1 }
 0x43f   :  { %v1153_v62 = vadd.f32 %v1105_v10, %v11661_v45  ;;  %v1155_v41 = vadd.f32 %v1146_v29, %v11664_v46 }
 0x440   :  { %v1107_v3 = vpop.f32.mrf.mxu0  ;;  %v1148_v59 = vpop.f32.mrf.mxu1 }
 0x441   :  { %v8957_v61 = vmul.f32 -1.442695, %v1153_v62  ;;  %v1154_v60 = vadd.f32 %v1107_v3, %v403_v2  ;;  %v8959_v55 = vmul.f32 -1.442695, %v1155_v41  ;;  %v1156_v47 = vadd.f32 %v1148_v59, %v476_v52 }
 0x442   :  { %v1109_v6 = vpop.f32.mrf.mxu0  ;;  %v1150_v30 = vpop.f32.mrf.mxu1 }
 0x443   :  { %10875 = vpow2.f32 %v8957_v61  ;;  %v8958_v32 = vmul.f32 -1.442695, %v1154_v60  ;;  %v13972_v61 = vld [vmem:[#allocation18_spill] sm:$0xff] }
 0x444   :  { %v1110_v37 = vpop.f32.mrf.mxu0  ;;  %v1151_v51 = vpop.f32.mrf.mxu1 }
 0x445   :  { %10877 = vpow2.f32 %v8958_v32  ;;  %v13973_v37 = vld [vmem:[#allocation20_spill] sm:$0xff] }
 0x446   :  { %10879 = vpow2.f32 %v8959_v55 }
 0x447   :  { %10881 = vtanh.f32 %v1156_v47 }
 0x450   :  { %v10876_v7 = vpop.eup %10875 }
 0x451   :  { %v1166_v45 = vadd.f32 1.0, %v10876_v7 }
 0x452   :  { %v10878_v12 = vpop.eup %10877 }
 0x453   :  { %10883 = vrcp.f32 %v1166_v45  ;;  %v1167_v13 = vadd.f32 1.0, %v10878_v12  ;;  %v10880_v31 = vpop.eup %10879  ;;  %v13974_v45 = vld [vmem:[#allocation19_spill] sm:$0xff] }
 0x454   :  { %v10882_v42 = vpop.eup %10881  ;;  %v1168_v10 = vadd.f32 1.0, %v10880_v31  ;;  %v13975_v31 = vld [vmem:[#allocation21_spill] sm:$0xff] }
 0x455   :  { %10885 = vrcp.f32 %v1167_v13 }
 0x456   :  { %10887 = vrcp.f32 %v1168_v10 }
 0x460   :  { %v10884_v11 = vpop.eup %10883 }
 0x461   :  { %v1177_v25 = vmul.f32 %v10884_v11, %v10882_v42 }
 0x462   :  { %v10886_v15 = vpop.eup %10885 }
 0x463   :  { %v1176_v46 = vmul.f32 %v10886_v15, %v11865_v38  ;;  %v10888_v48 = vpop.eup %10887 }
 0x465   :  { %v11909_v29 = vadd.f32 %v1177_v25, %v1176_v46 }
 0x467   :  { %10889 = vtanh.f32 %v11909_v29 }
 0x474   :  { %v10890_v2 = vpop.eup %10889 }
 0x475   :  { %v1180_v62 = vmul.f32 %v10890_v2, %v10888_v48 }
 0x477   :  { %v1185_v3 = vpack.c.bf16 %v1180_v62, %v1180_v62 }
 0x479   :  { %1219 = vmatmul.mubr.bf16.vlgmr.msra.gmra.mxu0 %v1185_v3  ;;  %1260 = vmatmul.mubr.bf16.vlgmr.msra.gmra.mxu1 %v1185_v3 }
 0x47a   :  { %1302 = vmatpush1.bf16.msra.mxu0 %v11718_v40  ;;  %1343 = vmatpush1.bf16.msra.mxu1 %v11721_v43 }
 0x47b   :  { %1303 = vmatprep.subr.bf16.mxu0 %v11724_v44  ;;  %1344 = vmatprep.subr.bf16.mxu1 %v11727_v49 }
 0x47c   :  { %1333 = vmatprep.mubr.bf16.mxu0 %v13971_v56  ;;  %1374 = vmatprep.mubr.bf16.mxu1 %v13971_v56 }
 0x47e   :  { %1304 = vmatpush1.bf16.msra.mxu0 %v11732_v50  ;;  %1345 = vmatpush1.bf16.msra.mxu1 %v11735_v53 }
 0x47f   :  { %1305 = vmatprep.subr.bf16.mxu0 %v11738_v54  ;;  %1346 = vmatprep.subr.bf16.mxu1 %v11741_v57 }
 0x482   :  { %1306 = vmatpush1.bf16.msra.mxu0 %v11744_v19  ;;  %1347 = vmatpush1.bf16.msra.mxu1 %v11747_v24 }
 0x483   :  { %1307 = vmatprep.subr.bf16.mxu0 %v11750_v22  ;;  %1348 = vmatprep.subr.bf16.mxu1 %v11753_v58 }
 0x486   :  { %1308 = vmatpush1.bf16.msra.mxu0 %v11756_v63  ;;  %1349 = vmatpush1.bf16.msra.mxu1 %v11759_v1 }
 0x487   :  { %1309 = vmatprep.subr.bf16.mxu0 %v11762_v4  ;;  %1350 = vmatprep.subr.bf16.mxu1 %v11765_v5 }
 0x48a   :  { %1310 = vmatpush1.bf16.msra.mxu0 %v11768_v8  ;;  %1351 = vmatpush1.bf16.msra.mxu1 %v11771_v9 }
 0x48b   :  { %1311 = vmatprep.subr.bf16.mxu0 %v11774_v14  ;;  %1352 = vmatprep.subr.bf16.mxu1 %v11777_v18 }
 0x48e   :  { %1312 = vmatpush1.bf16.msra.mxu0 %v11780_v26  ;;  %1353 = vmatpush1.bf16.msra.mxu1 %v11783_v20 }
 0x48f   :  { %1313 = vmatprep.subr.bf16.mxu0 %v11786_v21  ;;  %1354 = vmatprep.subr.bf16.mxu1 %v11789_v23 }
 0x492   :  { %1314 = vmatpush1.bf16.msra.mxu0 %v11792_v33  ;;  %1355 = vmatpush1.bf16.msra.mxu1 %v11795_v34 }
 0x493   :  { %1315 = vmatprep.subr.bf16.mxu0 %v11798_v39  ;;  %1356 = vmatprep.subr.bf16.mxu1 %v11801_v28 }
 0x496   :  { %1316 = vmatpush1.bf16.msra.mxu0 %v11804_v16  ;;  %1357 = vmatpush1.bf16.msra.mxu1 %v11807_v27 }
 0x497   :  { %1416 = vmatprep.subr.bf16.mxu0 %v11810_v17  ;;  %1457 = vmatprep.subr.bf16.mxu1 %v11813_v0 }
 0x539   :  { %v1220_v38 = vpop.f32.mrf.mxu0  ;;  %v1261_v59 = vpop.f32.mrf.mxu1 }
 0x53a   :  { %v1268_v60 = vadd.f32 %v1220_v38, %v13972_v61  ;;  %v1270_v12 = vadd.f32 %v1261_v59, %v13974_v45 }
 0x53b   :  { %v1222_v6 = vpop.f32.mrf.mxu0  ;;  %v1263_v30 = vpop.f32.mrf.mxu1 }
 0x53c   :  { %v8960_v32 = vmul.f32 -1.442695, %v1268_v60  ;;  %v1269_v51 = vadd.f32 %v1222_v6, %v13973_v37  ;;  %v8962_v13 = vmul.f32 -1.442695, %v1270_v12  ;;  %v1271_v42 = vadd.f32 %v1263_v30, %v13975_v31 }
 0x53d   :  { %v1224_v41 = vpop.f32.mrf.mxu0  ;;  %v1265_v52 = vpop.f32.mrf.mxu1 }
 0x53e   :  { %10891 = vpow2.f32 %v8960_v32  ;;  %v8961_v55 = vmul.f32 -1.442695, %v1269_v51  ;;  %v13976_v51 = vld [vmem:[#allocation24_spill] sm:$0xff]  ;;  %v13977_v52 = vld [vmem:[#allocation22_spill] sm:$0xff] }
 0x53f   :  { %v1225_v47 = vpop.f32.mrf.mxu0  ;;  %v1266_v7 = vpop.f32.mrf.mxu1  ;;  %v413_v41 = vadd.f32 %v13976_v51, %v11644_v35 }
 0x540   :  { %10893 = vpow2.f32 %v8961_v55 }
 0x541   :  { %10895 = vpow2.f32 %v8962_v13 }
 0x542   :  { %10897 = vtanh.f32 %v1271_v42 }
 0x54b   :  { %v10892_v11 = vpop.eup %10891 }
 0x54c   :  { %v1281_v25 = vadd.f32 1.0, %v10892_v11 }
 0x54d   :  { %v10894_v15 = vpop.eup %10893 }
 0x54e   :  { %10899 = vrcp.f32 %v1281_v25  ;;  %v1282_v10 = vadd.f32 1.0, %v10894_v15  ;;  %v10896_v46 = vpop.eup %10895  ;;  %v13979_v15 = vld [vmem:[#allocation25_spill] sm:$0xff] }
 0x54f   :  { %v10898_v48 = vpop.eup %10897  ;;  %v1283_v38 = vadd.f32 1.0, %v10896_v46 }
 0x550   :  { %10901 = vrcp.f32 %v1282_v10  ;;  %v486_v10 = vadd.f32 %v13979_v15, %v11648_v36 }
 0x551   :  { %10903 = vrcp.f32 %v1283_v38 }
 0x55b   :  { %v10900_v2 = vpop.eup %10899 }
 0x55c   :  { %v1292_v62 = vmul.f32 %v10900_v2, %v10898_v48 }
 0x55d   :  { %v10902_v3 = vpop.eup %10901 }
 0x55e   :  { %v1291_v61 = vmul.f32 %v10902_v3, %v11909_v29  ;;  %v10904_v60 = vpop.eup %10903 }
 0x560   :  { %v11951_v59 = vadd.f32 %v1292_v62, %v1291_v61 }
 0x562   :  { %10905 = vtanh.f32 %v11951_v59 }
 0x56f   :  { %v10906_v6 = vpop.eup %10905 }
 0x570   :  { %v1295_v30 = vmul.f32 %v10906_v6, %v10904_v60 }
 0x572   :  { %v1300_v32 = vpack.c.bf16 %v1295_v30, %v1295_v30 }
 0x574   :  { %1334 = vmatmul.mubr.bf16.vlgmr.msra.gmra.mxu0 %v1300_v32  ;;  %1375 = vmatmul.mubr.bf16.vlgmr.msra.gmra.mxu1 %v1300_v32 }
 0x575   :  { %1417 = vmatpush1.bf16.msra.mxu0 %v11718_v40  ;;  %1458 = vmatpush1.bf16.msra.mxu1 %v11721_v43 }
 0x576   :  { %1418 = vmatprep.subr.bf16.mxu0 %v11724_v44  ;;  %1459 = vmatprep.subr.bf16.mxu1 %v11727_v49 }
 0x577   :  { %1448 = vmatprep.mubr.bf16.mxu0 %v13971_v56  ;;  %1489 = vmatprep.mubr.bf16.mxu1 %v13971_v56 }
 0x579   :  { %1419 = vmatpush1.bf16.msra.mxu0 %v11732_v50  ;;  %1460 = vmatpush1.bf16.msra.mxu1 %v11735_v53 }
 0x57a   :  { %1420 = vmatprep.subr.bf16.mxu0 %v11738_v54  ;;  %1461 = vmatprep.subr.bf16.mxu1 %v11741_v57 }
 0x57d   :  { %1421 = vmatpush1.bf16.msra.mxu0 %v11744_v19  ;;  %1462 = vmatpush1.bf16.msra.mxu1 %v11747_v24 }
 0x57e   :  { %1422 = vmatprep.subr.bf16.mxu0 %v11750_v22  ;;  %1463 = vmatprep.subr.bf16.mxu1 %v11753_v58 }
 0x581   :  { %1423 = vmatpush1.bf16.msra.mxu0 %v11756_v63  ;;  %1464 = vmatpush1.bf16.msra.mxu1 %v11759_v1 }
 0x582   :  { %1424 = vmatprep.subr.bf16.mxu0 %v11762_v4  ;;  %1465 = vmatprep.subr.bf16.mxu1 %v11765_v5 }
 0x585   :  { %1425 = vmatpush1.bf16.msra.mxu0 %v11768_v8  ;;  %1466 = vmatpush1.bf16.msra.mxu1 %v11771_v9 }
 0x586   :  { %1426 = vmatprep.subr.bf16.mxu0 %v11774_v14  ;;  %1467 = vmatprep.subr.bf16.mxu1 %v11777_v18 }
 0x589   :  { %1427 = vmatpush1.bf16.msra.mxu0 %v11780_v26  ;;  %1468 = vmatpush1.bf16.msra.mxu1 %v11783_v20 }
 0x58a   :  { %1428 = vmatprep.subr.bf16.mxu0 %v11786_v21  ;;  %1469 = vmatprep.subr.bf16.mxu1 %v11789_v23 }
 0x58d   :  { %1429 = vmatpush1.bf16.msra.mxu0 %v11792_v33  ;;  %1470 = vmatpush1.bf16.msra.mxu1 %v11795_v34 }
 0x58e   :  { %1430 = vmatprep.subr.bf16.mxu0 %v11798_v39  ;;  %1471 = vmatprep.subr.bf16.mxu1 %v11801_v28 }
 0x591   :  { %1431 = vmatpush1.bf16.msra.mxu0 %v11804_v16  ;;  %1472 = vmatpush1.bf16.msra.mxu1 %v11807_v27 }
 0x592   :  { %1531 = vmatprep.subr.bf16.mxu0 %v11810_v17  ;;  %1572 = vmatprep.subr.bf16.mxu1 %v11813_v0  ;;  %v13978_v17 = vld [vmem:[#allocation23_spill] sm:$0xff] }
 0x634   :  { %v1335_v29 = vpop.f32.mrf.mxu0  ;;  %v1376_v37 = vpop.f32.mrf.mxu1 }
 0x635   :  { %v1383_v55 = vadd.f32 %v1335_v29, %v13977_v52  ;;  %v1385_v0 = vadd.f32 %v1376_v37, %v13978_v17  ;;  %v1703_v17 = vld [vmem:[#allocation10 + $0x1e8] sm:$0xff] }
 0x636   :  { %v1337_v47 = vpop.f32.mrf.mxu0  ;;  %v1378_v7 = vpop.f32.mrf.mxu1 }
 0x637   :  { %v8963_v45 = vmul.f32 -1.442695, %v1383_v55  ;;  %v1384_v12 = vadd.f32 %v1337_v47, %v413_v41  ;;  %v8965_v46 = vmul.f32 -1.442695, %v1385_v0  ;;  %v1386_v48 = vadd.f32 %v1378_v7, %v486_v10 }
 0x638   :  { %v1339_v13 = vpop.f32.mrf.mxu0  ;;  %v1380_v31 = vpop.f32.mrf.mxu1 }
 0x639   :  { %10907 = vpow2.f32 %v8963_v45  ;;  %v8964_v42 = vmul.f32 -1.442695, %v1384_v12  ;;  %v1698_v31 = vld [vmem:[#allocation10 + $0x1c0] sm:$0xff] }
 0x63a   :  { %v1340_v11 = vpop.f32.mrf.mxu0  ;;  %v1381_v25 = vpop.f32.mrf.mxu1 }
 0x63b   :  { %10909 = vpow2.f32 %v8964_v42  ;;  %v1702_v42 = vld [vmem:[#allocation10 + $0x1e0] sm:$0xff]  ;;  %v1699_v11 = vld [vmem:[#allocation10 + $0x1c8] sm:$0xff] }
 0x63c   :  { %10911 = vpow2.f32 %v8965_v46  ;;  %v9029_v25 = vcombine.high %v1698_v31, %v1702_v42  ;;  %v9028_v0 = vcombine.low %v1698_v31, %v1702_v42  ;;  %v9030_v15 = vcombine.low %v1699_v11, %v1703_v17  ;;  %v1690_v46 = vld [vmem:[#allocation10 + $0x180] sm:$0xff] }
 0x63d   :  { %10913 = vtanh.f32 %v1386_v48  ;;  %v9031_v10 = vcombine.high %v1699_v11, %v1703_v17  ;;  %v1694_v48 = vld [vmem:[#allocation10 + $0x1a0] sm:$0xff]  ;;  %v1643_v11 = vld [vmem:[#allocation10 + $0x8] sm:$0xff] }
 0x63e   :  { %v1646_v31 = vld [vmem:[#allocation10 + $0x20] sm:$0xff] }
 0x646   :  { %v10908_v2 = vpop.eup %10907 }
 0x647   :  { %v1396_v62 = vadd.f32 1.0, %v10908_v2  ;;  %v1691_v2 = vld [vmem:[#allocation10 + $0x188] sm:$0xff] }
 0x648   :  { %v10910_v3 = vpop.eup %10909 }
 0x649   :  { %10915 = vrcp.f32 %v1396_v62  ;;  %v1397_v38 = vadd.f32 1.0, %v10910_v3  ;;  %v10912_v61 = vpop.eup %10911  ;;  %v9021_v62 = vcombine.high %v1690_v46, %v1694_v48  ;;  %v1695_v3 = vld [vmem:[#allocation10 + $0x1a8] sm:$0xff] }
 0x64a   :  { %v10914_v60 = vpop.eup %10913  ;;  %v1398_v29 = vadd.f32 1.0, %v10912_v61  ;;  %v9022_v61 = vcombine.low %v1691_v2, %v1695_v3 }
 0x64b   :  { %10917 = vrcp.f32 %v1397_v38  ;;  %v9020_v38 = vcombine.low %v1690_v46, %v1694_v48 }
 0x64c   :  { %10919 = vrcp.f32 %v1398_v29 }
 0x656   :  { %v10916_v6 = vpop.eup %10915 }
 0x657   :  { %v1407_v30 = vmul.f32 %v10916_v6, %v10914_v60  ;;  %v9023_v60 = vcombine.high %v1691_v2, %v1695_v3  ;;  %v1682_v6 = vld [vmem:[#allocation10 + $0x140] sm:$0xff] }
 0x658   :  { %v10918_v32 = vpop.eup %10917 }
 0x659   :  { %v1406_v37 = vmul.f32 %v10918_v32, %v11951_v59  ;;  %v10920_v41 = vpop.eup %10919  ;;  %v1683_v32 = vld [vmem:[#allocation10 + $0x148] sm:$0xff] }
 0x65b   :  { %v11995_v51 = vadd.f32 %v1407_v30, %v1406_v37  ;;  %v1686_v30 = vld [vmem:[#allocation10 + $0x160] sm:$0xff]  ;;  %v1687_v37 = vld [vmem:[#allocation10 + $0x168] sm:$0xff] }
 0x65c   :  { %v9013_v29 = vcombine.high %v1682_v6, %v1686_v30 }
 0x65d   :  { %10921 = vtanh.f32 %v11995_v51 }
 0x66a   :  { %v10922_v52 = vpop.eup %10921 }
 0x66b   :  { %v1410_v55 = vmul.f32 %v10922_v52, %v10920_v41  ;;  %v9014_v41 = vcombine.low %v1683_v32, %v1687_v37  ;;  %v9015_v52 = vcombine.high %v1683_v32, %v1687_v37 }
 0x66d   :  { %v1415_v47 = vpack.c.bf16 %v1410_v55, %v1410_v55  ;;  %v1674_v55 = vld [vmem:[#allocation10 + $0x100] sm:$0xff] }
 0x66f   :  { %1449 = vmatmul.mubr.bf16.vlgmr.msra.gmra.mxu0 %v1415_v47  ;;  %1490 = vmatmul.mubr.bf16.vlgmr.msra.gmra.mxu1 %v1415_v47  ;;  %v1678_v47 = vld [vmem:[#allocation10 + $0x120] sm:$0xff] }
 0x670   :  { %1532 = vmatpush1.bf16.msra.mxu0 %v11718_v40  ;;  %1573 = vmatpush1.bf16.msra.mxu1 %v11721_v43 }
 0x671   :  { %1533 = vmatprep.subr.bf16.mxu0 %v11724_v44  ;;  %1574 = vmatprep.subr.bf16.mxu1 %v11727_v49  ;;  %v13980_v44 = vld [vmem:[#allocation26_spill] sm:$0xff] }
 0x672   :  { %1563 = vmatprep.mubr.bf16.mxu0 %v13971_v56  ;;  %1604 = vmatprep.mubr.bf16.mxu1 %v13971_v56 }
 0x674   :  { %1534 = vmatpush1.bf16.msra.mxu0 %v11732_v50  ;;  %1575 = vmatpush1.bf16.msra.mxu1 %v11735_v53 }
 0x675   :  { %1535 = vmatprep.subr.bf16.mxu0 %v11738_v54  ;;  %1576 = vmatprep.subr.bf16.mxu1 %v11741_v57  ;;  %v13981_v57 = vld [vmem:[#allocation28_spill] sm:$0xff] }
 0x678   :  { %1536 = vmatpush1.bf16.msra.mxu0 %v11744_v19  ;;  %1577 = vmatpush1.bf16.msra.mxu1 %v11747_v24 }
 0x679   :  { %1537 = vmatprep.subr.bf16.mxu0 %v11750_v22  ;;  %1578 = vmatprep.subr.bf16.mxu1 %v11753_v58 }
 0x67c   :  { %1538 = vmatpush1.bf16.msra.mxu0 %v11756_v63  ;;  %1579 = vmatpush1.bf16.msra.mxu1 %v11759_v1 }
 0x67d   :  { %1539 = vmatprep.subr.bf16.mxu0 %v11762_v4  ;;  %1580 = vmatprep.subr.bf16.mxu1 %v11765_v5 }
 0x680   :  { %1540 = vmatpush1.bf16.msra.mxu0 %v11768_v8  ;;  %1581 = vmatpush1.bf16.msra.mxu1 %v11771_v9 }
 0x681   :  { %1541 = vmatprep.subr.bf16.mxu0 %v11774_v14  ;;  %1582 = vmatprep.subr.bf16.mxu1 %v11777_v18 }
 0x684   :  { %1542 = vmatpush1.bf16.msra.mxu0 %v11780_v26  ;;  %1583 = vmatpush1.bf16.msra.mxu1 %v11783_v20 }
 0x685   :  { %1543 = vmatprep.subr.bf16.mxu0 %v11786_v21  ;;  %1584 = vmatprep.subr.bf16.mxu1 %v11789_v23 }
 0x688   :  { %1544 = vmatpush1.bf16.msra.mxu0 %v11792_v33  ;;  %1585 = vmatpush1.bf16.msra.mxu1 %v11795_v34 }
 0x689   :  { %1545 = vmatprep.subr.bf16.mxu0 %v11798_v39  ;;  %1586 = vmatprep.subr.bf16.mxu1 %v11801_v28  ;;  %v13982_v28 = vld [vmem:[#allocation27_spill] sm:$0xff] }
 0x68c   :  { %1546 = vmatpush1.bf16.msra.mxu0 %v11804_v16  ;;  %1587 = vmatpush1.bf16.msra.mxu1 %v11807_v27  ;;  %v13983_v27 = vld [vmem:[#allocation29_spill] sm:$0xff] }
 0x68d   :  { %2068 = vmatprep.subr.bf16.mxu0 %v9029_v25  ;;  %2109 = vmatprep.subr.bf16.mxu1 %v9031_v10  ;;  %v1647_v25 = vld [vmem:[#allocation10 + $0x28] sm:$0xff] }
 0x68e   :  { %v8975_v10 = vcombine.high %v1643_v11, %v1647_v25  ;;  %v8974_v48 = vcombine.low %v1643_v11, %v1647_v25  ;;  %v1689_v11 = vld [vmem:[#allocation10 + $0x178] sm:$0xff] }
 0x72f   :  { %v1450_v40 = vpop.f32.mrf.mxu0  ;;  %v1491_v43 = vpop.f32.mrf.mxu1 }
 0x730   :  { %v1498_v49 = vadd.f32 %v1450_v40, %v13980_v44  ;;  %v1500_v16 = vadd.f32 %v1491_v43, %v13982_v28  ;;  %v1675_v40 = vld [vmem:[#allocation10 + $0x108] sm:$0xff]  ;;  %v9005_v43 = vcombine.high %v1674_v55, %v1678_v47 }
 0x731   :  { %v1452_v50 = vpop.f32.mrf.mxu0  ;;  %v1493_v53 = vpop.f32.mrf.mxu1  ;;  %v1679_v44 = vld [vmem:[#allocation10 + $0x128] sm:$0xff] }
 0x732   :  { %v8966_v54 = vmul.f32 -1.442695, %v1498_v49  ;;  %v1499_v19 = vadd.f32 %v1452_v50, %v13981_v57  ;;  %v8968_v4 = vmul.f32 -1.442695, %v1500_v16  ;;  %v1501_v5 = vadd.f32 %v1493_v53, %v13983_v27  ;;  %v1670_v57 = vld [vmem:[#allocation10 + $0xe0] sm:$0xff]  ;;  %v1659_v27 = vld [vmem:[#allocation10 + $0x88] sm:$0xff] }
 0x733   :  { %v1454_v24 = vpop.f32.mrf.mxu0  ;;  %v1495_v22 = vpop.f32.mrf.mxu1  ;;  %v9004_v49 = vcombine.low %v1674_v55, %v1678_v47  ;;  %v9006_v50 = vcombine.low %v1675_v40, %v1679_v44  ;;  %v9007_v53 = vcombine.high %v1675_v40, %v1679_v44 }
 0x734   :  { %10923 = vpow2.f32 %v8966_v54  ;;  %v8967_v58 = vmul.f32 -1.442695, %v1499_v19  ;;  %v1666_v54 = vld [vmem:[#allocation10 + $0xc0] sm:$0xff]  ;;  %v1667_v19 = vld [vmem:[#allocation10 + $0xc8] sm:$0xff] }
 0x735   :  { %v1455_v63 = vpop.f32.mrf.mxu0  ;;  %v1496_v1 = vpop.f32.mrf.mxu1  ;;  %v8996_v24 = vcombine.low %v1666_v54, %v1670_v57  ;;  %v8997_v22 = vcombine.high %v1666_v54, %v1670_v57 }
 0x736   :  { %10925 = vpow2.f32 %v8967_v58  ;;  %v1671_v58 = vld [vmem:[#allocation10 + $0xe8] sm:$0xff]  ;;  %v1658_v63 = vld [vmem:[#allocation10 + $0x80] sm:$0xff] }
 0x737   :  { %10927 = vpow2.f32 %v8968_v4  ;;  %v1662_v1 = vld [vmem:[#allocation10 + $0xa0] sm:$0xff]  ;;  %v8998_v28 = vcombine.low %v1667_v19, %v1671_v58  ;;  %v8999_v16 = vcombine.high %v1667_v19, %v1671_v58 }
 0x738   :  { %10929 = vtanh.f32 %v1501_v5  ;;  %v8989_v4 = vcombine.high %v1658_v63, %v1662_v1  ;;  %v1663_v5 = vld [vmem:[#allocation10 + $0xa8] sm:$0xff] }
 0x741   :  { %v10924_v8 = vpop.eup %10923 }
 0x742   :  { %v1511_v9 = vadd.f32 1.0, %v10924_v8  ;;  %v8991_v8 = vcombine.high %v1659_v27, %v1663_v5 }
 0x743   :  { %v10926_v14 = vpop.eup %10925 }
 0x744   :  { %10931 = vrcp.f32 %v1511_v9  ;;  %v1512_v18 = vadd.f32 1.0, %v10926_v14  ;;  %v10928_v26 = vpop.eup %10927  ;;  %v1650_v9 = vld [vmem:[#allocation10 + $0x40] sm:$0xff] }
 0x745   :  { %v10930_v20 = vpop.eup %10929  ;;  %v1513_v34 = vadd.f32 1.0, %v10928_v26  ;;  %v1654_v14 = vld [vmem:[#allocation10 + $0x60] sm:$0xff]  ;;  %v1655_v26 = vld [vmem:[#allocation10 + $0x68] sm:$0xff] }
 0x746   :  { %10933 = vrcp.f32 %v1512_v18  ;;  %v1651_v18 = vld [vmem:[#allocation10 + $0x48] sm:$0xff]  ;;  %v8980_v17 = vcombine.low %v1650_v9, %v1654_v14 }
 0x747   :  { %10935 = vrcp.f32 %v1513_v34  ;;  %v8981_v34 = vcombine.high %v1650_v9, %v1654_v14  ;;  %v1696_v9 = vld [vmem:[#allocation10 + $0x1b0] sm:$0xff]  ;;  %v1693_v14 = vld [vmem:[#allocation10 + $0x198] sm:$0xff] }
 0x751   :  { %v10932_v21 = vpop.eup %10931 }
 0x752   :  { %v1522_v23 = vmul.f32 %v10932_v21, %v10930_v20  ;;  %v8988_v20 = vcombine.low %v1658_v63, %v1662_v1  ;;  %v12040_v21 = vld [vmem:[#allocation10 + $0x1d0] sm:$0xff] }
 0x753   :  { %v10934_v33 = vpop.eup %10933 }
 0x754   :  { %v1521_v39 = vmul.f32 %v10934_v33, %v11995_v51  ;;  %v10936_v7 = vpop.eup %10935  ;;  %v9012_v51 = vcombine.low %v1682_v6, %v1686_v30  ;;  %v8990_v33 = vcombine.low %v1659_v27, %v1663_v5  ;;  %v13985_v6 = vld [vmem:[#allocation30_spill] sm:$0xff]  ;;  %v1692_v5 = vld [vmem:[#allocation10 + $0x190] sm:$0xff] }
 0x756   :  { %v12035_v59 = vadd.f32 %v1522_v23, %v1521_v39  ;;  %v12042_v23 = vld [vmem:[#allocation10 + $0x1f0] sm:$0xff] }
 0x757   :  { %v9032_v39 = vcombine.low %v12040_v21, %v12042_v23  ;;  %v9033_v2 = vcombine.high %v12040_v21, %v12042_v23 }
 0x758   :  { %10937 = vtanh.f32 %v12035_v59 }
 0x765   :  { %v10938_v45 = vpop.eup %10937 }
 0x766   :  { %v1525_v12 = vmul.f32 %v10938_v45, %v10936_v7  ;;  %v12046_v7 = vld [vmem:[#allocation10 + $0x1d8] sm:$0xff] }
 0x767   :  { %v12048_v45 = vld [vmem:[#allocation10 + $0x1f8] sm:$0xff] }
 0x768   :  { %v1530_v13 = vpack.c.bf16 %v1525_v12, %v1525_v12  ;;  %v8983_v12 = vcombine.high %v1651_v18, %v1655_v26  ;;  %v9034_v42 = vcombine.low %v12046_v7, %v12048_v45 }
 0x76a   :  { %1564 = vmatmul.mubr.bf16.vlgmr.msra.gmra.mxu0 %v1530_v13  ;;  %1605 = vmatmul.mubr.bf16.vlgmr.msra.gmra.mxu1 %v1530_v13  ;;  %v1642_v13 = vld [vmem:[#allocation10] sm:$0xff] }
 0x76b   :  { %2100 = vmatprep.mubr.bf16.mxu0 %v13971_v56  ;;  %2141 = vmatprep.mubr.bf16.mxu1 %v13971_v56  ;;  %v8972_v46 = vcombine.low %v1642_v13, %v1646_v31 }
 0x76c   :  { %2069 = vmatpush1.bf16.msra.mxu0 %v9028_v0  ;;  %2110 = vmatpush1.bf16.msra.mxu1 %v9030_v15  ;;  %v8982_v0 = vcombine.low %v1651_v18, %v1655_v26  ;;  %v8973_v15 = vcombine.high %v1642_v13, %v1646_v31  ;;  %v1697_v18 = vld [vmem:[#allocation10 + $0x1b8] sm:$0xff]  ;;  %v1688_v13 = vld [vmem:[#allocation10 + $0x170] sm:$0xff] }
 0x76d   :  { %2070 = vmatprep.subr.bf16.mxu0 %v9021_v62  ;;  %2111 = vmatprep.subr.bf16.mxu1 %v9023_v60  ;;  %v9035_v62 = vcombine.high %v12046_v7, %v12048_v45  ;;  %v1685_v31 = vld [vmem:[#allocation10 + $0x158] sm:$0xff]  ;;  %v9026_v25 = vcombine.low %v1693_v14, %v1697_v18  ;;  %v1668_v45 = vld [vmem:[#allocation10 + $0xd0] sm:$0xff] }
 0x76e   :  { %v9018_v23 = vcombine.low %v1685_v31, %v1689_v11 }
 0x770   :  { %2071 = vmatpush1.bf16.msra.mxu0 %v9020_v38  ;;  %2112 = vmatpush1.bf16.msra.mxu1 %v9022_v61  ;;  %v13984_v61 = vld [vmem:[#allocation32_spill] sm:$0xff] }
 0x771   :  { %2072 = vmatprep.subr.bf16.mxu0 %v9013_v29  ;;  %2113 = vmatprep.subr.bf16.mxu1 %v9015_v52  ;;  %v423_v60 = vadd.f32 %v13984_v61, %v11644_v35 }
 0x774   :  { %2073 = vmatpush1.bf16.msra.mxu0 %v9012_v51  ;;  %2114 = vmatpush1.bf16.msra.mxu1 %v9014_v41 }
 0x775   :  { %2074 = vmatprep.subr.bf16.mxu0 %v9005_v43  ;;  %2115 = vmatprep.subr.bf16.mxu1 %v9007_v53  ;;  %v13986_v43 = vld [vmem:[#allocation31_spill] sm:$0xff] }
 0x778   :  { %2075 = vmatpush1.bf16.msra.mxu0 %v9004_v49  ;;  %2116 = vmatpush1.bf16.msra.mxu1 %v9006_v50  ;;  %v13987_v49 = vld [vmem:[#allocation33_spill] sm:$0xff] }
 0x779   :  { %2076 = vmatprep.subr.bf16.mxu0 %v8997_v22  ;;  %2117 = vmatprep.subr.bf16.mxu1 %v8999_v16  ;;  %v496_v50 = vadd.f32 %v13987_v49, %v11648_v36 }
 0x77c   :  { %2077 = vmatpush1.bf16.msra.mxu0 %v8996_v24  ;;  %2118 = vmatpush1.bf16.msra.mxu1 %v8998_v28 }
 0x77d   :  { %2078 = vmatprep.subr.bf16.mxu0 %v8989_v4  ;;  %2119 = vmatprep.subr.bf16.mxu1 %v8991_v8 }
 0x780   :  { %2079 = vmatpush1.bf16.msra.mxu0 %v8988_v20  ;;  %2120 = vmatpush1.bf16.msra.mxu1 %v8990_v33  ;;  %v9025_v33 = vcombine.high %v1692_v5, %v1696_v9 }
 0x781   :  { %2080 = vmatprep.subr.bf16.mxu0 %v8981_v34  ;;  %2121 = vmatprep.subr.bf16.mxu1 %v8983_v12  ;;  %v9027_v34 = vcombine.high %v1693_v14, %v1697_v18  ;;  %v1684_v12 = vld [vmem:[#allocation10 + $0x150] sm:$0xff]  ;;  %v12095_v14 = vld [vmem:[#allocation7 + $0xc8] ss:$16 sps:$4 sm:$0xff]  }
 0x782   :  { %v9016_v21 = vcombine.low %v1684_v12, %v1688_v13  ;;  %v12099_v18 = vld [vmem:[#allocation7 + $0xa4] ss:$16 sps:$4 sm:$0xff]  }
 0x784   :  { %2081 = vmatpush1.bf16.msra.mxu0 %v8980_v17  ;;  %2122 = vmatpush1.bf16.msra.mxu1 %v8982_v0  ;;  %v9017_v17 = vcombine.high %v1684_v12, %v1688_v13  ;;  %v9019_v0 = vcombine.high %v1685_v31, %v1689_v11  ;;  %v12115_v12 = vld [vmem:[#allocation7 + $0x8c] ss:$16 sps:$4 sm:$0xff]   ;;  %v12119_v13 = vld [vmem:[#allocation7 + $0x80] ss:$16 sps:$4 sm:$0xff]   ;;  %v12121_v31 = vld [vmem:[#allocation7 + $0x88] ss:$16 sps:$4 sm:$0xff]  }
 0x785   :  { %2082 = vmatprep.subr.bf16.mxu0 %v8973_v15  ;;  %2123 = vmatprep.subr.bf16.mxu1 %v8975_v10  ;;  %v1676_v15 = vld [vmem:[#allocation10 + $0x110] sm:$0xff] }
 0x786   :  { %v1680_v10 = vld [vmem:[#allocation10 + $0x130] sm:$0xff] }
 0x787   :  { %v12125_v11 = vld [vmem:[#allocation7 + $0x64] ss:$16 sps:$4 sm:$0xff]  }
 0x788   :  { %2083 = vmatpush1.bf16.msra.mxu0 %v8972_v46  ;;  %2124 = vmatpush1.bf16.msra.mxu1 %v8974_v48  ;;  %v1677_v46 = vld [vmem:[#allocation10 + $0x118] sm:$0xff] }
 0x789   :  { %2150 = vmatprep.subr.bf16.mxu0 %v9033_v2  ;;  %2191 = vmatprep.subr.bf16.mxu1 %v9035_v62  ;;  %v1681_v48 = vld [vmem:[#allocation10 + $0x138] sm:$0xff] }
 0x78a   :  { %v9011_v7 = vcombine.high %v1677_v46, %v1681_v48  ;;  %v1669_v2 = vld [vmem:[#allocation10 + $0xd8] sm:$0xff] }
 0x78b   :  { %v1673_v62 = vld [vmem:[#allocation10 + $0xf8] sm:$0xff] }
 0x82a   :  { %v1565_v3 = vpop.f32.mrf.mxu0  ;;  %v1606_v38 = vpop.f32.mrf.mxu1 }
 0x82b   :  { %v1613_v30 = vadd.f32 %v1565_v3, %v13985_v6  ;;  %v1615_v44 = vadd.f32 %v1606_v38, %v13986_v43  ;;  %v9008_v3 = vcombine.low %v1676_v15, %v1680_v10  ;;  %v9010_v38 = vcombine.low %v1677_v46, %v1681_v48  ;;  %v1660_v6 = vld [vmem:[#allocation10 + $0x90] sm:$0xff]  ;;  %v1657_v43 = vld [vmem:[#allocation10 + $0x78] sm:$0xff] }
 0x82c   :  { %v1567_v32 = vpop.f32.mrf.mxu0  ;;  %v1608_v29 = vpop.f32.mrf.mxu1  ;;  %v12145_v46 = vld [vmem:[#allocation7 + $0x48] ss:$16 sps:$4 sm:$0xff]   ;;  %v12149_v48 = vld [vmem:[#allocation7 + $0x24] ss:$16 sps:$4 sm:$0xff]  }
 0x82d   :  { %v8969_v37 = vmul.f32 -1.442695, %v1613_v30  ;;  %v1614_v51 = vadd.f32 %v1567_v32, %v423_v60  ;;  %v8971_v53 = vmul.f32 -1.442695, %v1615_v44  ;;  %v1616_v35 = vadd.f32 %v1608_v29, %v496_v50  ;;  %v1664_v30 = vld [vmem:[#allocation10 + $0xb0] sm:$0xff]  ;;  %v1661_v32 = vld [vmem:[#allocation10 + $0x98] sm:$0xff] }
 0x82e   :  { %v1569_v41 = vpop.f32.mrf.mxu0  ;;  %v1610_v52 = vpop.f32.mrf.mxu1  ;;  %v9003_v60 = vcombine.high %v1669_v2, %v1673_v62  ;;  %v1665_v29 = vld [vmem:[#allocation10 + $0xb8] sm:$0xff]  ;;  %v8992_v44 = vcombine.low %v1660_v6, %v1664_v30  ;;  %13988 = vst [vmem:[#allocation18_spill] sm:$0xff] %v12145_v46 }
 0x82f   :  { %10939 = vpow2.f32 %v8969_v37  ;;  %v8970_v55 = vmul.f32 -1.442695, %v1614_v51  ;;  %v9002_v51 = vcombine.low %v1669_v2, %v1673_v62  ;;  %v8993_v41 = vcombine.high %v1660_v6, %v1664_v30  ;;  %v12169_v2 = vld [vmem:[#allocation7 + $0x8] ss:$16 sps:$4 sm:$0xff]   ;;  %v12173_v62 = vld [vmem:[#allocation8 + $0xe4] ss:$16 sps:$4 sm:$0xff]  }
 0x830   :  { %v1570_v47 = vpop.f32.mrf.mxu0  ;;  %v1611_v40 = vpop.f32.mrf.mxu1  ;;  %v8995_v52 = vcombine.high %v1661_v32, %v1665_v29  ;;  %v8994_v49 = vcombine.low %v1661_v32, %v1665_v29  ;;  %13992 = vst [vmem:[#allocation24_spill] sm:$0xff] %v12169_v2  ;;  %v12187_v6 = vld [vmem:[#allocation8 + $0xcc] ss:$16 sps:$4 sm:$0xff]   ;;  %v12193_v30 = vld [vmem:[#allocation8 + $0xc0] ss:$16 sps:$4 sm:$0xff]  }
 0x831   :  { %10941 = vpow2.f32 %v8970_v55  ;;  %v1652_v55 = vld [vmem:[#allocation10 + $0x50] sm:$0xff]  ;;  %v1653_v40 = vld [vmem:[#allocation10 + $0x58] sm:$0xff]  ;;  %13995 = vst [vmem:[#allocation25_spill] sm:$0xff] %v12187_v6 }
 0x832   :  { %10943 = vpow2.f32 %v8971_v53  ;;  %v1656_v47 = vld [vmem:[#allocation10 + $0x70] sm:$0xff]  ;;  %v8987_v53 = vcombine.high %v1653_v40, %v1657_v43  ;;  %v12195_v32 = vld [vmem:[#allocation8 + $0xc8] ss:$16 sps:$4 sm:$0xff]  }
 0x833   :  { %10945 = vtanh.f32 %v1616_v35  ;;  %v8985_v50 = vcombine.high %v1652_v55, %v1656_v47  ;;  %v1644_v35 = vld [vmem:[#allocation10 + $0x10] sm:$0xff]  ;;  %13996 = vst [vmem:[#allocation26_spill] sm:$0xff] %v12195_v32 }
 0x834   :  { %v12199_v29 = vld [vmem:[#allocation8 + $0xa4] ss:$16 sps:$4 sm:$0xff]  }
 0x83c   :  { %v10940_v54 = vpop.eup %10939 }
 0x83d   :  { %v1626_v57 = vadd.f32 1.0, %v10940_v54  ;;  %v1648_v54 = vld [vmem:[#allocation10 + $0x30] sm:$0xff] }
 0x83e   :  { %v10942_v19 = vpop.eup %10941 }
 0x83f   :  { %10947 = vrcp.f32 %v1626_v57  ;;  %v1627_v24 = vadd.f32 1.0, %v10942_v19  ;;  %v10944_v22 = vpop.eup %10943  ;;  %v1645_v57 = vld [vmem:[#allocation10 + $0x18] sm:$0xff] }
 0x840   :  { %v10946_v58 = vpop.eup %10945  ;;  %v1628_v16 = vadd.f32 1.0, %v10944_v22  ;;  %v1649_v19 = vld [vmem:[#allocation10 + $0x38] sm:$0xff]  ;;  %v8986_v22 = vcombine.low %v1653_v40, %v1657_v43  ;;  %v12225_v43 = vld [vmem:[#allocation8 + $0x64] ss:$16 sps:$4 sm:$0xff]  }
 0x841   :  { %10949 = vrcp.f32 %v1627_v24  ;;  %v8984_v24 = vcombine.low %v1652_v55, %v1656_v47  ;;  %v12215_v55 = vld [vmem:[#allocation8 + $0x8c] ss:$16 sps:$4 sm:$0xff]   ;;  %v12219_v47 = vld [vmem:[#allocation8 + $0x80] ss:$16 sps:$4 sm:$0xff]   ;;  %v12221_v40 = vld [vmem:[#allocation8 + $0x88] ss:$16 sps:$4 sm:$0xff]  }
 0x842   :  { %10951 = vrcp.f32 %v1628_v16  ;;  %v12075_v16 = vld [vmem:[#allocation7 + $0xe4] ss:$16 sps:$4 sm:$0xff]   ;;  %13999 = vst [vmem:[#allocation29_spill] sm:$0xff] %v12215_v55  ;;  %14000 = vst [vmem:[#allocation32_spill] sm:$0xff] %v12221_v40 }
 0x84c   :  { %v10948_v63 = vpop.eup %10947 }
 0x84d   :  { %v1637_v1 = vmul.f32 %v10948_v63, %v10946_v58  ;;  %v8977_v58 = vcombine.high %v1644_v35, %v1648_v54  ;;  %v8979_v63 = vcombine.high %v1645_v57, %v1649_v19 }
 0x84e   :  { %v10950_v28 = vpop.eup %10949 }
 0x84f   :  { %v1636_v4 = vmul.f32 %v10950_v28, %v12035_v59  ;;  %v10952_v36 = vpop.eup %10951  ;;  %v9024_v59 = vcombine.low %v1692_v5, %v1696_v9  ;;  %v8978_v28 = vcombine.low %v1645_v57, %v1649_v19  ;;  %v12085_v5 = vld [vmem:[#allocation7 + $0xc4] ss:$16 sps:$4 sm:$0xff]   ;;  %v12093_v9 = vld [vmem:[#allocation7 + $0xc0] ss:$16 sps:$4 sm:$0xff]   ;;  %v12245_v57 = vld [vmem:[#allocation8 + $0x48] ss:$16 sps:$4 sm:$0xff]  }
 0x850   :  { %14005 = vst [vmem:[#allocation35_spill] sm:$0xff] %v12245_v57  ;;  %v12249_v19 = vld [vmem:[#allocation8 + $0x24] ss:$16 sps:$4 sm:$0xff]  }
 0x851   :  { %v1638_v27 = vadd.f32 %v1637_v1, %v1636_v4  ;;  %v8976_v1 = vcombine.low %v1644_v35, %v1648_v54  ;;  %v12077_v4 = vld [vmem:[#allocation7 + $0xec] ss:$16 sps:$4 sm:$0xff]   ;;  %v12243_v54 = vld [vmem:[#allocation8 + $0x40] ss:$16 sps:$4 sm:$0xff]   ;;  %14006 = vst [vmem:[#allocation36_spill] sm:$0xff] %v12249_v19 }
 0x852   :  { %v12239_v35 = vld [vmem:[#allocation8 + $0x4c] ss:$16 sps:$4 sm:$0xff]   ;;  %14004 = vst [vmem:[#allocation34_spill] sm:$0xff] %v12243_v54 }
 0x853   :  { %10953 = vtanh.f32 %v1638_v27  ;;  %v12079_v27 = vld [vmem:[#allocation7 + $0xe0] ss:$16 sps:$4 sm:$0xff]   ;;  %14003 = vst [vmem:[#allocation33_spill] sm:$0xff] %v12239_v35 }
 0x860   :  { %v10954_v8 = vpop.eup %10953 }
 0x861   :  { %v1640_v26 = vmul.f32 %v10954_v8, %v10952_v36  ;;  %v12081_v36 = vld [vmem:[#allocation7 + $0xe8] ss:$16 sps:$4 sm:$0xff]   ;;  %v12087_v8 = vld [vmem:[#allocation7 + $0xcc] ss:$16 sps:$4 sm:$0xff]  }
 0x863   :  { %v12063_v20 = vpack.c.bf16 %v1640_v26, %v1640_v26  ;;  %v12101_v26 = vld [vmem:[#allocation7 + $0xac] ss:$16 sps:$4 sm:$0xff]  }
 0x865   :  { %2101 = vmatmul.mubr.bf16.vlgmr.msra.gmra.mxu0 %v12063_v20  ;;  %2142 = vmatmul.mubr.bf16.vlgmr.msra.gmra.mxu1 %v12063_v20 }
 0x866   :  { %2151 = vmatpush1.bf16.msra.mxu0 %v9032_v39  ;;  %2192 = vmatpush1.bf16.msra.mxu1 %v9034_v42  ;;  %v9009_v39 = vcombine.high %v1676_v15, %v1680_v10  ;;  %v1672_v42 = vld [vmem:[#allocation10 + $0xf0] sm:$0xff]  ;;  %v12139_v15 = vld [vmem:[#allocation7 + $0x4c] ss:$16 sps:$4 sm:$0xff]  }
 0x867   :  { %2152 = vmatprep.subr.bf16.mxu0 %v9025_v33  ;;  %2193 = vmatprep.subr.bf16.mxu1 %v9027_v34  ;;  %v9001_v61 = vcombine.high %v1668_v45, %v1672_v42  ;;  %v9000_v37 = vcombine.low %v1668_v45, %v1672_v42  ;;  %v12109_v33 = vld [vmem:[#allocation7 + $0xa8] ss:$16 sps:$4 sm:$0xff]   ;;  %v12113_v34 = vld [vmem:[#allocation7 + $0x84] ss:$16 sps:$4 sm:$0xff]   ;;  %v12143_v10 = vld [vmem:[#allocation7 + $0x40] ss:$16 sps:$4 sm:$0xff]  }
 0x868   :  { %2182 = vmatprep.mubr.bf16.mxu0 %v13971_v56  ;;  %2223 = vmatprep.mubr.bf16.mxu1 %v13971_v56  ;;  %v12163_v45 = vld [vmem:[#allocation7 + $0xc] ss:$16 sps:$4 sm:$0xff]   ;;  %v12167_v42 = vld [vmem:[#allocation7] ss:$16 sps:$4 sm:$0xff]  }
 0x869   :  { %13991 = vst [vmem:[#allocation21_spill] sm:$0xff] %v12163_v45 }
 0x86a   :  { %2153 = vmatpush1.bf16.msra.mxu0 %v9024_v59  ;;  %2194 = vmatpush1.bf16.msra.mxu1 %v9026_v25  ;;  %v12127_v59 = vld [vmem:[#allocation7 + $0x6c] ss:$16 sps:$4 sm:$0xff]   ;;  %v12131_v25 = vld [vmem:[#allocation7 + $0x60] ss:$16 sps:$4 sm:$0xff]  }
 0x86b   :  { %2154 = vmatprep.subr.bf16.mxu0 %v9017_v17  ;;  %2195 = vmatprep.subr.bf16.mxu1 %v9019_v0  ;;  %v12133_v17 = vld [vmem:[#allocation7 + $0x68] ss:$16 sps:$4 sm:$0xff]   ;;  %v12137_v0 = vld [vmem:[#allocation7 + $0x44] ss:$16 sps:$4 sm:$0xff]  }
 0x86e   :  { %2155 = vmatpush1.bf16.msra.mxu0 %v9016_v21  ;;  %2196 = vmatpush1.bf16.msra.mxu1 %v9018_v23  ;;  %v12151_v21 = vld [vmem:[#allocation7 + $0x2c] ss:$16 sps:$4 sm:$0xff]   ;;  %v12155_v23 = vld [vmem:[#allocation7 + $0x20] ss:$16 sps:$4 sm:$0xff]  }
 0x86f   :  { %2156 = vmatprep.subr.bf16.mxu0 %v9009_v39  ;;  %2197 = vmatprep.subr.bf16.mxu1 %v9011_v7  ;;  %13989 = vst [vmem:[#allocation20_spill] sm:$0xff] %v12151_v21  ;;  %v12157_v39 = vld [vmem:[#allocation7 + $0x28] ss:$16 sps:$4 sm:$0xff]   ;;  %v12161_v7 = vld [vmem:[#allocation7 + $0x4] ss:$16 sps:$4 sm:$0xff]  }
 0x870   :  { %13990 = vst [vmem:[#allocation19_spill] sm:$0xff] %v12157_v39 }
 0x872   :  { %2157 = vmatpush1.bf16.msra.mxu0 %v9008_v3  ;;  %2198 = vmatpush1.bf16.msra.mxu1 %v9010_v38  ;;  %v12175_v3 = vld [vmem:[#allocation8 + $0xec] ss:$16 sps:$4 sm:$0xff]   ;;  %v12179_v38 = vld [vmem:[#allocation8 + $0xe0] ss:$16 sps:$4 sm:$0xff]  }
 0x873   :  { %2158 = vmatprep.subr.bf16.mxu0 %v9001_v61  ;;  %2199 = vmatprep.subr.bf16.mxu1 %v9003_v60  ;;  %13993 = vst [vmem:[#allocation22_spill] sm:$0xff] %v12175_v3  ;;  %v12181_v61 = vld [vmem:[#allocation8 + $0xe8] ss:$16 sps:$4 sm:$0xff]   ;;  %v12185_v60 = vld [vmem:[#allocation8 + $0xc4] ss:$16 sps:$4 sm:$0xff]  }
 0x874   :  { %13994 = vst [vmem:[#allocation23_spill] sm:$0xff] %v12181_v61 }
 0x876   :  { %2159 = vmatpush1.bf16.msra.mxu0 %v9000_v37  ;;  %2200 = vmatpush1.bf16.msra.mxu1 %v9002_v51  ;;  %v12201_v37 = vld [vmem:[#allocation8 + $0xac] ss:$16 sps:$4 sm:$0xff]   ;;  %v12207_v51 = vld [vmem:[#allocation8 + $0xa0] ss:$16 sps:$4 sm:$0xff]  }
 0x877   :  { %2160 = vmatprep.subr.bf16.mxu0 %v8993_v41  ;;  %2201 = vmatprep.subr.bf16.mxu1 %v8995_v52  ;;  %13997 = vst [vmem:[#allocation28_spill] sm:$0xff] %v12201_v37  ;;  %v12209_v41 = vld [vmem:[#allocation8 + $0xa8] ss:$16 sps:$4 sm:$0xff]   ;;  %v12213_v52 = vld [vmem:[#allocation8 + $0x84] ss:$16 sps:$4 sm:$0xff]  }
 0x878   :  { %13998 = vst [vmem:[#allocation27_spill] sm:$0xff] %v12209_v41 }
 0x87a   :  { %2161 = vmatpush1.bf16.msra.mxu0 %v8992_v44  ;;  %2202 = vmatpush1.bf16.msra.mxu1 %v8994_v49  ;;  %v12227_v44 = vld [vmem:[#allocation8 + $0x6c] ss:$16 sps:$4 sm:$0xff]   ;;  %v12231_v49 = vld [vmem:[#allocation8 + $0x60] ss:$16 sps:$4 sm:$0xff]  }
 0x87b   :  { %2162 = vmatprep.subr.bf16.mxu0 %v8985_v50  ;;  %2203 = vmatprep.subr.bf16.mxu1 %v8987_v53  ;;  %14001 = vst [vmem:[#allocation30_spill] sm:$0xff] %v12227_v44  ;;  %v12233_v50 = vld [vmem:[#allocation8 + $0x68] ss:$16 sps:$4 sm:$0xff]   ;;  %v12237_v53 = vld [vmem:[#allocation8 + $0x44] ss:$16 sps:$4 sm:$0xff]  }
 0x87c   :  { %14002 = vst [vmem:[#allocation31_spill] sm:$0xff] %v12233_v50 }
 0x87e   :  { %2163 = vmatpush1.bf16.msra.mxu0 %v8984_v24  ;;  %2204 = vmatpush1.bf16.msra.mxu1 %v8986_v22  ;;  %v12251_v24 = vld [vmem:[#allocation8 + $0x2c] ss:$16 sps:$4 sm:$0xff]   ;;  %v12255_v22 = vld [vmem:[#allocation8 + $0x20] ss:$16 sps:$4 sm:$0xff]  }
 0x87f   :  { %2164 = vmatprep.subr.bf16.mxu0 %v8977_v58  ;;  %2205 = vmatprep.subr.bf16.mxu1 %v8979_v63  ;;  %14007 = vst [vmem:[#allocation37_spill] sm:$0xff] %v12251_v24  ;;  %14008 = vst [vmem:[#allocation38_spill] sm:$0xff] %v12255_v22  ;;  %v12257_v58 = vld [vmem:[#allocation8 + $0x28] ss:$16 sps:$4 sm:$0xff]   ;;  %v12261_v63 = vld [vmem:[#allocation8 + $0x4] ss:$16 sps:$4 sm:$0xff]  }
 0x880   :  { %14009 = vst [vmem:[#allocation39_spill] sm:$0xff] %v12257_v58  ;;  %14010 = vst [vmem:[#allocation40_spill] sm:$0xff] %v12261_v63 }
 0x882   :  { %2165 = vmatpush1.bf16.msra.mxu0 %v8976_v1  ;;  %2206 = vmatpush1.bf16.msra.mxu1 %v8978_v28  ;;  %v12263_v1 = vld [vmem:[#allocation8 + $0xc] ss:$16 sps:$4 sm:$0xff]   ;;  %v12267_v28 = vld [vmem:[#allocation8] ss:$16 sps:$4 sm:$0xff]  }
 0x883   :  { %2424 = vmatprep.subr.bf16.mxu0 %v12075_v16  ;;  %2465 = vmatprep.subr.bf16.mxu1 %v12077_v4  ;;  %14011 = vst [vmem:[#allocation41_spill] sm:$0xff] %v12263_v1  ;;  %14012 = vst [vmem:[#allocation42_spill] sm:$0xff] %v12267_v28 }
 0x885   :  { %2183 = vmatmul.mubr.bf16.vlgmr.msra.gmra.mxu0 %v12063_v20  ;;  %2224 = vmatmul.mubr.bf16.vlgmr.msra.gmra.mxu1 %v12063_v20  ;;  %v12107_v20 = vld [vmem:[#allocation7 + $0xa0] ss:$16 sps:$4 sm:$0xff]  }
 0x886   :  { %2425 = vmatpush1.bf16.msra.mxu0 %v12079_v27  ;;  %2466 = vmatpush1.bf16.msra.mxu1 %v12081_v36 }
 0x887   :  { %2426 = vmatprep.subr.bf16.mxu0 %v12085_v5  ;;  %2467 = vmatprep.subr.bf16.mxu1 %v12087_v8 }
 0x888   :  { %2456 = vmatprep.mubr.bf16.mxu0 %v13971_v56  ;;  %2497 = vmatprep.mubr.bf16.mxu1 %v13971_v56 }
 0x88a   :  { %2427 = vmatpush1.bf16.msra.mxu0 %v12093_v9  ;;  %2468 = vmatpush1.bf16.msra.mxu1 %v12095_v14 }
 0x88b   :  { %2428 = vmatprep.subr.bf16.mxu0 %v12099_v18  ;;  %2469 = vmatprep.subr.bf16.mxu1 %v12101_v26 }
 0x88e   :  { %2429 = vmatpush1.bf16.msra.mxu0 %v12107_v20  ;;  %2470 = vmatpush1.bf16.msra.mxu1 %v12109_v33 }
 0x88f   :  { %2430 = vmatprep.subr.bf16.mxu0 %v12113_v34  ;;  %2471 = vmatprep.subr.bf16.mxu1 %v12115_v12 }
 0x892   :  { %2431 = vmatpush1.bf16.msra.mxu0 %v12119_v13  ;;  %2472 = vmatpush1.bf16.msra.mxu1 %v12121_v31 }
 0x893   :  { %2432 = vmatprep.subr.bf16.mxu0 %v12125_v11  ;;  %2473 = vmatprep.subr.bf16.mxu1 %v12127_v59 }
 0x896   :  { %2433 = vmatpush1.bf16.msra.mxu0 %v12131_v25  ;;  %2474 = vmatpush1.bf16.msra.mxu1 %v12133_v17 }
 0x897   :  { %2434 = vmatprep.subr.bf16.mxu0 %v12137_v0  ;;  %2475 = vmatprep.subr.bf16.mxu1 %v12139_v15 }
 0x89a   :  { %2435 = vmatpush1.bf16.msra.mxu0 %v12143_v10  ;;  %2476 = vmatpush1.bf16.msra.mxu1 %v12145_v46 }
 0x89b   :  { %2436 = vmatprep.subr.bf16.mxu0 %v12149_v48  ;;  %2477 = vmatprep.subr.bf16.mxu1 %v12151_v21 }
 0x89e   :  { %2437 = vmatpush1.bf16.msra.mxu0 %v12155_v23  ;;  %2478 = vmatpush1.bf16.msra.mxu1 %v12157_v39 }
 0x89f   :  { %2438 = vmatprep.subr.bf16.mxu0 %v12161_v7  ;;  %2479 = vmatprep.subr.bf16.mxu1 %v12163_v45 }
 0x8a2   :  { %2439 = vmatpush1.bf16.msra.mxu0 %v12167_v42  ;;  %2480 = vmatpush1.bf16.msra.mxu1 %v12169_v2 }
 0x8a3   :  { %2726 = vmatprep.subr.bf16.mxu0 %v12173_v62  ;;  %2767 = vmatprep.subr.bf16.mxu1 %v12175_v3  ;;  %v14014_v3 = vld [vmem:[#allocation17_spill] sm:$0xff] }
 0x8a4   :  { %v1738_v46 = vsub.s32 7, %v14014_v3 }
 0x8a5   :  { %2457 = vmatmul.mubr.bf16.vlgmr.msra.gmra.mxu0 %v13971_v56  ;;  %2498 = vmatmul.mubr.bf16.vlgmr.msra.gmra.mxu1 %v13971_v56 }
 0x8a6   :  { %2727 = vmatpush1.bf16.msra.mxu0 %v12179_v38  ;;  %2768 = vmatpush1.bf16.msra.mxu1 %v12181_v61 }
 0x8a7   :  { %2728 = vmatprep.subr.bf16.mxu0 %v12185_v60  ;;  %2769 = vmatprep.subr.bf16.mxu1 %v12187_v6  ;;  %v10424_v6 = vld [vmem:[#allocation11 + $0x10] sm:$0xff]  }
 0x8a8   :  { %2758 = vmatprep.mubr.bf16.mxu0 %v13971_v56  ;;  %2799 = vmatprep.mubr.bf16.mxu1 %v13971_v56 }
 0x8aa   :  { %2729 = vmatpush1.bf16.msra.mxu0 %v12193_v30  ;;  %2770 = vmatpush1.bf16.msra.mxu1 %v12195_v32  ;;  %v10422_v32 = vld [vmem:[#allocation11 + $0x20] sm:$0xff]  }
 0x8ab   :  { %2730 = vmatprep.subr.bf16.mxu0 %v12199_v29  ;;  %2771 = vmatprep.subr.bf16.mxu1 %v12201_v37 }
 0x8ae   :  { %2731 = vmatpush1.bf16.msra.mxu0 %v12207_v51  ;;  %2772 = vmatpush1.bf16.msra.mxu1 %v12209_v41 }
 0x8af   :  { %2732 = vmatprep.subr.bf16.mxu0 %v12213_v52  ;;  %2773 = vmatprep.subr.bf16.mxu1 %v12215_v55  ;;  %v10421_v55 = vld [vmem:[#allocation11 + $0x28] sm:$0xff]  }
 0x8b2   :  { %2733 = vmatpush1.bf16.msra.mxu0 %v12219_v47  ;;  %2774 = vmatpush1.bf16.msra.mxu1 %v12221_v40 }
 0x8b3   :  { %2734 = vmatprep.subr.bf16.mxu0 %v12225_v43  ;;  %2775 = vmatprep.subr.bf16.mxu1 %v12227_v44 }
 0x8b6   :  { %2735 = vmatpush1.bf16.msra.mxu0 %v12231_v49  ;;  %2776 = vmatpush1.bf16.msra.mxu1 %v12233_v50  ;;  %v10420_v50 = vld [vmem:[#allocation11 + $0x30] sm:$0xff]  }
 0x8b7   :  { %2736 = vmatprep.subr.bf16.mxu0 %v12237_v53  ;;  %2777 = vmatprep.subr.bf16.mxu1 %v12239_v35  ;;  %v12269_v35 = vld [vmem:[#allocation8 + $0x8] ss:$16 sps:$4 sm:$0xff]  }
 0x8b8   :  { %14013 = vst [vmem:[#allocation43_spill] sm:$0xff] %v12269_v35 }
 0x8ba   :  { %2737 = vmatpush1.bf16.msra.mxu0 %v12243_v54  ;;  %2778 = vmatpush1.bf16.msra.mxu1 %v12245_v57  ;;  %v10419_v57 = vld [vmem:[#allocation11 + $0x38] sm:$0xff]   ;;  %v14019_v54 = vsub.s32 2, %v14014_v3 }
 0x8bb   :  { %2738 = vmatprep.subr.bf16.mxu0 %v12249_v19  ;;  %2779 = vmatprep.subr.bf16.mxu1 %v12251_v24  ;;  %v13848_v24 = vmov 0.0  }
 0x8be   :  { %2739 = vmatpush1.bf16.msra.mxu0 %v12255_v22  ;;  %2780 = vmatpush1.bf16.msra.mxu1 %v12257_v58  ;;  %v10411_v58 = vld [vmem:[%s13818_s8 + $0x38] sm:$0xff]  }
 0x8bf   :  { %2740 = vmatprep.subr.bf16.mxu0 %v12261_v63  ;;  %2781 = vmatprep.subr.bf16.mxu1 %v12263_v1  ;;  %v10413_v1 = vld [vmem:[%s13818_s8 + $0x28] sm:$0xff]  }
 0x8c2   :  { %2741 = vmatpush1.bf16.msra.mxu0 %v12267_v28  ;;  %2782 = vmatpush1.bf16.msra.mxu1 %v12269_v35  ;;  %v10412_v35 = vld [vmem:[%s13818_s8 + $0x30] sm:$0xff]  }
 0x8c3   :  { %9884 = vmatprep.subr.bf16.mxu0 %v13848_v24  ;;  %9904 = vmatprep.subr.bf16.mxu1 %v13848_v24 }
 0x8c5   :  { %2759 = vmatmul.mubr.bf16.vlgmr.msra.gmra.mxu0 %v13971_v56  ;;  %2800 = vmatmul.mubr.bf16.vlgmr.msra.gmra.mxu1 %v13971_v56 }
 0x8c6   :  { %9885 = vmatpush3.bf16.msra.mxu0 %v10411_v58  ;;  %v10414_v58 = vld [vmem:[%s13818_s8 + $0x20] sm:$0xff]   ;;  %9900 = vmatprep.mubr.msk.bf16.mxu0 %vm11385_vm0, %v13848_v24 }
 0x8c7   :  { %9886 = vmatprep.subr.bf16.mxu0 %v13848_v24  ;;  %9920 = vmatprep.mubr.msk.bf16.mxu1 %vm11385_vm0, %v13848_v24 }
 0x8c8   :  { %9905 = vmatpush3.bf16.msra.mxu1 %v10419_v57  ;;  %v10423_v57 = vld [vmem:[#allocation11 + $0x18] sm:$0xff]  }
 0x8c9   :  { %9906 = vmatprep.subr.bf16.mxu1 %v13848_v24 }
 0x8ca   :  { %9887 = vmatpush3.bf16.msra.mxu0 %v10412_v35  ;;  %v10415_v35 = vld [vmem:[%s13818_s8 + $0x18] sm:$0xff]  }
 0x8cb   :  { %9888 = vmatprep.subr.bf16.mxu0 %v13848_v24 }
 0x8cc   :  { %9907 = vmatpush3.bf16.msra.mxu1 %v10420_v50  ;;  %v10425_v50 = vld [vmem:[#allocation11 + $0x8] sm:$0xff]  }
 0x8cd   :  { %9908 = vmatprep.subr.bf16.mxu1 %v13848_v24 }
 0x8ce   :  { %9889 = vmatpush3.bf16.msra.mxu0 %v10413_v1  ;;  %v10416_v1 = vld [vmem:[%s13818_s8 + $0x10] sm:$0xff]  }
 0x8cf   :  { %9890 = vmatprep.subr.bf16.mxu0 %v13848_v24 }
 0x8d0   :  { %9909 = vmatpush3.bf16.msra.mxu1 %v10421_v55 }
 0x8d1   :  { %9910 = vmatprep.subr.bf16.mxu1 %v13848_v24 }
 0x8d2   :  { %9891 = vmatpush3.bf16.msra.mxu0 %v10414_v58  ;;  %v10417_v58 = vld [vmem:[%s13818_s8 + $0x8] sm:$0xff]  }
 0x8d3   :  { %9892 = vmatprep.subr.bf16.mxu0 %v13848_v24 }
 0x8d4   :  { %9911 = vmatpush3.bf16.msra.mxu1 %v10422_v32 }
 0x8d5   :  { %9912 = vmatprep.subr.bf16.mxu1 %v13848_v24 }
 0x8d6   :  { %9893 = vmatpush3.bf16.msra.mxu0 %v10415_v35  ;;  %v10418_v35 = vld [vmem:[%s13818_s8] sm:$0xff]  }
 0x8d7   :  { %9894 = vmatprep.subr.bf16.mxu0 %v13848_v24 }
 0x8d8   :  { %9913 = vmatpush3.bf16.msra.mxu1 %v10423_v57 }
 0x8d9   :  { %9914 = vmatprep.subr.bf16.mxu1 %v13848_v24 }
 0x8da   :  { %9895 = vmatpush3.bf16.msra.mxu0 %v10416_v1 }
 0x8db   :  { %9896 = vmatprep.subr.bf16.mxu0 %v13848_v24 }
 0x8dc   :  { %9915 = vmatpush3.bf16.msra.mxu1 %v10424_v6 }
 0x8dd   :  { %9916 = vmatprep.subr.bf16.mxu1 %v13848_v24 }
 0x8de   :  { %9897 = vmatpush3.bf16.msra.mxu0 %v10417_v58 }
 0x8df   :  { %9898 = vmatprep.subr.bf16.mxu0 %v13848_v24 }
 0x8e0   :  { %9917 = vmatpush3.bf16.msra.mxu1 %v10425_v50  ;;  %v12330_v50 = vld [vmem:[%s13817_s7] sm:$0xff] }
 0x8e1   :  { %9918 = vmatprep.subr.bf16.mxu1 %v13848_v24  ;;  %v14015_v24 = vsub.s32 0, %v14014_v3 }
 0x8e2   :  { %9899 = vmatpush3.bf16.msra.mxu0 %v10418_v35 }
 0x8e3   :  { %3254 = vmatprep.subr.bf16.mxu0 %v12075_v16 }
 0x925   :  { %v2102_v1 = vpop.f32.mrf.mxu0  ;;  %v2143_v58 = vpop.f32.mrf.mxu1 }
 0x927   :  { %v2104_v44 = vpop.f32.mrf.mxu0  ;;  %v2145_v40 = vpop.f32.mrf.mxu1 }
 0x929   :  { %v2106_v16 = vpop.f32.mrf.mxu0  ;;  %v2147_v35 = vpop.f32.mrf.mxu1 }
 0x92a   :  { %v10426_v16 = vld [vmem:[#allocation11] sm:$0xff]  }
 0x92b   :  { %v2107_v41 = vpop.f32.mrf.mxu0  ;;  %v2148_v37 = vpop.f32.mrf.mxu1  ;;  %9919 = vmatpush3.bf16.msra.mxu1 %v10426_v16  ;;  %v1711_v16 = vrot.slane %v12330_v50, %v14015_v24 }
 0x92c   :  { %3295 = vmatprep.subr.bf16.mxu1 %v12077_v4  ;;  %v14016_v4 = vsub.s32 1, %v14014_v3 }
 0x92d   :  { %v12338_v2 = vadd.f32 %v2102_v1, %v1711_v16  ;;  %v1719_v1 = vrot.slane %v12330_v50, %v14019_v54 }
 0x92e   :  { %v1715_v28 = vrot.slane %v12330_v50, %v14016_v4 }
 0x92f   :  { %14017 = vst [vmem:[#allocation17_spill] sm:$0xff] %v12338_v2 }
 0x945   :  { %v2184_v37 = vpop.f32.mrf.mxu0  ;;  %v12323_v32 = vpop.f32.mrf.mxu1 }
 0x947   :  { %v2186_v41 = vpop.f32.mrf.mxu0  ;;  %v12325_v55 = vpop.f32.mrf.mxu1 }
 0x949   :  { %v2188_v35 = vpop.f32.mrf.mxu0  ;;  %v2229_v57 = vpop.f32.mrf.mxu1 }
 0x94a   :  { %v12340_v57 = vadd.f32 %v2104_v44, %v1715_v28  ;;  %v12347_v44 = vadd.f32 %v2143_v58, %v1719_v1  ;;  %v1726_v58 = vsub.s32 4, %v14014_v3 }
 0x94b   :  { %v2189_v61 = vpop.f32.mrf.mxu0  ;;  %v2230_v6 = vpop.f32.mrf.mxu1 }
 0x94c   :  { %14018 = vst [vmem:[#allocation44_spill] sm:$0xff] %v12340_v57  ;;  %14020 = vst [vmem:[#allocation45_spill] sm:$0xff] %v12347_v44  ;;  %v1727_v1 = vrot.slane %v12330_v50, %v1726_v58 }
 0x965   :  { %v2458_v63 = vpop.f32.mrf.mxu0  ;;  %v2499_v35 = vpop.f32.mrf.mxu1 }
 0x966   :  { %v2506_v61 = vadd.f32 %v2458_v63, %v12338_v2  ;;  %v14021_v63 = vsub.s32 3, %v14014_v3 }
 0x967   :  { %v2460_v6 = vpop.f32.mrf.mxu0  ;;  %v2501_v45 = vpop.f32.mrf.mxu1 }
 0x968   :  { %v9068_v22 = vmul.f32 -1.442695, %v2506_v61  ;;  %v2507_v39 = vadd.f32 %v2460_v6, %v12340_v57  ;;  %v1723_v28 = vrot.slane %v12330_v50, %v14021_v63  ;;  %v2508_v61 = vadd.f32 %v2499_v35, %v12347_v44 }
 0x969   :  { %v2462_v19 = vpop.f32.mrf.mxu0  ;;  %v2503_v21 = vpop.f32.mrf.mxu1  ;;  %v12360_v35 = vadd.f32 %v2184_v37, %v1727_v1 }
 0x96a   :  { %10955 = vpow2.f32 %v9068_v22  ;;  %v9069_v24 = vmul.f32 -1.442695, %v2507_v39  ;;  %v12353_v6 = vadd.f32 %v2145_v40, %v1723_v28  ;;  %v9070_v21 = vmul.f32 -1.442695, %v2508_v61 }
 0x96b   :  { %v2463_v16 = vpop.f32.mrf.mxu0  ;;  %v2504_v4 = vpop.f32.mrf.mxu1  ;;  %14023 = vst [vmem:[#allocation47_spill] sm:$0xff] %v12360_v35  ;;  %v1734_v61 = vsub.s32 6, %v14014_v3 }
 0x96c   :  { %10957 = vpow2.f32 %v9069_v24  ;;  %14022 = vst [vmem:[#allocation46_spill] sm:$0xff] %v12353_v6  ;;  %v2509_v39 = vadd.f32 %v2501_v45, %v12353_v6  ;;  %v1730_v24 = vsub.s32 5, %v14014_v3 }
 0x96d   :  { %10959 = vpow2.f32 %v9070_v21 }
 0x96e   :  { %v1731_v40 = vrot.slane %v12330_v50, %v1730_v24 }
 0x970   :  { %v12362_v63 = vadd.f32 %v2186_v41, %v1731_v40  ;;  %v1735_v40 = vrot.slane %v12330_v50, %v1734_v61 }
 0x977   :  { %v10956_v19 = vpop.eup %10955 }
 0x978   :  { %v2519_v22 = vadd.f32 1.0, %v10956_v19 }
 0x979   :  { %v10958_v2 = vpop.eup %10957 }
 0x97a   :  { %10961 = vrcp.f32 %v2519_v22  ;;  %v2520_v54 = vadd.f32 1.0, %v10958_v2  ;;  %v10960_v45 = vpop.eup %10959 }
 0x97b   :  { %10963 = vtanh.f32 %v2509_v39  ;;  %v2521_v24 = vadd.f32 1.0, %v10960_v45  ;;  %v12373_v45 = vadd.f32 %v12323_v32, %v1735_v40  ;;  %v10433_v40 = vld [vmem:[%s13818_s8 + $0x8] sm:$0xff]  }
 0x97c   :  { %10965 = vrcp.f32 %v2520_v54 }
 0x985   :  { %v2760_v16 = vpop.f32.mrf.mxu0  ;;  %v2801_v4 = vpop.f32.mrf.mxu1 }
 0x986   :  { %v2808_v28 = vadd.f32 %v2760_v16, %v12360_v35 }
 0x987   :  { %v10962_v2 = vpop.eup %10961  ;;  %v2762_v21 = vpop.f32.mrf.mxu0 }
 0x988   :  { %v2803_v19 = vpop.f32.mrf.mxu1  ;;  %v10964_v39 = vpop.eup %10963  ;;  %v9103_v22 = vmul.f32 -1.442695, %v2808_v28  ;;  %v2809_v54 = vadd.f32 %v2762_v21, %v12362_v63  ;;  %v1739_v28 = vrot.slane %v12330_v50, %v1738_v46 }
 0x989   :  { %v10966_v58 = vpop.eup %10965  ;;  %v2764_v37 = vpop.f32.mrf.mxu0  ;;  %v2530_v44 = vmul.f32 %v10964_v39, %v10962_v2  ;;  %v2810_v2 = vadd.f32 %v2801_v4, %v12373_v45 }
 0x98a   :  { %v2805_v1 = vpop.f32.mrf.mxu1  ;;  %v2529_v6 = vmul.f32 0.0, %v10966_v58  ;;  %10967 = vpow2.f32 %v9103_v22  ;;  %v9104_v41 = vmul.f32 -1.442695, %v2809_v54  ;;  %v12378_v21 = vadd.f32 %v12325_v55, %v1739_v28  ;;  %v12492_v28 = vld [vmem:[#allocation7 + $0xe4] ss:$16 sps:$4 sm:$0xff]  }
 0x98b   :  { %v2765_v16 = vpop.f32.mrf.mxu0  ;;  %v9105_v61 = vmul.f32 -1.442695, %v2810_v2  ;;  %v10431_v1 = vld [vmem:[%s13818_s8 + $0x18] sm:$0xff]  }
 0x98c   :  { %v2806_v35 = vpop.f32.mrf.mxu1  ;;  %v12368_v57 = vadd.f32 %v2530_v44, %v2529_v6  ;;  %10969 = vpow2.f32 %v9104_v41  ;;  %v2811_v44 = vadd.f32 %v2803_v19, %v12378_v21  ;;  %v10432_v41 = vld [vmem:[%s13818_s8 + $0x10] sm:$0xff]   ;;  %v10434_v16 = vld [vmem:[%s13818_s8] sm:$0xff]   ;;  %v10438_v2 = vld [vmem:[#allocation11 + $0x38] sm:$0xff]  }
 0x98d   :  { %10971 = vrcp.f32 %v2521_v24 }
 0x98e   :  { %10973 = vtanh.f32 %v12368_v57 }
 0x98f   :  { %10975 = vpow2.f32 %v9105_v61  ;;  %v10442_v61 = vld [vmem:[#allocation11 + $0x30] sm:$0xff]  }
 0x997   :  { %v10968_v35 = vpop.eup %10967 }
 0x998   :  { %v2821_v6 = vadd.f32 1.0, %v10968_v35  ;;  %v10446_v35 = vld [vmem:[#allocation11 + $0x28] sm:$0xff]  }
 0x999   :  { %v10970_v39 = vpop.eup %10969 }
 0x99a   :  { %v10972_v3 = vpop.eup %10971  ;;  %10977 = vrcp.f32 %v2821_v6  ;;  %v2822_v22 = vadd.f32 1.0, %v10970_v39  ;;  %v10454_v6 = vld [vmem:[#allocation11 + $0x18] sm:$0xff]   ;;  %v10458_v39 = vld [vmem:[#allocation11 + $0x10] sm:$0xff]  }
 0x99b   :  { %v10974_v54 = vpop.eup %10973  ;;  %10979 = vtanh.f32 %v2811_v44  ;;  %v10450_v44 = vld [vmem:[#allocation11 + $0x20] sm:$0xff]  }
 0x99c   :  { %10981 = vrcp.f32 %v2822_v22  ;;  %v2533_v32 = vmul.f32 %v10974_v54, %v10972_v3  ;;  %v10976_v55 = vpop.eup %10975  ;;  %v12503_v3 = vld [vmem:[%s13819_s9] ss:$0 sm:$0xff] }
 0x99d   :  { %v2823_v58 = vadd.f32 1.0, %v10976_v55 }
 0x99e   :  { %v12381_v46 = vpack.c.bf16 %v2533_v32, %v2533_v32  ;;  %v10462_v32 = vld [vmem:[#allocation11 + $0x8] sm:$0xff]  }
 0x99f   :  { %10983 = vrcp.f32 %v2823_v58  ;;  %v12517_v58 = vld [vmem:[%s13821_s11] ss:$0 sm:$0xff] }
 0x9a0   :  { %9901 = vmatmul.mubr.bf16.vlgmr.msra.gmra.mxu0 %v12381_v46 }
 0x9a1   :  { %3255 = vmatpush1.bf16.msra.mxu0 %v12079_v27  ;;  %3286 = vmatprep.mubr.bf16.mxu0 %v13971_v56 }
 0x9a2   :  { %3256 = vmatprep.subr.bf16.mxu0 %v12085_v5 }
 0x9a5   :  { %3257 = vmatpush1.bf16.msra.mxu0 %v12093_v9 }
 0x9a6   :  { %3258 = vmatprep.subr.bf16.mxu0 %v12099_v18 }
 0x9a7   :  { %v10978_v50 = vpop.eup %10977 }
 0x9a8   :  { %v10980_v4 = vpop.eup %10979 }
 0x9a9   :  { %v10982_v19 = vpop.eup %10981  ;;  %3259 = vmatpush1.bf16.msra.mxu0 %v12107_v20  ;;  %v2832_v37 = vmul.f32 %v10980_v4, %v10978_v50  ;;  %v10466_v50 = vld [vmem:[#allocation11] sm:$0xff]  }
 0x9aa   :  { %v2831_v24 = vmul.f32 0.0, %v10982_v19  ;;  %3260 = vmatprep.subr.bf16.mxu0 %v12113_v34  ;;  %v14029_v34 = vld [vmem:[#allocation38_spill] sm:$0xff] }
 0x9ab   :  { %v12511_v19 = vld [vmem:[#allocation7 + $0xec] ss:$16 sps:$4 sm:$0xff]  }
 0x9ac   :  { %v12391_v27 = vadd.f32 %v2832_v37, %v2831_v24  ;;  %v10984_v5 = vpop.eup %10983 }
 0x9ad   :  { %3261 = vmatpush1.bf16.msra.mxu0 %v12119_v13  ;;  %v14031_v13 = vld [vmem:[#allocation40_spill] sm:$0xff] }
 0x9ae   :  { %10985 = vtanh.f32 %v12391_v27  ;;  %3262 = vmatprep.subr.bf16.mxu0 %v12125_v11  ;;  %v14033_v11 = vld [vmem:[#allocation42_spill] sm:$0xff] }
 0x9b1   :  { %3263 = vmatpush1.bf16.msra.mxu0 %v12131_v25  ;;  %v14035_v25 = vmov 0.0  }
 0x9b2   :  { %3264 = vmatprep.subr.bf16.mxu0 %v12137_v0  ;;  %v14037_v0 = vld [vmem:[#allocation25_spill] sm:$0xff] }
 0x9b5   :  { %3265 = vmatpush1.bf16.msra.mxu0 %v12143_v10  ;;  %v14039_v10 = vld [vmem:[#allocation28_spill] sm:$0xff] }
 0x9b6   :  { %3266 = vmatprep.subr.bf16.mxu0 %v12149_v48  ;;  %v14040_v48 = vld [vmem:[#allocation27_spill] sm:$0xff] }
 0x9b9   :  { %3267 = vmatpush1.bf16.msra.mxu0 %v12155_v23  ;;  %v14041_v23 = vld [vmem:[#allocation29_spill] sm:$0xff] }
 0x9ba   :  { %3268 = vmatprep.subr.bf16.mxu0 %v12161_v7  ;;  %v14042_v7 = vld [vmem:[#allocation32_spill] sm:$0xff] }
 0x9bb   :  { %v10986_v9 = vpop.eup %10985 }
 0x9bc   :  { %v2835_v18 = vmul.f32 %v10986_v9, %v10984_v5 }
 0x9bd   :  { %3269 = vmatpush1.bf16.msra.mxu0 %v12167_v42  ;;  %v14043_v42 = vld [vmem:[#allocation30_spill] sm:$0xff] }
 0x9be   :  { %3556 = vmatprep.subr.bf16.mxu0 %v12173_v62  ;;  %v2949_v20 = vpack.c.bf16 %v2835_v18, %v2835_v18  ;;  %v14044_v62 = vld [vmem:[#allocation31_spill] sm:$0xff] }
 0x9c0   :  { %3287 = vmatmul.mubr.bf16.vlgmr.msra.gmra.mxu0 %v12381_v46  ;;  %9921 = vmatmul.mubr.bf16.vlgmr.msra.gmra.mxu1 %v2949_v20 }
 0x9c1   :  { %3296 = vmatpush1.bf16.msra.mxu1 %v12081_v36  ;;  %3557 = vmatpush1.bf16.msra.mxu0 %v12179_v38  ;;  %v14024_v36 = vld [vmem:[#allocation18_spill] sm:$0xff]  ;;  %v14045_v38 = vld [vmem:[#allocation33_spill] sm:$0xff] }
 0x9c2   :  { %3297 = vmatprep.subr.bf16.mxu1 %v12087_v8  ;;  %3558 = vmatprep.subr.bf16.mxu0 %v12185_v60  ;;  %v14025_v8 = vld [vmem:[#allocation34_spill] sm:$0xff]  ;;  %v14046_v60 = vld [vmem:[#allocation35_spill] sm:$0xff] }
 0x9c3   :  { %3327 = vmatprep.mubr.bf16.mxu1 %v13971_v56  ;;  %3588 = vmatprep.mubr.bf16.mxu0 %v13971_v56 }
 0x9c5   :  { %3298 = vmatpush1.bf16.msra.mxu1 %v12095_v14  ;;  %3559 = vmatpush1.bf16.msra.mxu0 %v12193_v30  ;;  %v14026_v14 = vld [vmem:[#allocation20_spill] sm:$0xff]  ;;  %v14047_v30 = vld [vmem:[#allocation37_spill] sm:$0xff] }
 0x9c6   :  { %3299 = vmatprep.subr.bf16.mxu1 %v12101_v26  ;;  %3560 = vmatprep.subr.bf16.mxu0 %v12199_v29  ;;  %v14027_v26 = vld [vmem:[#allocation36_spill] sm:$0xff]  ;;  %v14048_v29 = vld [vmem:[#allocation39_spill] sm:$0xff] }
 0x9c9   :  { %3300 = vmatpush1.bf16.msra.mxu1 %v12109_v33  ;;  %3561 = vmatpush1.bf16.msra.mxu0 %v12207_v51  ;;  %v14028_v33 = vld [vmem:[#allocation19_spill] sm:$0xff]  ;;  %v14049_v51 = vld [vmem:[#allocation41_spill] sm:$0xff] }
 0x9ca   :  { %3301 = vmatprep.subr.bf16.mxu1 %v12115_v12  ;;  %3562 = vmatprep.subr.bf16.mxu0 %v12213_v52  ;;  %v14030_v12 = vld [vmem:[#allocation21_spill] sm:$0xff]  ;;  %v14050_v52 = vld [vmem:[#allocation43_spill] sm:$0xff] }
 0x9cd   :  { %3302 = vmatpush1.bf16.msra.mxu1 %v12121_v31  ;;  %3563 = vmatpush1.bf16.msra.mxu0 %v12219_v47  ;;  %v14032_v31 = vld [vmem:[#allocation24_spill] sm:$0xff] }
 0x9ce   :  { %3303 = vmatprep.subr.bf16.mxu1 %v12127_v59  ;;  %3564 = vmatprep.subr.bf16.mxu0 %v12225_v43  ;;  %v14034_v59 = vld [vmem:[#allocation22_spill] sm:$0xff]  ;;  %v10427_v47 = vld [vmem:[%s13818_s8 + $0x38] sm:$0xff]   ;;  %v10428_v43 = vld [vmem:[%s13818_s8 + $0x30] sm:$0xff]  }
 0x9d1   :  { %3304 = vmatpush1.bf16.msra.mxu1 %v12133_v17  ;;  %3565 = vmatpush1.bf16.msra.mxu0 %v12231_v49  ;;  %v14036_v17 = vld [vmem:[#allocation23_spill] sm:$0xff]  ;;  %v10429_v49 = vld [vmem:[%s13818_s8 + $0x28] sm:$0xff]  }
 0x9d2   :  { %3305 = vmatprep.subr.bf16.mxu1 %v12139_v15  ;;  %3566 = vmatprep.subr.bf16.mxu0 %v12237_v53  ;;  %v14038_v15 = vld [vmem:[#allocation26_spill] sm:$0xff]  ;;  %v10430_v53 = vld [vmem:[%s13818_s8 + $0x20] sm:$0xff]  }
 0x9d5   :  { %3306 = vmatpush1.bf16.msra.mxu1 %v14024_v36  ;;  %3567 = vmatpush1.bf16.msra.mxu0 %v14025_v8 }
 0x9d6   :  { %3307 = vmatprep.subr.bf16.mxu1 %v14026_v14  ;;  %3568 = vmatprep.subr.bf16.mxu0 %v14027_v26  ;;  %v14051_v26 = vld [vmem:[#allocation44_spill] sm:$0xff] }
 0x9d9   :  { %3308 = vmatpush1.bf16.msra.mxu1 %v14028_v33  ;;  %3569 = vmatpush1.bf16.msra.mxu0 %v14029_v34  ;;  %v14052_v34 = vld [vmem:[#allocation17_spill] sm:$0xff] }
 0x9da   :  { %3309 = vmatprep.subr.bf16.mxu1 %v14030_v12  ;;  %3570 = vmatprep.subr.bf16.mxu0 %v14031_v13 }
 0x9dd   :  { %3310 = vmatpush1.bf16.msra.mxu1 %v14032_v31  ;;  %3571 = vmatpush1.bf16.msra.mxu0 %v14033_v11 }
 0x9de   :  { %3597 = vmatprep.subr.bf16.mxu1 %v14034_v59  ;;  %9924 = vmatprep.subr.bf16.mxu0 %v14035_v25 }
 0x9e0   :  { %3328 = vmatmul.mubr.bf16.vlgmr.msra.gmra.mxu1 %v12381_v46  ;;  %3589 = vmatmul.mubr.bf16.vlgmr.msra.gmra.mxu0 %v2949_v20 }
 0x9e1   :  { %3598 = vmatpush1.bf16.msra.mxu1 %v14036_v17  ;;  %3629 = vmatprep.mubr.bf16.mxu1 %v13971_v56 }
 0x9e2   :  { %3599 = vmatprep.subr.bf16.mxu1 %v14037_v0  ;;  %9940 = vmatprep.mubr.msk.bf16.mxu0 %vm11385_vm0, %v14035_v25 }
 0x9e3   :  { %9925 = vmatpush3.bf16.msra.mxu0 %v10427_v47  ;;  %v14055_v47 = vld [vmem:[#allocation47_spill] sm:$0xff] }
 0x9e4   :  { %9926 = vmatprep.subr.bf16.mxu0 %v14035_v25 }
 0x9e5   :  { %3600 = vmatpush1.bf16.msra.mxu1 %v14038_v15 }
 0x9e6   :  { %3601 = vmatprep.subr.bf16.mxu1 %v14039_v10  ;;  %v14053_v10 = vld [vmem:[#allocation45_spill] sm:$0xff] }
 0x9e7   :  { %9927 = vmatpush3.bf16.msra.mxu0 %v10428_v43 }
 0x9e8   :  { %9928 = vmatprep.subr.bf16.mxu0 %v14035_v25 }
 0x9e9   :  { %3602 = vmatpush1.bf16.msra.mxu1 %v14040_v48 }
 0x9ea   :  { %3603 = vmatprep.subr.bf16.mxu1 %v14041_v23 }
 0x9eb   :  { %9929 = vmatpush3.bf16.msra.mxu0 %v10429_v49 }
 0x9ec   :  { %9930 = vmatprep.subr.bf16.mxu0 %v14035_v25 }
 0x9ed   :  { %3604 = vmatpush1.bf16.msra.mxu1 %v14042_v7 }
 0x9ee   :  { %3605 = vmatprep.subr.bf16.mxu1 %v14043_v42 }
 0x9ef   :  { %9931 = vmatpush3.bf16.msra.mxu0 %v10430_v53 }
 0x9f0   :  { %9932 = vmatprep.subr.bf16.mxu0 %v14035_v25 }
 0x9f1   :  { %3606 = vmatpush1.bf16.msra.mxu1 %v14044_v62 }
 0x9f2   :  { %3607 = vmatprep.subr.bf16.mxu1 %v14045_v38  ;;  %v14054_v38 = vld [vmem:[#allocation46_spill] sm:$0xff] }
 0x9f3   :  { %9933 = vmatpush3.bf16.msra.mxu0 %v10431_v1 }
 0x9f4   :  { %9934 = vmatprep.subr.bf16.mxu0 %v14035_v25 }
 0x9f5   :  { %3608 = vmatpush1.bf16.msra.mxu1 %v14046_v60 }
 0x9f6   :  { %3609 = vmatprep.subr.bf16.mxu1 %v14047_v30 }
 0x9f7   :  { %9935 = vmatpush3.bf16.msra.mxu0 %v10432_v41 }
 0x9f8   :  { %9936 = vmatprep.subr.bf16.mxu0 %v14035_v25 }
 0x9f9   :  { %3610 = vmatpush1.bf16.msra.mxu1 %v14048_v29 }
 0x9fa   :  { %3611 = vmatprep.subr.bf16.mxu1 %v14049_v51 }
 0x9fb   :  { %9937 = vmatpush3.bf16.msra.mxu0 %v10433_v40 }
 0x9fc   :  { %9938 = vmatprep.subr.bf16.mxu0 %v14035_v25 }
 0x9fd   :  { %3612 = vmatpush1.bf16.msra.mxu1 %v14050_v52 }
 0x9fe   :  { %9944 = vmatprep.subr.bf16.mxu1 %v14035_v25 }
 0x9ff   :  { %9939 = vmatpush3.bf16.msra.mxu0 %v10434_v16 }
 0xa00   :  { %3630 = vmatmul.mubr.bf16.vlgmr.msra.gmra.mxu1 %v2949_v20  ;;  %4084 = vmatprep.subr.bf16.mxu0 %v12492_v28 }
 0xa01   :  { %9960 = vmatprep.mubr.msk.bf16.mxu1 %vm11385_vm0, %v14035_v25  ;;  %9945 = vmatpush3.bf16.msra.mxu1 %v10438_v2 }
 0xa02   :  { %9946 = vmatprep.subr.bf16.mxu1 %v14035_v25 }
 0xa05   :  { %9947 = vmatpush3.bf16.msra.mxu1 %v10442_v61 }
 0xa06   :  { %9948 = vmatprep.subr.bf16.mxu1 %v14035_v25 }
 0xa09   :  { %9949 = vmatpush3.bf16.msra.mxu1 %v10446_v35 }
 0xa0a   :  { %9950 = vmatprep.subr.bf16.mxu1 %v14035_v25 }
 0xa0d   :  { %9951 = vmatpush3.bf16.msra.mxu1 %v10450_v44 }
 0xa0e   :  { %9952 = vmatprep.subr.bf16.mxu1 %v14035_v25 }
 0xa11   :  { %9953 = vmatpush3.bf16.msra.mxu1 %v10454_v6 }
 0xa12   :  { %9954 = vmatprep.subr.bf16.mxu1 %v14035_v25 }
 0xa15   :  { %9955 = vmatpush3.bf16.msra.mxu1 %v10458_v39 }
 0xa16   :  { %9956 = vmatprep.subr.bf16.mxu1 %v14035_v25 }
 0xa19   :  { %9957 = vmatpush3.bf16.msra.mxu1 %v10462_v32 }
 0xa1a   :  { %9958 = vmatprep.subr.bf16.mxu1 %v14035_v25 }
 0xa1d   :  { %9959 = vmatpush3.bf16.msra.mxu1 %v10466_v50 }
 0xa1e   :  { %4125 = vmatprep.subr.bf16.mxu1 %v12511_v19 }
 0xa60   :  { %v2942_v22 = vpop.f32.mrf.mxu0 }
 0xa61   :  { %v2943_v54 = vadd.f32 %v12503_v3, %v2942_v22 }
 0xa62   :  { %v9902_v46 = vpop.f32.mrf.mxu0 }
 0xa63   :  { %2948 = vst [vmem:[%s13822_s12] sm:$0xff] %v2943_v54 }
 0xa64   :  { %v2945_v55 = vpop.f32.mrf.mxu0 }
 0xa66   :  { %v9903_v4 = vpop.f32.mrf.mxu0 }
 0xa80   :  { %v3288_v24 = vpop.f32.mrf.mxu0  ;;  %v3055_v37 = vpop.f32.mrf.mxu1 }
 0xa81   :  { %v3056_v5 = vadd.f32 %v12517_v58, %v3055_v37  ;;  %v3336_v12 = vadd.f32 %v3288_v24, %v14052_v34 }
 0xa82   :  { %v3290_v9 = vpop.f32.mrf.mxu0  ;;  %v9922_v18 = vpop.f32.mrf.mxu1 }
 0xa83   :  { %3061 = vst [vmem:[%s13823_s13] sm:$0xff] %v3056_v5  ;;  %v3337_v33 = vadd.f32 %v3290_v9, %v14051_v26  ;;  %v9156_v31 = vmul.f32 -1.442695, %v3336_v12 }
 0xa84   :  { %v3292_v20 = vpop.f32.mrf.mxu0  ;;  %v3058_v36 = vpop.f32.mrf.mxu1 }
 0xa85   :  { %v9157_v13 = vmul.f32 -1.442695, %v3337_v33  ;;  %v12535_v20 = vld [vmem:[#allocation7 + $0xe0] ss:$16 sps:$4 sm:$0xff]   ;;  %v12547_v33 = vld [vmem:[#allocation7 + $0xa4] ss:$16 sps:$4 sm:$0xff]  }
 0xa86   :  { %v3293_v8 = vpop.f32.mrf.mxu0  ;;  %v9923_v14 = vpop.f32.mrf.mxu1 }
 0xa87   :  { %10987 = vpow2.f32 %v9157_v13  ;;  %v12539_v8 = vld [vmem:[#allocation7 + $0xc4] ss:$16 sps:$4 sm:$0xff]   ;;  %v12543_v14 = vld [vmem:[#allocation7 + $0xc0] ss:$16 sps:$4 sm:$0xff]  }
 0xa88   :  { %10989 = vpow2.f32 %v9156_v31  ;;  %v12550_v13 = vld [vmem:[#allocation7 + $0xa0] ss:$16 sps:$4 sm:$0xff]  }
 0xa94   :  { %v10988_v11 = vpop.eup %10987 }
 0xa95   :  { %v10990_v59 = vpop.eup %10989  ;;  %v3350_v17 = vadd.f32 1.0, %v10988_v11  ;;  %v12553_v11 = vld [vmem:[#allocation7 + $0x84] ss:$16 sps:$4 sm:$0xff]  }
 0xa96   :  { %v3349_v23 = vadd.f32 1.0, %v10990_v59 }
 0xa97   :  { %10991 = vrcp.f32 %v3350_v17 }
 0xaa0   :  { %v3329_v0 = vpop.f32.mrf.mxu1  ;;  %v3590_v15 = vpop.f32.mrf.mxu0 }
 0xaa1   :  { %v3338_v48 = vadd.f32 %v3329_v0, %v14053_v10  ;;  %v3638_v43 = vadd.f32 %v3590_v15, %v14055_v47 }
 0xaa2   :  { %v3331_v7 = vpop.f32.mrf.mxu1  ;;  %v3592_v42 = vpop.f32.mrf.mxu0 }
 0xaa3   :  { %v9158_v62 = vmul.f32 -1.442695, %v3338_v48  ;;  %v3339_v60 = vadd.f32 %v3331_v7, %v14054_v38  ;;  %v3639_v49 = vadd.f32 %v3592_v42, %v12362_v63  ;;  %v9191_v53 = vmul.f32 -1.442695, %v3638_v43  ;;  %v12560_v7 = vld [vmem:[#allocation7 + $0x64] ss:$16 sps:$4 sm:$0xff]  }
 0xaa4   :  { %v3333_v30 = vpop.f32.mrf.mxu1  ;;  %v3594_v29 = vpop.f32.mrf.mxu0  ;;  %v12584_v43 = vld [vmem:[#allocation7] ss:$16 sps:$4 sm:$0xff]  }
 0xaa5   :  { %10993 = vpow2.f32 %v9158_v62  ;;  %v9192_v1 = vmul.f32 -1.442695, %v3639_v49  ;;  %v10992_v41 = vpop.eup %10991  ;;  %v12566_v62 = vld [vmem:[#allocation7 + $0x60] ss:$16 sps:$4 sm:$0xff]   ;;  %v12575_v30 = vld [vmem:[#allocation7 + $0x24] ss:$16 sps:$4 sm:$0xff]  }
 0xaa6   :  { %10995 = vrcp.f32 %v3349_v23  ;;  %v3334_v51 = vpop.f32.mrf.mxu1  ;;  %v3595_v52 = vpop.f32.mrf.mxu0  ;;  %v3359_v35 = vmul.f32 %v10992_v41, %v12368_v57  ;;  %v12557_v23 = vld [vmem:[#allocation7 + $0x80] ss:$16 sps:$4 sm:$0xff]   ;;  %v12589_v41 = vld [vmem:[#allocation7 + $0xe8] ss:$16 sps:$4 sm:$0xff]  }
 0xaa7   :  { %10997 = vtanh.f32 %v3339_v60  ;;  %v12572_v60 = vld [vmem:[#allocation7 + $0x40] ss:$16 sps:$4 sm:$0xff]   ;;  %v12581_v51 = vld [vmem:[#allocation7 + $0x4] ss:$16 sps:$4 sm:$0xff]  }
 0xaa8   :  { %10999 = vpow2.f32 %v9191_v53  ;;  %v12578_v29 = vld [vmem:[#allocation7 + $0x20] ss:$16 sps:$4 sm:$0xff]   ;;  %v12587_v53 = vld [vmem:[#allocation8 + $0xe4] ss:$16 sps:$4 sm:$0xff]  }
 0xaa9   :  { %11001 = vpow2.f32 %v9192_v1 }
 0xab2   :  { %v10994_v40 = vpop.eup %10993 }
 0xab3   :  { %v10996_v16 = vpop.eup %10995  ;;  %v3351_v61 = vadd.f32 1.0, %v10994_v40  ;;  %v12592_v40 = vld [vmem:[#allocation8 + $0xe0] ss:$16 sps:$4 sm:$0xff]  }
 0xab4   :  { %v10998_v2 = vpop.eup %10997 }
 0xab5   :  { %v3360_v44 = vmul.f32 %v10998_v2, %v10996_v16  ;;  %11003 = vrcp.f32 %v3351_v61  ;;  %v11000_v39 = vpop.eup %10999  ;;  %v12596_v2 = vld [vmem:[#allocation7 + $0xcc] ss:$16 sps:$4 sm:$0xff]   ;;  %v12599_v61 = vld [vmem:[#allocation8 + $0xc4] ss:$16 sps:$4 sm:$0xff]  }
 0xab6   :  { %v11002_v22 = vpop.eup %11001  ;;  %v3651_v54 = vadd.f32 1.0, %v11000_v39  ;;  %v12610_v39 = vld [vmem:[#allocation7 + $0xac] ss:$16 sps:$4 sm:$0xff]  }
 0xab7   :  { %v12530_v6 = vadd.f32 %v3360_v44, %v3359_v35  ;;  %v3652_v32 = vadd.f32 1.0, %v11002_v22  ;;  %v12604_v35 = vld [vmem:[#allocation7 + $0xc8] ss:$16 sps:$4 sm:$0xff]   ;;  %v12608_v44 = vld [vmem:[#allocation8 + $0xc0] ss:$16 sps:$4 sm:$0xff]  }
 0xab8   :  { %v12613_v22 = vld [vmem:[#allocation8 + $0xa4] ss:$16 sps:$4 sm:$0xff]  }
 0xab9   :  { %11005 = vtanh.f32 %v12530_v6 }
 0xaba   :  { %11007 = vrcp.f32 %v3651_v54  ;;  %v12618_v54 = vld [vmem:[#allocation7 + $0xa8] ss:$16 sps:$4 sm:$0xff]  }
 0xabb   :  { %11009 = vrcp.f32 %v3652_v32  ;;  %v12622_v32 = vld [vmem:[#allocation8 + $0xa0] ss:$16 sps:$4 sm:$0xff]  }
 0xac0   :  { %v3631_v46 = vpop.f32.mrf.mxu1 }
 0xac1   :  { %v3640_v55 = vadd.f32 %v3631_v46, %v12373_v45  ;;  %v12624_v46 = vld [vmem:[#allocation7 + $0x8c] ss:$16 sps:$4 sm:$0xff]  }
 0xac2   :  { %v3633_v50 = vpop.f32.mrf.mxu1  ;;  %v11004_v37 = vpop.eup %11003 }
 0xac3   :  { %v9193_v4 = vmul.f32 -1.442695, %v3640_v55  ;;  %v3641_v24 = vadd.f32 %v3633_v50, %v12378_v21  ;;  %v12627_v55 = vld [vmem:[#allocation8 + $0x84] ss:$16 sps:$4 sm:$0xff]   ;;  %v12630_v50 = vld [vmem:[#allocation7 + $0x88] ss:$16 sps:$4 sm:$0xff]  }
 0xac4   :  { %v3635_v57 = vpop.f32.mrf.mxu1 }
 0xac5   :  { %11011 = vpow2.f32 %v9193_v4  ;;  %v12634_v4 = vld [vmem:[#allocation8 + $0x80] ss:$16 sps:$4 sm:$0xff]   ;;  %v12639_v57 = vld [vmem:[#allocation8 + $0x64] ss:$16 sps:$4 sm:$0xff]  }
 0xac6   :  { %v11006_v5 = vpop.eup %11005  ;;  %11013 = vtanh.f32 %v3641_v24  ;;  %v3636_v9 = vpop.f32.mrf.mxu1  ;;  %v12636_v24 = vld [vmem:[#allocation7 + $0x6c] ss:$16 sps:$4 sm:$0xff]  }
 0xac7   :  { %v3363_v18 = vmul.f32 %v11006_v5, %v11004_v37  ;;  %v11008_v12 = vpop.eup %11007  ;;  %v12642_v37 = vld [vmem:[#allocation7 + $0x68] ss:$16 sps:$4 sm:$0xff]   ;;  %v12646_v5 = vld [vmem:[#allocation8 + $0x60] ss:$16 sps:$4 sm:$0xff]   ;;  %v12648_v9 = vld [vmem:[#allocation7 + $0x4c] ss:$16 sps:$4 sm:$0xff]  }
 0xac8   :  { %v11010_v31 = vpop.eup %11009 }
 0xac9   :  { %v12537_v36 = vpack.c.bf16 %v3363_v18, %v3363_v18  ;;  %v3661_v15 = vmul.f32 %v11010_v31, %v12391_v27  ;;  %v12569_v27 = vld [vmem:[#allocation7 + $0x44] ss:$16 sps:$4 sm:$0xff]   ;;  %v12658_v31 = vld [vmem:[#allocation8 + $0x40] ss:$16 sps:$4 sm:$0xff]  }
 0xaca   :  { %v12651_v18 = vld [vmem:[#allocation8 + $0x44] ss:$16 sps:$4 sm:$0xff]   ;;  %14057 = vst [vmem:[#allocation34_spill] sm:$0xff] %v12658_v31 }
 0xacb   :  { %9941 = vmatmul.mubr.bf16.vlgmr.msra.gmra.mxu0 %v12537_v36 }
 0xacc   :  { %4085 = vmatpush1.bf16.msra.mxu0 %v12535_v20  ;;  %4116 = vmatprep.mubr.bf16.mxu0 %v13971_v56 }
 0xacd   :  { %4086 = vmatprep.subr.bf16.mxu0 %v12539_v8 }
 0xad0   :  { %4087 = vmatpush1.bf16.msra.mxu0 %v12543_v14 }
 0xad1   :  { %4088 = vmatprep.subr.bf16.mxu0 %v12547_v33 }
 0xad2   :  { %v11012_v59 = vpop.eup %11011 }
 0xad3   :  { %v11014_v17 = vpop.eup %11013  ;;  %v3653_v0 = vadd.f32 1.0, %v11012_v59  ;;  %v12660_v59 = vld [vmem:[#allocation7 + $0x2c] ss:$16 sps:$4 sm:$0xff]  }
 0xad4   :  { %v3662_v48 = vmul.f32 %v11014_v17, %v11008_v12  ;;  %4089 = vmatpush1.bf16.msra.mxu0 %v12550_v13  ;;  %v12654_v12 = vld [vmem:[#allocation7 + $0x48] ss:$16 sps:$4 sm:$0xff]   ;;  %14058 = vst [vmem:[#allocation20_spill] sm:$0xff] %v12660_v59  ;;  %v12663_v17 = vld [vmem:[#allocation8 + $0x24] ss:$16 sps:$4 sm:$0xff]  }
 0xad5   :  { %4090 = vmatprep.subr.bf16.mxu0 %v12553_v11  ;;  %11015 = vrcp.f32 %v3653_v0  ;;  %14056 = vst [vmem:[#allocation18_spill] sm:$0xff] %v12654_v12  ;;  %14059 = vst [vmem:[#allocation36_spill] sm:$0xff] %v12663_v17  ;;  %v12666_v0 = vld [vmem:[#allocation7 + $0x28] ss:$16 sps:$4 sm:$0xff]  }
 0xad6   :  { %v12562_v42 = vadd.f32 %v3662_v48, %v3661_v15  ;;  %14060 = vst [vmem:[#allocation19_spill] sm:$0xff] %v12666_v0  ;;  %v12670_v15 = vld [vmem:[#allocation8 + $0x20] ss:$16 sps:$4 sm:$0xff]   ;;  %v12672_v48 = vld [vmem:[#allocation7 + $0xc] ss:$16 sps:$4 sm:$0xff]  }
 0xad7   :  { %14061 = vst [vmem:[#allocation38_spill] sm:$0xff] %v12670_v15  ;;  %14062 = vst [vmem:[#allocation21_spill] sm:$0xff] %v12672_v48 }
 0xad8   :  { %11017 = vtanh.f32 %v12562_v42  ;;  %4091 = vmatpush1.bf16.msra.mxu0 %v12557_v23 }
 0xad9   :  { %4092 = vmatprep.subr.bf16.mxu0 %v12560_v7 }
 0xadc   :  { %4093 = vmatpush1.bf16.msra.mxu0 %v12566_v62 }
 0xadd   :  { %4094 = vmatprep.subr.bf16.mxu0 %v12569_v27 }
 0xae0   :  { %4095 = vmatpush1.bf16.msra.mxu0 %v12572_v60 }
 0xae1   :  { %4096 = vmatprep.subr.bf16.mxu0 %v12575_v30 }
 0xae2   :  { %v11016_v52 = vpop.eup %11015 }
 0xae4   :  { %4097 = vmatpush1.bf16.msra.mxu0 %v12578_v29 }
 0xae5   :  { %v11018_v49 = vpop.eup %11017  ;;  %4098 = vmatprep.subr.bf16.mxu0 %v12581_v51 }
 0xae6   :  { %v3665_v1 = vmul.f32 %v11018_v49, %v11016_v52  ;;  %v12675_v52 = vld [vmem:[#allocation8 + $0x4] ss:$16 sps:$4 sm:$0xff]   ;;  %v12678_v49 = vld [vmem:[#allocation7 + $0x8] ss:$16 sps:$4 sm:$0xff]  }
 0xae7   :  { %14063 = vst [vmem:[#allocation40_spill] sm:$0xff] %v12675_v52  ;;  %14064 = vst [vmem:[#allocation24_spill] sm:$0xff] %v12678_v49 }
 0xae8   :  { %4099 = vmatpush1.bf16.msra.mxu0 %v12584_v43  ;;  %v12594_v16 = vpack.c.bf16 %v3665_v1, %v3665_v1  ;;  %v12682_v1 = vld [vmem:[#allocation8] ss:$16 sps:$4 sm:$0xff]  }
 0xae9   :  { %4386 = vmatprep.subr.bf16.mxu0 %v12587_v53  ;;  %14065 = vst [vmem:[#allocation42_spill] sm:$0xff] %v12682_v1 }
 0xaea   :  { %9961 = vmatmul.mubr.bf16.vlgmr.msra.gmra.mxu1 %v12594_v16 }
 0xaeb   :  { %4117 = vmatmul.mubr.bf16.vlgmr.msra.gmra.mxu0 %v12537_v36  ;;  %4126 = vmatpush1.bf16.msra.mxu1 %v12589_v41 }
 0xaec   :  { %4387 = vmatpush1.bf16.msra.mxu0 %v12592_v40  ;;  %4127 = vmatprep.subr.bf16.mxu1 %v12596_v2 }
 0xaed   :  { %4388 = vmatprep.subr.bf16.mxu0 %v12599_v61  ;;  %4157 = vmatprep.mubr.bf16.mxu1 %v13971_v56 }
 0xaee   :  { %4418 = vmatprep.mubr.bf16.mxu0 %v13971_v56 }
 0xaef   :  { %4128 = vmatpush1.bf16.msra.mxu1 %v12604_v35 }
 0xaf0   :  { %4389 = vmatpush1.bf16.msra.mxu0 %v12608_v44  ;;  %4129 = vmatprep.subr.bf16.mxu1 %v12610_v39 }
 0xaf1   :  { %4390 = vmatprep.subr.bf16.mxu0 %v12613_v22 }
 0xaf3   :  { %4130 = vmatpush1.bf16.msra.mxu1 %v12618_v54 }
 0xaf4   :  { %4391 = vmatpush1.bf16.msra.mxu0 %v12622_v32  ;;  %4131 = vmatprep.subr.bf16.mxu1 %v12624_v46 }
 0xaf5   :  { %4392 = vmatprep.subr.bf16.mxu0 %v12627_v55 }
 0xaf7   :  { %4132 = vmatpush1.bf16.msra.mxu1 %v12630_v50 }
 0xaf8   :  { %4393 = vmatpush1.bf16.msra.mxu0 %v12634_v4  ;;  %4133 = vmatprep.subr.bf16.mxu1 %v12636_v24 }
 0xaf9   :  { %4394 = vmatprep.subr.bf16.mxu0 %v12639_v57 }
 0xafb   :  { %4134 = vmatpush1.bf16.msra.mxu1 %v12642_v37 }
 0xafc   :  { %4395 = vmatpush1.bf16.msra.mxu0 %v12646_v5  ;;  %4135 = vmatprep.subr.bf16.mxu1 %v12648_v9 }
 0xafd   :  { %4396 = vmatprep.subr.bf16.mxu0 %v12651_v18 }
 0xaff   :  { %4136 = vmatpush1.bf16.msra.mxu1 %v12654_v12 }
 0xb00   :  { %4397 = vmatpush1.bf16.msra.mxu0 %v12658_v31  ;;  %4137 = vmatprep.subr.bf16.mxu1 %v12660_v59  ;;  %v12684_v31 = vld [vmem:[#allocation8 + $0xec] ss:$16 sps:$4 sm:$0xff]   ;;  %v12688_v59 = vld [vmem:[#allocation8 + $0xe8] ss:$16 sps:$4 sm:$0xff]  }
 0xb01   :  { %4398 = vmatprep.subr.bf16.mxu0 %v12663_v17  ;;  %14066 = vst [vmem:[#allocation22_spill] sm:$0xff] %v12684_v31  ;;  %14067 = vst [vmem:[#allocation23_spill] sm:$0xff] %v12688_v59 }
 0xb03   :  { %4138 = vmatpush1.bf16.msra.mxu1 %v12666_v0  ;;  %v12692_v0 = vld [vmem:[#allocation8 + $0xcc] ss:$16 sps:$4 sm:$0xff]  }
 0xb04   :  { %4399 = vmatpush1.bf16.msra.mxu0 %v12670_v15  ;;  %4139 = vmatprep.subr.bf16.mxu1 %v12672_v48  ;;  %14068 = vst [vmem:[#allocation25_spill] sm:$0xff] %v12692_v0  ;;  %v12698_v48 = vld [vmem:[#allocation8 + $0xc8] ss:$16 sps:$4 sm:$0xff]  }
 0xb05   :  { %4400 = vmatprep.subr.bf16.mxu0 %v12675_v52  ;;  %14069 = vst [vmem:[#allocation26_spill] sm:$0xff] %v12698_v48 }
 0xb07   :  { %4140 = vmatpush1.bf16.msra.mxu1 %v12678_v49  ;;  %v12701_v49 = vld [vmem:[#allocation8 + $0xac] ss:$16 sps:$4 sm:$0xff]  }
 0xb08   :  { %4401 = vmatpush1.bf16.msra.mxu0 %v12682_v1  ;;  %4427 = vmatprep.subr.bf16.mxu1 %v12684_v31  ;;  %14070 = vst [vmem:[#allocation28_spill] sm:$0xff] %v12701_v49  ;;  %v12707_v31 = vld [vmem:[#allocation8 + $0xa8] ss:$16 sps:$4 sm:$0xff]  }
 0xb09   :  { %9964 = vmatprep.subr.bf16.mxu0 %v14035_v25  ;;  %14071 = vst [vmem:[#allocation27_spill] sm:$0xff] %v12707_v31  ;;  %v12719_v1 = vld [vmem:[#allocation8 + $0x68] ss:$16 sps:$4 sm:$0xff]  }
 0xb0a   :  { %4158 = vmatmul.mubr.bf16.vlgmr.msra.gmra.mxu1 %v12537_v36  ;;  %v12710_v36 = vld [vmem:[#allocation8 + $0x8c] ss:$16 sps:$4 sm:$0xff]   ;;  %14075 = vst [vmem:[#allocation31_spill] sm:$0xff] %v12719_v1 }
 0xb0b   :  { %4419 = vmatmul.mubr.bf16.vlgmr.msra.gmra.mxu0 %v12594_v16  ;;  %4428 = vmatpush1.bf16.msra.mxu1 %v12688_v59  ;;  %14072 = vst [vmem:[#allocation29_spill] sm:$0xff] %v12710_v36  ;;  %v12713_v59 = vld [vmem:[#allocation8 + $0x88] ss:$16 sps:$4 sm:$0xff]  }
 0xb0c   :  { %4429 = vmatprep.subr.bf16.mxu1 %v12692_v0  ;;  %4459 = vmatprep.mubr.bf16.mxu1 %v13971_v56  ;;  %14073 = vst [vmem:[#allocation32_spill] sm:$0xff] %v12713_v59  ;;  %v12716_v0 = vld [vmem:[#allocation8 + $0x6c] ss:$16 sps:$4 sm:$0xff]  }
 0xb0d   :  { %9980 = vmatprep.mubr.msk.bf16.mxu0 %vm11385_vm0, %v14035_v25  ;;  %14074 = vst [vmem:[#allocation30_spill] sm:$0xff] %v12716_v0 }
 0xb0f   :  { %4430 = vmatpush1.bf16.msra.mxu1 %v12698_v48  ;;  %v12722_v48 = vld [vmem:[#allocation8 + $0x4c] ss:$16 sps:$4 sm:$0xff]  }
 0xb10   :  { %4431 = vmatprep.subr.bf16.mxu1 %v12701_v49  ;;  %14076 = vst [vmem:[#allocation33_spill] sm:$0xff] %v12722_v48  ;;  %v12725_v49 = vld [vmem:[#allocation8 + $0x48] ss:$16 sps:$4 sm:$0xff]  }
 0xb11   :  { %14077 = vst [vmem:[#allocation35_spill] sm:$0xff] %v12725_v49 }
 0xb13   :  { %4432 = vmatpush1.bf16.msra.mxu1 %v12707_v31  ;;  %v12728_v31 = vld [vmem:[#allocation8 + $0x2c] ss:$16 sps:$4 sm:$0xff]  }
 0xb14   :  { %4433 = vmatprep.subr.bf16.mxu1 %v12710_v36  ;;  %14078 = vst [vmem:[#allocation37_spill] sm:$0xff] %v12728_v31  ;;  %v12731_v36 = vld [vmem:[#allocation8 + $0x28] ss:$16 sps:$4 sm:$0xff]  }
 0xb15   :  { %14079 = vst [vmem:[#allocation39_spill] sm:$0xff] %v12731_v36 }
 0xb17   :  { %4434 = vmatpush1.bf16.msra.mxu1 %v12713_v59  ;;  %v12734_v59 = vld [vmem:[#allocation8 + $0xc] ss:$16 sps:$4 sm:$0xff]  }
 0xb18   :  { %4435 = vmatprep.subr.bf16.mxu1 %v12716_v0  ;;  %14080 = vst [vmem:[#allocation41_spill] sm:$0xff] %v12734_v59  ;;  %v12737_v0 = vld [vmem:[#allocation8 + $0x8] ss:$16 sps:$4 sm:$0xff]  }
 0xb19   :  { %14081 = vst [vmem:[#allocation43_spill] sm:$0xff] %v12737_v0 }
 0xb1b   :  { %4436 = vmatpush1.bf16.msra.mxu1 %v12719_v1 }
 0xb1c   :  { %4437 = vmatprep.subr.bf16.mxu1 %v12722_v48 }
 0xb1f   :  { %4438 = vmatpush1.bf16.msra.mxu1 %v12725_v49  ;;  %v10551_v49 = vld [vmem:[#allocation11 + $0x18] sm:$0xff]  }
 0xb20   :  { %4439 = vmatprep.subr.bf16.mxu1 %v12728_v31  ;;  %v10539_v31 = vld [vmem:[%s13818_s8 + $0x38] sm:$0xff]  }
 0xb21   :  { %9965 = vmatpush3.bf16.msra.mxu0 %v10539_v31  ;;  %v10542_v31 = vld [vmem:[%s13818_s8 + $0x20] sm:$0xff]  }
 0xb22   :  { %9966 = vmatprep.subr.bf16.mxu0 %v14035_v25 }
 0xb23   :  { %4440 = vmatpush1.bf16.msra.mxu1 %v12731_v36  ;;  %v10549_v36 = vld [vmem:[#allocation11 + $0x28] sm:$0xff]  }
 0xb24   :  { %4441 = vmatprep.subr.bf16.mxu1 %v12734_v59  ;;  %v10540_v59 = vld [vmem:[%s13818_s8 + $0x30] sm:$0xff]  }
 0xb25   :  { %9967 = vmatpush3.bf16.msra.mxu0 %v10540_v59  ;;  %v10543_v59 = vld [vmem:[%s13818_s8 + $0x18] sm:$0xff]  }
 0xb26   :  { %9968 = vmatprep.subr.bf16.mxu0 %v14035_v25 }
 0xb27   :  { %4442 = vmatpush1.bf16.msra.mxu1 %v12737_v0  ;;  %v10544_v0 = vld [vmem:[%s13818_s8 + $0x10] sm:$0xff]  }
 0xb28   :  { %9984 = vmatprep.subr.bf16.mxu1 %v14035_v25 }
 0xb2a   :  { %4460 = vmatmul.mubr.bf16.vlgmr.msra.gmra.mxu1 %v12594_v16  ;;  %v10541_v16 = vld [vmem:[%s13818_s8 + $0x28] sm:$0xff]  }
 0xb2b   :  { %10000 = vmatprep.mubr.msk.bf16.mxu1 %vm11385_vm0, %v14035_v25  ;;  %9969 = vmatpush3.bf16.msra.mxu0 %v10541_v16  ;;  %v10545_v16 = vld [vmem:[%s13818_s8 + $0x8] sm:$0xff]  }
 0xb2c   :  { %9970 = vmatprep.subr.bf16.mxu0 %v14035_v25 }
 0xb2f   :  { %9971 = vmatpush3.bf16.msra.mxu0 %v10542_v31  ;;  %v10546_v31 = vld [vmem:[%s13818_s8] sm:$0xff]  }
 0xb30   :  { %9972 = vmatprep.subr.bf16.mxu0 %v14035_v25 }
 0xb33   :  { %9973 = vmatpush3.bf16.msra.mxu0 %v10543_v59  ;;  %v10547_v59 = vld [vmem:[#allocation11 + $0x38] sm:$0xff]  }
 0xb34   :  { %9974 = vmatprep.subr.bf16.mxu0 %v14035_v25  ;;  %9985 = vmatpush3.bf16.msra.mxu1 %v10547_v59  ;;  %v10553_v59 = vld [vmem:[#allocation11 + $0x8] sm:$0xff]  }
 0xb35   :  { %9986 = vmatprep.subr.bf16.mxu1 %v14035_v25 }
 0xb37   :  { %9975 = vmatpush3.bf16.msra.mxu0 %v10544_v0  ;;  %v10548_v0 = vld [vmem:[#allocation11 + $0x30] sm:$0xff]  }
 0xb38   :  { %9976 = vmatprep.subr.bf16.mxu0 %v14035_v25  ;;  %9987 = vmatpush3.bf16.msra.mxu1 %v10548_v0 }
 0xb39   :  { %9988 = vmatprep.subr.bf16.mxu1 %v14035_v25 }
 0xb3b   :  { %9977 = vmatpush3.bf16.msra.mxu0 %v10545_v16  ;;  %v10550_v16 = vld [vmem:[#allocation11 + $0x20] sm:$0xff]  }
 0xb3c   :  { %9978 = vmatprep.subr.bf16.mxu0 %v14035_v25  ;;  %9989 = vmatpush3.bf16.msra.mxu1 %v10549_v36 }
 0xb3d   :  { %9990 = vmatprep.subr.bf16.mxu1 %v14035_v25 }
 0xb3f   :  { %9979 = vmatpush3.bf16.msra.mxu0 %v10546_v31 }
 0xb40   :  { %4914 = vmatprep.subr.bf16.mxu0 %v12492_v28  ;;  %9991 = vmatpush3.bf16.msra.mxu1 %v10550_v16  ;;  %v10552_v28 = vld [vmem:[#allocation11 + $0x10] sm:$0xff]  }
 0xb41   :  { %9992 = vmatprep.subr.bf16.mxu1 %v14035_v25 }
 0xb44   :  { %9993 = vmatpush3.bf16.msra.mxu1 %v10551_v49  ;;  %v10554_v49 = vld [vmem:[#allocation11] sm:$0xff]  }
 0xb45   :  { %9994 = vmatprep.subr.bf16.mxu1 %v14035_v25 }
 0xb48   :  { %9995 = vmatpush3.bf16.msra.mxu1 %v10552_v28 }
 0xb49   :  { %9996 = vmatprep.subr.bf16.mxu1 %v14035_v25 }
 0xb4c   :  { %9997 = vmatpush3.bf16.msra.mxu1 %v10553_v59 }
 0xb4d   :  { %9998 = vmatprep.subr.bf16.mxu1 %v14035_v25 }
 0xb50   :  { %9999 = vmatpush3.bf16.msra.mxu1 %v10554_v49 }
 0xb51   :  { %4955 = vmatprep.subr.bf16.mxu1 %v12511_v19 }
 0xb8b   :  { %v3772_v31 = vpop.f32.mrf.mxu0 }
 0xb8c   :  { %v3773_v0 = vadd.f32 %v12503_v3, %v3772_v31 }
 0xb8d   :  { %v9942_v48 = vpop.f32.mrf.mxu0 }
 0xb8e   :  { %3778 = vst [vmem:[%s13822_s12 + $0x8] sm:$0xff] %v3773_v0 }
 0xb8f   :  { %v3775_v36 = vpop.f32.mrf.mxu0 }
 0xb91   :  { %v9943_v16 = vpop.f32.mrf.mxu0 }
 0xbaa   :  { %v3885_v28 = vpop.f32.mrf.mxu1 }
 0xbab   :  { %v4118_v1 = vpop.f32.mrf.mxu0  ;;  %v3886_v52 = vadd.f32 %v12517_v58, %v3885_v28 }
 0xbac   :  { %v9962_v15 = vpop.f32.mrf.mxu1  ;;  %v4166_v49 = vadd.f32 %v4118_v1, %v14052_v34 }
 0xbad   :  { %3891 = vst [vmem:[%s13823_s13 + $0x8] sm:$0xff] %v3886_v52  ;;  %v4120_v3 = vpop.f32.mrf.mxu0 }
 0xbae   :  { %v3888_v48 = vpop.f32.mrf.mxu1  ;;  %v4167_v36 = vadd.f32 %v4120_v3, %v14051_v26  ;;  %v9244_v19 = vmul.f32 -1.442695, %v4166_v49 }
 0xbaf   :  { %v4122_v31 = vpop.f32.mrf.mxu0 }
 0xbb0   :  { %v9963_v59 = vpop.f32.mrf.mxu1  ;;  %v9245_v16 = vmul.f32 -1.442695, %v4167_v36 }
 0xbb1   :  { %v4123_v0 = vpop.f32.mrf.mxu0 }
 0xbb2   :  { %11019 = vpow2.f32 %v9245_v16 }
 0xbb3   :  { %11021 = vpow2.f32 %v9244_v19 }
 0xbbf   :  { %v11020_v25 = vpop.eup %11019 }
 0xbc0   :  { %v11022_v58 = vpop.eup %11021  ;;  %v4180_v15 = vadd.f32 1.0, %v11020_v25 }
 0xbc1   :  { %v4179_v12 = vadd.f32 1.0, %v11022_v58 }
 0xbc2   :  { %11023 = vrcp.f32 %v4180_v15 }
 0xbca   :  { %v4159_v28 = vpop.f32.mrf.mxu1 }
 0xbcb   :  { %v4168_v17 = vadd.f32 %v4159_v28, %v14053_v10  ;;  %v4420_v52 = vpop.f32.mrf.mxu0 }
 0xbcc   :  { %v4161_v48 = vpop.f32.mrf.mxu1  ;;  %v4468_v49 = vadd.f32 %v4420_v52, %v14055_v47 }
 0xbcd   :  { %v9246_v31 = vmul.f32 -1.442695, %v4168_v17  ;;  %v4169_v59 = vadd.f32 %v4161_v48, %v14054_v38  ;;  %v4422_v0 = vpop.f32.mrf.mxu0 }
 0xbce   :  { %v4163_v3 = vpop.f32.mrf.mxu1  ;;  %v4469_v16 = vadd.f32 %v4422_v0, %v12362_v63  ;;  %v9279_v19 = vmul.f32 -1.442695, %v4468_v49 }
 0xbcf   :  { %11025 = vpow2.f32 %v9246_v31  ;;  %v4424_v1 = vpop.f32.mrf.mxu0  ;;  %v11024_v17 = vpop.eup %11023 }
 0xbd0   :  { %11027 = vrcp.f32 %v4179_v12  ;;  %v4164_v36 = vpop.f32.mrf.mxu1  ;;  %v9280_v28 = vmul.f32 -1.442695, %v4469_v16  ;;  %v4189_v31 = vmul.f32 %v11024_v17, %v12530_v6 }
 0xbd1   :  { %11029 = vtanh.f32 %v4169_v59  ;;  %v4425_v25 = vpop.f32.mrf.mxu0 }
 0xbd2   :  { %11031 = vpow2.f32 %v9279_v19 }
 0xbd3   :  { %11033 = vpow2.f32 %v9280_v28 }
 0xbdc   :  { %v11026_v58 = vpop.eup %11025 }
 0xbdd   :  { %v11028_v48 = vpop.eup %11027  ;;  %v4181_v15 = vadd.f32 1.0, %v11026_v58 }
 0xbde   :  { %v11030_v38 = vpop.eup %11029 }
 0xbdf   :  { %v4190_v3 = vmul.f32 %v11030_v38, %v11028_v48  ;;  %11035 = vrcp.f32 %v4181_v15  ;;  %v11032_v52 = vpop.eup %11031 }
 0xbe0   :  { %v11034_v59 = vpop.eup %11033  ;;  %v4481_v0 = vadd.f32 1.0, %v11032_v52 }
 0xbe1   :  { %v12800_v12 = vadd.f32 %v4190_v3, %v4189_v31  ;;  %v4482_v1 = vadd.f32 1.0, %v11034_v59 }
 0xbe3   :  { %11037 = vtanh.f32 %v12800_v12 }
 0xbe4   :  { %11039 = vrcp.f32 %v4481_v0 }
 0xbe5   :  { %11041 = vrcp.f32 %v4482_v1 }
 0xbea   :  { %v4461_v36 = vpop.f32.mrf.mxu1 }
 0xbeb   :  { %v4470_v49 = vadd.f32 %v4461_v36, %v12373_v45  ;;  %v10560_v36 = vld [vmem:[%s13818_s8 + $0x10] sm:$0xff]  }
 0xbec   :  { %v4463_v25 = vpop.f32.mrf.mxu1  ;;  %v11036_v38 = vpop.eup %11035 }
 0xbed   :  { %v9281_v16 = vmul.f32 -1.442695, %v4470_v49  ;;  %v4471_v19 = vadd.f32 %v4463_v25, %v12378_v21  ;;  %v10561_v49 = vld [vmem:[%s13818_s8 + $0x8] sm:$0xff]   ;;  %v10562_v25 = vld [vmem:[%s13818_s8] sm:$0xff]  }
 0xbee   :  { %v4465_v6 = vpop.f32.mrf.mxu1 }
 0xbef   :  { %11043 = vpow2.f32 %v9281_v16  ;;  %v12917_v16 = vld [vmem:[#allocation7 + $0xe4] ss:$16 sps:$4 sm:$0xff]  }
 0xbf0   :  { %v11038_v28 = vpop.eup %11037  ;;  %11045 = vtanh.f32 %v4471_v19  ;;  %v4466_v17 = vpop.f32.mrf.mxu1  ;;  %v10566_v19 = vld [vmem:[#allocation11 + $0x38] sm:$0xff]   ;;  %v10570_v6 = vld [vmem:[#allocation11 + $0x30] sm:$0xff]  }
 0xbf1   :  { %v4193_v58 = vmul.f32 %v11038_v28, %v11036_v38  ;;  %v11040_v15 = vpop.eup %11039  ;;  %v10574_v38 = vld [vmem:[#allocation11 + $0x28] sm:$0xff]   ;;  %v10578_v28 = vld [vmem:[#allocation11 + $0x20] sm:$0xff]   ;;  %v10582_v17 = vld [vmem:[#allocation11 + $0x18] sm:$0xff]  }
 0xbf2   :  { %v11042_v31 = vpop.eup %11041 }
 0xbf3   :  { %v12805_v48 = vpack.c.bf16 %v4193_v58, %v4193_v58  ;;  %v4491_v0 = vmul.f32 %v11042_v31, %v12562_v42  ;;  %v14085_v42 = vld [vmem:[#allocation36_spill] sm:$0xff]  ;;  %v10586_v58 = vld [vmem:[#allocation11 + $0x10] sm:$0xff]   ;;  %v10590_v31 = vld [vmem:[#allocation11 + $0x8] sm:$0xff]  }
 0xbf5   :  { %9981 = vmatmul.mubr.bf16.vlgmr.msra.gmra.mxu0 %v12805_v48 }
 0xbf6   :  { %4915 = vmatpush1.bf16.msra.mxu0 %v12535_v20  ;;  %4946 = vmatprep.mubr.bf16.mxu0 %v13971_v56 }
 0xbf7   :  { %4916 = vmatprep.subr.bf16.mxu0 %v12539_v8 }
 0xbfa   :  { %4917 = vmatpush1.bf16.msra.mxu0 %v12543_v14 }
 0xbfb   :  { %4918 = vmatprep.subr.bf16.mxu0 %v12547_v33 }
 0xbfc   :  { %v11044_v3 = vpop.eup %11043 }
 0xbfd   :  { %v11046_v52 = vpop.eup %11045  ;;  %v4483_v59 = vadd.f32 1.0, %v11044_v3 }
 0xbfe   :  { %v4492_v1 = vmul.f32 %v11046_v52, %v11040_v15  ;;  %4919 = vmatpush1.bf16.msra.mxu0 %v12550_v13 }
 0xbff   :  { %4920 = vmatprep.subr.bf16.mxu0 %v12553_v11  ;;  %11047 = vrcp.f32 %v4483_v59  ;;  %v14082_v11 = vld [vmem:[#allocation18_spill] sm:$0xff] }
 0xc00   :  { %v12816_v20 = vadd.f32 %v4492_v1, %v4491_v0  ;;  %v10594_v0 = vld [vmem:[#allocation11] sm:$0xff]  }
 0xc02   :  { %11049 = vtanh.f32 %v12816_v20  ;;  %4921 = vmatpush1.bf16.msra.mxu0 %v12557_v23  ;;  %v14083_v23 = vld [vmem:[#allocation34_spill] sm:$0xff] }
 0xc03   :  { %4922 = vmatprep.subr.bf16.mxu0 %v12560_v7  ;;  %v14084_v7 = vld [vmem:[#allocation20_spill] sm:$0xff] }
 0xc06   :  { %4923 = vmatpush1.bf16.msra.mxu0 %v12566_v62  ;;  %v14086_v62 = vld [vmem:[#allocation19_spill] sm:$0xff] }
 0xc07   :  { %4924 = vmatprep.subr.bf16.mxu0 %v12569_v27  ;;  %v14087_v27 = vld [vmem:[#allocation38_spill] sm:$0xff] }
 0xc0a   :  { %4925 = vmatpush1.bf16.msra.mxu0 %v12572_v60  ;;  %v14088_v60 = vld [vmem:[#allocation21_spill] sm:$0xff] }
 0xc0b   :  { %4926 = vmatprep.subr.bf16.mxu0 %v12575_v30  ;;  %v14089_v30 = vld [vmem:[#allocation40_spill] sm:$0xff] }
 0xc0c   :  { %v11048_v8 = vpop.eup %11047 }
 0xc0e   :  { %4927 = vmatpush1.bf16.msra.mxu0 %v12578_v29  ;;  %v14090_v29 = vld [vmem:[#allocation24_spill] sm:$0xff] }
 0xc0f   :  { %v11050_v14 = vpop.eup %11049  ;;  %4928 = vmatprep.subr.bf16.mxu0 %v12581_v51  ;;  %v14091_v51 = vld [vmem:[#allocation42_spill] sm:$0xff] }
 0xc10   :  { %v4495_v33 = vmul.f32 %v11050_v14, %v11048_v8  ;;  %v12936_v8 = vld [vmem:[#allocation7 + $0xec] ss:$16 sps:$4 sm:$0xff]   ;;  %v12942_v14 = vld [vmem:[%s13821_s11] ss:$0 sm:$0xff] }
 0xc12   :  { %4929 = vmatpush1.bf16.msra.mxu0 %v12584_v43  ;;  %v4609_v13 = vpack.c.bf16 %v4495_v33, %v4495_v33  ;;  %v14092_v43 = vld [vmem:[#allocation22_spill] sm:$0xff] }
 0xc13   :  { %5216 = vmatprep.subr.bf16.mxu0 %v12587_v53  ;;  %v14093_v53 = vmov 0.0  }
 0xc14   :  { %10001 = vmatmul.mubr.bf16.vlgmr.msra.gmra.mxu1 %v4609_v13 }
 0xc15   :  { %4947 = vmatmul.mubr.bf16.vlgmr.msra.gmra.mxu0 %v12805_v48  ;;  %4956 = vmatpush1.bf16.msra.mxu1 %v12589_v41  ;;  %v14094_v41 = vld [vmem:[#allocation23_spill] sm:$0xff] }
 0xc16   :  { %5217 = vmatpush1.bf16.msra.mxu0 %v12592_v40  ;;  %4957 = vmatprep.subr.bf16.mxu1 %v12596_v2  ;;  %v14095_v40 = vld [vmem:[#allocation25_spill] sm:$0xff]  ;;  %v14096_v2 = vld [vmem:[#allocation26_spill] sm:$0xff] }
 0xc17   :  { %5218 = vmatprep.subr.bf16.mxu0 %v12599_v61  ;;  %4987 = vmatprep.mubr.bf16.mxu1 %v13971_v56  ;;  %v14097_v61 = vld [vmem:[#allocation28_spill] sm:$0xff] }
 0xc18   :  { %5248 = vmatprep.mubr.bf16.mxu0 %v13971_v56 }
 0xc19   :  { %4958 = vmatpush1.bf16.msra.mxu1 %v12604_v35  ;;  %v14098_v35 = vld [vmem:[#allocation27_spill] sm:$0xff] }
 0xc1a   :  { %5219 = vmatpush1.bf16.msra.mxu0 %v12608_v44  ;;  %4959 = vmatprep.subr.bf16.mxu1 %v12610_v39  ;;  %v14099_v44 = vld [vmem:[#allocation29_spill] sm:$0xff]  ;;  %v14100_v39 = vld [vmem:[#allocation32_spill] sm:$0xff] }
 0xc1b   :  { %5220 = vmatprep.subr.bf16.mxu0 %v12613_v22  ;;  %v14101_v22 = vld [vmem:[#allocation30_spill] sm:$0xff] }
 0xc1d   :  { %4960 = vmatpush1.bf16.msra.mxu1 %v12618_v54  ;;  %v14102_v54 = vld [vmem:[#allocation31_spill] sm:$0xff] }
 0xc1e   :  { %5221 = vmatpush1.bf16.msra.mxu0 %v12622_v32  ;;  %4961 = vmatprep.subr.bf16.mxu1 %v12624_v46  ;;  %v14103_v32 = vld [vmem:[#allocation33_spill] sm:$0xff]  ;;  %v14104_v46 = vld [vmem:[#allocation35_spill] sm:$0xff] }
 0xc1f   :  { %5222 = vmatprep.subr.bf16.mxu0 %v12627_v55  ;;  %v14105_v55 = vld [vmem:[#allocation37_spill] sm:$0xff] }
 0xc21   :  { %4962 = vmatpush1.bf16.msra.mxu1 %v12630_v50  ;;  %v14106_v50 = vld [vmem:[#allocation39_spill] sm:$0xff] }
 0xc22   :  { %5223 = vmatpush1.bf16.msra.mxu0 %v12634_v4  ;;  %4963 = vmatprep.subr.bf16.mxu1 %v12636_v24  ;;  %v14107_v4 = vld [vmem:[#allocation41_spill] sm:$0xff]  ;;  %v14108_v24 = vld [vmem:[#allocation43_spill] sm:$0xff] }
 0xc23   :  { %5224 = vmatprep.subr.bf16.mxu0 %v12639_v57  ;;  %v10555_v57 = vld [vmem:[%s13818_s8 + $0x38] sm:$0xff]  }
 0xc25   :  { %4964 = vmatpush1.bf16.msra.mxu1 %v12642_v37  ;;  %v10556_v37 = vld [vmem:[%s13818_s8 + $0x30] sm:$0xff]  }
 0xc26   :  { %5225 = vmatpush1.bf16.msra.mxu0 %v12646_v5  ;;  %4965 = vmatprep.subr.bf16.mxu1 %v12648_v9  ;;  %v10557_v5 = vld [vmem:[%s13818_s8 + $0x28] sm:$0xff]   ;;  %v10558_v9 = vld [vmem:[%s13818_s8 + $0x20] sm:$0xff]  }
 0xc27   :  { %5226 = vmatprep.subr.bf16.mxu0 %v12651_v18  ;;  %v10559_v18 = vld [vmem:[%s13818_s8 + $0x18] sm:$0xff]  }
 0xc29   :  { %4966 = vmatpush1.bf16.msra.mxu1 %v14082_v11 }
 0xc2a   :  { %5227 = vmatpush1.bf16.msra.mxu0 %v14083_v23  ;;  %4967 = vmatprep.subr.bf16.mxu1 %v14084_v7 }
 0xc2b   :  { %5228 = vmatprep.subr.bf16.mxu0 %v14085_v42 }
 0xc2d   :  { %4968 = vmatpush1.bf16.msra.mxu1 %v14086_v62 }
 0xc2e   :  { %5229 = vmatpush1.bf16.msra.mxu0 %v14087_v27  ;;  %4969 = vmatprep.subr.bf16.mxu1 %v14088_v60 }
 0xc2f   :  { %5230 = vmatprep.subr.bf16.mxu0 %v14089_v30 }
 0xc31   :  { %4970 = vmatpush1.bf16.msra.mxu1 %v14090_v29 }
 0xc32   :  { %5231 = vmatpush1.bf16.msra.mxu0 %v14091_v51  ;;  %5257 = vmatprep.subr.bf16.mxu1 %v14092_v43 }
 0xc33   :  { %10004 = vmatprep.subr.bf16.mxu0 %v14093_v53 }
 0xc34   :  { %4988 = vmatmul.mubr.bf16.vlgmr.msra.gmra.mxu1 %v12805_v48  ;;  %v12928_v48 = vld [vmem:[%s13819_s9] ss:$0 sm:$0xff] }
 0xc35   :  { %5249 = vmatmul.mubr.bf16.vlgmr.msra.gmra.mxu0 %v4609_v13  ;;  %5258 = vmatpush1.bf16.msra.mxu1 %v14094_v41 }
 0xc36   :  { %5259 = vmatprep.subr.bf16.mxu1 %v14095_v40  ;;  %5289 = vmatprep.mubr.bf16.mxu1 %v13971_v56 }
 0xc37   :  { %10020 = vmatprep.mubr.msk.bf16.mxu0 %vm11385_vm0, %v14093_v53  ;;  %10005 = vmatpush3.bf16.msra.mxu0 %v10555_v57 }
 0xc38   :  { %10006 = vmatprep.subr.bf16.mxu0 %v14093_v53 }
 0xc39   :  { %5260 = vmatpush1.bf16.msra.mxu1 %v14096_v2 }
 0xc3a   :  { %5261 = vmatprep.subr.bf16.mxu1 %v14097_v61 }
 0xc3b   :  { %10007 = vmatpush3.bf16.msra.mxu0 %v10556_v37 }
 0xc3c   :  { %10008 = vmatprep.subr.bf16.mxu0 %v14093_v53 }
 0xc3d   :  { %5262 = vmatpush1.bf16.msra.mxu1 %v14098_v35 }
 0xc3e   :  { %5263 = vmatprep.subr.bf16.mxu1 %v14099_v44 }
 0xc3f   :  { %10009 = vmatpush3.bf16.msra.mxu0 %v10557_v5 }
 0xc40   :  { %10010 = vmatprep.subr.bf16.mxu0 %v14093_v53 }
 0xc41   :  { %5264 = vmatpush1.bf16.msra.mxu1 %v14100_v39 }
 0xc42   :  { %5265 = vmatprep.subr.bf16.mxu1 %v14101_v22 }
 0xc43   :  { %10011 = vmatpush3.bf16.msra.mxu0 %v10558_v9 }
 0xc44   :  { %10012 = vmatprep.subr.bf16.mxu0 %v14093_v53 }
 0xc45   :  { %5266 = vmatpush1.bf16.msra.mxu1 %v14102_v54 }
 0xc46   :  { %5267 = vmatprep.subr.bf16.mxu1 %v14103_v32  ;;  %v14109_v32 = vld [vmem:[#allocation46_spill] sm:$0xff] }
 0xc47   :  { %10013 = vmatpush3.bf16.msra.mxu0 %v10559_v18 }
 0xc48   :  { %10014 = vmatprep.subr.bf16.mxu0 %v14093_v53 }
 0xc49   :  { %5268 = vmatpush1.bf16.msra.mxu1 %v14104_v46 }
 0xc4a   :  { %5269 = vmatprep.subr.bf16.mxu1 %v14105_v55 }
 0xc4b   :  { %10015 = vmatpush3.bf16.msra.mxu0 %v10560_v36 }
 0xc4c   :  { %10016 = vmatprep.subr.bf16.mxu0 %v14093_v53 }
 0xc4d   :  { %5270 = vmatpush1.bf16.msra.mxu1 %v14106_v50 }
 0xc4e   :  { %5271 = vmatprep.subr.bf16.mxu1 %v14107_v4 }
 0xc4f   :  { %10017 = vmatpush3.bf16.msra.mxu0 %v10561_v49 }
 0xc50   :  { %10018 = vmatprep.subr.bf16.mxu0 %v14093_v53 }
 0xc51   :  { %5272 = vmatpush1.bf16.msra.mxu1 %v14108_v24 }
 0xc52   :  { %10024 = vmatprep.subr.bf16.mxu1 %v14093_v53 }
 0xc53   :  { %10019 = vmatpush3.bf16.msra.mxu0 %v10562_v25 }
 0xc54   :  { %5290 = vmatmul.mubr.bf16.vlgmr.msra.gmra.mxu1 %v4609_v13  ;;  %5744 = vmatprep.subr.bf16.mxu0 %v12917_v16 }
 0xc55   :  { %10040 = vmatprep.mubr.msk.bf16.mxu1 %vm11385_vm0, %v14093_v53  ;;  %10025 = vmatpush3.bf16.msra.mxu1 %v10566_v19 }
 0xc56   :  { %10026 = vmatprep.subr.bf16.mxu1 %v14093_v53 }
 0xc59   :  { %10027 = vmatpush3.bf16.msra.mxu1 %v10570_v6 }
 0xc5a   :  { %10028 = vmatprep.subr.bf16.mxu1 %v14093_v53 }
 0xc5d   :  { %10029 = vmatpush3.bf16.msra.mxu1 %v10574_v38 }
 0xc5e   :  { %10030 = vmatprep.subr.bf16.mxu1 %v14093_v53 }
 0xc61   :  { %10031 = vmatpush3.bf16.msra.mxu1 %v10578_v28 }
 0xc62   :  { %10032 = vmatprep.subr.bf16.mxu1 %v14093_v53 }
 0xc65   :  { %10033 = vmatpush3.bf16.msra.mxu1 %v10582_v17 }
 0xc66   :  { %10034 = vmatprep.subr.bf16.mxu1 %v14093_v53 }
 0xc69   :  { %10035 = vmatpush3.bf16.msra.mxu1 %v10586_v58 }
 0xc6a   :  { %10036 = vmatprep.subr.bf16.mxu1 %v14093_v53 }
 0xc6d   :  { %10037 = vmatpush3.bf16.msra.mxu1 %v10590_v31 }
 0xc6e   :  { %10038 = vmatprep.subr.bf16.mxu1 %v14093_v53 }
 0xc71   :  { %10039 = vmatpush3.bf16.msra.mxu1 %v10594_v0 }
 0xc72   :  { %5785 = vmatprep.subr.bf16.mxu1 %v12936_v8 }
 0xcb5   :  { %v4602_v15 = vpop.f32.mrf.mxu0 }
 0xcb6   :  { %v4603_v3 = vadd.f32 %v12928_v48, %v4602_v15 }
 0xcb7   :  { %v9982_v52 = vpop.f32.mrf.mxu0 }
 0xcb8   :  { %4608 = vst [vmem:[%s13822_s12 + $0x10] sm:$0xff] %v4603_v3 }
 0xcb9   :  { %v4605_v59 = vpop.f32.mrf.mxu0 }
 0xcbb   :  { %v9983_v1 = vpop.f32.mrf.mxu0 }
 0xcd4   :  { %v4715_v33 = vpop.f32.mrf.mxu1 }
 0xcd5   :  { %v4948_v13 = vpop.f32.mrf.mxu0  ;;  %v4716_v11 = vadd.f32 %v12942_v14, %v4715_v33 }
 0xcd6   :  { %v10002_v23 = vpop.f32.mrf.mxu1  ;;  %v4996_v29 = vadd.f32 %v4948_v13, %v14052_v34 }
 0xcd7   :  { %4721 = vst [vmem:[%s13823_s13 + $0x10] sm:$0xff] %v4716_v11  ;;  %v4950_v7 = vpop.f32.mrf.mxu0 }
 0xcd8   :  { %v4718_v42 = vpop.f32.mrf.mxu1  ;;  %v4997_v30 = vadd.f32 %v4950_v7, %v14051_v26  ;;  %v9332_v43 = vmul.f32 -1.442695, %v4996_v29 }
 0xcd9   :  { %v4952_v62 = vpop.f32.mrf.mxu0  ;;  %v12960_v42 = vld [vmem:[#allocation7 + $0xe0] ss:$16 sps:$4 sm:$0xff]  }
 0xcda   :  { %v10003_v27 = vpop.f32.mrf.mxu1  ;;  %v9333_v51 = vmul.f32 -1.442695, %v4997_v30  ;;  %v12972_v30 = vld [vmem:[#allocation7 + $0xa4] ss:$16 sps:$4 sm:$0xff]  }
 0xcdb   :  { %v4953_v60 = vpop.f32.mrf.mxu0  ;;  %v12964_v27 = vld [vmem:[#allocation7 + $0xc4] ss:$16 sps:$4 sm:$0xff]  }
 0xcdc   :  { %11051 = vpow2.f32 %v9333_v51  ;;  %v12968_v60 = vld [vmem:[#allocation7 + $0xc0] ss:$16 sps:$4 sm:$0xff]  }
 0xcdd   :  { %11053 = vpow2.f32 %v9332_v43  ;;  %v12975_v51 = vld [vmem:[#allocation7 + $0xa0] ss:$16 sps:$4 sm:$0xff]  }
 0xce9   :  { %v11052_v41 = vpop.eup %11051 }
 0xcea   :  { %v11054_v40 = vpop.eup %11053  ;;  %v5010_v2 = vadd.f32 1.0, %v11052_v41  ;;  %v12978_v41 = vld [vmem:[#allocation7 + $0x84] ss:$16 sps:$4 sm:$0xff]  }
 0xceb   :  { %v5009_v39 = vadd.f32 1.0, %v11054_v40 }
 0xcec   :  { %11055 = vrcp.f32 %v5010_v2 }
 0xcf4   :  { %v4989_v61 = vpop.f32.mrf.mxu1 }
 0xcf5   :  { %v4998_v35 = vadd.f32 %v4989_v61, %v14053_v10  ;;  %v5250_v44 = vpop.f32.mrf.mxu0 }
 0xcf6   :  { %v4991_v22 = vpop.f32.mrf.mxu1  ;;  %v5298_v57 = vadd.f32 %v5250_v44, %v14055_v47 }
 0xcf7   :  { %v9334_v54 = vmul.f32 -1.442695, %v4998_v35  ;;  %v4999_v46 = vadd.f32 %v4991_v22, %v14109_v32  ;;  %v5252_v55 = vpop.f32.mrf.mxu0  ;;  %v12985_v22 = vld [vmem:[#allocation7 + $0x64] ss:$16 sps:$4 sm:$0xff]  }
 0xcf8   :  { %v4993_v50 = vpop.f32.mrf.mxu1  ;;  %v5299_v5 = vadd.f32 %v5252_v55, %v12362_v63  ;;  %v9367_v9 = vmul.f32 -1.442695, %v5298_v57  ;;  %v12997_v55 = vld [vmem:[#allocation7 + $0x40] ss:$16 sps:$4 sm:$0xff]  }
 0xcf9   :  { %11057 = vpow2.f32 %v9334_v54  ;;  %v5254_v4 = vpop.f32.mrf.mxu0  ;;  %v11056_v36 = vpop.eup %11055  ;;  %v13000_v50 = vld [vmem:[#allocation7 + $0x24] ss:$16 sps:$4 sm:$0xff]  }
 0xcfa   :  { %11059 = vrcp.f32 %v5009_v39  ;;  %v4994_v24 = vpop.f32.mrf.mxu1  ;;  %v9368_v18 = vmul.f32 -1.442695, %v5299_v5  ;;  %v5019_v38 = vmul.f32 %v11056_v36, %v12800_v12  ;;  %v12982_v39 = vld [vmem:[#allocation7 + $0x80] ss:$16 sps:$4 sm:$0xff]   ;;  %v13014_v36 = vld [vmem:[#allocation7 + $0xe8] ss:$16 sps:$4 sm:$0xff]  }
 0xcfb   :  { %11061 = vtanh.f32 %v4999_v46  ;;  %v5255_v37 = vpop.f32.mrf.mxu0  ;;  %v12991_v46 = vld [vmem:[#allocation7 + $0x60] ss:$16 sps:$4 sm:$0xff]   ;;  %v13006_v24 = vld [vmem:[#allocation7 + $0x4] ss:$16 sps:$4 sm:$0xff]  }
 0xcfc   :  { %11063 = vpow2.f32 %v9367_v9  ;;  %v13003_v4 = vld [vmem:[#allocation7 + $0x20] ss:$16 sps:$4 sm:$0xff]   ;;  %v13012_v9 = vld [vmem:[#allocation8 + $0xe4] ss:$16 sps:$4 sm:$0xff]  }
 0xcfd   :  { %11065 = vpow2.f32 %v9368_v18  ;;  %v13009_v37 = vld [vmem:[#allocation7] ss:$16 sps:$4 sm:$0xff]  }
 0xd06   :  { %v11058_v49 = vpop.eup %11057 }
 0xd07   :  { %v11060_v25 = vpop.eup %11059  ;;  %v5011_v6 = vadd.f32 1.0, %v11058_v49  ;;  %v13017_v49 = vld [vmem:[#allocation8 + $0xe0] ss:$16 sps:$4 sm:$0xff]  }
 0xd08   :  { %v11062_v19 = vpop.eup %11061 }
 0xd09   :  { %v5020_v28 = vmul.f32 %v11062_v19, %v11060_v25  ;;  %11067 = vrcp.f32 %v5011_v6  ;;  %v11064_v58 = vpop.eup %11063  ;;  %v13021_v19 = vld [vmem:[#allocation7 + $0xcc] ss:$16 sps:$4 sm:$0xff]   ;;  %v13024_v6 = vld [vmem:[#allocation8 + $0xc4] ss:$16 sps:$4 sm:$0xff]  }
 0xd0a   :  { %v11066_v15 = vpop.eup %11065  ;;  %v5311_v31 = vadd.f32 1.0, %v11064_v58  ;;  %v13035_v58 = vld [vmem:[#allocation7 + $0xac] ss:$16 sps:$4 sm:$0xff]  }
 0xd0b   :  { %v12955_v17 = vadd.f32 %v5020_v28, %v5019_v38  ;;  %v5312_v3 = vadd.f32 1.0, %v11066_v15  ;;  %v13029_v38 = vld [vmem:[#allocation7 + $0xc8] ss:$16 sps:$4 sm:$0xff]   ;;  %v13033_v28 = vld [vmem:[#allocation8 + $0xc0] ss:$16 sps:$4 sm:$0xff]  }
 0xd0c   :  { %v13038_v15 = vld [vmem:[#allocation8 + $0xa4] ss:$16 sps:$4 sm:$0xff]  }
 0xd0d   :  { %11069 = vtanh.f32 %v12955_v17 }
 0xd0e   :  { %11071 = vrcp.f32 %v5311_v31  ;;  %v13043_v31 = vld [vmem:[#allocation7 + $0xa8] ss:$16 sps:$4 sm:$0xff]  }
 0xd0f   :  { %11073 = vrcp.f32 %v5312_v3  ;;  %v13047_v3 = vld [vmem:[#allocation8 + $0xa0] ss:$16 sps:$4 sm:$0xff]  }
 0xd14   :  { %v5291_v52 = vpop.f32.mrf.mxu1 }
 0xd15   :  { %v5300_v59 = vadd.f32 %v5291_v52, %v12373_v45  ;;  %v13049_v52 = vld [vmem:[#allocation7 + $0x8c] ss:$16 sps:$4 sm:$0xff]  }
 0xd16   :  { %v5293_v0 = vpop.f32.mrf.mxu1  ;;  %v11068_v13 = vpop.eup %11067 }
 0xd17   :  { %v9369_v1 = vmul.f32 -1.442695, %v5300_v59  ;;  %v5301_v33 = vadd.f32 %v5293_v0, %v12378_v21  ;;  %v13052_v59 = vld [vmem:[#allocation8 + $0x84] ss:$16 sps:$4 sm:$0xff]   ;;  %v13055_v0 = vld [vmem:[#allocation7 + $0x88] ss:$16 sps:$4 sm:$0xff]  }
 0xd18   :  { %v5295_v12 = vpop.f32.mrf.mxu1 }
 0xd19   :  { %11075 = vpow2.f32 %v9369_v1  ;;  %v13059_v1 = vld [vmem:[#allocation8 + $0x80] ss:$16 sps:$4 sm:$0xff]   ;;  %v13064_v12 = vld [vmem:[#allocation8 + $0x64] ss:$16 sps:$4 sm:$0xff]  }
 0xd1a   :  { %v11070_v11 = vpop.eup %11069  ;;  %11077 = vtanh.f32 %v5301_v33  ;;  %v5296_v23 = vpop.f32.mrf.mxu1  ;;  %v13061_v33 = vld [vmem:[#allocation7 + $0x6c] ss:$16 sps:$4 sm:$0xff]  }
 0xd1b   :  { %v5023_v7 = vmul.f32 %v11070_v11, %v11068_v13  ;;  %v11072_v29 = vpop.eup %11071  ;;  %v13067_v13 = vld [vmem:[#allocation7 + $0x68] ss:$16 sps:$4 sm:$0xff]   ;;  %v13071_v11 = vld [vmem:[#allocation8 + $0x60] ss:$16 sps:$4 sm:$0xff]   ;;  %v13073_v23 = vld [vmem:[#allocation7 + $0x4c] ss:$16 sps:$4 sm:$0xff]  }
 0xd1c   :  { %v11074_v43 = vpop.eup %11073 }
 0xd1d   :  { %v12962_v62 = vpack.c.bf16 %v5023_v7, %v5023_v7  ;;  %v5321_v35 = vmul.f32 %v11074_v43, %v12816_v20  ;;  %v12994_v20 = vld [vmem:[#allocation7 + $0x44] ss:$16 sps:$4 sm:$0xff]   ;;  %v13083_v43 = vld [vmem:[#allocation8 + $0x40] ss:$16 sps:$4 sm:$0xff]  }
 0xd1e   :  { %v13076_v7 = vld [vmem:[#allocation8 + $0x44] ss:$16 sps:$4 sm:$0xff]   ;;  %14111 = vst [vmem:[#allocation17_spill] sm:$0xff] %v13083_v43 }
 0xd1f   :  { %10021 = vmatmul.mubr.bf16.vlgmr.msra.gmra.mxu0 %v12962_v62 }
 0xd20   :  { %5745 = vmatpush1.bf16.msra.mxu0 %v12960_v42  ;;  %5776 = vmatprep.mubr.bf16.mxu0 %v13971_v56 }
 0xd21   :  { %5746 = vmatprep.subr.bf16.mxu0 %v12964_v27 }
 0xd24   :  { %5747 = vmatpush1.bf16.msra.mxu0 %v12968_v60 }
 0xd25   :  { %5748 = vmatprep.subr.bf16.mxu0 %v12972_v30 }
 0xd26   :  { %v11076_v40 = vpop.eup %11075 }
 0xd27   :  { %v11078_v2 = vpop.eup %11077  ;;  %v5313_v61 = vadd.f32 1.0, %v11076_v40  ;;  %v13085_v40 = vld [vmem:[#allocation7 + $0x2c] ss:$16 sps:$4 sm:$0xff]  }
 0xd28   :  { %v5322_v44 = vmul.f32 %v11078_v2, %v11072_v29  ;;  %5749 = vmatpush1.bf16.msra.mxu0 %v12975_v51  ;;  %v13079_v29 = vld [vmem:[#allocation7 + $0x48] ss:$16 sps:$4 sm:$0xff]   ;;  %14112 = vst [vmem:[#allocation45_spill] sm:$0xff] %v13085_v40  ;;  %v13088_v2 = vld [vmem:[#allocation8 + $0x24] ss:$16 sps:$4 sm:$0xff]  }
 0xd29   :  { %5750 = vmatprep.subr.bf16.mxu0 %v12978_v41  ;;  %11079 = vrcp.f32 %v5313_v61  ;;  %14110 = vst [vmem:[#allocation44_spill] sm:$0xff] %v13079_v29  ;;  %14113 = vst [vmem:[#allocation47_spill] sm:$0xff] %v13088_v2  ;;  %v13091_v61 = vld [vmem:[#allocation7 + $0x28] ss:$16 sps:$4 sm:$0xff]  }
 0xd2a   :  { %v12987_v54 = vadd.f32 %v5322_v44, %v5321_v35  ;;  %14114 = vst [vmem:[#allocation18_spill] sm:$0xff] %v13091_v61  ;;  %v13095_v35 = vld [vmem:[#allocation8 + $0x20] ss:$16 sps:$4 sm:$0xff]   ;;  %v13097_v44 = vld [vmem:[#allocation7 + $0xc] ss:$16 sps:$4 sm:$0xff]  }
 0xd2b   :  { %14115 = vst [vmem:[#allocation34_spill] sm:$0xff] %v13095_v35  ;;  %14116 = vst [vmem:[#allocation20_spill] sm:$0xff] %v13097_v44 }
 0xd2c   :  { %11081 = vtanh.f32 %v12987_v54  ;;  %5751 = vmatpush1.bf16.msra.mxu0 %v12982_v39 }
 0xd2d   :  { %5752 = vmatprep.subr.bf16.mxu0 %v12985_v22 }
 0xd30   :  { %5753 = vmatpush1.bf16.msra.mxu0 %v12991_v46 }
 0xd31   :  { %5754 = vmatprep.subr.bf16.mxu0 %v12994_v20 }
 0xd34   :  { %5755 = vmatpush1.bf16.msra.mxu0 %v12997_v55 }
 0xd35   :  { %5756 = vmatprep.subr.bf16.mxu0 %v13000_v50 }
 0xd36   :  { %v11080_v57 = vpop.eup %11079 }
 0xd38   :  { %5757 = vmatpush1.bf16.msra.mxu0 %v13003_v4 }
 0xd39   :  { %v11082_v5 = vpop.eup %11081  ;;  %5758 = vmatprep.subr.bf16.mxu0 %v13006_v24 }
 0xd3a   :  { %v5325_v18 = vmul.f32 %v11082_v5, %v11080_v57  ;;  %v13100_v57 = vld [vmem:[#allocation8 + $0x4] ss:$16 sps:$4 sm:$0xff]   ;;  %v13103_v5 = vld [vmem:[#allocation7 + $0x8] ss:$16 sps:$4 sm:$0xff]  }
 0xd3b   :  { %14117 = vst [vmem:[#allocation36_spill] sm:$0xff] %v13100_v57  ;;  %14118 = vst [vmem:[#allocation19_spill] sm:$0xff] %v13103_v5 }
 0xd3c   :  { %5759 = vmatpush1.bf16.msra.mxu0 %v13009_v37  ;;  %v13019_v25 = vpack.c.bf16 %v5325_v18, %v5325_v18  ;;  %v13107_v18 = vld [vmem:[#allocation8] ss:$16 sps:$4 sm:$0xff]  }
 0xd3d   :  { %6046 = vmatprep.subr.bf16.mxu0 %v13012_v9  ;;  %14119 = vst [vmem:[#allocation38_spill] sm:$0xff] %v13107_v18 }
 0xd3e   :  { %10041 = vmatmul.mubr.bf16.vlgmr.msra.gmra.mxu1 %v13019_v25 }
 0xd3f   :  { %5777 = vmatmul.mubr.bf16.vlgmr.msra.gmra.mxu0 %v12962_v62  ;;  %5786 = vmatpush1.bf16.msra.mxu1 %v13014_v36 }
 0xd40   :  { %6047 = vmatpush1.bf16.msra.mxu0 %v13017_v49  ;;  %5787 = vmatprep.subr.bf16.mxu1 %v13021_v19 }
 0xd41   :  { %6048 = vmatprep.subr.bf16.mxu0 %v13024_v6  ;;  %5817 = vmatprep.mubr.bf16.mxu1 %v13971_v56 }
 0xd42   :  { %6078 = vmatprep.mubr.bf16.mxu0 %v13971_v56 }
 0xd43   :  { %5788 = vmatpush1.bf16.msra.mxu1 %v13029_v38 }
 0xd44   :  { %6049 = vmatpush1.bf16.msra.mxu0 %v13033_v28  ;;  %5789 = vmatprep.subr.bf16.mxu1 %v13035_v58 }
 0xd45   :  { %6050 = vmatprep.subr.bf16.mxu0 %v13038_v15 }
 0xd47   :  { %5790 = vmatpush1.bf16.msra.mxu1 %v13043_v31 }
 0xd48   :  { %6051 = vmatpush1.bf16.msra.mxu0 %v13047_v3  ;;  %5791 = vmatprep.subr.bf16.mxu1 %v13049_v52 }
 0xd49   :  { %6052 = vmatprep.subr.bf16.mxu0 %v13052_v59 }
 0xd4b   :  { %5792 = vmatpush1.bf16.msra.mxu1 %v13055_v0 }
 0xd4c   :  { %6053 = vmatpush1.bf16.msra.mxu0 %v13059_v1  ;;  %5793 = vmatprep.subr.bf16.mxu1 %v13061_v33 }
 0xd4d   :  { %6054 = vmatprep.subr.bf16.mxu0 %v13064_v12 }
 0xd4f   :  { %5794 = vmatpush1.bf16.msra.mxu1 %v13067_v13 }
 0xd50   :  { %6055 = vmatpush1.bf16.msra.mxu0 %v13071_v11  ;;  %5795 = vmatprep.subr.bf16.mxu1 %v13073_v23 }
 0xd51   :  { %6056 = vmatprep.subr.bf16.mxu0 %v13076_v7 }
 0xd53   :  { %5796 = vmatpush1.bf16.msra.mxu1 %v13079_v29 }
 0xd54   :  { %6057 = vmatpush1.bf16.msra.mxu0 %v13083_v43  ;;  %5797 = vmatprep.subr.bf16.mxu1 %v13085_v40  ;;  %v13109_v43 = vld [vmem:[#allocation8 + $0xec] ss:$16 sps:$4 sm:$0xff]   ;;  %v13113_v40 = vld [vmem:[#allocation8 + $0xe8] ss:$16 sps:$4 sm:$0xff]  }
 0xd55   :  { %6058 = vmatprep.subr.bf16.mxu0 %v13088_v2  ;;  %14120 = vst [vmem:[#allocation21_spill] sm:$0xff] %v13109_v43  ;;  %14121 = vst [vmem:[#allocation40_spill] sm:$0xff] %v13113_v40 }
 0xd57   :  { %5798 = vmatpush1.bf16.msra.mxu1 %v13091_v61  ;;  %v13117_v61 = vld [vmem:[#allocation8 + $0xcc] ss:$16 sps:$4 sm:$0xff]  }
 0xd58   :  { %6059 = vmatpush1.bf16.msra.mxu0 %v13095_v35  ;;  %5799 = vmatprep.subr.bf16.mxu1 %v13097_v44  ;;  %14122 = vst [vmem:[#allocation24_spill] sm:$0xff] %v13117_v61  ;;  %v13123_v44 = vld [vmem:[#allocation8 + $0xc8] ss:$16 sps:$4 sm:$0xff]  }
 0xd59   :  { %6060 = vmatprep.subr.bf16.mxu0 %v13100_v57  ;;  %14123 = vst [vmem:[#allocation42_spill] sm:$0xff] %v13123_v44 }
 0xd5b   :  { %5800 = vmatpush1.bf16.msra.mxu1 %v13103_v5  ;;  %v13126_v5 = vld [vmem:[#allocation8 + $0xac] ss:$16 sps:$4 sm:$0xff]  }
 0xd5c   :  { %6061 = vmatpush1.bf16.msra.mxu0 %v13107_v18  ;;  %6087 = vmatprep.subr.bf16.mxu1 %v13109_v43  ;;  %14124 = vst [vmem:[#allocation22_spill] sm:$0xff] %v13126_v5  ;;  %v13132_v43 = vld [vmem:[#allocation8 + $0xa8] ss:$16 sps:$4 sm:$0xff]  }
 0xd5d   :  { %10044 = vmatprep.subr.bf16.mxu0 %v14093_v53  ;;  %14125 = vst [vmem:[#allocation23_spill] sm:$0xff] %v13132_v43  ;;  %v13144_v18 = vld [vmem:[#allocation8 + $0x68] ss:$16 sps:$4 sm:$0xff]  }
 0xd5e   :  { %5818 = vmatmul.mubr.bf16.vlgmr.msra.gmra.mxu1 %v12962_v62  ;;  %v13135_v62 = vld [vmem:[#allocation8 + $0x8c] ss:$16 sps:$4 sm:$0xff]   ;;  %14129 = vst [vmem:[#allocation27_spill] sm:$0xff] %v13144_v18 }
 0xd5f   :  { %6079 = vmatmul.mubr.bf16.vlgmr.msra.gmra.mxu0 %v13019_v25  ;;  %6088 = vmatpush1.bf16.msra.mxu1 %v13113_v40  ;;  %14126 = vst [vmem:[#allocation25_spill] sm:$0xff] %v13135_v62  ;;  %v13138_v40 = vld [vmem:[#allocation8 + $0x88] ss:$16 sps:$4 sm:$0xff]  }
 0xd60   :  { %6089 = vmatprep.subr.bf16.mxu1 %v13117_v61  ;;  %6119 = vmatprep.mubr.bf16.mxu1 %v13971_v56  ;;  %14127 = vst [vmem:[#allocation26_spill] sm:$0xff] %v13138_v40  ;;  %v13141_v61 = vld [vmem:[#allocation8 + $0x6c] ss:$16 sps:$4 sm:$0xff]  }
 0xd61   :  { %10060 = vmatprep.mubr.msk.bf16.mxu0 %vm11385_vm0, %v14093_v53  ;;  %14128 = vst [vmem:[#allocation28_spill] sm:$0xff] %v13141_v61 }
 0xd63   :  { %6090 = vmatpush1.bf16.msra.mxu1 %v13123_v44  ;;  %v13147_v44 = vld [vmem:[#allocation8 + $0x4c] ss:$16 sps:$4 sm:$0xff]  }
 0xd64   :  { %6091 = vmatprep.subr.bf16.mxu1 %v13126_v5  ;;  %14130 = vst [vmem:[#allocation29_spill] sm:$0xff] %v13147_v44  ;;  %v13150_v5 = vld [vmem:[#allocation8 + $0x48] ss:$16 sps:$4 sm:$0xff]  }
 0xd65   :  { %14131 = vst [vmem:[#allocation32_spill] sm:$0xff] %v13150_v5 }
 0xd67   :  { %6092 = vmatpush1.bf16.msra.mxu1 %v13132_v43  ;;  %v13153_v43 = vld [vmem:[#allocation8 + $0x2c] ss:$16 sps:$4 sm:$0xff]  }
 0xd68   :  { %6093 = vmatprep.subr.bf16.mxu1 %v13135_v62  ;;  %14132 = vst [vmem:[#allocation30_spill] sm:$0xff] %v13153_v43  ;;  %v13156_v62 = vld [vmem:[#allocation8 + $0x28] ss:$16 sps:$4 sm:$0xff]  }
 0xd69   :  { %14133 = vst [vmem:[#allocation31_spill] sm:$0xff] %v13156_v62 }
 0xd6b   :  { %6094 = vmatpush1.bf16.msra.mxu1 %v13138_v40  ;;  %v13159_v40 = vld [vmem:[#allocation8 + $0xc] ss:$16 sps:$4 sm:$0xff]  }
 0xd6c   :  { %6095 = vmatprep.subr.bf16.mxu1 %v13141_v61  ;;  %14134 = vst [vmem:[#allocation33_spill] sm:$0xff] %v13159_v40  ;;  %v13162_v61 = vld [vmem:[#allocation8 + $0x8] ss:$16 sps:$4 sm:$0xff]  }
 0xd6d   :  { %14135 = vst [vmem:[#allocation35_spill] sm:$0xff] %v13162_v61 }
 0xd6f   :  { %6096 = vmatpush1.bf16.msra.mxu1 %v13144_v18 }
 0xd70   :  { %6097 = vmatprep.subr.bf16.mxu1 %v13147_v44 }
 0xd73   :  { %6098 = vmatpush1.bf16.msra.mxu1 %v13150_v5  ;;  %v10679_v5 = vld [vmem:[#allocation11 + $0x18] sm:$0xff]  }
 0xd74   :  { %6099 = vmatprep.subr.bf16.mxu1 %v13153_v43  ;;  %v10667_v43 = vld [vmem:[%s13818_s8 + $0x38] sm:$0xff]  }
 0xd75   :  { %10045 = vmatpush3.bf16.msra.mxu0 %v10667_v43  ;;  %v10670_v43 = vld [vmem:[%s13818_s8 + $0x20] sm:$0xff]  }
 0xd76   :  { %10046 = vmatprep.subr.bf16.mxu0 %v14093_v53 }
 0xd77   :  { %6100 = vmatpush1.bf16.msra.mxu1 %v13156_v62  ;;  %v10677_v62 = vld [vmem:[#allocation11 + $0x28] sm:$0xff]  }
 0xd78   :  { %6101 = vmatprep.subr.bf16.mxu1 %v13159_v40  ;;  %v10668_v40 = vld [vmem:[%s13818_s8 + $0x30] sm:$0xff]  }
 0xd79   :  { %10047 = vmatpush3.bf16.msra.mxu0 %v10668_v40  ;;  %v10671_v40 = vld [vmem:[%s13818_s8 + $0x18] sm:$0xff]  }
 0xd7a   :  { %10048 = vmatprep.subr.bf16.mxu0 %v14093_v53 }
 0xd7b   :  { %6102 = vmatpush1.bf16.msra.mxu1 %v13162_v61  ;;  %v10672_v61 = vld [vmem:[%s13818_s8 + $0x10] sm:$0xff]  }
 0xd7c   :  { %10064 = vmatprep.subr.bf16.mxu1 %v14093_v53 }
 0xd7e   :  { %6120 = vmatmul.mubr.bf16.vlgmr.msra.gmra.mxu1 %v13019_v25  ;;  %v10669_v25 = vld [vmem:[%s13818_s8 + $0x28] sm:$0xff]  }
 0xd7f   :  { %10080 = vmatprep.mubr.msk.bf16.mxu1 %vm11385_vm0, %v14093_v53  ;;  %10049 = vmatpush3.bf16.msra.mxu0 %v10669_v25  ;;  %v10673_v25 = vld [vmem:[%s13818_s8 + $0x8] sm:$0xff]  }
 0xd80   :  { %10050 = vmatprep.subr.bf16.mxu0 %v14093_v53 }
 0xd83   :  { %10051 = vmatpush3.bf16.msra.mxu0 %v10670_v43  ;;  %v10674_v43 = vld [vmem:[%s13818_s8] sm:$0xff]  }
 0xd84   :  { %10052 = vmatprep.subr.bf16.mxu0 %v14093_v53 }
 0xd87   :  { %10053 = vmatpush3.bf16.msra.mxu0 %v10671_v40  ;;  %v10675_v40 = vld [vmem:[#allocation11 + $0x38] sm:$0xff]  }
 0xd88   :  { %10054 = vmatprep.subr.bf16.mxu0 %v14093_v53  ;;  %10065 = vmatpush3.bf16.msra.mxu1 %v10675_v40  ;;  %v10681_v40 = vld [vmem:[#allocation11 + $0x8] sm:$0xff]  }
 0xd89   :  { %10066 = vmatprep.subr.bf16.mxu1 %v14093_v53 }
 0xd8b   :  { %10055 = vmatpush3.bf16.msra.mxu0 %v10672_v61  ;;  %v10676_v61 = vld [vmem:[#allocation11 + $0x30] sm:$0xff]  }
 0xd8c   :  { %10056 = vmatprep.subr.bf16.mxu0 %v14093_v53  ;;  %10067 = vmatpush3.bf16.msra.mxu1 %v10676_v61 }
 0xd8d   :  { %10068 = vmatprep.subr.bf16.mxu1 %v14093_v53 }
 0xd8f   :  { %10057 = vmatpush3.bf16.msra.mxu0 %v10673_v25  ;;  %v10678_v25 = vld [vmem:[#allocation11 + $0x20] sm:$0xff]  }
 0xd90   :  { %10058 = vmatprep.subr.bf16.mxu0 %v14093_v53  ;;  %10069 = vmatpush3.bf16.msra.mxu1 %v10677_v62 }
 0xd91   :  { %10070 = vmatprep.subr.bf16.mxu1 %v14093_v53 }
 0xd93   :  { %10059 = vmatpush3.bf16.msra.mxu0 %v10674_v43 }
 0xd94   :  { %6574 = vmatprep.subr.bf16.mxu0 %v12917_v16  ;;  %10071 = vmatpush3.bf16.msra.mxu1 %v10678_v25  ;;  %v10680_v16 = vld [vmem:[#allocation11 + $0x10] sm:$0xff]  }
 0xd95   :  { %10072 = vmatprep.subr.bf16.mxu1 %v14093_v53 }
 0xd98   :  { %10073 = vmatpush3.bf16.msra.mxu1 %v10679_v5  ;;  %v10682_v5 = vld [vmem:[#allocation11] sm:$0xff]  }
 0xd99   :  { %10074 = vmatprep.subr.bf16.mxu1 %v14093_v53 }
 0xd9c   :  { %10075 = vmatpush3.bf16.msra.mxu1 %v10680_v16 }
 0xd9d   :  { %10076 = vmatprep.subr.bf16.mxu1 %v14093_v53 }
 0xda0   :  { %10077 = vmatpush3.bf16.msra.mxu1 %v10681_v40 }
 0xda1   :  { %10078 = vmatprep.subr.bf16.mxu1 %v14093_v53 }
 0xda4   :  { %10079 = vmatpush3.bf16.msra.mxu1 %v10682_v5 }
 0xda5   :  { %6615 = vmatprep.subr.bf16.mxu1 %v12936_v8 }
 0xddf   :  { %v5432_v43 = vpop.f32.mrf.mxu0 }
 0xde0   :  { %v5433_v61 = vadd.f32 %v12928_v48, %v5432_v43 }
 0xde1   :  { %v10022_v44 = vpop.f32.mrf.mxu0 }
 0xde2   :  { %5438 = vst [vmem:[%s13822_s12 + $0x18] sm:$0xff] %v5433_v61 }
 0xde3   :  { %v5435_v62 = vpop.f32.mrf.mxu0 }
 0xde5   :  { %v10023_v25 = vpop.f32.mrf.mxu0 }
 0xdfe   :  { %v5545_v16 = vpop.f32.mrf.mxu1 }
 0xdff   :  { %v5778_v18 = vpop.f32.mrf.mxu0  ;;  %v5546_v57 = vadd.f32 %v12942_v14, %v5545_v16 }
 0xe00   :  { %v10042_v35 = vpop.f32.mrf.mxu1  ;;  %v5826_v5 = vadd.f32 %v5778_v18, %v14052_v34 }
 0xe01   :  { %5551 = vst [vmem:[%s13823_s13 + $0x18] sm:$0xff] %v5546_v57  ;;  %v5780_v48 = vpop.f32.mrf.mxu0 }
 0xe02   :  { %v5548_v44 = vpop.f32.mrf.mxu1  ;;  %v5827_v62 = vadd.f32 %v5780_v48, %v14051_v26  ;;  %v9420_v8 = vmul.f32 -1.442695, %v5826_v5 }
 0xe03   :  { %v5782_v43 = vpop.f32.mrf.mxu0 }
 0xe04   :  { %v10043_v40 = vpop.f32.mrf.mxu1  ;;  %v9421_v25 = vmul.f32 -1.442695, %v5827_v62 }
 0xe05   :  { %v5783_v61 = vpop.f32.mrf.mxu0 }
 0xe06   :  { %11083 = vpow2.f32 %v9421_v25 }
 0xe07   :  { %11085 = vpow2.f32 %v9420_v8 }
 0xe13   :  { %v11084_v53 = vpop.eup %11083 }
 0xe14   :  { %v11086_v14 = vpop.eup %11085  ;;  %v5840_v35 = vadd.f32 1.0, %v11084_v53 }
 0xe15   :  { %v5839_v29 = vadd.f32 1.0, %v11086_v14 }
 0xe16   :  { %11087 = vrcp.f32 %v5840_v35 }
 0xe1e   :  { %v5819_v16 = vpop.f32.mrf.mxu1 }
 0xe1f   :  { %v5828_v2 = vadd.f32 %v5819_v16, %v14053_v10  ;;  %v6080_v57 = vpop.f32.mrf.mxu0 }
 0xe20   :  { %v5821_v44 = vpop.f32.mrf.mxu1  ;;  %v6128_v5 = vadd.f32 %v6080_v57, %v14055_v47 }
 0xe21   :  { %v9422_v43 = vmul.f32 -1.442695, %v5828_v2  ;;  %v5829_v40 = vadd.f32 %v5821_v44, %v14109_v32  ;;  %v6082_v61 = vpop.f32.mrf.mxu0 }
 0xe22   :  { %v5823_v48 = vpop.f32.mrf.mxu1  ;;  %v6129_v25 = vadd.f32 %v6082_v61, %v12362_v63  ;;  %v9455_v8 = vmul.f32 -1.442695, %v6128_v5 }
 0xe23   :  { %11089 = vpow2.f32 %v9422_v43  ;;  %v6084_v18 = vpop.f32.mrf.mxu0  ;;  %v11088_v2 = vpop.eup %11087 }
 0xe24   :  { %11091 = vrcp.f32 %v5839_v29  ;;  %v5824_v62 = vpop.f32.mrf.mxu1  ;;  %v9456_v16 = vmul.f32 -1.442695, %v6129_v25  ;;  %v5849_v43 = vmul.f32 %v11088_v2, %v12955_v17 }
 0xe25   :  { %11093 = vtanh.f32 %v5829_v40  ;;  %v6085_v53 = vpop.f32.mrf.mxu0 }
 0xe26   :  { %11095 = vpow2.f32 %v9455_v8 }
 0xe27   :  { %11097 = vpow2.f32 %v9456_v16 }
 0xe30   :  { %v11090_v14 = vpop.eup %11089 }
 0xe31   :  { %v11092_v44 = vpop.eup %11091  ;;  %v5841_v35 = vadd.f32 1.0, %v11090_v14 }
 0xe32   :  { %v11094_v32 = vpop.eup %11093 }
 0xe33   :  { %v5850_v48 = vmul.f32 %v11094_v32, %v11092_v44  ;;  %11099 = vrcp.f32 %v5841_v35  ;;  %v11096_v57 = vpop.eup %11095 }
 0xe34   :  { %v11098_v40 = vpop.eup %11097  ;;  %v6141_v61 = vadd.f32 1.0, %v11096_v57 }
 0xe35   :  { %v13225_v29 = vadd.f32 %v5850_v48, %v5849_v43  ;;  %v6142_v18 = vadd.f32 1.0, %v11098_v40 }
 0xe37   :  { %11101 = vtanh.f32 %v13225_v29 }
 0xe38   :  { %11103 = vrcp.f32 %v6141_v61 }
 0xe39   :  { %11105 = vrcp.f32 %v6142_v18 }
 0xe3e   :  { %v6121_v62 = vpop.f32.mrf.mxu1 }
 0xe3f   :  { %v6130_v5 = vadd.f32 %v6121_v62, %v12373_v45  ;;  %v10688_v62 = vld [vmem:[%s13818_s8 + $0x10] sm:$0xff]  }
 0xe40   :  { %v6123_v53 = vpop.f32.mrf.mxu1  ;;  %v11100_v32 = vpop.eup %11099 }
 0xe41   :  { %v9457_v25 = vmul.f32 -1.442695, %v6130_v5  ;;  %v6131_v8 = vadd.f32 %v6123_v53, %v12378_v21  ;;  %v10689_v5 = vld [vmem:[%s13818_s8 + $0x8] sm:$0xff]   ;;  %v10690_v53 = vld [vmem:[%s13818_s8] sm:$0xff]  }
 0xe42   :  { %v6125_v17 = vpop.f32.mrf.mxu1 }
 0xe43   :  { %11107 = vpow2.f32 %v9457_v25  ;;  %v13342_v25 = vld [vmem:[#allocation7 + $0xe4] ss:$16 sps:$4 sm:$0xff]  }
 0xe44   :  { %v11102_v16 = vpop.eup %11101  ;;  %11109 = vtanh.f32 %v6131_v8  ;;  %v6126_v2 = vpop.f32.mrf.mxu1  ;;  %v10694_v8 = vld [vmem:[#allocation11 + $0x38] sm:$0xff]   ;;  %v10698_v17 = vld [vmem:[#allocation11 + $0x30] sm:$0xff]  }
 0xe45   :  { %v5853_v14 = vmul.f32 %v11102_v16, %v11100_v32  ;;  %v11104_v35 = vpop.eup %11103  ;;  %v10702_v32 = vld [vmem:[#allocation11 + $0x28] sm:$0xff]   ;;  %v10706_v16 = vld [vmem:[#allocation11 + $0x20] sm:$0xff]   ;;  %v10710_v2 = vld [vmem:[#allocation11 + $0x18] sm:$0xff]  }
 0xe46   :  { %v11106_v43 = vpop.eup %11105 }
 0xe47   :  { %v13230_v44 = vpack.c.bf16 %v5853_v14, %v5853_v14  ;;  %v6151_v61 = vmul.f32 %v11106_v43, %v12987_v54  ;;  %v14139_v54 = vld [vmem:[#allocation47_spill] sm:$0xff]  ;;  %v10718_v43 = vld [vmem:[#allocation11 + $0x8] sm:$0xff]  }
 0xe48   :  { %v10714_v14 = vld [vmem:[#allocation11 + $0x10] sm:$0xff]  }
 0xe49   :  { %10061 = vmatmul.mubr.bf16.vlgmr.msra.gmra.mxu0 %v13230_v44 }
 0xe4a   :  { %6575 = vmatpush1.bf16.msra.mxu0 %v12960_v42  ;;  %6606 = vmatprep.mubr.bf16.mxu0 %v13971_v56 }
 0xe4b   :  { %6576 = vmatprep.subr.bf16.mxu0 %v12964_v27 }
 0xe4e   :  { %6577 = vmatpush1.bf16.msra.mxu0 %v12968_v60 }
 0xe4f   :  { %6578 = vmatprep.subr.bf16.mxu0 %v12972_v30 }
 0xe50   :  { %v11108_v48 = vpop.eup %11107 }
 0xe51   :  { %v11110_v57 = vpop.eup %11109  ;;  %v6143_v40 = vadd.f32 1.0, %v11108_v48 }
 0xe52   :  { %v6152_v18 = vmul.f32 %v11110_v57, %v11104_v35  ;;  %6579 = vmatpush1.bf16.msra.mxu0 %v12975_v51 }
 0xe53   :  { %6580 = vmatprep.subr.bf16.mxu0 %v12978_v41  ;;  %11111 = vrcp.f32 %v6143_v40  ;;  %v14136_v41 = vld [vmem:[#allocation44_spill] sm:$0xff] }
 0xe54   :  { %v13241_v42 = vadd.f32 %v6152_v18, %v6151_v61  ;;  %v10722_v61 = vld [vmem:[#allocation11] sm:$0xff]  }
 0xe56   :  { %11113 = vtanh.f32 %v13241_v42  ;;  %6581 = vmatpush1.bf16.msra.mxu0 %v12982_v39  ;;  %v14137_v39 = vld [vmem:[#allocation17_spill] sm:$0xff] }
 0xe57   :  { %6582 = vmatprep.subr.bf16.mxu0 %v12985_v22  ;;  %v14138_v22 = vld [vmem:[#allocation45_spill] sm:$0xff] }
 0xe5a   :  { %6583 = vmatpush1.bf16.msra.mxu0 %v12991_v46  ;;  %v14140_v46 = vld [vmem:[#allocation18_spill] sm:$0xff] }
 0xe5b   :  { %6584 = vmatprep.subr.bf16.mxu0 %v12994_v20  ;;  %v14141_v20 = vld [vmem:[#allocation34_spill] sm:$0xff] }
 0xe5e   :  { %6585 = vmatpush1.bf16.msra.mxu0 %v12997_v55  ;;  %v14142_v55 = vld [vmem:[#allocation20_spill] sm:$0xff] }
 0xe5f   :  { %6586 = vmatprep.subr.bf16.mxu0 %v13000_v50  ;;  %v14143_v50 = vld [vmem:[#allocation36_spill] sm:$0xff] }
 0xe60   :  { %v11112_v27 = vpop.eup %11111 }
 0xe62   :  { %6587 = vmatpush1.bf16.msra.mxu0 %v13003_v4  ;;  %v14144_v4 = vld [vmem:[#allocation19_spill] sm:$0xff] }
 0xe63   :  { %v11114_v60 = vpop.eup %11113  ;;  %6588 = vmatprep.subr.bf16.mxu0 %v13006_v24  ;;  %v14145_v24 = vld [vmem:[#allocation38_spill] sm:$0xff] }
 0xe64   :  { %v6155_v30 = vmul.f32 %v11114_v60, %v11112_v27  ;;  %v13361_v27 = vld [vmem:[#allocation7 + $0xec] ss:$16 sps:$4 sm:$0xff]   ;;  %v13367_v60 = vld [vmem:[%s13821_s11] ss:$0 sm:$0xff] }
 0xe66   :  { %6589 = vmatpush1.bf16.msra.mxu0 %v13009_v37  ;;  %v6269_v51 = vpack.c.bf16 %v6155_v30, %v6155_v30  ;;  %v14146_v37 = vld [vmem:[#allocation21_spill] sm:$0xff] }
 0xe67   :  { %6876 = vmatprep.subr.bf16.mxu0 %v13012_v9  ;;  %v14147_v9 = vmov 0.0  }
 0xe68   :  { %10081 = vmatmul.mubr.bf16.vlgmr.msra.gmra.mxu1 %v6269_v51 }
 0xe69   :  { %6607 = vmatmul.mubr.bf16.vlgmr.msra.gmra.mxu0 %v13230_v44  ;;  %6616 = vmatpush1.bf16.msra.mxu1 %v13014_v36  ;;  %v14148_v36 = vld [vmem:[#allocation40_spill] sm:$0xff] }
 0xe6a   :  { %6877 = vmatpush1.bf16.msra.mxu0 %v13017_v49  ;;  %6617 = vmatprep.subr.bf16.mxu1 %v13021_v19  ;;  %v14149_v49 = vld [vmem:[#allocation24_spill] sm:$0xff]  ;;  %v14150_v19 = vld [vmem:[#allocation42_spill] sm:$0xff] }
 0xe6b   :  { %6878 = vmatprep.subr.bf16.mxu0 %v13024_v6  ;;  %6647 = vmatprep.mubr.bf16.mxu1 %v13971_v56  ;;  %v14151_v6 = vld [vmem:[#allocation22_spill] sm:$0xff] }
 0xe6c   :  { %6908 = vmatprep.mubr.bf16.mxu0 %v13971_v56 }
 0xe6d   :  { %6618 = vmatpush1.bf16.msra.mxu1 %v13029_v38  ;;  %v14152_v38 = vld [vmem:[#allocation23_spill] sm:$0xff] }
 0xe6e   :  { %6879 = vmatpush1.bf16.msra.mxu0 %v13033_v28  ;;  %6619 = vmatprep.subr.bf16.mxu1 %v13035_v58  ;;  %v14153_v28 = vld [vmem:[#allocation25_spill] sm:$0xff]  ;;  %v14154_v58 = vld [vmem:[#allocation26_spill] sm:$0xff] }
 0xe6f   :  { %6880 = vmatprep.subr.bf16.mxu0 %v13038_v15  ;;  %v14155_v15 = vld [vmem:[#allocation28_spill] sm:$0xff] }
 0xe71   :  { %6620 = vmatpush1.bf16.msra.mxu1 %v13043_v31  ;;  %v14156_v31 = vld [vmem:[#allocation27_spill] sm:$0xff] }
 0xe72   :  { %6881 = vmatpush1.bf16.msra.mxu0 %v13047_v3  ;;  %6621 = vmatprep.subr.bf16.mxu1 %v13049_v52  ;;  %v14157_v3 = vld [vmem:[#allocation29_spill] sm:$0xff]  ;;  %v14158_v52 = vld [vmem:[#allocation32_spill] sm:$0xff] }
 0xe73   :  { %6882 = vmatprep.subr.bf16.mxu0 %v13052_v59  ;;  %v14159_v59 = vld [vmem:[#allocation30_spill] sm:$0xff] }
 0xe75   :  { %6622 = vmatpush1.bf16.msra.mxu1 %v13055_v0  ;;  %v14160_v0 = vld [vmem:[#allocation31_spill] sm:$0xff] }
 0xe76   :  { %6883 = vmatpush1.bf16.msra.mxu0 %v13059_v1  ;;  %6623 = vmatprep.subr.bf16.mxu1 %v13061_v33  ;;  %v14161_v1 = vld [vmem:[#allocation33_spill] sm:$0xff]  ;;  %v14162_v33 = vld [vmem:[#allocation35_spill] sm:$0xff] }
 0xe77   :  { %6884 = vmatprep.subr.bf16.mxu0 %v13064_v12  ;;  %v10683_v12 = vld [vmem:[%s13818_s8 + $0x38] sm:$0xff]  }
 0xe79   :  { %6624 = vmatpush1.bf16.msra.mxu1 %v13067_v13  ;;  %v10684_v13 = vld [vmem:[%s13818_s8 + $0x30] sm:$0xff]  }
 0xe7a   :  { %6885 = vmatpush1.bf16.msra.mxu0 %v13071_v11  ;;  %6625 = vmatprep.subr.bf16.mxu1 %v13073_v23  ;;  %v10685_v11 = vld [vmem:[%s13818_s8 + $0x28] sm:$0xff]   ;;  %v10686_v23 = vld [vmem:[%s13818_s8 + $0x20] sm:$0xff]  }
 0xe7b   :  { %6886 = vmatprep.subr.bf16.mxu0 %v13076_v7  ;;  %v10687_v7 = vld [vmem:[%s13818_s8 + $0x18] sm:$0xff]  }
 0xe7d   :  { %6626 = vmatpush1.bf16.msra.mxu1 %v14136_v41 }
 0xe7e   :  { %6887 = vmatpush1.bf16.msra.mxu0 %v14137_v39  ;;  %6627 = vmatprep.subr.bf16.mxu1 %v14138_v22 }
 0xe7f   :  { %6888 = vmatprep.subr.bf16.mxu0 %v14139_v54 }
 0xe81   :  { %6628 = vmatpush1.bf16.msra.mxu1 %v14140_v46 }
 0xe82   :  { %6889 = vmatpush1.bf16.msra.mxu0 %v14141_v20  ;;  %6629 = vmatprep.subr.bf16.mxu1 %v14142_v55 }
 0xe83   :  { %6890 = vmatprep.subr.bf16.mxu0 %v14143_v50 }
 0xe85   :  { %6630 = vmatpush1.bf16.msra.mxu1 %v14144_v4 }
 0xe86   :  { %6891 = vmatpush1.bf16.msra.mxu0 %v14145_v24  ;;  %6917 = vmatprep.subr.bf16.mxu1 %v14146_v37 }
 0xe87   :  { %10084 = vmatprep.subr.bf16.mxu0 %v14147_v9 }
 0xe88   :  { %6648 = vmatmul.mubr.bf16.vlgmr.msra.gmra.mxu1 %v13230_v44  ;;  %v13353_v44 = vld [vmem:[%s13819_s9] ss:$0 sm:$0xff] }
 0xe89   :  { %6909 = vmatmul.mubr.bf16.vlgmr.msra.gmra.mxu0 %v6269_v51  ;;  %6918 = vmatpush1.bf16.msra.mxu1 %v14148_v36 }
 0xe8a   :  { %6919 = vmatprep.subr.bf16.mxu1 %v14149_v49  ;;  %6949 = vmatprep.mubr.bf16.mxu1 %v13971_v56 }
 0xe8b   :  { %10100 = vmatprep.mubr.msk.bf16.mxu0 %vm11385_vm0, %v14147_v9  ;;  %10085 = vmatpush3.bf16.msra.mxu0 %v10683_v12 }
 0xe8c   :  { %10086 = vmatprep.subr.bf16.mxu0 %v14147_v9 }
 0xe8d   :  { %6920 = vmatpush1.bf16.msra.mxu1 %v14150_v19 }
 0xe8e   :  { %6921 = vmatprep.subr.bf16.mxu1 %v14151_v6 }
 0xe8f   :  { %10087 = vmatpush3.bf16.msra.mxu0 %v10684_v13 }
 0xe90   :  { %10088 = vmatprep.subr.bf16.mxu0 %v14147_v9 }
 0xe91   :  { %6922 = vmatpush1.bf16.msra.mxu1 %v14152_v38 }
 0xe92   :  { %6923 = vmatprep.subr.bf16.mxu1 %v14153_v28 }
 0xe93   :  { %10089 = vmatpush3.bf16.msra.mxu0 %v10685_v11 }
 0xe94   :  { %10090 = vmatprep.subr.bf16.mxu0 %v14147_v9 }
 0xe95   :  { %6924 = vmatpush1.bf16.msra.mxu1 %v14154_v58 }
 0xe96   :  { %6925 = vmatprep.subr.bf16.mxu1 %v14155_v15 }
 0xe97   :  { %10091 = vmatpush3.bf16.msra.mxu0 %v10686_v23 }
 0xe98   :  { %10092 = vmatprep.subr.bf16.mxu0 %v14147_v9 }
 0xe99   :  { %6926 = vmatpush1.bf16.msra.mxu1 %v14156_v31 }
 0xe9a   :  { %6927 = vmatprep.subr.bf16.mxu1 %v14157_v3  ;;  %v14163_v3 = vld [vmem:[#allocation46_spill] sm:$0xff] }
 0xe9b   :  { %10093 = vmatpush3.bf16.msra.mxu0 %v10687_v7 }
 0xe9c   :  { %10094 = vmatprep.subr.bf16.mxu0 %v14147_v9 }
 0xe9d   :  { %6928 = vmatpush1.bf16.msra.mxu1 %v14158_v52 }
 0xe9e   :  { %6929 = vmatprep.subr.bf16.mxu1 %v14159_v59 }
 0xe9f   :  { %10095 = vmatpush3.bf16.msra.mxu0 %v10688_v62 }
 0xea0   :  { %10096 = vmatprep.subr.bf16.mxu0 %v14147_v9 }
 0xea1   :  { %6930 = vmatpush1.bf16.msra.mxu1 %v14160_v0 }
 0xea2   :  { %6931 = vmatprep.subr.bf16.mxu1 %v14161_v1 }
 0xea3   :  { %10097 = vmatpush3.bf16.msra.mxu0 %v10689_v5 }
 0xea4   :  { %10098 = vmatprep.subr.bf16.mxu0 %v14147_v9 }
 0xea5   :  { %6932 = vmatpush1.bf16.msra.mxu1 %v14162_v33 }
 0xea6   :  { %10104 = vmatprep.subr.bf16.mxu1 %v14147_v9 }
 0xea7   :  { %10099 = vmatpush3.bf16.msra.mxu0 %v10690_v53 }
 0xea8   :  { %6950 = vmatmul.mubr.bf16.vlgmr.msra.gmra.mxu1 %v6269_v51  ;;  %7404 = vmatprep.subr.bf16.mxu0 %v13342_v25 }
 0xea9   :  { %10120 = vmatprep.mubr.msk.bf16.mxu1 %vm11385_vm0, %v14147_v9  ;;  %10105 = vmatpush3.bf16.msra.mxu1 %v10694_v8 }
 0xeaa   :  { %10106 = vmatprep.subr.bf16.mxu1 %v14147_v9 }
 0xead   :  { %10107 = vmatpush3.bf16.msra.mxu1 %v10698_v17 }
 0xeae   :  { %10108 = vmatprep.subr.bf16.mxu1 %v14147_v9 }
 0xeb1   :  { %10109 = vmatpush3.bf16.msra.mxu1 %v10702_v32 }
 0xeb2   :  { %10110 = vmatprep.subr.bf16.mxu1 %v14147_v9 }
 0xeb5   :  { %10111 = vmatpush3.bf16.msra.mxu1 %v10706_v16 }
 0xeb6   :  { %10112 = vmatprep.subr.bf16.mxu1 %v14147_v9 }
 0xeb9   :  { %10113 = vmatpush3.bf16.msra.mxu1 %v10710_v2 }
 0xeba   :  { %10114 = vmatprep.subr.bf16.mxu1 %v14147_v9 }
 0xebd   :  { %10115 = vmatpush3.bf16.msra.mxu1 %v10714_v14 }
 0xebe   :  { %10116 = vmatprep.subr.bf16.mxu1 %v14147_v9 }
 0xec1   :  { %10117 = vmatpush3.bf16.msra.mxu1 %v10718_v43 }
 0xec2   :  { %10118 = vmatprep.subr.bf16.mxu1 %v14147_v9 }
 0xec5   :  { %10119 = vmatpush3.bf16.msra.mxu1 %v10722_v61 }
 0xec6   :  { %7445 = vmatprep.subr.bf16.mxu1 %v13361_v27 }
 0xf09   :  { %v6262_v35 = vpop.f32.mrf.mxu0 }
 0xf0a   :  { %v6263_v48 = vadd.f32 %v13353_v44, %v6262_v35 }
 0xf0b   :  { %v10062_v57 = vpop.f32.mrf.mxu0 }
 0xf0c   :  { %6268 = vst [vmem:[%s13822_s12 + $0x20] sm:$0xff] %v6263_v48 }
 0xf0d   :  { %v6265_v40 = vpop.f32.mrf.mxu0 }
 0xf0f   :  { %v10063_v18 = vpop.f32.mrf.mxu0 }
 0xf28   :  { %v6375_v30 = vpop.f32.mrf.mxu1 }
 0xf29   :  { %v6608_v51 = vpop.f32.mrf.mxu0  ;;  %v6376_v41 = vadd.f32 %v13367_v60, %v6375_v30 }
 0xf2a   :  { %v10082_v39 = vpop.f32.mrf.mxu1  ;;  %v6656_v4 = vadd.f32 %v6608_v51, %v14052_v34 }
 0xf2b   :  { %6381 = vst [vmem:[%s13823_s13 + $0x20] sm:$0xff] %v6376_v41  ;;  %v6610_v22 = vpop.f32.mrf.mxu0 }
 0xf2c   :  { %v6378_v54 = vpop.f32.mrf.mxu1  ;;  %v6657_v50 = vadd.f32 %v6610_v22, %v14051_v26  ;;  %v9508_v37 = vmul.f32 -1.442695, %v6656_v4 }
 0xf2d   :  { %v6612_v46 = vpop.f32.mrf.mxu0  ;;  %v13385_v54 = vld [vmem:[#allocation7 + $0xe0] ss:$16 sps:$4 sm:$0xff]  }
 0xf2e   :  { %v10083_v20 = vpop.f32.mrf.mxu1  ;;  %v9509_v24 = vmul.f32 -1.442695, %v6657_v50  ;;  %v13397_v50 = vld [vmem:[#allocation7 + $0xa4] ss:$16 sps:$4 sm:$0xff]  }
 0xf2f   :  { %v6613_v55 = vpop.f32.mrf.mxu0  ;;  %v13389_v20 = vld [vmem:[#allocation7 + $0xc4] ss:$16 sps:$4 sm:$0xff]  }
 0xf30   :  { %11115 = vpow2.f32 %v9509_v24  ;;  %v13393_v55 = vld [vmem:[#allocation7 + $0xc0] ss:$16 sps:$4 sm:$0xff]  }
 0xf31   :  { %11117 = vpow2.f32 %v9508_v37  ;;  %v13400_v24 = vld [vmem:[#allocation7 + $0xa0] ss:$16 sps:$4 sm:$0xff]  }
 0xf3d   :  { %v11116_v36 = vpop.eup %11115 }
 0xf3e   :  { %v11118_v49 = vpop.eup %11117  ;;  %v6670_v19 = vadd.f32 1.0, %v11116_v36  ;;  %v13403_v36 = vld [vmem:[#allocation7 + $0x84] ss:$16 sps:$4 sm:$0xff]  }
 0xf3f   :  { %v6669_v58 = vadd.f32 1.0, %v11118_v49 }
 0xf40   :  { %11119 = vrcp.f32 %v6670_v19 }
 0xf48   :  { %v6649_v6 = vpop.f32.mrf.mxu1 }
 0xf49   :  { %v6658_v38 = vadd.f32 %v6649_v6, %v14053_v10  ;;  %v6910_v28 = vpop.f32.mrf.mxu0 }
 0xf4a   :  { %v6651_v15 = vpop.f32.mrf.mxu1  ;;  %v6958_v12 = vadd.f32 %v6910_v28, %v14055_v47 }
 0xf4b   :  { %v9510_v31 = vmul.f32 -1.442695, %v6658_v38  ;;  %v6659_v52 = vadd.f32 %v6651_v15, %v14163_v3  ;;  %v6912_v59 = vpop.f32.mrf.mxu0  ;;  %v13410_v15 = vld [vmem:[#allocation7 + $0x64] ss:$16 sps:$4 sm:$0xff]  }
 0xf4c   :  { %v6653_v0 = vpop.f32.mrf.mxu1  ;;  %v6959_v11 = vadd.f32 %v6912_v59, %v12362_v63  ;;  %v9543_v23 = vmul.f32 -1.442695, %v6958_v12  ;;  %v13422_v59 = vld [vmem:[#allocation7 + $0x40] ss:$16 sps:$4 sm:$0xff]  }
 0xf4d   :  { %11121 = vpow2.f32 %v9510_v31  ;;  %v6914_v1 = vpop.f32.mrf.mxu0  ;;  %v11120_v62 = vpop.eup %11119  ;;  %v13425_v0 = vld [vmem:[#allocation7 + $0x24] ss:$16 sps:$4 sm:$0xff]  }
 0xf4e   :  { %11123 = vrcp.f32 %v6669_v58  ;;  %v6654_v33 = vpop.f32.mrf.mxu1  ;;  %v9544_v7 = vmul.f32 -1.442695, %v6959_v11  ;;  %v6679_v32 = vmul.f32 %v11120_v62, %v13225_v29  ;;  %v13407_v58 = vld [vmem:[#allocation7 + $0x80] ss:$16 sps:$4 sm:$0xff]   ;;  %v13439_v62 = vld [vmem:[#allocation7 + $0xe8] ss:$16 sps:$4 sm:$0xff]  }
 0xf4f   :  { %11125 = vtanh.f32 %v6659_v52  ;;  %v6915_v13 = vpop.f32.mrf.mxu0  ;;  %v13416_v52 = vld [vmem:[#allocation7 + $0x60] ss:$16 sps:$4 sm:$0xff]   ;;  %v13431_v33 = vld [vmem:[#allocation7 + $0x4] ss:$16 sps:$4 sm:$0xff]  }
 0xf50   :  { %11127 = vpow2.f32 %v9543_v23  ;;  %v13428_v1 = vld [vmem:[#allocation7 + $0x20] ss:$16 sps:$4 sm:$0xff]   ;;  %v13437_v23 = vld [vmem:[#allocation8 + $0xe4] ss:$16 sps:$4 sm:$0xff]  }
 0xf51   :  { %11129 = vpow2.f32 %v9544_v7  ;;  %v13434_v13 = vld [vmem:[#allocation7] ss:$16 sps:$4 sm:$0xff]  }
 0xf5a   :  { %v11122_v5 = vpop.eup %11121 }
 0xf5b   :  { %v11124_v53 = vpop.eup %11123  ;;  %v6671_v17 = vadd.f32 1.0, %v11122_v5  ;;  %v13442_v5 = vld [vmem:[#allocation8 + $0xe0] ss:$16 sps:$4 sm:$0xff]  }
 0xf5c   :  { %v11126_v8 = vpop.eup %11125 }
 0xf5d   :  { %v6680_v16 = vmul.f32 %v11126_v8, %v11124_v53  ;;  %11131 = vrcp.f32 %v6671_v17  ;;  %v11128_v14 = vpop.eup %11127  ;;  %v13446_v8 = vld [vmem:[#allocation7 + $0xcc] ss:$16 sps:$4 sm:$0xff]   ;;  %v13449_v17 = vld [vmem:[#allocation8 + $0xc4] ss:$16 sps:$4 sm:$0xff]  }
 0xf5e   :  { %v11130_v35 = vpop.eup %11129  ;;  %v6971_v43 = vadd.f32 1.0, %v11128_v14  ;;  %v13460_v14 = vld [vmem:[#allocation7 + $0xac] ss:$16 sps:$4 sm:$0xff]  }
 0xf5f   :  { %v13380_v2 = vadd.f32 %v6680_v16, %v6679_v32  ;;  %v6972_v48 = vadd.f32 1.0, %v11130_v35  ;;  %v13454_v32 = vld [vmem:[#allocation7 + $0xc8] ss:$16 sps:$4 sm:$0xff]   ;;  %v13458_v16 = vld [vmem:[#allocation8 + $0xc0] ss:$16 sps:$4 sm:$0xff]  }
 0xf60   :  { %v13463_v35 = vld [vmem:[#allocation8 + $0xa4] ss:$16 sps:$4 sm:$0xff]  }
 0xf61   :  { %11133 = vtanh.f32 %v13380_v2 }
 0xf62   :  { %11135 = vrcp.f32 %v6971_v43  ;;  %v13468_v43 = vld [vmem:[#allocation7 + $0xa8] ss:$16 sps:$4 sm:$0xff]  }
 0xf63   :  { %11137 = vrcp.f32 %v6972_v48  ;;  %v13472_v48 = vld [vmem:[#allocation8 + $0xa0] ss:$16 sps:$4 sm:$0xff]  }
 0xf68   :  { %v6951_v57 = vpop.f32.mrf.mxu1 }
 0xf69   :  { %v6960_v40 = vadd.f32 %v6951_v57, %v12373_v45  ;;  %v13474_v57 = vld [vmem:[#allocation7 + $0x8c] ss:$16 sps:$4 sm:$0xff]  }
 0xf6a   :  { %v6953_v61 = vpop.f32.mrf.mxu1  ;;  %v11132_v51 = vpop.eup %11131 }
 0xf6b   :  { %v9545_v18 = vmul.f32 -1.442695, %v6960_v40  ;;  %v6961_v30 = vadd.f32 %v6953_v61, %v12378_v21  ;;  %v13477_v40 = vld [vmem:[#allocation8 + $0x84] ss:$16 sps:$4 sm:$0xff]   ;;  %v13480_v61 = vld [vmem:[#allocation7 + $0x88] ss:$16 sps:$4 sm:$0xff]  }
 0xf6c   :  { %v6955_v29 = vpop.f32.mrf.mxu1 }
 0xf6d   :  { %11139 = vpow2.f32 %v9545_v18  ;;  %v13484_v18 = vld [vmem:[#allocation8 + $0x80] ss:$16 sps:$4 sm:$0xff]   ;;  %v13489_v29 = vld [vmem:[#allocation8 + $0x64] ss:$16 sps:$4 sm:$0xff]  }
 0xf6e   :  { %v11134_v41 = vpop.eup %11133  ;;  %11141 = vtanh.f32 %v6961_v30  ;;  %v6956_v39 = vpop.f32.mrf.mxu1  ;;  %v13486_v30 = vld [vmem:[#allocation7 + $0x6c] ss:$16 sps:$4 sm:$0xff]  }
 0xf6f   :  { %v6683_v22 = vmul.f32 %v11134_v41, %v11132_v51  ;;  %v11136_v4 = vpop.eup %11135  ;;  %v13492_v51 = vld [vmem:[#allocation7 + $0x68] ss:$16 sps:$4 sm:$0xff]   ;;  %v13496_v41 = vld [vmem:[#allocation8 + $0x60] ss:$16 sps:$4 sm:$0xff]   ;;  %v13498_v39 = vld [vmem:[#allocation7 + $0x4c] ss:$16 sps:$4 sm:$0xff]  }
 0xf70   :  { %v11138_v37 = vpop.eup %11137 }
 0xf71   :  { %v13387_v46 = vpack.c.bf16 %v6683_v22, %v6683_v22  ;;  %v6981_v38 = vmul.f32 %v11138_v37, %v13241_v42  ;;  %v13419_v42 = vld [vmem:[#allocation7 + $0x44] ss:$16 sps:$4 sm:$0xff]   ;;  %v13508_v37 = vld [vmem:[#allocation8 + $0x40] ss:$16 sps:$4 sm:$0xff]  }
 0xf72   :  { %v13501_v22 = vld [vmem:[#allocation8 + $0x44] ss:$16 sps:$4 sm:$0xff]   ;;  %14165 = vst [vmem:[#allocation39_spill] sm:$0xff] %v13508_v37 }
 0xf73   :  { %10101 = vmatmul.mubr.bf16.vlgmr.msra.gmra.mxu0 %v13387_v46 }
 0xf74   :  { %7405 = vmatpush1.bf16.msra.mxu0 %v13385_v54  ;;  %7436 = vmatprep.mubr.bf16.mxu0 %v13971_v56 }
 0xf75   :  { %7406 = vmatprep.subr.bf16.mxu0 %v13389_v20 }
 0xf78   :  { %7407 = vmatpush1.bf16.msra.mxu0 %v13393_v55 }
 0xf79   :  { %7408 = vmatprep.subr.bf16.mxu0 %v13397_v50 }
 0xf7a   :  { %v11140_v49 = vpop.eup %11139 }
 0xf7b   :  { %v11142_v19 = vpop.eup %11141  ;;  %v6973_v6 = vadd.f32 1.0, %v11140_v49  ;;  %v13510_v49 = vld [vmem:[#allocation7 + $0x2c] ss:$16 sps:$4 sm:$0xff]  }
 0xf7c   :  { %v6982_v28 = vmul.f32 %v11142_v19, %v11136_v4  ;;  %7409 = vmatpush1.bf16.msra.mxu0 %v13400_v24  ;;  %v13504_v4 = vld [vmem:[#allocation7 + $0x48] ss:$16 sps:$4 sm:$0xff]   ;;  %14166 = vst [vmem:[#allocation41_spill] sm:$0xff] %v13510_v49  ;;  %v13513_v19 = vld [vmem:[#allocation8 + $0x24] ss:$16 sps:$4 sm:$0xff]  }
 0xf7d   :  { %7410 = vmatprep.subr.bf16.mxu0 %v13403_v36  ;;  %11143 = vrcp.f32 %v6973_v6  ;;  %14164 = vst [vmem:[#allocation37_spill] sm:$0xff] %v13504_v4  ;;  %14167 = vst [vmem:[#allocation43_spill] sm:$0xff] %v13513_v19  ;;  %v13516_v6 = vld [vmem:[#allocation7 + $0x28] ss:$16 sps:$4 sm:$0xff]  }
 0xf7e   :  { %v13412_v31 = vadd.f32 %v6982_v28, %v6981_v38  ;;  %14168 = vst [vmem:[#allocation44_spill] sm:$0xff] %v13516_v6  ;;  %v13520_v38 = vld [vmem:[#allocation8 + $0x20] ss:$16 sps:$4 sm:$0xff]   ;;  %v13522_v28 = vld [vmem:[#allocation7 + $0xc] ss:$16 sps:$4 sm:$0xff]  }
 0xf7f   :  { %14169 = vst [vmem:[#allocation17_spill] sm:$0xff] %v13520_v38  ;;  %14170 = vst [vmem:[#allocation45_spill] sm:$0xff] %v13522_v28 }
 0xf80   :  { %11145 = vtanh.f32 %v13412_v31  ;;  %7411 = vmatpush1.bf16.msra.mxu0 %v13407_v58 }
 0xf81   :  { %7412 = vmatprep.subr.bf16.mxu0 %v13410_v15 }
 0xf84   :  { %7413 = vmatpush1.bf16.msra.mxu0 %v13416_v52 }
 0xf85   :  { %7414 = vmatprep.subr.bf16.mxu0 %v13419_v42 }
 0xf88   :  { %7415 = vmatpush1.bf16.msra.mxu0 %v13422_v59 }
 0xf89   :  { %7416 = vmatprep.subr.bf16.mxu0 %v13425_v0 }
 0xf8a   :  { %v11144_v12 = vpop.eup %11143 }
 0xf8c   :  { %7417 = vmatpush1.bf16.msra.mxu0 %v13428_v1 }
 0xf8d   :  { %v11146_v11 = vpop.eup %11145  ;;  %7418 = vmatprep.subr.bf16.mxu0 %v13431_v33 }
 0xf8e   :  { %v6985_v7 = vmul.f32 %v11146_v11, %v11144_v12  ;;  %v13525_v12 = vld [vmem:[#allocation8 + $0x4] ss:$16 sps:$4 sm:$0xff]   ;;  %v13528_v11 = vld [vmem:[#allocation7 + $0x8] ss:$16 sps:$4 sm:$0xff]  }
 0xf8f   :  { %14171 = vst [vmem:[#allocation47_spill] sm:$0xff] %v13525_v12  ;;  %14172 = vst [vmem:[#allocation18_spill] sm:$0xff] %v13528_v11 }
 0xf90   :  { %7419 = vmatpush1.bf16.msra.mxu0 %v13434_v13  ;;  %v13444_v53 = vpack.c.bf16 %v6985_v7, %v6985_v7  ;;  %v13532_v7 = vld [vmem:[#allocation8] ss:$16 sps:$4 sm:$0xff]  }
 0xf91   :  { %7706 = vmatprep.subr.bf16.mxu0 %v13437_v23  ;;  %14173 = vst [vmem:[#allocation34_spill] sm:$0xff] %v13532_v7 }
 0xf92   :  { %10121 = vmatmul.mubr.bf16.vlgmr.msra.gmra.mxu1 %v13444_v53 }
 0xf93   :  { %7437 = vmatmul.mubr.bf16.vlgmr.msra.gmra.mxu0 %v13387_v46  ;;  %7446 = vmatpush1.bf16.msra.mxu1 %v13439_v62 }
 0xf94   :  { %7707 = vmatpush1.bf16.msra.mxu0 %v13442_v5  ;;  %7447 = vmatprep.subr.bf16.mxu1 %v13446_v8 }
 0xf95   :  { %7708 = vmatprep.subr.bf16.mxu0 %v13449_v17  ;;  %7477 = vmatprep.mubr.bf16.mxu1 %v13971_v56 }
 0xf96   :  { %7738 = vmatprep.mubr.bf16.mxu0 %v13971_v56 }
 0xf97   :  { %7448 = vmatpush1.bf16.msra.mxu1 %v13454_v32 }
 0xf98   :  { %7709 = vmatpush1.bf16.msra.mxu0 %v13458_v16  ;;  %7449 = vmatprep.subr.bf16.mxu1 %v13460_v14 }
 0xf99   :  { %7710 = vmatprep.subr.bf16.mxu0 %v13463_v35 }
 0xf9b   :  { %7450 = vmatpush1.bf16.msra.mxu1 %v13468_v43 }
 0xf9c   :  { %7711 = vmatpush1.bf16.msra.mxu0 %v13472_v48  ;;  %7451 = vmatprep.subr.bf16.mxu1 %v13474_v57 }
 0xf9d   :  { %7712 = vmatprep.subr.bf16.mxu0 %v13477_v40 }
 0xf9f   :  { %7452 = vmatpush1.bf16.msra.mxu1 %v13480_v61 }
 0xfa0   :  { %7713 = vmatpush1.bf16.msra.mxu0 %v13484_v18  ;;  %7453 = vmatprep.subr.bf16.mxu1 %v13486_v30 }
 0xfa1   :  { %7714 = vmatprep.subr.bf16.mxu0 %v13489_v29 }
 0xfa3   :  { %7454 = vmatpush1.bf16.msra.mxu1 %v13492_v51 }
 0xfa4   :  { %7715 = vmatpush1.bf16.msra.mxu0 %v13496_v41  ;;  %7455 = vmatprep.subr.bf16.mxu1 %v13498_v39 }
 0xfa5   :  { %7716 = vmatprep.subr.bf16.mxu0 %v13501_v22 }
 0xfa7   :  { %7456 = vmatpush1.bf16.msra.mxu1 %v13504_v4 }
 0xfa8   :  { %7717 = vmatpush1.bf16.msra.mxu0 %v13508_v37  ;;  %7457 = vmatprep.subr.bf16.mxu1 %v13510_v49  ;;  %v13534_v37 = vld [vmem:[#allocation8 + $0xec] ss:$16 sps:$4 sm:$0xff]   ;;  %v13538_v49 = vld [vmem:[#allocation8 + $0xe8] ss:$16 sps:$4 sm:$0xff]  }
 0xfa9   :  { %7718 = vmatprep.subr.bf16.mxu0 %v13513_v19  ;;  %14174 = vst [vmem:[#allocation20_spill] sm:$0xff] %v13534_v37  ;;  %14175 = vst [vmem:[#allocation36_spill] sm:$0xff] %v13538_v49 }
 0xfab   :  { %7458 = vmatpush1.bf16.msra.mxu1 %v13516_v6  ;;  %v13542_v6 = vld [vmem:[#allocation8 + $0xcc] ss:$16 sps:$4 sm:$0xff]  }
 0xfac   :  { %7719 = vmatpush1.bf16.msra.mxu0 %v13520_v38  ;;  %7459 = vmatprep.subr.bf16.mxu1 %v13522_v28  ;;  %14176 = vst [vmem:[#allocation19_spill] sm:$0xff] %v13542_v6  ;;  %v13548_v28 = vld [vmem:[#allocation8 + $0xc8] ss:$16 sps:$4 sm:$0xff]  }
 0xfad   :  { %7720 = vmatprep.subr.bf16.mxu0 %v13525_v12  ;;  %14177 = vst [vmem:[#allocation38_spill] sm:$0xff] %v13548_v28 }
 0xfaf   :  { %7460 = vmatpush1.bf16.msra.mxu1 %v13528_v11  ;;  %v13551_v11 = vld [vmem:[#allocation8 + $0xac] ss:$16 sps:$4 sm:$0xff]  }
 0xfb0   :  { %7721 = vmatpush1.bf16.msra.mxu0 %v13532_v7  ;;  %7747 = vmatprep.subr.bf16.mxu1 %v13534_v37  ;;  %14178 = vst [vmem:[#allocation21_spill] sm:$0xff] %v13551_v11  ;;  %v13557_v37 = vld [vmem:[#allocation8 + $0xa8] ss:$16 sps:$4 sm:$0xff]  }
 0xfb1   :  { %10124 = vmatprep.subr.bf16.mxu0 %v14147_v9  ;;  %14179 = vst [vmem:[#allocation40_spill] sm:$0xff] %v13557_v37  ;;  %v13569_v7 = vld [vmem:[#allocation8 + $0x68] ss:$16 sps:$4 sm:$0xff]  }
 0xfb2   :  { %7478 = vmatmul.mubr.bf16.vlgmr.msra.gmra.mxu1 %v13387_v46  ;;  %v13560_v46 = vld [vmem:[#allocation8 + $0x8c] ss:$16 sps:$4 sm:$0xff]   ;;  %14183 = vst [vmem:[#allocation23_spill] sm:$0xff] %v13569_v7 }
 0xfb3   :  { %7739 = vmatmul.mubr.bf16.vlgmr.msra.gmra.mxu0 %v13444_v53  ;;  %7748 = vmatpush1.bf16.msra.mxu1 %v13538_v49  ;;  %14180 = vst [vmem:[#allocation24_spill] sm:$0xff] %v13560_v46  ;;  %v13563_v49 = vld [vmem:[#allocation8 + $0x88] ss:$16 sps:$4 sm:$0xff]  }
 0xfb4   :  { %7749 = vmatprep.subr.bf16.mxu1 %v13542_v6  ;;  %7779 = vmatprep.mubr.bf16.mxu1 %v13971_v56  ;;  %14181 = vst [vmem:[#allocation42_spill] sm:$0xff] %v13563_v49  ;;  %v13566_v6 = vld [vmem:[#allocation8 + $0x6c] ss:$16 sps:$4 sm:$0xff]  }
 0xfb5   :  { %10140 = vmatprep.mubr.msk.bf16.mxu0 %vm11385_vm0, %v14147_v9  ;;  %14182 = vst [vmem:[#allocation22_spill] sm:$0xff] %v13566_v6 }
 0xfb7   :  { %7750 = vmatpush1.bf16.msra.mxu1 %v13548_v28  ;;  %v13572_v28 = vld [vmem:[#allocation8 + $0x4c] ss:$16 sps:$4 sm:$0xff]  }
 0xfb8   :  { %7751 = vmatprep.subr.bf16.mxu1 %v13551_v11  ;;  %14184 = vst [vmem:[#allocation25_spill] sm:$0xff] %v13572_v28  ;;  %v13575_v11 = vld [vmem:[#allocation8 + $0x48] ss:$16 sps:$4 sm:$0xff]  }
 0xfb9   :  { %14185 = vst [vmem:[#allocation26_spill] sm:$0xff] %v13575_v11 }
 0xfbb   :  { %7752 = vmatpush1.bf16.msra.mxu1 %v13557_v37  ;;  %v13578_v37 = vld [vmem:[#allocation8 + $0x2c] ss:$16 sps:$4 sm:$0xff]  }
 0xfbc   :  { %7753 = vmatprep.subr.bf16.mxu1 %v13560_v46  ;;  %14186 = vst [vmem:[#allocation28_spill] sm:$0xff] %v13578_v37  ;;  %v13581_v46 = vld [vmem:[#allocation8 + $0x28] ss:$16 sps:$4 sm:$0xff]  }
 0xfbd   :  { %14187 = vst [vmem:[#allocation27_spill] sm:$0xff] %v13581_v46 }
 0xfbf   :  { %7754 = vmatpush1.bf16.msra.mxu1 %v13563_v49  ;;  %v13584_v49 = vld [vmem:[#allocation8 + $0xc] ss:$16 sps:$4 sm:$0xff]  }
 0xfc0   :  { %7755 = vmatprep.subr.bf16.mxu1 %v13566_v6  ;;  %14188 = vst [vmem:[#allocation29_spill] sm:$0xff] %v13584_v49  ;;  %v13587_v6 = vld [vmem:[#allocation8 + $0x8] ss:$16 sps:$4 sm:$0xff]  }
 0xfc1   :  { %14189 = vst [vmem:[#allocation32_spill] sm:$0xff] %v13587_v6 }
 0xfc3   :  { %7756 = vmatpush1.bf16.msra.mxu1 %v13569_v7 }
 0xfc4   :  { %7757 = vmatprep.subr.bf16.mxu1 %v13572_v28 }
 0xfc7   :  { %7758 = vmatpush1.bf16.msra.mxu1 %v13575_v11  ;;  %v10807_v11 = vld [vmem:[#allocation11 + $0x18] sm:$0xff]  }
 0xfc8   :  { %7759 = vmatprep.subr.bf16.mxu1 %v13578_v37  ;;  %v10795_v37 = vld [vmem:[%s13818_s8 + $0x38] sm:$0xff]  }
 0xfc9   :  { %10125 = vmatpush3.bf16.msra.mxu0 %v10795_v37  ;;  %v10798_v37 = vld [vmem:[%s13818_s8 + $0x20] sm:$0xff]  }
 0xfca   :  { %10126 = vmatprep.subr.bf16.mxu0 %v14147_v9 }
 0xfcb   :  { %7760 = vmatpush1.bf16.msra.mxu1 %v13581_v46  ;;  %v10805_v46 = vld [vmem:[#allocation11 + $0x28] sm:$0xff]  }
 0xfcc   :  { %7761 = vmatprep.subr.bf16.mxu1 %v13584_v49  ;;  %v10796_v49 = vld [vmem:[%s13818_s8 + $0x30] sm:$0xff]  }
 0xfcd   :  { %10127 = vmatpush3.bf16.msra.mxu0 %v10796_v49  ;;  %v10799_v49 = vld [vmem:[%s13818_s8 + $0x18] sm:$0xff]  }
 0xfce   :  { %10128 = vmatprep.subr.bf16.mxu0 %v14147_v9 }
 0xfcf   :  { %7762 = vmatpush1.bf16.msra.mxu1 %v13587_v6  ;;  %v10800_v6 = vld [vmem:[%s13818_s8 + $0x10] sm:$0xff]  }
 0xfd0   :  { %10144 = vmatprep.subr.bf16.mxu1 %v14147_v9 }
 0xfd2   :  { %7780 = vmatmul.mubr.bf16.vlgmr.msra.gmra.mxu1 %v13444_v53  ;;  %v10797_v53 = vld [vmem:[%s13818_s8 + $0x28] sm:$0xff]  }
 0xfd3   :  { %10160 = vmatprep.mubr.msk.bf16.mxu1 %vm11385_vm0, %v14147_v9  ;;  %10129 = vmatpush3.bf16.msra.mxu0 %v10797_v53  ;;  %v10801_v53 = vld [vmem:[%s13818_s8 + $0x8] sm:$0xff]  }
 0xfd4   :  { %10130 = vmatprep.subr.bf16.mxu0 %v14147_v9 }
 0xfd7   :  { %10131 = vmatpush3.bf16.msra.mxu0 %v10798_v37  ;;  %v10802_v37 = vld [vmem:[%s13818_s8] sm:$0xff]  }
 0xfd8   :  { %10132 = vmatprep.subr.bf16.mxu0 %v14147_v9 }
 0xfdb   :  { %10133 = vmatpush3.bf16.msra.mxu0 %v10799_v49  ;;  %v10803_v49 = vld [vmem:[#allocation11 + $0x38] sm:$0xff]  }
 0xfdc   :  { %10134 = vmatprep.subr.bf16.mxu0 %v14147_v9  ;;  %10145 = vmatpush3.bf16.msra.mxu1 %v10803_v49  ;;  %v10809_v49 = vld [vmem:[#allocation11 + $0x8] sm:$0xff]  }
 0xfdd   :  { %10146 = vmatprep.subr.bf16.mxu1 %v14147_v9 }
 0xfdf   :  { %10135 = vmatpush3.bf16.msra.mxu0 %v10800_v6  ;;  %v10804_v6 = vld [vmem:[#allocation11 + $0x30] sm:$0xff]  }
 0xfe0   :  { %10136 = vmatprep.subr.bf16.mxu0 %v14147_v9  ;;  %10147 = vmatpush3.bf16.msra.mxu1 %v10804_v6 }
 0xfe1   :  { %10148 = vmatprep.subr.bf16.mxu1 %v14147_v9 }
 0xfe3   :  { %10137 = vmatpush3.bf16.msra.mxu0 %v10801_v53  ;;  %v10806_v53 = vld [vmem:[#allocation11 + $0x20] sm:$0xff]  }
 0xfe4   :  { %10138 = vmatprep.subr.bf16.mxu0 %v14147_v9  ;;  %10149 = vmatpush3.bf16.msra.mxu1 %v10805_v46 }
 0xfe5   :  { %10150 = vmatprep.subr.bf16.mxu1 %v14147_v9 }
 0xfe7   :  { %10139 = vmatpush3.bf16.msra.mxu0 %v10802_v37 }
 0xfe8   :  { %8234 = vmatprep.subr.bf16.mxu0 %v13342_v25  ;;  %10151 = vmatpush3.bf16.msra.mxu1 %v10806_v53  ;;  %v10808_v25 = vld [vmem:[#allocation11 + $0x10] sm:$0xff]  }
 0xfe9   :  { %10152 = vmatprep.subr.bf16.mxu1 %v14147_v9 }
 0xfec   :  { %10153 = vmatpush3.bf16.msra.mxu1 %v10807_v11  ;;  %v10810_v11 = vld [vmem:[#allocation11] sm:$0xff]  }
 0xfed   :  { %10154 = vmatprep.subr.bf16.mxu1 %v14147_v9 }
 0xff0   :  { %10155 = vmatpush3.bf16.msra.mxu1 %v10808_v25 }
 0xff1   :  { %10156 = vmatprep.subr.bf16.mxu1 %v14147_v9 }
 0xff4   :  { %10157 = vmatpush3.bf16.msra.mxu1 %v10809_v49 }
 0xff5   :  { %10158 = vmatprep.subr.bf16.mxu1 %v14147_v9 }
 0xff8   :  { %10159 = vmatpush3.bf16.msra.mxu1 %v10810_v11 }
 0xff9   :  { %8275 = vmatprep.subr.bf16.mxu1 %v13361_v27 }
0x1033   :  { %v7092_v37 = vpop.f32.mrf.mxu0 }
0x1034   :  { %v7093_v6 = vadd.f32 %v13353_v44, %v7092_v37 }
0x1035   :  { %v10102_v28 = vpop.f32.mrf.mxu0 }
0x1036   :  { %7098 = vst [vmem:[%s13822_s12 + $0x28] sm:$0xff] %v7093_v6 }
0x1037   :  { %v7095_v46 = vpop.f32.mrf.mxu0 }
0x1039   :  { %v10103_v53 = vpop.f32.mrf.mxu0 }
0x1052   :  { %v7205_v25 = vpop.f32.mrf.mxu1 }
0x1053   :  { %v7438_v7 = vpop.f32.mrf.mxu0  ;;  %v7206_v12 = vadd.f32 %v13367_v60, %v7205_v25 }
0x1054   :  { %v10122_v38 = vpop.f32.mrf.mxu1  ;;  %v7486_v11 = vadd.f32 %v7438_v7, %v14052_v34 }
0x1055   :  { %7211 = vst [vmem:[%s13823_s13 + $0x28] sm:$0xff] %v7206_v12  ;;  %v7440_v44 = vpop.f32.mrf.mxu0 }
0x1056   :  { %v7208_v28 = vpop.f32.mrf.mxu1  ;;  %v7487_v46 = vadd.f32 %v7440_v44, %v14051_v26  ;;  %v9596_v27 = vmul.f32 -1.442695, %v7486_v11 }
0x1057   :  { %v7442_v37 = vpop.f32.mrf.mxu0 }
0x1058   :  { %v10123_v49 = vpop.f32.mrf.mxu1  ;;  %v9597_v53 = vmul.f32 -1.442695, %v7487_v46 }
0x1059   :  { %v7443_v6 = vpop.f32.mrf.mxu0 }
0x105a   :  { %11147 = vpow2.f32 %v9597_v53 }
0x105b   :  { %11149 = vpow2.f32 %v9596_v27 }
0x1067   :  { %v11148_v9 = vpop.eup %11147 }
0x1068   :  { %v11150_v60 = vpop.eup %11149  ;;  %v7500_v38 = vadd.f32 1.0, %v11148_v9 }
0x1069   :  { %v7499_v4 = vadd.f32 1.0, %v11150_v60 }
0x106a   :  { %11151 = vrcp.f32 %v7500_v38 }
0x1072   :  { %v7479_v25 = vpop.f32.mrf.mxu1 }
0x1073   :  { %v7488_v19 = vadd.f32 %v7479_v25, %v14053_v10  ;;  %v7740_v12 = vpop.f32.mrf.mxu0 }
0x1074   :  { %v7481_v28 = vpop.f32.mrf.mxu1  ;;  %v7788_v11 = vadd.f32 %v7740_v12, %v14055_v47 }
0x1075   :  { %v9598_v37 = vmul.f32 -1.442695, %v7488_v19  ;;  %v7489_v49 = vadd.f32 %v7481_v28, %v14163_v3  ;;  %v7742_v6 = vpop.f32.mrf.mxu0 }
0x1076   :  { %v7483_v44 = vpop.f32.mrf.mxu1  ;;  %v7789_v53 = vadd.f32 %v7742_v6, %v12362_v63  ;;  %v9631_v27 = vmul.f32 -1.442695, %v7788_v11 }
0x1077   :  { %11153 = vpow2.f32 %v9598_v37  ;;  %v7744_v7 = vpop.f32.mrf.mxu0  ;;  %v11152_v19 = vpop.eup %11151 }
0x1078   :  { %11155 = vrcp.f32 %v7499_v4  ;;  %v7484_v46 = vpop.f32.mrf.mxu1  ;;  %v9632_v25 = vmul.f32 -1.442695, %v7789_v53  ;;  %v7509_v37 = vmul.f32 %v11152_v19, %v13380_v2 }
0x1079   :  { %11157 = vtanh.f32 %v7489_v49  ;;  %v7745_v9 = vpop.f32.mrf.mxu0 }
0x107a   :  { %11159 = vpow2.f32 %v9631_v27 }
0x107b   :  { %11161 = vpow2.f32 %v9632_v25 }
0x1084   :  { %v11154_v60 = vpop.eup %11153 }
0x1085   :  { %v11156_v28 = vpop.eup %11155  ;;  %v7501_v38 = vadd.f32 1.0, %v11154_v60 }
0x1086   :  { %v11158_v3 = vpop.eup %11157 }
0x1087   :  { %v7510_v44 = vmul.f32 %v11158_v3, %v11156_v28  ;;  %11163 = vrcp.f32 %v7501_v38  ;;  %v11160_v12 = vpop.eup %11159 }
0x1088   :  { %v11162_v49 = vpop.eup %11161  ;;  %v7801_v6 = vadd.f32 1.0, %v11160_v12 }
0x1089   :  { %v13650_v4 = vadd.f32 %v7510_v44, %v7509_v37  ;;  %v7802_v7 = vadd.f32 1.0, %v11162_v49 }
0x108b   :  { %11165 = vtanh.f32 %v13650_v4 }
0x108c   :  { %11167 = vrcp.f32 %v7801_v6 }
0x108d   :  { %11169 = vrcp.f32 %v7802_v7 }
0x1092   :  { %v7781_v46 = vpop.f32.mrf.mxu1 }
0x1093   :  { %v7790_v11 = vadd.f32 %v7781_v46, %v12373_v45  ;;  %v10817_v46 = vld [vmem:[%s13818_s8 + $0x8] sm:$0xff]  }
0x1094   :  { %v7783_v9 = vpop.f32.mrf.mxu1  ;;  %v11164_v3 = vpop.eup %11163 }
0x1095   :  { %v9633_v53 = vmul.f32 -1.442695, %v7790_v11  ;;  %v7791_v27 = vadd.f32 %v7783_v9, %v12378_v21  ;;  %v10818_v11 = vld [vmem:[%s13818_s8] sm:$0xff]   ;;  %v10819_v9 = vld [vmem:[#allocation11 + $0x38] sm:$0xff]  }
0x1096   :  { %v7785_v2 = vpop.f32.mrf.mxu1 }
0x1097   :  { %11171 = vpow2.f32 %v9633_v53  ;;  %v10820_v53 = vld [vmem:[#allocation11 + $0x30] sm:$0xff]   ;;  %v10822_v2 = vld [vmem:[#allocation11 + $0x20] sm:$0xff]  }
0x1098   :  { %v11166_v25 = vpop.eup %11165  ;;  %11173 = vtanh.f32 %v7791_v27  ;;  %v7786_v19 = vpop.f32.mrf.mxu1  ;;  %v10821_v27 = vld [vmem:[#allocation11 + $0x28] sm:$0xff]  }
0x1099   :  { %v7513_v60 = vmul.f32 %v11166_v25, %v11164_v3  ;;  %v11168_v38 = vpop.eup %11167  ;;  %v10823_v3 = vld [vmem:[#allocation11 + $0x18] sm:$0xff]   ;;  %v10824_v25 = vld [vmem:[#allocation11 + $0x10] sm:$0xff]   ;;  %v13775_v19 = vld [vmem:[%s13819_s9] ss:$0 sm:$0xff] }
0x109a   :  { %v11170_v37 = vpop.eup %11169 }
0x109b   :  { %v13655_v28 = vpack.c.bf16 %v7513_v60, %v7513_v60  ;;  %v7811_v6 = vmul.f32 %v11170_v37, %v13412_v31  ;;  %v14193_v31 = vld [vmem:[#allocation43_spill] sm:$0xff]  ;;  %v10825_v60 = vld [vmem:[#allocation11 + $0x8] sm:$0xff]  }
0x109d   :  { %10141 = vmatmul.mubr.bf16.vlgmr.msra.gmra.mxu0 %v13655_v28 }
0x109e   :  { %8235 = vmatpush1.bf16.msra.mxu0 %v13385_v54  ;;  %8266 = vmatprep.mubr.bf16.mxu0 %v13971_v56 }
0x109f   :  { %8236 = vmatprep.subr.bf16.mxu0 %v13389_v20 }
0x10a2   :  { %8237 = vmatpush1.bf16.msra.mxu0 %v13393_v55 }
0x10a3   :  { %8238 = vmatprep.subr.bf16.mxu0 %v13397_v50 }
0x10a4   :  { %v11172_v44 = vpop.eup %11171 }
0x10a5   :  { %v11174_v12 = vpop.eup %11173  ;;  %v7803_v49 = vadd.f32 1.0, %v11172_v44  ;;  %v10826_v44 = vld [vmem:[#allocation11] sm:$0xff]  }
0x10a6   :  { %v7812_v7 = vmul.f32 %v11174_v12, %v11168_v38  ;;  %8239 = vmatpush1.bf16.msra.mxu0 %v13400_v24 }
0x10a7   :  { %8240 = vmatprep.subr.bf16.mxu0 %v13403_v36  ;;  %11175 = vrcp.f32 %v7803_v49  ;;  %v14190_v36 = vld [vmem:[#allocation37_spill] sm:$0xff] }
0x10a8   :  { %v13666_v54 = vadd.f32 %v7812_v7, %v7811_v6  ;;  %v13786_v6 = vld [vmem:[%s13821_s11] ss:$0 sm:$0xff] }
0x10aa   :  { %11177 = vtanh.f32 %v13666_v54  ;;  %8241 = vmatpush1.bf16.msra.mxu0 %v13407_v58  ;;  %v14191_v58 = vld [vmem:[#allocation39_spill] sm:$0xff] }
0x10ab   :  { %8242 = vmatprep.subr.bf16.mxu0 %v13410_v15  ;;  %v14192_v15 = vld [vmem:[#allocation41_spill] sm:$0xff] }
0x10ae   :  { %8243 = vmatpush1.bf16.msra.mxu0 %v13416_v52  ;;  %v14194_v52 = vld [vmem:[#allocation44_spill] sm:$0xff] }
0x10af   :  { %8244 = vmatprep.subr.bf16.mxu0 %v13419_v42  ;;  %v14195_v42 = vld [vmem:[#allocation17_spill] sm:$0xff] }
0x10b2   :  { %8245 = vmatpush1.bf16.msra.mxu0 %v13422_v59  ;;  %v14196_v59 = vld [vmem:[#allocation45_spill] sm:$0xff] }
0x10b3   :  { %8246 = vmatprep.subr.bf16.mxu0 %v13425_v0  ;;  %v14197_v0 = vld [vmem:[#allocation47_spill] sm:$0xff] }
0x10b4   :  { %v11176_v20 = vpop.eup %11175 }
0x10b6   :  { %8247 = vmatpush1.bf16.msra.mxu0 %v13428_v1  ;;  %v14198_v1 = vld [vmem:[#allocation18_spill] sm:$0xff] }
0x10b7   :  { %v11178_v55 = vpop.eup %11177  ;;  %8248 = vmatprep.subr.bf16.mxu0 %v13431_v33  ;;  %v14199_v33 = vld [vmem:[#allocation34_spill] sm:$0xff] }
0x10b8   :  { %v7815_v50 = vmul.f32 %v11178_v55, %v11176_v20 }
0x10ba   :  { %8249 = vmatpush1.bf16.msra.mxu0 %v13434_v13  ;;  %v7929_v24 = vpack.c.bf16 %v7815_v50, %v7815_v50  ;;  %v14200_v13 = vld [vmem:[#allocation20_spill] sm:$0xff] }
0x10bb   :  { %8536 = vmatprep.subr.bf16.mxu0 %v13437_v23  ;;  %v14201_v23 = vmov 0.0  }
0x10bc   :  { %10161 = vmatmul.mubr.bf16.vlgmr.msra.gmra.mxu1 %v7929_v24 }
0x10bd   :  { %8267 = vmatmul.mubr.bf16.vlgmr.msra.gmra.mxu0 %v13655_v28  ;;  %8276 = vmatpush1.bf16.msra.mxu1 %v13439_v62  ;;  %v14202_v62 = vld [vmem:[#allocation36_spill] sm:$0xff] }
0x10be   :  { %8537 = vmatpush1.bf16.msra.mxu0 %v13442_v5  ;;  %8277 = vmatprep.subr.bf16.mxu1 %v13446_v8  ;;  %v14203_v5 = vld [vmem:[#allocation19_spill] sm:$0xff]  ;;  %v14204_v8 = vld [vmem:[#allocation38_spill] sm:$0xff] }
0x10bf   :  { %8538 = vmatprep.subr.bf16.mxu0 %v13449_v17  ;;  %8307 = vmatprep.mubr.bf16.mxu1 %v13971_v56  ;;  %v14205_v17 = vld [vmem:[#allocation21_spill] sm:$0xff] }
0x10c0   :  { %8568 = vmatprep.mubr.bf16.mxu0 %v13971_v56 }
0x10c1   :  { %8278 = vmatpush1.bf16.msra.mxu1 %v13454_v32  ;;  %v14206_v32 = vld [vmem:[#allocation40_spill] sm:$0xff] }
0x10c2   :  { %8539 = vmatpush1.bf16.msra.mxu0 %v13458_v16  ;;  %8279 = vmatprep.subr.bf16.mxu1 %v13460_v14  ;;  %v14207_v16 = vld [vmem:[#allocation24_spill] sm:$0xff]  ;;  %v14208_v14 = vld [vmem:[#allocation42_spill] sm:$0xff] }
0x10c3   :  { %8540 = vmatprep.subr.bf16.mxu0 %v13463_v35  ;;  %v14209_v35 = vld [vmem:[#allocation22_spill] sm:$0xff] }
0x10c5   :  { %8280 = vmatpush1.bf16.msra.mxu1 %v13468_v43  ;;  %v14210_v43 = vld [vmem:[#allocation23_spill] sm:$0xff] }
0x10c6   :  { %8541 = vmatpush1.bf16.msra.mxu0 %v13472_v48  ;;  %8281 = vmatprep.subr.bf16.mxu1 %v13474_v57  ;;  %v14211_v48 = vld [vmem:[#allocation25_spill] sm:$0xff]  ;;  %v14213_v57 = vld [vmem:[#allocation28_spill] sm:$0xff] }
0x10c7   :  { %8542 = vmatprep.subr.bf16.mxu0 %v13477_v40  ;;  %v14214_v40 = vld [vmem:[#allocation27_spill] sm:$0xff] }
0x10c9   :  { %8282 = vmatpush1.bf16.msra.mxu1 %v13480_v61  ;;  %v14215_v61 = vld [vmem:[#allocation29_spill] sm:$0xff] }
0x10ca   :  { %8543 = vmatpush1.bf16.msra.mxu0 %v13484_v18  ;;  %8283 = vmatprep.subr.bf16.mxu1 %v13486_v30  ;;  %v14216_v18 = vld [vmem:[#allocation32_spill] sm:$0xff] }
0x10cb   :  { %8544 = vmatprep.subr.bf16.mxu0 %v13489_v29  ;;  %v10811_v30 = vld [vmem:[%s13818_s8 + $0x38] sm:$0xff]   ;;  %v10812_v29 = vld [vmem:[%s13818_s8 + $0x30] sm:$0xff]  }
0x10cd   :  { %8284 = vmatpush1.bf16.msra.mxu1 %v13492_v51  ;;  %v10813_v51 = vld [vmem:[%s13818_s8 + $0x28] sm:$0xff]  }
0x10ce   :  { %8545 = vmatpush1.bf16.msra.mxu0 %v13496_v41  ;;  %8285 = vmatprep.subr.bf16.mxu1 %v13498_v39  ;;  %v10814_v41 = vld [vmem:[%s13818_s8 + $0x20] sm:$0xff]   ;;  %v10815_v39 = vld [vmem:[%s13818_s8 + $0x18] sm:$0xff]  }
0x10cf   :  { %8546 = vmatprep.subr.bf16.mxu0 %v13501_v22  ;;  %v10816_v22 = vld [vmem:[%s13818_s8 + $0x10] sm:$0xff]  }
0x10d1   :  { %8286 = vmatpush1.bf16.msra.mxu1 %v14190_v36 }
0x10d2   :  { %8547 = vmatpush1.bf16.msra.mxu0 %v14191_v58  ;;  %8287 = vmatprep.subr.bf16.mxu1 %v14192_v15 }
0x10d3   :  { %8548 = vmatprep.subr.bf16.mxu0 %v14193_v31 }
0x10d5   :  { %8288 = vmatpush1.bf16.msra.mxu1 %v14194_v52 }
0x10d6   :  { %8549 = vmatpush1.bf16.msra.mxu0 %v14195_v42  ;;  %8289 = vmatprep.subr.bf16.mxu1 %v14196_v59 }
0x10d7   :  { %8550 = vmatprep.subr.bf16.mxu0 %v14197_v0 }
0x10d9   :  { %8290 = vmatpush1.bf16.msra.mxu1 %v14198_v1 }
0x10da   :  { %8551 = vmatpush1.bf16.msra.mxu0 %v14199_v33  ;;  %8577 = vmatprep.subr.bf16.mxu1 %v14200_v13 }
0x10db   :  { %10164 = vmatprep.subr.bf16.mxu0 %v14201_v23 }
0x10dc   :  { %8308 = vmatmul.mubr.bf16.vlgmr.msra.gmra.mxu1 %v13655_v28 }
0x10dd   :  { %8569 = vmatmul.mubr.bf16.vlgmr.msra.gmra.mxu0 %v7929_v24  ;;  %8578 = vmatpush1.bf16.msra.mxu1 %v14202_v62 }
0x10de   :  { %8579 = vmatprep.subr.bf16.mxu1 %v14203_v5  ;;  %8609 = vmatprep.mubr.bf16.mxu1 %v13971_v56  ;;  %v14212_v56 = vld [vmem:[#allocation26_spill] sm:$0xff] }
0x10df   :  { %10180 = vmatprep.mubr.msk.bf16.mxu0 %vm11385_vm0, %v14201_v23  ;;  %10165 = vmatpush3.bf16.msra.mxu0 %v10811_v30 }
0x10e0   :  { %10166 = vmatprep.subr.bf16.mxu0 %v14201_v23 }
0x10e1   :  { %8580 = vmatpush1.bf16.msra.mxu1 %v14204_v8 }
0x10e2   :  { %8581 = vmatprep.subr.bf16.mxu1 %v14205_v17 }
0x10e3   :  { %10167 = vmatpush3.bf16.msra.mxu0 %v10812_v29 }
0x10e4   :  { %10168 = vmatprep.subr.bf16.mxu0 %v14201_v23 }
0x10e5   :  { %8582 = vmatpush1.bf16.msra.mxu1 %v14206_v32 }
0x10e6   :  { %8583 = vmatprep.subr.bf16.mxu1 %v14207_v16  ;;  %v14217_v16 = vld [vmem:[#allocation46_spill] sm:$0xff] }
0x10e7   :  { %10169 = vmatpush3.bf16.msra.mxu0 %v10813_v51 }
0x10e8   :  { %10170 = vmatprep.subr.bf16.mxu0 %v14201_v23 }
0x10e9   :  { %8584 = vmatpush1.bf16.msra.mxu1 %v14208_v14 }
0x10ea   :  { %8585 = vmatprep.subr.bf16.mxu1 %v14209_v35 }
0x10eb   :  { %10171 = vmatpush3.bf16.msra.mxu0 %v10814_v41 }
0x10ec   :  { %10172 = vmatprep.subr.bf16.mxu0 %v14201_v23 }
0x10ed   :  { %8586 = vmatpush1.bf16.msra.mxu1 %v14210_v43 }
0x10ee   :  { %8587 = vmatprep.subr.bf16.mxu1 %v14211_v48 }
0x10ef   :  { %10173 = vmatpush3.bf16.msra.mxu0 %v10815_v39 }
0x10f0   :  { %10174 = vmatprep.subr.bf16.mxu0 %v14201_v23 }
0x10f1   :  { %8588 = vmatpush1.bf16.msra.mxu1 %v14212_v56 }
0x10f2   :  { %8589 = vmatprep.subr.bf16.mxu1 %v14213_v57 }
0x10f3   :  { %10175 = vmatpush3.bf16.msra.mxu0 %v10816_v22 }
0x10f4   :  { %10176 = vmatprep.subr.bf16.mxu0 %v14201_v23 }
0x10f5   :  { %8590 = vmatpush1.bf16.msra.mxu1 %v14214_v40 }
0x10f6   :  { %8591 = vmatprep.subr.bf16.mxu1 %v14215_v61 }
0x10f7   :  { %10177 = vmatpush3.bf16.msra.mxu0 %v10817_v46 }
0x10f8   :  { %10178 = vmatprep.subr.bf16.mxu0 %v14201_v23 }
0x10f9   :  { %8592 = vmatpush1.bf16.msra.mxu1 %v14216_v18 }
0x10fa   :  { %10184 = vmatprep.subr.bf16.mxu1 %v14201_v23 }
0x10fb   :  { %10179 = vmatpush3.bf16.msra.mxu0 %v10818_v11 }
0x10fc   :  { %8610 = vmatmul.mubr.bf16.vlgmr.msra.gmra.mxu1 %v7929_v24 }
0x10fd   :  { %10200 = vmatprep.mubr.msk.bf16.mxu1 %vm11385_vm0, %v14201_v23  ;;  %10185 = vmatpush3.bf16.msra.mxu1 %v10819_v9 }
0x10fe   :  { %10186 = vmatprep.subr.bf16.mxu1 %v14201_v23 }
0x1101   :  { %10187 = vmatpush3.bf16.msra.mxu1 %v10820_v53 }
0x1102   :  { %10188 = vmatprep.subr.bf16.mxu1 %v14201_v23 }
0x1105   :  { %10189 = vmatpush3.bf16.msra.mxu1 %v10821_v27 }
0x1106   :  { %10190 = vmatprep.subr.bf16.mxu1 %v14201_v23 }
0x1109   :  { %10191 = vmatpush3.bf16.msra.mxu1 %v10822_v2 }
0x110a   :  { %10192 = vmatprep.subr.bf16.mxu1 %v14201_v23 }
0x110d   :  { %10193 = vmatpush3.bf16.msra.mxu1 %v10823_v3 }
0x110e   :  { %10194 = vmatprep.subr.bf16.mxu1 %v14201_v23 }
0x1111   :  { %10195 = vmatpush3.bf16.msra.mxu1 %v10824_v25 }
0x1112   :  { %10196 = vmatprep.subr.bf16.mxu1 %v14201_v23 }
0x1115   :  { %10197 = vmatpush3.bf16.msra.mxu1 %v10825_v60 }
0x1116   :  { %10198 = vmatprep.subr.bf16.mxu1 %v14201_v23 }
0x1119   :  { %10199 = vmatpush3.bf16.msra.mxu1 %v10826_v44 }
0x115d   :  { %v7922_v28 = vpop.f32.mrf.mxu0 }
0x115e   :  { %v7923_v38 = vadd.f32 %v13775_v19, %v7922_v28 }
0x115f   :  { %v10142_v37 = vpop.f32.mrf.mxu0 }
0x1160   :  { %7928 = vst [vmem:[%s13822_s12 + $0x30] sm:$0xff] %v7923_v38 }
0x1161   :  { %v7925_v12 = vpop.f32.mrf.mxu0 }
0x1163   :  { %v10143_v49 = vpop.f32.mrf.mxu0 }
0x117c   :  { %v8035_v7 = vpop.f32.mrf.mxu1 }
0x117d   :  { %v8268_v20 = vpop.f32.mrf.mxu0  ;;  %v8036_v55 = vadd.f32 %v13786_v6, %v8035_v7 }
0x117e   :  { %v10162_v50 = vpop.f32.mrf.mxu1  ;;  %v8316_v42 = vadd.f32 %v8268_v20, %v14052_v34 }
0x117f   :  { %8041 = vst [vmem:[%s13823_s13 + $0x30] sm:$0xff] %v8036_v55  ;;  %v8270_v24 = vpop.f32.mrf.mxu0 }
0x1180   :  { %v8038_v36 = vpop.f32.mrf.mxu1  ;;  %v8317_v52 = vadd.f32 %v8270_v24, %v14051_v26  ;;  %v9684_v0 = vmul.f32 -1.442695, %v8316_v42 }
0x1181   :  { %v8272_v58 = vpop.f32.mrf.mxu0 }
0x1182   :  { %v10163_v15 = vpop.f32.mrf.mxu1  ;;  %v9685_v59 = vmul.f32 -1.442695, %v8317_v52 }
0x1183   :  { %v8273_v31 = vpop.f32.mrf.mxu0 }
0x1184   :  { %11179 = vpow2.f32 %v9685_v59 }
0x1185   :  { %11181 = vpow2.f32 %v9684_v0 }
0x1191   :  { %v11180_v1 = vpop.eup %11179 }
0x1192   :  { %v11182_v33 = vpop.eup %11181  ;;  %v8330_v13 = vadd.f32 1.0, %v11180_v1 }
0x1193   :  { %v8329_v8 = vadd.f32 1.0, %v11182_v33 }
0x1194   :  { %11183 = vrcp.f32 %v8330_v13 }
0x119c   :  { %v8309_v23 = vpop.f32.mrf.mxu1 }
0x119d   :  { %v8318_v62 = vadd.f32 %v8309_v23, %v14053_v10  ;;  %v8570_v5 = vpop.f32.mrf.mxu0 }
0x119e   :  { %v8311_v17 = vpop.f32.mrf.mxu1  ;;  %v8618_v48 = vadd.f32 %v8570_v5, %v14055_v47 }
0x119f   :  { %v9686_v32 = vmul.f32 -1.442695, %v8318_v62  ;;  %v8319_v14 = vadd.f32 %v8311_v17, %v14217_v16  ;;  %v8572_v35 = vpop.f32.mrf.mxu0 }
0x11a0   :  { %v8313_v26 = vpop.f32.mrf.mxu1  ;;  %v8619_v57 = vadd.f32 %v8572_v35, %v12362_v63  ;;  %v9719_v10 = vmul.f32 -1.442695, %v8618_v48 }
0x11a1   :  { %11185 = vpow2.f32 %v9686_v32  ;;  %v8574_v34 = vpop.f32.mrf.mxu0  ;;  %v11184_v61 = vpop.eup %11183 }
0x11a2   :  { %11187 = vrcp.f32 %v8329_v8  ;;  %v8314_v43 = vpop.f32.mrf.mxu1  ;;  %v9720_v40 = vmul.f32 -1.442695, %v8619_v57  ;;  %v8339_v41 = vmul.f32 %v11184_v61, %v13650_v4 }
0x11a3   :  { %11189 = vtanh.f32 %v8319_v14  ;;  %v8575_v56 = vpop.f32.mrf.mxu0 }
0x11a4   :  { %11191 = vpow2.f32 %v9719_v10 }
0x11a5   :  { %11193 = vpow2.f32 %v9720_v40 }
0x11ae   :  { %v11186_v18 = vpop.eup %11185 }
0x11af   :  { %v11188_v30 = vpop.eup %11187  ;;  %v8331_v51 = vadd.f32 1.0, %v11186_v18 }
0x11b0   :  { %v11190_v29 = vpop.eup %11189 }
0x11b1   :  { %v8340_v39 = vmul.f32 %v11190_v29, %v11188_v30  ;;  %11195 = vrcp.f32 %v8331_v51  ;;  %v11192_v47 = vpop.eup %11191 }
0x11b2   :  { %v11194_v46 = vpop.eup %11193  ;;  %v8631_v11 = vadd.f32 1.0, %v11192_v47 }
0x11b3   :  { %v8341_v22 = vadd.f32 %v8340_v39, %v8339_v41  ;;  %v8632_v9 = vadd.f32 1.0, %v11194_v46 }
0x11b5   :  { %11197 = vtanh.f32 %v8341_v22 }
0x11b6   :  { %11199 = vrcp.f32 %v8631_v11 }
0x11b7   :  { %11201 = vrcp.f32 %v8632_v9 }
0x11bc   :  { %v8611_v63 = vpop.f32.mrf.mxu1 }
0x11bd   :  { %v8620_v53 = vadd.f32 %v8611_v63, %v12373_v45 }
0x11be   :  { %v8613_v27 = vpop.f32.mrf.mxu1  ;;  %v11196_v60 = vpop.eup %11195 }
0x11bf   :  { %v9721_v2 = vmul.f32 -1.442695, %v8620_v53  ;;  %v8621_v3 = vadd.f32 %v8613_v27, %v12378_v21 }
0x11c0   :  { %v8615_v25 = vpop.f32.mrf.mxu1 }
0x11c1   :  { %11203 = vpow2.f32 %v9721_v2 }
0x11c2   :  { %v11198_v4 = vpop.eup %11197  ;;  %11205 = vtanh.f32 %v8621_v3  ;;  %v8616_v28 = vpop.f32.mrf.mxu1 }
0x11c3   :  { %v8343_v38 = vmul.f32 %v11198_v4, %v11196_v60  ;;  %v11200_v44 = vpop.eup %11199 }
0x11c4   :  { %v11202_v12 = vpop.eup %11201 }
0x11c5   :  { %v8646_v37 = vpack.c.bf16 %v8343_v38, %v8343_v38  ;;  %v8641_v20 = vmul.f32 %v11202_v12, %v13666_v54 }
0x11c7   :  { %10181 = vmatmul.mubr.bf16.vlgmr.msra.gmra.mxu0 %v8646_v37 }
0x11ce   :  { %v11204_v49 = vpop.eup %11203 }
0x11cf   :  { %v11206_v7 = vpop.eup %11205  ;;  %v8633_v45 = vadd.f32 1.0, %v11204_v49 }
0x11d0   :  { %v8642_v55 = vmul.f32 %v11206_v7, %v11200_v44 }
0x11d1   :  { %11207 = vrcp.f32 %v8633_v45 }
0x11d2   :  { %v8643_v50 = vadd.f32 %v8642_v55, %v8641_v20 }
0x11d4   :  { %11209 = vtanh.f32 %v8643_v50 }
0x11de   :  { %v11208_v21 = vpop.eup %11207 }
0x11e1   :  { %v11210_v24 = vpop.eup %11209 }
0x11e2   :  { %v8645_v36 = vmul.f32 %v11210_v24, %v11208_v21 }
0x11e4   :  { %v8759_v58 = vpack.c.bf16 %v8645_v36, %v8645_v36 }
0x11e6   :  { %10201 = vmatmul.mubr.bf16.vlgmr.msra.gmra.mxu1 %v8759_v58 }
0x1287   :  { %v8752_v15 = vpop.f32.mrf.mxu0 }
0x1288   :  { %v8753_v31 = vadd.f32 %v13775_v19, %v8752_v15 }
0x1289   :  { %v10182_v52 = vpop.f32.mrf.mxu0 }
0x128a   :  { %8758 = vst [vmem:[%s13822_s12 + $0x38] sm:$0xff] %v8753_v31 }
0x128b   :  { %v8755_v42 = vpop.f32.mrf.mxu0 }
0x128d   :  { %v10183_v59 = vpop.f32.mrf.mxu0 }
0x12a6   :  { %v8865_v54 = vpop.f32.mrf.mxu1 }
0x12a7   :  { %v8866_v0 = vadd.f32 %v13786_v6, %v8865_v54 }
0x12a8   :  { %v10202_v1 = vpop.f32.mrf.mxu1 }
0x12a9   :  { %8871 = vst [vmem:[%s13823_s13 + $0x38] sm:$0xff] %v8866_v0 }
0x12aa   :  { %v8868_v33 = vpop.f32.mrf.mxu1 }
0x12ac   :  { %v10203_v13 = vpop.f32.mrf.mxu1 }
0x12ad   :  { %8880 = vsyncpa [#allocation4], 1 }
0x12ae   :  { %8881 = vsyncpa [#allocation6], 1 }
0x12af   :  { %8882 = vsyncpa [#allocation9], 1 }
0x12b0   :  { %8883 = vsyncpa [#allocation12], 1 }

</bundles_post_ra>
